<compile_context>
chip_gen: v6e
topology: v6e:2x2x1
jax: 0.10.0
libtpu: 0.0.40
codegen_flags: <defaults>
</compile_context>

<pallas_src>
import numpy as np
import jax
import jax.numpy as jnp
from jax.experimental import pallas as pl
from jax.experimental.pallas import tpu as pltpu

NEG_SLOPE = 0.01                     # torch.nn.LeakyReLU default
_VMEM_LIMIT = 32 * 1024 * 1024       # safe on v5e/v6e (128 MiB) and v7x (64 MiB)


def _leaky(x):
    return jnp.where(x >= 0, x, NEG_SLOPE * x)


# --------------------------------------------------------------------------
# Static index bookkeeping (host-side, trace-time constants).
# --------------------------------------------------------------------------
def _refl(a, n):
    """Reflect-pad-1 index map: padded coordinate in [0, n+1] -> source [0, n-1]."""
    if a == 0:
        return 1
    if a == n + 1:
        return n - 2
    return a - 1


def _conv1_gather_indices():
    """(256*16,) gather map from a flat 28x28 image to conv1's patch rows.

    Row uv = u*16 + v is position (u, v) of the reflect-padded (16x16) pooled
    conv1 map; its 16 columns are the 4x4 raw-input window covering the 2x2
    max-pool window of 3x3 conv taps at that position.
    """
    idx = np.zeros((16, 16, 16), np.int32)
    for u in range(16):
        for v in range(16):
            h2 = _refl(u, 14)                 # pooled-map row
            w2 = _refl(v, 14)                 # pooled-map col
            for wy in range(4):
                for wx in range(4):
                    idx[u, v, wy * 4 + wx] = (
                        _refl(2 * h2 + wy, 28) * 28 + _refl(2 * w2 + wx, 28))
    return idx.reshape(-1)


_CONV1_IDX = _conv1_gather_indices()


def _pick_block(n, target):
    """Block size <= target, multiple of 8 (or == n), >=2 grid steps if possible."""
    if n <= 8:
        return n
    b = min(target, n)
    if b == n:                       # give v7x's two TensorCores >= 2 grid steps
        b = max(8, n // 2)
    b = max(8, (b // 8) * 8)
    return min(b, n)


# --------------------------------------------------------------------------
# Kernel 1: (x*2-1) + 3x3 reflect conv (1->64) + LeakyReLU + 2x2 max-pool
#           + reflect pad, emitted as the (n,16,16,64) padded pooled map.
# One (b*32,128)@(128,2048) bf16 MXU matmul per block; pooling = max of four
# contiguous 512-lane slabs; output store is lane-dense (512 = 4*128).
# --------------------------------------------------------------------------
def conv1_kernel(p_ref, w_ref, b_ref, o_ref):
    # p_ref: (M,128) bf16  w_ref: (128,2048) bf16  b_ref: (1,512) f32  o_ref: (M,512) bf16
    y = jnp.dot(p_ref[...], w_ref[...], preferred_element_type=jnp.float32)
    m = jnp.maximum(jnp.maximum(y[:, 0:512], y[:, 512:1024]),
                    jnp.maximum(y[:, 1024:1536], y[:, 1536:2048]))
    o_ref[...] = _leaky(m + b_ref[...]).astype(o_ref.dtype)


def conv1_stage(patches, w_bd, b_eff, n, b):
    rows = 32
    flops = 2 * n * rows * 128 * 2048
    bytes_acc = (n * rows * 128 * 2 + 128 * 2048 * 2 + 512 * 4
                 + n * rows * 512 * 2)
    return pl.pallas_call(
        conv1_kernel,
        out_shape=jax.ShapeDtypeStruct((n * rows, 512), jnp.bfloat16),
        grid=(pl.cdiv(n, b),),
        in_specs=[
            pl.BlockSpec((b * rows, 128), lambda i: (i, 0)),
            pl.BlockSpec((128, 2048), lambda i: (0, 0)),
            pl.BlockSpec((1, 512), lambda i: (0, 0)),
        ],
        out_specs=pl.BlockSpec((b * rows, 512), lambda i: (i, 0)),
        compiler_params=pltpu.CompilerParams(
            dimension_semantics=("parallel",), vmem_limit_bytes=_VMEM_LIMIT),
        cost_estimate=pl.CostEstimate(flops=flops, transcendentals=0,
                                      bytes_accessed=bytes_acc),
    )(patches, w_bd, b_eff)


# --------------------------------------------------------------------------
# Kernel 2: 3x3 conv (64->64) + LeakyReLU + 2x2 max-pool on the padded map.
# Nine accumulated K=64 bf16 matmuls (no im2col lane concatenation): the kx
# shift is a lane-preserving roll of the sublane (w) axis, the ky shift is a
# cheap leading-dim slice.  Pooling over h uses a free leading-dim split;
# pooling over w extracts 14 static sublanes of the 7x16 half-pooled map.
# --------------------------------------------------------------------------
def conv2_kernel(x_ref, w_ref, b_ref, o_ref):
    # x_ref: (B,16,16,64) bf16 (h, w, cin)   w_ref: (9,64,64) bf16 (tap, cin, cout)
    # b_ref: (1,64) f32                      o_ref: (B,7,7,64) bf16
    bb = x_ref.shape[0]
    x = x_ref[...]
    acc = None
    for kx in range(3):
        xs = x if kx == 0 else jnp.roll(x, -kx, axis=2)       # shift along w
        for ky in range(3):
            lhs = xs[:, ky:ky + 14, :, :].reshape(bb * 14 * 16, 64)
            z = jnp.dot(lhs, w_ref[ky * 3 + kx],
                        preferred_element_type=jnp.float32)
            acc = z if acc is None else acc + z
    y = _leaky(acc + b_ref[...]).reshape(bb, 14, 16, 64)       # w >= 14 is junk
    y5 = y.reshape(bb, 7, 2, 16, 64)                           # free leading split
    hmax = jnp.maximum(y5[:, :, 0], y5[:, :, 1])               # pool over rows
    cols = [jnp.maximum(hmax[:, :, 2 * s, :], hmax[:, :, 2 * s + 1, :])
            for s in range(7)]                                 # pool over cols
    o_ref[...] = jnp.stack(cols, axis=2).astype(o_ref.dtype)   # (B,7,7,64)


def conv2_stage(y1, w2, b2, n, b):
    flops = 2 * 9 * n * 14 * 16 * 64 * 64
    bytes_acc = (n * 16 * 16 * 64 * 2 + 9 * 64 * 64 * 2 + 64 * 4
                 + n * 7 * 7 * 64 * 2)
    return pl.pallas_call(
        conv2_kernel,
        out_shape=jax.ShapeDtypeStruct((n, 7, 7, 64), jnp.bfloat16),
        grid=(pl.cdiv(n, b),),
        in_specs=[
            pl.BlockSpec((b, 16, 16, 64), lambda i: (i, 0, 0, 0)),
            pl.BlockSpec((9, 64, 64), lambda i: (0, 0, 0)),
            pl.BlockSpec((1, 64), lambda i: (0, 0)),
        ],
        out_specs=pl.BlockSpec((b, 7, 7, 64), lambda i: (i, 0, 0, 0)),
        compiler_params=pltpu.CompilerParams(
            dimension_semantics=("parallel",), vmem_limit_bytes=_VMEM_LIMIT),
        cost_estimate=pl.CostEstimate(flops=flops, transcendentals=0,
                                      bytes_accessed=bytes_acc),
    )(y1, w2, b2)


# --------------------------------------------------------------------------
# Kernel 3: MLP (3136->256->256->10) + LogSoftmax, tiled over the batch.
# bf16 operands for the two big layers, f32 accumulation / final layer.
# --------------------------------------------------------------------------
def mlp_kernel(x_ref, w1_ref, b1_ref, w2_ref, b2_ref, w3_ref, b3_ref, o_ref):
    h = jnp.dot(x_ref[...], w1_ref[...], preferred_element_type=jnp.float32)
    h = _leaky(h + b1_ref[...]).astype(jnp.bfloat16)
    h = jnp.dot(h, w2_ref[...], preferred_element_type=jnp.float32)
    h = _leaky(h + b2_ref[...])
    logits = jnp.dot(h, w3_ref[...],
                     preferred_element_type=jnp.float32) + b3_ref[...]
    m = jnp.max(logits, axis=1, keepdims=True)
    z = logits - m
    lse = jnp.log(jnp.sum(jnp.exp(z), axis=1, keepdims=True))
    o_ref[...] = z - lse


def mlp_stage(x, w1, b1, w2, b2, w3, b3, tn):
    n, f = x.shape
    h1, h2d, od = w1.shape[1], w2.shape[1], w3.shape[1]
    flops = 2 * n * (f * h1 + h1 * h2d + h2d * od)
    trans = n * (od + 1)
    bytes_acc = (n * f * 2 + (f * h1 + h1 * h2d) * 2 + h2d * od * 4
                 + (h1 + h2d + od) * 4 + n * od * 4)
    const = lambda shape: pl.BlockSpec(shape, lambda i, _s=shape: (0,) * len(_s))
    return pl.pallas_call(
        mlp_kernel,
        out_shape=jax.ShapeDtypeStruct((n, od), jnp.float32),
        grid=(pl.cdiv(n, tn),),
        in_specs=[
            pl.BlockSpec((tn, f), lambda i: (i, 0)),
            const((f, h1)), const((1, h1)),
            const((h1, h2d)), const((1, h2d)),
            const((h2d, od)), const((1, od)),
        ],
        out_specs=pl.BlockSpec((tn, od), lambda i: (i, 0)),
        compiler_params=pltpu.CompilerParams(
            dimension_semantics=("parallel",), vmem_limit_bytes=_VMEM_LIMIT),
        cost_estimate=pl.CostEstimate(flops=flops, transcendentals=trans,
                                      bytes_accessed=bytes_acc),
    )(x, w1, b1, w2, b2, w3, b3)


# --------------------------------------------------------------------------
# Forward pass
# --------------------------------------------------------------------------
def b5_forward(x, params, conv_block=16, mlp_block=256):
    # x: (N, 28, 28, 1) float32 (NHWC; the torch module permutes it to NCHW)
    n = x.shape[0]
    bc = _pick_block(n, conv_block)
    bm = _pick_block(n, mlp_block)

    xflat = x[..., 0].reshape(n, 28 * 28).astype(jnp.bfloat16)
    # TODO(synk): small bf16 XLA gather (8 KiB/image); in-kernel patch build
    # would need a lane gather and is not worth it for this model size.
    patches = jnp.take(xflat, jnp.asarray(_CONV1_IDX), axis=1)
    patches = patches.reshape(n * 32, 128)        # free row-major reinterpretation

    y1 = conv1_stage(patches, params["w_c1_bd"], params["b_c1_eff"], n, bc)
    y1 = y1.reshape(n, 16, 16, 64)                # free: (n*32,512) == (n,16,16,64)

    y2 = conv2_stage(y1, params["w_c2_k"], params["b_c2"], n, bc)   # (n,7,7,64)
    feat = y2.reshape(n, 7 * 7 * 64)              # free reshape, (h, w, c) order

    return mlp_stage(feat,
                     params["w_l1"], params["b_l1"],
                     params["w_l2"], params["b_l2"],
                     params["w_l3"], params["b_l3"], bm)


# --------------------------------------------------------------------------
# Parameters (torch-style raw params + kernel-layout derived params)
# --------------------------------------------------------------------------
def init_params(key):
    ks = jax.random.split(key, 10)

    def u(k, shape, fan_in):
        s = 1.0 / np.sqrt(float(fan_in))
        return jax.random.uniform(k, shape, jnp.float32, -s, s)

    # torch-equivalent raw parameters
    w_c1 = u(ks[0], (9, 64), 9)              # (tap=ky*3+kx, cout)
    b_c1 = u(ks[1], (64,), 9)
    w_c2 = u(ks[2], (9, 64, 64), 576)        # (tap, cin, cout)
    b_c2 = u(ks[3], (64,), 576)
    w_l1_t = u(ks[4], (3136, 256), 3136)     # rows in torch (c, r, s) flatten order
    b_l1 = u(ks[5], (256,), 3136)
    w_l2 = u(ks[6], (256, 256), 256)
    b_l2 = u(ks[7], (256,), 256)
    w_l3 = u(ks[8], (256, 10), 256)
    b_l3 = u(ks[9], (10,), 256)

    # conv1: fold (x*2-1), the 3x3 conv and the 2x2 pool taps into a (16,256)
    # weight: K = 4x4 window pixel, N = (pool tap q) x cout.
    w1 = np.asarray(w_c1)
    w_eff = np.zeros((16, 256), np.float32)
    for ey in range(2):
        for ex in range(2):
            q = ey * 2 + ex
            for ky in range(3):
                for kx in range(3):
                    m = (ey + ky) * 4 + (ex + kx)
                    w_eff[m, q * 64:(q + 1) * 64] = 2.0 * w1[ky * 3 + kx]
    # ...then lay it out block-diagonally for the 8-rows-per-128-lanes packing.
    # Columns ordered (pool tap q, slot j, cout c) so pooling is the max of four
    # contiguous 512-lane slabs and the pooled output keeps the (slot, cout) order.
    w_bd = np.zeros((128, 2048), np.float32)
    for j in range(8):
        for q in range(4):
            w_bd[16 * j:16 * (j + 1),
                 512 * q + 64 * j:512 * q + 64 * (j + 1)] = w_eff[:, 64 * q:64 * (q + 1)]
    b512 = np.tile(np.asarray(b_c1) - w1.sum(axis=0), 8).reshape(1, 512)

    # first linear: permute rows from torch (c, r, s) order to the kernel's
    # (r, s, c) flatten order (one-time host-side transform).
    w_l1_k = jnp.asarray(w_l1_t).reshape(64, 7, 7, 256).transpose(1, 2, 0, 3)
    w_l1_k = w_l1_k.reshape(3136, 256)

    params = {
        "w_c1_bd": jnp.asarray(w_bd, jnp.bfloat16),
        "b_c1_eff": jnp.asarray(b512, jnp.float32),
        "w_c2_k": jnp.asarray(w_c2, jnp.bfloat16),
        "b_c2": jnp.asarray(b_c2).reshape(1, 64),
        "w_l1": w_l1_k.astype(jnp.bfloat16),
        "b_l1": b_l1.reshape(1, 256),
        "w_l2": w_l2.astype(jnp.bfloat16),
        "b_l2": b_l2.reshape(1, 256),
        "w_l3": w_l3,
        "b_l3": b_l3.reshape(1, 10),
    }
    raw = {
        "w_c1": w_c1, "b_c1": b_c1, "w_c2": w_c2, "b_c2": b_c2,
        "w_l1": w_l1_t, "b_l1": b_l1, "w_l2": w_l2, "b_l2": b_l2,
        "w_l3": w_l3, "b_l3": b_l3,
    }
    return params, raw


# --------------------------------------------------------------------------
# Plain-JAX f32 reference of the torch forward (correctness cross-check only)
# --------------------------------------------------------------------------
def _maxpool2(x):  # (N, H, W, C), kernel 2, stride 2
    n, h, w, c = x.shape
    return jnp.max(x.reshape(n, h // 2, 2, w // 2, 2, c), axis=(2, 4))


def _reference_forward(x, raw):
    n = x.shape[0]
    xs = x[..., 0] * 2.0 - 1.0
    xp = jnp.pad(xs, ((0, 0), (1, 1), (1, 1)), mode="reflect")
    c1 = sum(xp[:, ky:ky + 28, kx:kx + 28, None] * raw["w_c1"][ky * 3 + kx]
             for ky in range(3) for kx in range(3))
    c1 = _leaky(c1 + raw["b_c1"])
    p1 = _maxpool2(c1)
    p1p = jnp.pad(p1, ((0, 0), (1, 1), (1, 1), (0, 0)), mode="reflect")
    c2 = sum(jnp.einsum("nhwc,cd->nhwd", p1p[:, ky:ky + 14, kx:kx + 14, :],
                        raw["w_c2"][ky * 3 + kx])
             for ky in range(3) for kx in range(3))
    c2 = _leaky(c2 + raw["b_c2"])
    p2 = _maxpool2(c2)
    feat = jnp.transpose(p2, (0, 3, 1, 2)).reshape(n, 3136)   # torch .flatten(1)
    h = _leaky(feat @ raw["w_l1"] + raw["b_l1"])
    h = _leaky(h @ raw["w_l2"] + raw["b_l2"])
    logits = h @ raw["w_l3"] + raw["b_l3"]
    return jax.nn.log_softmax(logits, axis=1)


if __name__ == "__main__":
    key = jax.random.PRNGKey(0)
    pkey, xkey = jax.random.split(key)
    params, raw = init_params(pkey)
    x = jax.random.uniform(xkey, (2, 28, 28, 1), dtype=jnp.float32)  # MNIST-like

    y = jax.jit(b5_forward)(x, params)
    y = jax.block_until_ready(y)

    assert y.shape == (2, 10), y.shape
    # rows of a LogSoftmax output must exponentiate-sum to 1
    assert bool(jnp.allclose(jnp.exp(y).sum(axis=1), 1.0, atol=1e-3))

    # numerics cross-check against the plain-JAX f32 reference of the torch
    # forward (kernels feed the MXU bf16, so tolerance is loosened to ~1e-2).
    y_ref = jax.block_until_ready(jax.jit(_reference_forward)(x, raw))
    err = float(jnp.max(jnp.abs(y - y_ref)))
    assert err < 5e-2, err

    print("KERNEL_OK")
</pallas_src>

<mosaic_0001>
module attributes {stable_mosaic.version = 11 : i64} {
  func.func @conv1_kernel(%arg0: i32, %arg1: memref<64x128xbf16, #tpu.memory_space<vmem>>, %arg2: memref<128x2048xbf16, #tpu.memory_space<vmem>>, %arg3: memref<1x512xf32, #tpu.memory_space<vmem>>, %arg4: memref<64x512xbf16, #tpu.memory_space<vmem>>) attributes {dimension_semantics = [#tpu.dimension_semantics<parallel>], iteration_bounds = array<i64: 1>, scalar_prefetch = 0 : i64, scratch_operands = 0 : i64, tpu.core_type = #tpu.core_type<tc>, window_params = [{transform_indices = @transform_0, window_bounds = array<i64: 64, 128>}, {pipeline_mode = #tpu.pipeline_mode<synchronous>, transform_indices = @transform_1, window_bounds = array<i64: 128, 2048>}, {pipeline_mode = #tpu.pipeline_mode<synchronous>, transform_indices = @transform_2, window_bounds = array<i64: 1, 512>}, {transform_indices = @transform_3, window_bounds = array<i64: 64, 512>}]} {
    %c0 = arith.constant 0 : index
    %c0_0 = arith.constant 0 : index
    %0 = vector.load %arg1[%c0, %c0_0] : memref<64x128xbf16, #tpu.memory_space<vmem>>, vector<64x128xbf16>
    %c0_1 = arith.constant 0 : index
    %c0_2 = arith.constant 0 : index
    %1 = vector.load %arg2[%c0_1, %c0_2] : memref<128x2048xbf16, #tpu.memory_space<vmem>>, vector<128x2048xbf16>
    %cst = arith.constant dense<0.000000e+00> : vector<64x2048xf32>
    %2 = tpu.matmul %0, %1, %cst {dimension_numbers = #tpu.dot_dimension_numbers<[1], [0], [0], [1], [0, 0, 1, 1], [], []>} : vector<64x128xbf16>, vector<128x2048xbf16>, vector<64x2048xf32> -> vector<64x2048xf32>
    %3 = vector.extract_strided_slice %2 {offsets = [0, 0], sizes = [64, 512], strides = [1, 1]} : vector<64x2048xf32> to vector<64x512xf32>
    %4 = vector.extract_strided_slice %2 {offsets = [0, 512], sizes = [64, 512], strides = [1, 1]} : vector<64x2048xf32> to vector<64x512xf32>
    %5 = arith.maximumf %3, %4 : vector<64x512xf32>
    %6 = vector.extract_strided_slice %2 {offsets = [0, 1024], sizes = [64, 512], strides = [1, 1]} : vector<64x2048xf32> to vector<64x512xf32>
    %7 = vector.extract_strided_slice %2 {offsets = [0, 1536], sizes = [64, 512], strides = [1, 1]} : vector<64x2048xf32> to vector<64x512xf32>
    %8 = arith.maximumf %6, %7 : vector<64x512xf32>
    %9 = arith.maximumf %5, %8 : vector<64x512xf32>
    %c0_3 = arith.constant 0 : index
    %c0_4 = arith.constant 0 : index
    %10 = vector.load %arg3[%c0_3, %c0_4] : memref<1x512xf32, #tpu.memory_space<vmem>>, vector<1x512xf32>
    %11 = vector.broadcast %10 : vector<1x512xf32> to vector<64x512xf32>
    %12 = arith.addf %9, %11 : vector<64x512xf32>
    %cst_5 = arith.constant 0.000000e+00 : f32
    %13 = vector.broadcast %cst_5 : f32 to vector<64x512xf32>
    %14 = arith.cmpf oge, %12, %13 : vector<64x512xf32>
    %cst_6 = arith.constant 0.00999999977 : f32
    %15 = vector.broadcast %cst_6 : f32 to vector<64x512xf32>
    %16 = arith.mulf %15, %12 : vector<64x512xf32>
    %17 = arith.select %14, %12, %16 : vector<64x512xi1>, vector<64x512xf32>
    %18 = arith.truncf %17 : vector<64x512xf32> to vector<64x512xbf16>
    %c0_7 = arith.constant 0 : index
    %c0_8 = arith.constant 0 : index
    %19 = vector.load %arg4[%c0_7, %c0_8] : memref<64x512xbf16, #tpu.memory_space<vmem>>, vector<64x512xbf16>
    tpu.vector_store %arg4[%c0_7, %c0_8], %18 {strides = array<i32>} : memref<64x512xbf16, #tpu.memory_space<vmem>>, vector<64x512xbf16>,
    return
  }
  func.func @transform_0(%arg0: i32) -> (i32, i32) {
    %c0_i32 = arith.constant 0 : i32
    %c0_i32_0 = arith.constant 0 : i32
    return %arg0, %c0_i32 : i32, i32
  }
  func.func @transform_1(%arg0: i32) -> (i32, i32) {
    %c0_i32 = arith.constant 0 : i32
    %c0_i32_0 = arith.constant 0 : i32
    %c0_i32_1 = arith.constant 0 : i32
    return %c0_i32, %c0_i32_0 : i32, i32
  }
  func.func @transform_2(%arg0: i32) -> (i32, i32) {
    %c0_i32 = arith.constant 0 : i32
    %c0_i32_0 = arith.constant 0 : i32
    %c0_i32_1 = arith.constant 0 : i32
    return %c0_i32, %c0_i32_0 : i32, i32
  }
  func.func @transform_3(%arg0: i32) -> (i32, i32) {
    %c0_i32 = arith.constant 0 : i32
    %c0_i32_0 = arith.constant 0 : i32
    return %arg0, %c0_i32 : i32, i32
  }
}

module attributes {stable_mosaic.version = 11 : i64} {
  func.func @conv2_kernel(%arg0: i32, %arg1: memref<2x16x16x64xbf16, #tpu.memory_space<vmem>>, %arg2: memref<9x64x64xbf16, #tpu.memory_space<vmem>>, %arg3: memref<1x64xf32, #tpu.memory_space<vmem>>, %arg4: memref<2x7x7x64xbf16, #tpu.memory_space<vmem>>) attributes {dimension_semantics = [#tpu.dimension_semantics<parallel>], iteration_bounds = array<i64: 1>, scalar_prefetch = 0 : i64, scratch_operands = 0 : i64, tpu.core_type = #tpu.core_type<tc>, window_params = [{transform_indices = @transform_0, window_bounds = array<i64: 2, 16, 16, 64>}, {pipeline_mode = #tpu.pipeline_mode<synchronous>, transform_indices = @transform_1, window_bounds = array<i64: 9, 64, 64>}, {pipeline_mode = #tpu.pipeline_mode<synchronous>, transform_indices = @transform_2, window_bounds = array<i64: 1, 64>}, {transform_indices = @transform_3, window_bounds = array<i64: 2, 7, 7, 64>}]} {
    %c0 = arith.constant 0 : index
    %c0_0 = arith.constant 0 : index
    %c0_1 = arith.constant 0 : index
    %c0_2 = arith.constant 0 : index
    %0 = vector.load %arg1[%c0, %c0_0, %c0_1, %c0_2] : memref<2x16x16x64xbf16, #tpu.memory_space<vmem>>, vector<2x16x16x64xbf16>
    %1 = vector.extract_strided_slice %0 {offsets = [0, 0, 0, 0], sizes = [2, 14, 16, 64], strides = [1, 1, 1, 1]} : vector<2x16x16x64xbf16> to vector<2x14x16x64xbf16>
    %2 = vector.shape_cast %1 : vector<2x14x16x64xbf16> to vector<448x64xbf16>
    %c0_3 = arith.constant 0 : index
    %c0_4 = arith.constant 0 : index
    %c0_5 = arith.constant 0 : index
    %3 = vector.load %arg2[%c0_3, %c0_4, %c0_5] : memref<9x64x64xbf16, #tpu.memory_space<vmem>>, vector<1x64x64xbf16>
    %4 = vector.shape_cast %3 : vector<1x64x64xbf16> to vector<64x64xbf16>
    %cst = arith.constant dense<0.000000e+00> : vector<448x64xf32>
    %5 = tpu.matmul %2, %4, %cst {dimension_numbers = #tpu.dot_dimension_numbers<[1], [0], [0], [1], [0, 0, 1, 1], [], []>} : vector<448x64xbf16>, vector<64x64xbf16>, vector<448x64xf32> -> vector<448x64xf32>
    %6 = vector.extract_strided_slice %0 {offsets = [0, 1, 0, 0], sizes = [2, 14, 16, 64], strides = [1, 1, 1, 1]} : vector<2x16x16x64xbf16> to vector<2x14x16x64xbf16>
    %7 = vector.shape_cast %6 : vector<2x14x16x64xbf16> to vector<448x64xbf16>
    %c3 = arith.constant 3 : index
    %c0_6 = arith.constant 0 : index
    %c0_7 = arith.constant 0 : index
    %8 = vector.load %arg2[%c3, %c0_6, %c0_7] : memref<9x64x64xbf16, #tpu.memory_space<vmem>>, vector<1x64x64xbf16>
    %9 = vector.shape_cast %8 : vector<1x64x64xbf16> to vector<64x64xbf16>
    %cst_8 = arith.constant dense<0.000000e+00> : vector<448x64xf32>
    %10 = tpu.matmul %7, %9, %cst_8 {dimension_numbers = #tpu.dot_dimension_numbers<[1], [0], [0], [1], [0, 0, 1, 1], [], []>} : vector<448x64xbf16>, vector<64x64xbf16>, vector<448x64xf32> -> vector<448x64xf32>
    %11 = arith.addf %5, %10 : vector<448x64xf32>
    %12 = vector.extract_strided_slice %0 {offsets = [0, 2, 0, 0], sizes = [2, 14, 16, 64], strides = [1, 1, 1, 1]} : vector<2x16x16x64xbf16> to vector<2x14x16x64xbf16>
    %13 = vector.shape_cast %12 : vector<2x14x16x64xbf16> to vector<448x64xbf16>
    %c6 = arith.constant 6 : index
    %c0_9 = arith.constant 0 : index
    %c0_10 = arith.constant 0 : index
    %14 = vector.load %arg2[%c6, %c0_9, %c0_10] : memref<9x64x64xbf16, #tpu.memory_space<vmem>>, vector<1x64x64xbf16>
    %15 = vector.shape_cast %14 : vector<1x64x64xbf16> to vector<64x64xbf16>
    %cst_11 = arith.constant dense<0.000000e+00> : vector<448x64xf32>
    %16 = tpu.matmul %13, %15, %cst_11 {dimension_numbers = #tpu.dot_dimension_numbers<[1], [0], [0], [1], [0, 0, 1, 1], [], []>} : vector<448x64xbf16>, vector<64x64xbf16>, vector<448x64xf32> -> vector<448x64xf32>
    %17 = arith.addf %11, %16 : vector<448x64xf32>
    %18 = vector.extract_strided_slice %0 {offsets = [0, 0, 1, 0], sizes = [2, 16, 15, 64], strides = [1, 1, 1, 1]} : vector<2x16x16x64xbf16> to vector<2x16x15x64xbf16>
    %19 = vector.extract_strided_slice %0 {offsets = [0, 0, 0, 0], sizes = [2, 16, 1, 64], strides = [1, 1, 1, 1]} : vector<2x16x16x64xbf16> to vector<2x16x1x64xbf16>
    %20 = tpu.concatenate %18, %19 in 2 : vector<2x16x15x64xbf16>, vector<2x16x1x64xbf16> -> vector<2x16x16x64xbf16>
    %21 = vector.extract_strided_slice %20 {offsets = [0, 0, 0, 0], sizes = [2, 14, 16, 64], strides = [1, 1, 1, 1]} : vector<2x16x16x64xbf16> to vector<2x14x16x64xbf16>
    %22 = vector.shape_cast %21 : vector<2x14x16x64xbf16> to vector<448x64xbf16>
    %c1 = arith.constant 1 : index
    %c0_12 = arith.constant 0 : index
    %c0_13 = arith.constant 0 : index
    %23 = vector.load %arg2[%c1, %c0_12, %c0_13] : memref<9x64x64xbf16, #tpu.memory_space<vmem>>, vector<1x64x64xbf16>
    %24 = vector.shape_cast %23 : vector<1x64x64xbf16> to vector<64x64xbf16>
    %cst_14 = arith.constant dense<0.000000e+00> : vector<448x64xf32>
    %25 = tpu.matmul %22, %24, %cst_14 {dimension_numbers = #tpu.dot_dimension_numbers<[1], [0], [0], [1], [0, 0, 1, 1], [], []>} : vector<448x64xbf16>, vector<64x64xbf16>, vector<448x64xf32> -> vector<448x64xf32>
    %26 = arith.addf %17, %25 : vector<448x64xf32>
    %27 = vector.extract_strided_slice %20 {offsets = [0, 1, 0, 0], sizes = [2, 14, 16, 64], strides = [1, 1, 1, 1]} : vector<2x16x16x64xbf16> to vector<2x14x16x64xbf16>
    %28 = vector.shape_cast %27 : vector<2x14x16x64xbf16> to vector<448x64xbf16>
    %c4 = arith.constant 4 : index
    %c0_15 = arith.constant 0 : index
    %c0_16 = arith.constant 0 : index
    %29 = vector.load %arg2[%c4, %c0_15, %c0_16] : memref<9x64x64xbf16, #tpu.memory_space<vmem>>, vector<1x64x64xbf16>
    %30 = vector.shape_cast %29 : vector<1x64x64xbf16> to vector<64x64xbf16>
    %cst_17 = arith.constant dense<0.000000e+00> : vector<448x64xf32>
    %31 = tpu.matmul %28, %30, %cst_17 {dimension_numbers = #tpu.dot_dimension_numbers<[1], [0], [0], [1], [0, 0, 1, 1], [], []>} : vector<448x64xbf16>, vector<64x64xbf16>, vector<448x64xf32> -> vector<448x64xf32>
    %32 = arith.addf %26, %31 : vector<448x64xf32>
    %33 = vector.extract_strided_slice %20 {offsets = [0, 2, 0, 0], sizes = [2, 14, 16, 64], strides = [1, 1, 1, 1]} : vector<2x16x16x64xbf16> to vector<2x14x16x64xbf16>
    %34 = vector.shape_cast %33 : vector<2x14x16x64xbf16> to vector<448x64xbf16>
    %c7 = arith.constant 7 : index
    %c0_18 = arith.constant 0 : index
    %c0_19 = arith.constant 0 : index
    %35 = vector.load %arg2[%c7, %c0_18, %c0_19] : memref<9x64x64xbf16, #tpu.memory_space<vmem>>, vector<1x64x64xbf16>
    %36 = vector.shape_cast %35 : vector<1x64x64xbf16> to vector<64x64xbf16>
    %cst_20 = arith.constant dense<0.000000e+00> : vector<448x64xf32>
    %37 = tpu.matmul %34, %36, %cst_20 {dimension_numbers = #tpu.dot_dimension_numbers<[1], [0], [0], [1], [0, 0, 1, 1], [], []>} : vector<448x64xbf16>, vector<64x64xbf16>, vector<448x64xf32> -> vector<448x64xf32>
    %38 = arith.addf %32, %37 : vector<448x64xf32>
    %39 = vector.extract_strided_slice %0 {offsets = [0, 0, 2, 0], sizes = [2, 16, 14, 64], strides = [1, 1, 1, 1]} : vector<2x16x16x64xbf16> to vector<2x16x14x64xbf16>
    %40 = vector.extract_strided_slice %0 {offsets = [0, 0, 0, 0], sizes = [2, 16, 2, 64], strides = [1, 1, 1, 1]} : vector<2x16x16x64xbf16> to vector<2x16x2x64xbf16>
    %41 = tpu.concatenate %39, %40 in 2 : vector<2x16x14x64xbf16>, vector<2x16x2x64xbf16> -> vector<2x16x16x64xbf16>
    %42 = vector.extract_strided_slice %41 {offsets = [0, 0, 0, 0], sizes = [2, 14, 16, 64], strides = [1, 1, 1, 1]} : vector<2x16x16x64xbf16> to vector<2x14x16x64xbf16>
    %43 = vector.shape_cast %42 : vector<2x14x16x64xbf16> to vector<448x64xbf16>
    %c2 = arith.constant 2 : index
    %c0_21 = arith.constant 0 : index
    %c0_22 = arith.constant 0 : index
    %44 = vector.load %arg2[%c2, %c0_21, %c0_22] : memref<9x64x64xbf16, #tpu.memory_space<vmem>>, vector<1x64x64xbf16>
    %45 = vector.shape_cast %44 : vector<1x64x64xbf16> to vector<64x64xbf16>
    %cst_23 = arith.constant dense<0.000000e+00> : vector<448x64xf32>
    %46 = tpu.matmul %43, %45, %cst_23 {dimension_numbers = #tpu.dot_dimension_numbers<[1], [0], [0], [1], [0, 0, 1, 1], [], []>} : vector<448x64xbf16>, vector<64x64xbf16>, vector<448x64xf32> -> vector<448x64xf32>
    %47 = arith.addf %38, %46 : vector<448x64xf32>
    %48 = vector.extract_strided_slice %41 {offsets = [0, 1, 0, 0], sizes = [2, 14, 16, 64], strides = [1, 1, 1, 1]} : vector<2x16x16x64xbf16> to vector<2x14x16x64xbf16>
    %49 = vector.shape_cast %48 : vector<2x14x16x64xbf16> to vector<448x64xbf16>
    %c5 = arith.constant 5 : index
    %c0_24 = arith.constant 0 : index
    %c0_25 = arith.constant 0 : index
    %50 = vector.load %arg2[%c5, %c0_24, %c0_25] : memref<9x64x64xbf16, #tpu.memory_space<vmem>>, vector<1x64x64xbf16>
    %51 = vector.shape_cast %50 : vector<1x64x64xbf16> to vector<64x64xbf16>
    %cst_26 = arith.constant dense<0.000000e+00> : vector<448x64xf32>
    %52 = tpu.matmul %49, %51, %cst_26 {dimension_numbers = #tpu.dot_dimension_numbers<[1], [0], [0], [1], [0, 0, 1, 1], [], []>} : vector<448x64xbf16>, vector<64x64xbf16>, vector<448x64xf32> -> vector<448x64xf32>
    %53 = arith.addf %47, %52 : vector<448x64xf32>
    %54 = vector.extract_strided_slice %41 {offsets = [0, 2, 0, 0], sizes = [2, 14, 16, 64], strides = [1, 1, 1, 1]} : vector<2x16x16x64xbf16> to vector<2x14x16x64xbf16>
    %55 = vector.shape_cast %54 : vector<2x14x16x64xbf16> to vector<448x64xbf16>
    %c8 = arith.constant 8 : index
    %c0_27 = arith.constant 0 : index
    %c0_28 = arith.constant 0 : index
    %56 = vector.load %arg2[%c8, %c0_27, %c0_28] : memref<9x64x64xbf16, #tpu.memory_space<vmem>>, vector<1x64x64xbf16>
    %57 = vector.shape_cast %56 : vector<1x64x64xbf16> to vector<64x64xbf16>
    %cst_29 = arith.constant dense<0.000000e+00> : vector<448x64xf32>
    %58 = tpu.matmul %55, %57, %cst_29 {dimension_numbers = #tpu.dot_dimension_numbers<[1], [0], [0], [1], [0, 0, 1, 1], [], []>} : vector<448x64xbf16>, vector<64x64xbf16>, vector<448x64xf32> -> vector<448x64xf32>
    %59 = arith.addf %53, %58 : vector<448x64xf32>
    %c0_30 = arith.constant 0 : index
    %c0_31 = arith.constant 0 : index
    %60 = vector.load %arg3[%c0_30, %c0_31] : memref<1x64xf32, #tpu.memory_space<vmem>>, vector<1x64xf32>
    %61 = vector.broadcast %60 : vector<1x64xf32> to vector<448x64xf32>
    %62 = arith.addf %59, %61 : vector<448x64xf32>
    %cst_32 = arith.constant 0.000000e+00 : f32
    %63 = vector.broadcast %cst_32 : f32 to vector<448x64xf32>
    %64 = arith.cmpf oge, %62, %63 : vector<448x64xf32>
    %cst_33 = arith.constant 0.00999999977 : f32
    %65 = vector.broadcast %cst_33 : f32 to vector<448x64xf32>
    %66 = arith.mulf %65, %62 : vector<448x64xf32>
    %67 = arith.select %64, %62, %66 : vector<448x64xi1>, vector<448x64xf32>
    %68 = vector.shape_cast %67 : vector<448x64xf32> to vector<2x14x16x64xf32>
    %69 = vector.shape_cast %68 : vector<2x14x16x64xf32> to vector<2x7x2x16x64xf32>
    %70 = vector.extract_strided_slice %69 {offsets = [0, 0, 0, 0, 0], sizes = [2, 7, 1, 16, 64], strides = [1, 1, 1, 1, 1]} : vector<2x7x2x16x64xf32> to vector<2x7x1x16x64xf32>
    %71 = vector.shape_cast %70 : vector<2x7x1x16x64xf32> to vector<2x7x16x64xf32>
    %72 = vector.extract_strided_slice %69 {offsets = [0, 0, 1, 0, 0], sizes = [2, 7, 1, 16, 64], strides = [1, 1, 1, 1, 1]} : vector<2x7x2x16x64xf32> to vector<2x7x1x16x64xf32>
    %73 = vector.shape_cast %72 : vector<2x7x1x16x64xf32> to vector<2x7x16x64xf32>
    %74 = arith.maximumf %71, %73 : vector<2x7x16x64xf32>
    %75 = vector.extract_strided_slice %74 {offsets = [0, 0, 0, 0], sizes = [2, 7, 1, 64], strides = [1, 1, 1, 1]} : vector<2x7x16x64xf32> to vector<2x7x1x64xf32>
    %76 = vector.shape_cast %75 : vector<2x7x1x64xf32> to vector<2x7x64xf32>
    %77 = vector.extract_strided_slice %74 {offsets = [0, 0, 1, 0], sizes = [2, 7, 1, 64], strides = [1, 1, 1, 1]} : vector<2x7x16x64xf32> to vector<2x7x1x64xf32>
    %78 = vector.shape_cast %77 : vector<2x7x1x64xf32> to vector<2x7x64xf32>
    %79 = arith.maximumf %76, %78 : vector<2x7x64xf32>
    %80 = vector.extract_strided_slice %74 {offsets = [0, 0, 2, 0], sizes = [2, 7, 1, 64], strides = [1, 1, 1, 1]} : vector<2x7x16x64xf32> to vector<2x7x1x64xf32>
    %81 = vector.shape_cast %80 : vector<2x7x1x64xf32> to vector<2x7x64xf32>
    %82 = vector.extract_strided_slice %74 {offsets = [0, 0, 3, 0], sizes = [2, 7, 1, 64], strides = [1, 1, 1, 1]} : vector<2x7x16x64xf32> to vector<2x7x1x64xf32>
    %83 = vector.shape_cast %82 : vector<2x7x1x64xf32> to vector<2x7x64xf32>
    %84 = arith.maximumf %81, %83 : vector<2x7x64xf32>
    %85 = vector.extract_strided_slice %74 {offsets = [0, 0, 4, 0], sizes = [2, 7, 1, 64], strides = [1, 1, 1, 1]} : vector<2x7x16x64xf32> to vector<2x7x1x64xf32>
    %86 = vector.shape_cast %85 : vector<2x7x1x64xf32> to vector<2x7x64xf32>
    %87 = vector.extract_strided_slice %74 {offsets = [0, 0, 5, 0], sizes = [2, 7, 1, 64], strides = [1, 1, 1, 1]} : vector<2x7x16x64xf32> to vector<2x7x1x64xf32>
    %88 = vector.shape_cast %87 : vector<2x7x1x64xf32> to vector<2x7x64xf32>
    %89 = arith.maximumf %86, %88 : vector<2x7x64xf32>
    %90 = vector.extract_strided_slice %74 {offsets = [0, 0, 6, 0], sizes = [2, 7, 1, 64], strides = [1, 1, 1, 1]} : vector<2x7x16x64xf32> to vector<2x7x1x64xf32>
    %91 = vector.shape_cast %90 : vector<2x7x1x64xf32> to vector<2x7x64xf32>
    %92 = vector.extract_strided_slice %74 {offsets = [0, 0, 7, 0], sizes = [2, 7, 1, 64], strides = [1, 1, 1, 1]} : vector<2x7x16x64xf32> to vector<2x7x1x64xf32>
    %93 = vector.shape_cast %92 : vector<2x7x1x64xf32> to vector<2x7x64xf32>
    %94 = arith.maximumf %91, %93 : vector<2x7x64xf32>
    %95 = vector.extract_strided_slice %74 {offsets = [0, 0, 8, 0], sizes = [2, 7, 1, 64], strides = [1, 1, 1, 1]} : vector<2x7x16x64xf32> to vector<2x7x1x64xf32>
    %96 = vector.shape_cast %95 : vector<2x7x1x64xf32> to vector<2x7x64xf32>
    %97 = vector.extract_strided_slice %74 {offsets = [0, 0, 9, 0], sizes = [2, 7, 1, 64], strides = [1, 1, 1, 1]} : vector<2x7x16x64xf32> to vector<2x7x1x64xf32>
    %98 = vector.shape_cast %97 : vector<2x7x1x64xf32> to vector<2x7x64xf32>
    %99 = arith.maximumf %96, %98 : vector<2x7x64xf32>
    %100 = vector.extract_strided_slice %74 {offsets = [0, 0, 10, 0], sizes = [2, 7, 1, 64], strides = [1, 1, 1, 1]} : vector<2x7x16x64xf32> to vector<2x7x1x64xf32>
    %101 = vector.shape_cast %100 : vector<2x7x1x64xf32> to vector<2x7x64xf32>
    %102 = vector.extract_strided_slice %74 {offsets = [0, 0, 11, 0], sizes = [2, 7, 1, 64], strides = [1, 1, 1, 1]} : vector<2x7x16x64xf32> to vector<2x7x1x64xf32>
    %103 = vector.shape_cast %102 : vector<2x7x1x64xf32> to vector<2x7x64xf32>
    %104 = arith.maximumf %101, %103 : vector<2x7x64xf32>
    %105 = vector.extract_strided_slice %74 {offsets = [0, 0, 12, 0], sizes = [2, 7, 1, 64], strides = [1, 1, 1, 1]} : vector<2x7x16x64xf32> to vector<2x7x1x64xf32>
    %106 = vector.shape_cast %105 : vector<2x7x1x64xf32> to vector<2x7x64xf32>
    %107 = vector.extract_strided_slice %74 {offsets = [0, 0, 13, 0], sizes = [2, 7, 1, 64], strides = [1, 1, 1, 1]} : vector<2x7x16x64xf32> to vector<2x7x1x64xf32>
    %108 = vector.shape_cast %107 : vector<2x7x1x64xf32> to vector<2x7x64xf32>
    %109 = arith.maximumf %106, %108 : vector<2x7x64xf32>
    %110 = vector.shape_cast %79 : vector<2x7x64xf32> to vector<2x7x1x64xf32>
    %111 = vector.shape_cast %84 : vector<2x7x64xf32> to vector<2x7x1x64xf32>
    %112 = vector.shape_cast %89 : vector<2x7x64xf32> to vector<2x7x1x64xf32>
    %113 = vector.shape_cast %94 : vector<2x7x64xf32> to vector<2x7x1x64xf32>
    %114 = vector.shape_cast %99 : vector<2x7x64xf32> to vector<2x7x1x64xf32>
    %115 = vector.shape_cast %104 : vector<2x7x64xf32> to vector<2x7x1x64xf32>
    %116 = vector.shape_cast %109 : vector<2x7x64xf32> to vector<2x7x1x64xf32>
    %117 = tpu.concatenate %110, %111, %112, %113, %114, %115, %116 in 2 : vector<2x7x1x64xf32>, vector<2x7x1x64xf32>, vector<2x7x1x64xf32>, vector<2x7x1x64xf32>, vector<2x7x1x64xf32>, vector<2x7x1x64xf32>, vector<2x7x1x64xf32> -> vector<2x7x7x64xf32>
    %118 = arith.truncf %117 : vector<2x7x7x64xf32> to vector<2x7x7x64xbf16>
    %c0_34 = arith.constant 0 : index
    %c0_35 = arith.constant 0 : index
    %c0_36 = arith.constant 0 : index
    %c0_37 = arith.constant 0 : index
    %119 = vector.load %arg4[%c0_34, %c0_35, %c0_36, %c0_37] : memref<2x7x7x64xbf16, #tpu.memory_space<vmem>>, vector<2x7x7x64xbf16>
    tpu.vector_store %arg4[%c0_34, %c0_35, %c0_36, %c0_37], %118 {strides = array<i32>} : memref<2x7x7x64xbf16, #tpu.memory_space<vmem>>, vector<2x7x7x64xbf16>,
    return
  }
  func.func @transform_0(%arg0: i32) -> (i32, i32, i32, i32) {
    %c0_i32 = arith.constant 0 : i32
    %c0_i32_0 = arith.constant 0 : i32
    %c0_i32_1 = arith.constant 0 : i32
    %c0_i32_2 = arith.constant 0 : i32
    return %arg0, %c0_i32, %c0_i32_0, %c0_i32_1 : i32, i32, i32, i32
  }
  func.func @transform_1(%arg0: i32) -> (i32, i32, i32) {
    %c0_i32 = arith.constant 0 : i32
    %c0_i32_0 = arith.constant 0 : i32
    %c0_i32_1 = arith.constant 0 : i32
    %c0_i32_2 = arith.constant 0 : i32
    return %c0_i32, %c0_i32_0, %c0_i32_1 : i32, i32, i32
  }
  func.func @transform_2(%arg0: i32) -> (i32, i32) {
    %c0_i32 = arith.constant 0 : i32
    %c0_i32_0 = arith.constant 0 : i32
    %c0_i32_1 = arith.constant 0 : i32
    return %c0_i32, %c0_i32_0 : i32, i32
  }
  func.func @transform_3(%arg0: i32) -> (i32, i32, i32, i32) {
    %c0_i32 = arith.constant 0 : i32
    %c0_i32_0 = arith.constant 0 : i32
    %c0_i32_1 = arith.constant 0 : i32
    %c0_i32_2 = arith.constant 0 : i32
    return %arg0, %c0_i32, %c0_i32_0, %c0_i32_1 : i32, i32, i32, i32
  }
}

module attributes {stable_mosaic.version = 11 : i64} {
  func.func @mlp_kernel(%arg0: i32, %arg1: memref<2x3136xbf16, #tpu.memory_space<vmem>>, %arg2: memref<3136x256xbf16, #tpu.memory_space<vmem>>, %arg3: memref<1x256xf32, #tpu.memory_space<vmem>>, %arg4: memref<256x256xbf16, #tpu.memory_space<vmem>>, %arg5: memref<1x256xf32, #tpu.memory_space<vmem>>, %arg6: memref<256x10xf32, #tpu.memory_space<vmem>>, %arg7: memref<1x10xf32, #tpu.memory_space<vmem>>, %arg8: memref<2x10xf32, #tpu.memory_space<vmem>>) attributes {dimension_semantics = [#tpu.dimension_semantics<parallel>], iteration_bounds = array<i64: 1>, scalar_prefetch = 0 : i64, scratch_operands = 0 : i64, tpu.core_type = #tpu.core_type<tc>, window_params = [{transform_indices = @transform_0, window_bounds = array<i64: 2, 3136>}, {pipeline_mode = #tpu.pipeline_mode<synchronous>, transform_indices = @transform_1, window_bounds = array<i64: 3136, 256>}, {pipeline_mode = #tpu.pipeline_mode<synchronous>, transform_indices = @transform_2, window_bounds = array<i64: 1, 256>}, {pipeline_mode = #tpu.pipeline_mode<synchronous>, transform_indices = @transform_3, window_bounds = array<i64: 256, 256>}, {pipeline_mode = #tpu.pipeline_mode<synchronous>, transform_indices = @transform_4, window_bounds = array<i64: 1, 256>}, {pipeline_mode = #tpu.pipeline_mode<synchronous>, transform_indices = @transform_5, window_bounds = array<i64: 256, 10>}, {pipeline_mode = #tpu.pipeline_mode<synchronous>, transform_indices = @transform_6, window_bounds = array<i64: 1, 10>}, {transform_indices = @transform_7, window_bounds = array<i64: 2, 10>}]} {
    %c0 = arith.constant 0 : index
    %c0_0 = arith.constant 0 : index
    %0 = vector.load %arg1[%c0, %c0_0] : memref<2x3136xbf16, #tpu.memory_space<vmem>>, vector<2x3136xbf16>
    %c0_1 = arith.constant 0 : index
    %c0_2 = arith.constant 0 : index
    %1 = vector.load %arg2[%c0_1, %c0_2] : memref<3136x256xbf16, #tpu.memory_space<vmem>>, vector<3136x256xbf16>
    %cst = arith.constant dense<0.000000e+00> : vector<2x256xf32>
    %2 = tpu.matmul %0, %1, %cst {dimension_numbers = #tpu.dot_dimension_numbers<[1], [0], [0], [1], [0, 0, 1, 1], [], []>} : vector<2x3136xbf16>, vector<3136x256xbf16>, vector<2x256xf32> -> vector<2x256xf32>
    %c0_3 = arith.constant 0 : index
    %c0_4 = arith.constant 0 : index
    %3 = vector.load %arg3[%c0_3, %c0_4] : memref<1x256xf32, #tpu.memory_space<vmem>>, vector<1x256xf32>
    %4 = vector.broadcast %3 : vector<1x256xf32> to vector<2x256xf32>
    %5 = arith.addf %2, %4 : vector<2x256xf32>
    %cst_5 = arith.constant 0.000000e+00 : f32
    %6 = vector.broadcast %cst_5 : f32 to vector<2x256xf32>
    %7 = arith.cmpf oge, %5, %6 : vector<2x256xf32>
    %cst_6 = arith.constant 0.00999999977 : f32
    %8 = vector.broadcast %cst_6 : f32 to vector<2x256xf32>
    %9 = arith.mulf %8, %5 : vector<2x256xf32>
    %10 = arith.select %7, %5, %9 : vector<2x256xi1>, vector<2x256xf32>
    %11 = arith.truncf %10 : vector<2x256xf32> to vector<2x256xbf16>
    %c0_7 = arith.constant 0 : index
    %c0_8 = arith.constant 0 : index
    %12 = vector.load %arg4[%c0_7, %c0_8] : memref<256x256xbf16, #tpu.memory_space<vmem>>, vector<256x256xbf16>
    %cst_9 = arith.constant dense<0.000000e+00> : vector<2x256xf32>
    %13 = tpu.matmul %11, %12, %cst_9 {dimension_numbers = #tpu.dot_dimension_numbers<[1], [0], [0], [1], [0, 0, 1, 1], [], []>} : vector<2x256xbf16>, vector<256x256xbf16>, vector<2x256xf32> -> vector<2x256xf32>
    %c0_10 = arith.constant 0 : index
    %c0_11 = arith.constant 0 : index
    %14 = vector.load %arg5[%c0_10, %c0_11] : memref<1x256xf32, #tpu.memory_space<vmem>>, vector<1x256xf32>
    %15 = vector.broadcast %14 : vector<1x256xf32> to vector<2x256xf32>
    %16 = arith.addf %13, %15 : vector<2x256xf32>
    %cst_12 = arith.constant 0.000000e+00 : f32
    %17 = vector.broadcast %cst_12 : f32 to vector<2x256xf32>
    %18 = arith.cmpf oge, %16, %17 : vector<2x256xf32>
    %cst_13 = arith.constant 0.00999999977 : f32
    %19 = vector.broadcast %cst_13 : f32 to vector<2x256xf32>
    %20 = arith.mulf %19, %16 : vector<2x256xf32>
    %21 = arith.select %18, %16, %20 : vector<2x256xi1>, vector<2x256xf32>
    %c0_14 = arith.constant 0 : index
    %c0_15 = arith.constant 0 : index
    %22 = vector.load %arg6[%c0_14, %c0_15] : memref<256x10xf32, #tpu.memory_space<vmem>>, vector<256x10xf32>
    %cst_16 = arith.constant dense<0.000000e+00> : vector<2x10xf32>
    %23 = tpu.matmul %21, %22, %cst_16 {dimension_numbers = #tpu.dot_dimension_numbers<[1], [0], [0], [1], [0, 0, 1, 1], [], []>} : vector<2x256xf32>, vector<256x10xf32>, vector<2x10xf32> -> vector<2x10xf32>
    %c0_17 = arith.constant 0 : index
    %c0_18 = arith.constant 0 : index
    %24 = vector.load %arg7[%c0_17, %c0_18] : memref<1x10xf32, #tpu.memory_space<vmem>>, vector<1x10xf32>
    %25 = vector.broadcast %24 : vector<1x10xf32> to vector<2x10xf32>
    %26 = arith.addf %23, %25 : vector<2x10xf32>
    %cst_19 = arith.constant dense<0xFF800000> : vector<2xf32>
    %27 = vector.multi_reduction <maximumf>, %26, %cst_19 [1] : vector<2x10xf32> to vector<2xf32>
    %28 = vector.shape_cast %27 : vector<2xf32> to vector<2x1xf32>
    %29 = vector.broadcast %28 : vector<2x1xf32> to vector<2x10xf32>
    %30 = arith.subf %26, %29 : vector<2x10xf32>
    %31 = math.exp %30 : vector<2x10xf32>
    %cst_20 = arith.constant dense<0.000000e+00> : vector<2xf32>
    %32 = vector.multi_reduction <add>, %31, %cst_20 [1] : vector<2x10xf32> to vector<2xf32>
    %33 = vector.shape_cast %32 : vector<2xf32> to vector<2x1xf32>
    %34 = math.log %33 : vector<2x1xf32>
    %35 = vector.broadcast %34 : vector<2x1xf32> to vector<2x10xf32>
    %36 = arith.subf %30, %35 : vector<2x10xf32>
    %c0_21 = arith.constant 0 : index
    %c0_22 = arith.constant 0 : index
    %37 = vector.load %arg8[%c0_21, %c0_22] : memref<2x10xf32, #tpu.memory_space<vmem>>, vector<2x10xf32>
    tpu.vector_store %arg8[%c0_21, %c0_22], %36 {strides = array<i32>} : memref<2x10xf32, #tpu.memory_space<vmem>>, vector<2x10xf32>,
    return
  }
  func.func @transform_0(%arg0: i32) -> (i32, i32) {
    %c0_i32 = arith.constant 0 : i32
    %c0_i32_0 = arith.constant 0 : i32
    return %arg0, %c0_i32 : i32, i32
  }
  func.func @transform_1(%arg0: i32) -> (i32, i32) {
    %c0_i32 = arith.constant 0 : i32
    %c0_i32_0 = arith.constant 0 : i32
    %c0_i32_1 = arith.constant 0 : i32
    return %c0_i32, %c0_i32_0 : i32, i32
  }
  func.func @transform_2(%arg0: i32) -> (i32, i32) {
    %c0_i32 = arith.constant 0 : i32
    %c0_i32_0 = arith.constant 0 : i32
    %c0_i32_1 = arith.constant 0 : i32
    return %c0_i32, %c0_i32_0 : i32, i32
  }
  func.func @transform_3(%arg0: i32) -> (i32, i32) {
    %c0_i32 = arith.constant 0 : i32
    %c0_i32_0 = arith.constant 0 : i32
    %c0_i32_1 = arith.constant 0 : i32
    return %c0_i32, %c0_i32_0 : i32, i32
  }
  func.func @transform_4(%arg0: i32) -> (i32, i32) {
    %c0_i32 = arith.constant 0 : i32
    %c0_i32_0 = arith.constant 0 : i32
    %c0_i32_1 = arith.constant 0 : i32
    return %c0_i32, %c0_i32_0 : i32, i32
  }
  func.func @transform_5(%arg0: i32) -> (i32, i32) {
    %c0_i32 = arith.constant 0 : i32
    %c0_i32_0 = arith.constant 0 : i32
    %c0_i32_1 = arith.constant 0 : i32
    return %c0_i32, %c0_i32_0 : i32, i32
  }
  func.func @transform_6(%arg0: i32) -> (i32, i32) {
    %c0_i32 = arith.constant 0 : i32
    %c0_i32_0 = arith.constant 0 : i32
    %c0_i32_1 = arith.constant 0 : i32
    return %c0_i32, %c0_i32_0 : i32, i32
  }
  func.func @transform_7(%arg0: i32) -> (i32, i32) {
    %c0_i32 = arith.constant 0 : i32
    %c0_i32_0 = arith.constant 0 : i32
    return %arg0, %c0_i32 : i32, i32
  }
}

</mosaic_0001>

<bundles_post_ra>
// kernel: b5_forward.3
= control target key start
LH: loop header
LB: loop body
LE: loop exit
PB: predicated region body
PF: predicated region fallthrough
CT: control target
= control target key end

     0   :  { %8 = vsyncpa [#allocation3], 0  ;;  %s1966_s12 = smov [#allocation2]   ;;  %s2916_s0 = inlined_call_operand.vmem [shape: bf16[64,128], index: 0, kind: input, shape index: {}]   ;;  %s2917_s1 = inlined_call_operand.vmem [shape: bf16[128,2048], index: 1, kind: input, shape index: {}]   ;;  %s2918_s2 = inlined_call_operand.hbm [shape: f32[1,512], index: 2, kind: input, shape index: {}]   ;;  %s2919_s3 = inlined_call_operand.vmem [shape: bf16[64,512], index: 3, kind: output, shape index: {}]  }
   0x1   :  { %s19_s13 = sshll.u32 %s1966_s12, 4  ;;  %s20_s13 = int_to_ptr.vmem [resolvable:$true] %s19_s13 }
   0x2   :  { %s1952_s14 = scalar_lea.vmem %s20_s13, 64  ;;  %p1957_p1 = scmp.lt.s32.totalorder %s20_s13, %s20_s13 }
   0x3   :  { %p1953_p0 = scmp.ne.s32.totalorder %s20_s13, %s1952_s14  ;;  %p1958_p2 = scmp.lt.s32.totalorder %s1952_s14, %s1952_s14 }
   0x5   :  { %p1959_p3 = por %p1958_p2, %p1957_p1 }
   0x7   :  { %p1960_p4 = pnand %p1959_p3, %p1953_p0 }
   0x9   :  { %1963 = shalt.err (!%p1960_p4)
}
   0xa   :  { %22 = dma.hbm_to_vmem [thread:$0]  %s2918_s2, 64, %s20_s13, [#allocation3]  }
   0xb   :  { %1964 = dma.done.wait [#allocation3], 64  }
   0xc   :  { %1965 = vsyncadd [#allocation3], 4294967232  ;;  %v1967_v0 = vmov 0   ;;  %v147_v1 = vld [vmem:[%s2917_s1 + $0x380] sm:$0xff]  ;;  %v148_v3 = vld [vmem:[%s2917_s1 + $0x388] sm:$0xff] }
   0xd   :  { %859 = vmatprep.mubr.bf16.mxu0 %v1967_v0  ;;  %932 = vmatprep.mubr.bf16.mxu1 %v1967_v0  ;;  %v155_v2 = vld [vmem:[%s2917_s1 + $0x3c0] sm:$0xff]  ;;  %v156_v5 = vld [vmem:[%s2917_s1 + $0x3c8] sm:$0xff]  ;;  %v149_v63 = vld [vmem:[%s2917_s1 + $0x390] sm:$0xff] }
   0xe   :  { %v1891_v4 = vcombine.high %v147_v1, %v155_v2  ;;  %v1890_v6 = vcombine.low %v147_v1, %v155_v2  ;;  %v131_v7 = vld [vmem:[%s2917_s1 + $0x300] sm:$0xff]  ;;  %v1893_v9 = vcombine.high %v148_v3, %v156_v5  ;;  %v1892_v10 = vcombine.low %v148_v3, %v156_v5  ;;  %v132_v12 = vld [vmem:[%s2917_s1 + $0x308] sm:$0xff]  ;;  %v157_v1 = vld [vmem:[%s2917_s1 + $0x3d0] sm:$0xff] }
   0xf   :  { %v139_v8 = vld [vmem:[%s2917_s1 + $0x340] sm:$0xff]  ;;  %v140_v13 = vld [vmem:[%s2917_s1 + $0x348] sm:$0xff]  ;;  %v150_v2 = vld [vmem:[%s2917_s1 + $0x398] sm:$0xff] }
  0x10   :  { %v1875_v11 = vcombine.high %v131_v7, %v139_v8  ;;  %v115_v14 = vld [vmem:[%s2917_s1 + $0x280] sm:$0xff]  ;;  %827 = vmatprep.subr.bf16.mxu0 %v1891_v4  ;;  %v1877_v15 = vcombine.high %v132_v12, %v140_v13  ;;  %v116_v17 = vld [vmem:[%s2917_s1 + $0x288] sm:$0xff]  ;;  %900 = vmatprep.subr.bf16.mxu1 %v1893_v9  ;;  %v1874_v19 = vcombine.low %v131_v7, %v139_v8  ;;  %v158_v3 = vld [vmem:[%s2917_s1 + $0x3d8] sm:$0xff] }
  0x11   :  { %v123_v16 = vld [vmem:[%s2917_s1 + $0x2c0] sm:$0xff]  ;;  %v124_v18 = vld [vmem:[%s2917_s1 + $0x2c8] sm:$0xff]  ;;  %828 = vmatpush1.bf16.msra.mxu0 %v1890_v6  ;;  %901 = vmatpush1.bf16.msra.mxu1 %v1892_v10  ;;  %v1876_v20 = vcombine.low %v132_v12, %v140_v13  ;;  %v1895_v6 = vcombine.high %v149_v63, %v157_v1  ;;  %v1897_v7 = vcombine.high %v150_v2, %v158_v3  ;;  %v133_v8 = vld [vmem:[%s2917_s1 + $0x310] sm:$0xff] }
  0x12   :  { %829 = vmatprep.subr.bf16.mxu0 %v1875_v11  ;;  %v1859_v21 = vcombine.high %v115_v14, %v123_v16  ;;  %902 = vmatprep.subr.bf16.mxu1 %v1877_v15  ;;  %v1861_v22 = vcombine.high %v116_v17, %v124_v18  ;;  %v99_v23 = vld [vmem:[%s2917_s1 + $0x200] sm:$0xff]  ;;  %v100_v25 = vld [vmem:[%s2917_s1 + $0x208] sm:$0xff]  ;;  %v1858_v27 = vcombine.low %v115_v14, %v123_v16  ;;  %v141_v9 = vld [vmem:[%s2917_s1 + $0x350] sm:$0xff] }
  0x13   :  { %v107_v24 = vld [vmem:[%s2917_s1 + $0x240] sm:$0xff]  ;;  %v108_v26 = vld [vmem:[%s2917_s1 + $0x248] sm:$0xff]  ;;  %v1860_v28 = vcombine.low %v116_v17, %v124_v18  ;;  %v134_v11 = vld [vmem:[%s2917_s1 + $0x318] sm:$0xff]  ;;  %v1894_v13 = vcombine.low %v149_v63, %v157_v1  ;;  %v1896_v14 = vcombine.low %v150_v2, %v158_v3  ;;  %v1879_v15 = vcombine.high %v133_v8, %v141_v9 }
  0x14   :  { %v1843_v29 = vcombine.high %v99_v23, %v107_v24  ;;  %v1845_v30 = vcombine.high %v100_v25, %v108_v26  ;;  %v83_v31 = vld [vmem:[%s2917_s1 + $0x180] sm:$0xff]  ;;  %v84_v33 = vld [vmem:[%s2917_s1 + $0x188] sm:$0xff]  ;;  %v1842_v35 = vcombine.low %v99_v23, %v107_v24  ;;  %v1844_v36 = vcombine.low %v100_v25, %v108_v26  ;;  %v142_v12 = vld [vmem:[%s2917_s1 + $0x358] sm:$0xff] }
  0x15   :  { %830 = vmatpush1.bf16.msra.mxu0 %v1874_v19  ;;  %903 = vmatpush1.bf16.msra.mxu1 %v1876_v20  ;;  %v91_v32 = vld [vmem:[%s2917_s1 + $0x1c0] sm:$0xff]  ;;  %v92_v34 = vld [vmem:[%s2917_s1 + $0x1c8] sm:$0xff]  ;;  %v1881_v16 = vcombine.high %v134_v11, %v142_v12  ;;  %v117_v17 = vld [vmem:[%s2917_s1 + $0x290] sm:$0xff] }
  0x16   :  { %831 = vmatprep.subr.bf16.mxu0 %v1859_v21  ;;  %904 = vmatprep.subr.bf16.mxu1 %v1861_v22  ;;  %v1827_v37 = vcombine.high %v83_v31, %v91_v32  ;;  %v67_v38 = vld [vmem:[%s2917_s1 + $0x100] sm:$0xff]  ;;  %v1829_v39 = vcombine.high %v84_v33, %v92_v34  ;;  %v68_v41 = vld [vmem:[%s2917_s1 + $0x108] sm:$0xff]  ;;  %v1826_v43 = vcombine.low %v83_v31, %v91_v32  ;;  %v125_v18 = vld [vmem:[%s2917_s1 + $0x2d0] sm:$0xff] }
  0x17   :  { %v75_v40 = vld [vmem:[%s2917_s1 + $0x140] sm:$0xff]  ;;  %v76_v42 = vld [vmem:[%s2917_s1 + $0x148] sm:$0xff]  ;;  %v1828_v44 = vcombine.low %v84_v33, %v92_v34  ;;  %v118_v19 = vld [vmem:[%s2917_s1 + $0x298] sm:$0xff]  ;;  %v1878_v21 = vcombine.low %v133_v8, %v141_v9  ;;  %v1880_v22 = vcombine.low %v134_v11, %v142_v12  ;;  %v1863_v23 = vcombine.high %v117_v17, %v125_v18 }
  0x18   :  { %v1811_v45 = vcombine.high %v67_v38, %v75_v40  ;;  %v51_v46 = vld [vmem:[%s2917_s1 + $0x80] sm:$0xff]  ;;  %v1813_v47 = vcombine.high %v68_v41, %v76_v42  ;;  %v52_v49 = vld [vmem:[%s2917_s1 + $0x88] sm:$0xff]  ;;  %v1810_v51 = vcombine.low %v67_v38, %v75_v40  ;;  %v1812_v52 = vcombine.low %v68_v41, %v76_v42  ;;  %v126_v20 = vld [vmem:[%s2917_s1 + $0x2d8] sm:$0xff] }
  0x19   :  { %832 = vmatpush1.bf16.msra.mxu0 %v1858_v27  ;;  %905 = vmatpush1.bf16.msra.mxu1 %v1860_v28  ;;  %v59_v48 = vld [vmem:[%s2917_s1 + $0xc0] sm:$0xff]  ;;  %v60_v50 = vld [vmem:[%s2917_s1 + $0xc8] sm:$0xff]  ;;  %v1865_v24 = vcombine.high %v118_v19, %v126_v20  ;;  %v101_v25 = vld [vmem:[%s2917_s1 + $0x210] sm:$0xff]  ;;  %v1864_v31 = vcombine.low %v118_v19, %v126_v20 }
  0x1a   :  { %833 = vmatprep.subr.bf16.mxu0 %v1843_v29  ;;  %906 = vmatprep.subr.bf16.mxu1 %v1845_v30  ;;  %v1795_v53 = vcombine.high %v51_v46, %v59_v48  ;;  %v1797_v54 = vcombine.high %v52_v49, %v60_v50  ;;  %v35_v55 = vld [vmem:[%s2917_s1] sm:$0xff]  ;;  %v36_v57 = vld [vmem:[%s2917_s1 + $0x8] sm:$0xff]  ;;  %v1794_v59 = vcombine.low %v51_v46, %v59_v48  ;;  %v109_v26 = vld [vmem:[%s2917_s1 + $0x250] sm:$0xff] }
  0x1b   :  { %v43_v56 = vld [vmem:[%s2917_s1 + $0x40] sm:$0xff]  ;;  %v44_v58 = vld [vmem:[%s2917_s1 + $0x48] sm:$0xff]  ;;  %v1796_v60 = vcombine.low %v52_v49, %v60_v50  ;;  %v102_v28 = vld [vmem:[%s2917_s1 + $0x218] sm:$0xff]  ;;  %v1862_v30 = vcombine.low %v117_v17, %v125_v18  ;;  %v1847_v32 = vcombine.high %v101_v25, %v109_v26  ;;  %v1846_v38 = vcombine.low %v101_v25, %v109_v26 }
  0x1c   :  { %v1779_v61 = vcombine.high %v35_v55, %v43_v56  ;;  %v1781_v62 = vcombine.high %v36_v57, %v44_v58  ;;  %v1778_v4 = vcombine.low %v35_v55, %v43_v56  ;;  %v1780_v5 = vcombine.low %v36_v57, %v44_v58  ;;  %v2110_v10 = vld [vmem:[%s2916_s0] sm:$0xff]   ;;  %v2143_v27 = vld [vmem:[%s2916_s0 + $0x8] sm:$0xff]   ;;  %v110_v29 = vld [vmem:[%s2917_s1 + $0x258] sm:$0xff] }
  0x1d   :  { %834 = vmatpush1.bf16.msra.mxu0 %v1842_v35  ;;  %907 = vmatpush1.bf16.msra.mxu1 %v1844_v36  ;;  %v1849_v33 = vcombine.high %v102_v28, %v110_v29  ;;  %v85_v34 = vld [vmem:[%s2917_s1 + $0x190] sm:$0xff]  ;;  %v86_v36 = vld [vmem:[%s2917_s1 + $0x198] sm:$0xff]  ;;  %v160_v8 = vld [vmem:[%s2917_s1 + $0x3e8] sm:$0xff] }
  0x1e   :  { %835 = vmatprep.subr.bf16.mxu0 %v1827_v37  ;;  %908 = vmatprep.subr.bf16.mxu1 %v1829_v39  ;;  %v93_v35 = vld [vmem:[%s2917_s1 + $0x1d0] sm:$0xff]  ;;  %v94_v37 = vld [vmem:[%s2917_s1 + $0x1d8] sm:$0xff]  ;;  %v1848_v39 = vcombine.low %v102_v28, %v110_v29  ;;  %v144_v17 = vld [vmem:[%s2917_s1 + $0x368] sm:$0xff] }
  0x1f   :  { %v1831_v40 = vcombine.high %v85_v34, %v93_v35  ;;  %v1833_v41 = vcombine.high %v86_v36, %v94_v37  ;;  %v69_v42 = vld [vmem:[%s2917_s1 + $0x110] sm:$0xff]  ;;  %v78_v46 = vld [vmem:[%s2917_s1 + $0x158] sm:$0xff]  ;;  %v1832_v48 = vcombine.low %v86_v36, %v94_v37  ;;  %v128_v25 = vld [vmem:[%s2917_s1 + $0x2e8] sm:$0xff] }
  0x20   :  { %v46_v63 = vld [vmem:[%s2917_s1 + $0x58] sm:$0xff] }
  0x21   :  { %836 = vmatpush1.bf16.msra.mxu0 %v1826_v43  ;;  %909 = vmatpush1.bf16.msra.mxu1 %v1828_v44  ;;  %v77_v43 = vld [vmem:[%s2917_s1 + $0x150] sm:$0xff] }
  0x22   :  { %837 = vmatprep.subr.bf16.mxu0 %v1811_v45  ;;  %910 = vmatprep.subr.bf16.mxu1 %v1813_v47  ;;  %v2176_v44 = vld [vmem:[%s2916_s0 + $0x10] sm:$0xff]   ;;  %v70_v45 = vld [vmem:[%s2917_s1 + $0x118] sm:$0xff]  ;;  %v1830_v47 = vcombine.low %v85_v34, %v93_v35  ;;  %v1815_v49 = vcombine.high %v69_v42, %v77_v43  ;;  %v1814_v55 = vcombine.low %v69_v42, %v77_v43  ;;  %v112_v34 = vld [vmem:[%s2917_s1 + $0x268] sm:$0xff] }
  0x23   :  { %v1817_v50 = vcombine.high %v70_v45, %v78_v46  ;;  %v1816_v56 = vcombine.low %v70_v45, %v78_v46  ;;  %v96_v42 = vld [vmem:[%s2917_s1 + $0x1e8] sm:$0xff] }
  0x25   :  { %838 = vmatpush1.bf16.msra.mxu0 %v1810_v51  ;;  %911 = vmatpush1.bf16.msra.mxu1 %v1812_v52  ;;  %v53_v51 = vld [vmem:[%s2917_s1 + $0x90] sm:$0xff] }
  0x26   :  { %839 = vmatprep.subr.bf16.mxu0 %v1795_v53  ;;  %912 = vmatprep.subr.bf16.mxu1 %v1797_v54  ;;  %v61_v52 = vld [vmem:[%s2917_s1 + $0xd0] sm:$0xff]  ;;  %v54_v53 = vld [vmem:[%s2917_s1 + $0x98] sm:$0xff] }
  0x27   :  { %v62_v54 = vld [vmem:[%s2917_s1 + $0xd8] sm:$0xff]  ;;  %v1799_v57 = vcombine.high %v53_v51, %v61_v52  ;;  %v1798_v1 = vcombine.low %v53_v51, %v61_v52  ;;  %v80_v51 = vld [vmem:[%s2917_s1 + $0x168] sm:$0xff] }
  0x28   :  { %v1801_v58 = vcombine.high %v54_v53, %v62_v54  ;;  %v1800_v2 = vcombine.low %v54_v53, %v62_v54 }
  0x29   :  { %840 = vmatpush1.bf16.msra.mxu0 %v1794_v59  ;;  %913 = vmatpush1.bf16.msra.mxu1 %v1796_v60  ;;  %v37_v59 = vld [vmem:[%s2917_s1 + $0x10] sm:$0xff] }
  0x2a   :  { %841 = vmatprep.subr.bf16.mxu0 %v1779_v61  ;;  %914 = vmatprep.subr.bf16.mxu1 %v1781_v62  ;;  %v45_v60 = vld [vmem:[%s2917_s1 + $0x50] sm:$0xff]  ;;  %v2209_v61 = vld [vmem:[%s2916_s0 + $0x18] sm:$0xff]  }
  0x2b   :  { %v38_v62 = vld [vmem:[%s2917_s1 + $0x18] sm:$0xff]  ;;  %v1783_v3 = vcombine.high %v37_v59, %v45_v60  ;;  %v1782_v9 = vcombine.low %v37_v59, %v45_v60  ;;  %v64_v59 = vld [vmem:[%s2917_s1 + $0xe8] sm:$0xff] }
  0x2c   :  { %v1784_v11 = vcombine.low %v38_v62, %v46_v63 }
  0x2d   :  { %842 = vmatpush1.bf16.msra.mxu0 %v1778_v4  ;;  %915 = vmatpush1.bf16.msra.mxu1 %v1780_v5  ;;  %v1785_v4 = vcombine.high %v38_v62, %v46_v63  ;;  %v151_v5 = vld [vmem:[%s2917_s1 + $0x3a0] sm:$0xff] }
  0x2e   :  { %973 = vmatprep.subr.bf16.mxu0 %v1895_v6  ;;  %1046 = vmatprep.subr.bf16.mxu1 %v1897_v7  ;;  %v159_v6 = vld [vmem:[%s2917_s1 + $0x3e0] sm:$0xff]  ;;  %v152_v7 = vld [vmem:[%s2917_s1 + $0x3a8] sm:$0xff] }
  0x2f   :  { %v1899_v12 = vcombine.high %v151_v5, %v159_v6  ;;  %v1898_v18 = vcombine.low %v151_v5, %v159_v6  ;;  %v1900_v19 = vcombine.low %v152_v7, %v160_v8  ;;  %v48_v5 = vld [vmem:[%s2917_s1 + $0x68] sm:$0xff] }
  0x30   :  { %860 = vmatmul.mubr.bf16.vlgmr.msra.gmra.mxu0 %v2110_v10  ;;  %933 = vmatmul.mubr.bf16.vlgmr.msra.gmra.mxu1 %v2110_v10 }
  0x31   :  { %974 = vmatpush1.bf16.msra.mxu0 %v1894_v13  ;;  %1047 = vmatpush1.bf16.msra.mxu1 %v1896_v14  ;;  %v1901_v13 = vcombine.high %v152_v7, %v160_v8  ;;  %v135_v14 = vld [vmem:[%s2917_s1 + $0x320] sm:$0xff] }
  0x32   :  { %975 = vmatprep.subr.bf16.mxu0 %v1879_v15  ;;  %1048 = vmatprep.subr.bf16.mxu1 %v1881_v16  ;;  %v143_v15 = vld [vmem:[%s2917_s1 + $0x360] sm:$0xff]  ;;  %v136_v16 = vld [vmem:[%s2917_s1 + $0x328] sm:$0xff] }
  0x33   :  { %869 = vmatprep.mubr.bf16.mxu0 %v1967_v0  ;;  %942 = vmatprep.mubr.bf16.mxu1 %v1967_v0  ;;  %v1883_v20 = vcombine.high %v135_v14, %v143_v15  ;;  %v1882_v26 = vcombine.low %v135_v14, %v143_v15  ;;  %v1884_v28 = vcombine.low %v136_v16, %v144_v17  ;;  %v162_v14 = vld [vmem:[%s2917_s1 + $0x3f8] sm:$0xff] }
  0x35   :  { %976 = vmatpush1.bf16.msra.mxu0 %v1878_v21  ;;  %1049 = vmatpush1.bf16.msra.mxu1 %v1880_v22  ;;  %v1885_v21 = vcombine.high %v136_v16, %v144_v17  ;;  %v119_v22 = vld [vmem:[%s2917_s1 + $0x2a0] sm:$0xff] }
  0x36   :  { %977 = vmatprep.subr.bf16.mxu0 %v1863_v23  ;;  %1050 = vmatprep.subr.bf16.mxu1 %v1865_v24  ;;  %v127_v23 = vld [vmem:[%s2917_s1 + $0x2e0] sm:$0xff]  ;;  %v120_v24 = vld [vmem:[%s2917_s1 + $0x2a8] sm:$0xff] }
  0x37   :  { %v1867_v29 = vcombine.high %v119_v22, %v127_v23  ;;  %v1866_v35 = vcombine.low %v119_v22, %v127_v23  ;;  %v1868_v36 = vcombine.low %v120_v24, %v128_v25  ;;  %v146_v22 = vld [vmem:[%s2917_s1 + $0x378] sm:$0xff] }
  0x38   :  { %870 = vmatmul.mubr.bf16.gmra.mxu0 %v2143_v27  ;;  %943 = vmatmul.mubr.bf16.gmra.mxu1 %v2143_v27 }
  0x39   :  { %978 = vmatpush1.bf16.msra.mxu0 %v1862_v30  ;;  %1051 = vmatpush1.bf16.msra.mxu1 %v1864_v31  ;;  %v1869_v30 = vcombine.high %v120_v24, %v128_v25  ;;  %v103_v31 = vld [vmem:[%s2917_s1 + $0x220] sm:$0xff] }
  0x3a   :  { %979 = vmatprep.subr.bf16.mxu0 %v1847_v32  ;;  %1052 = vmatprep.subr.bf16.mxu1 %v1849_v33  ;;  %v111_v32 = vld [vmem:[%s2917_s1 + $0x260] sm:$0xff]  ;;  %v104_v33 = vld [vmem:[%s2917_s1 + $0x228] sm:$0xff] }
  0x3b   :  { %879 = vmatprep.mubr.bf16.mxu0 %v1967_v0  ;;  %952 = vmatprep.mubr.bf16.mxu1 %v1967_v0  ;;  %v1851_v37 = vcombine.high %v103_v31, %v111_v32  ;;  %v1850_v43 = vcombine.low %v103_v31, %v111_v32  ;;  %v1852_v45 = vcombine.low %v104_v33, %v112_v34  ;;  %v130_v31 = vld [vmem:[%s2917_s1 + $0x2f8] sm:$0xff] }
  0x3d   :  { %980 = vmatpush1.bf16.msra.mxu0 %v1846_v38  ;;  %1053 = vmatpush1.bf16.msra.mxu1 %v1848_v39  ;;  %v1853_v38 = vcombine.high %v104_v33, %v112_v34  ;;  %v87_v39 = vld [vmem:[%s2917_s1 + $0x1a0] sm:$0xff] }
  0x3e   :  { %981 = vmatprep.subr.bf16.mxu0 %v1831_v40  ;;  %1054 = vmatprep.subr.bf16.mxu1 %v1833_v41  ;;  %v95_v40 = vld [vmem:[%s2917_s1 + $0x1e0] sm:$0xff]  ;;  %v88_v41 = vld [vmem:[%s2917_s1 + $0x1a8] sm:$0xff] }
  0x3f   :  { %v1835_v46 = vcombine.high %v87_v39, %v95_v40  ;;  %v1834_v52 = vcombine.low %v87_v39, %v95_v40  ;;  %v1836_v53 = vcombine.low %v88_v41, %v96_v42  ;;  %v114_v39 = vld [vmem:[%s2917_s1 + $0x278] sm:$0xff] }
  0x40   :  { %880 = vmatmul.mubr.bf16.gmra.mxu0 %v2176_v44  ;;  %953 = vmatmul.mubr.bf16.gmra.mxu1 %v2176_v44 }
  0x41   :  { %982 = vmatpush1.bf16.msra.mxu0 %v1830_v47  ;;  %1055 = vmatpush1.bf16.msra.mxu1 %v1832_v48  ;;  %v1837_v47 = vcombine.high %v88_v41, %v96_v42  ;;  %v71_v48 = vld [vmem:[%s2917_s1 + $0x120] sm:$0xff] }
  0x42   :  { %983 = vmatprep.subr.bf16.mxu0 %v1815_v49  ;;  %1056 = vmatprep.subr.bf16.mxu1 %v1817_v50  ;;  %v79_v49 = vld [vmem:[%s2917_s1 + $0x160] sm:$0xff]  ;;  %v72_v50 = vld [vmem:[%s2917_s1 + $0x128] sm:$0xff] }
  0x43   :  { %889 = vmatprep.mubr.bf16.mxu0 %v1967_v0  ;;  %962 = vmatprep.mubr.bf16.mxu1 %v1967_v0  ;;  %v1819_v54 = vcombine.high %v71_v48, %v79_v49  ;;  %v1818_v60 = vcombine.low %v71_v48, %v79_v49  ;;  %v1820_v62 = vcombine.low %v72_v50, %v80_v51  ;;  %v98_v48 = vld [vmem:[%s2917_s1 + $0x1f8] sm:$0xff] }
  0x45   :  { %984 = vmatpush1.bf16.msra.mxu0 %v1814_v55  ;;  %1057 = vmatpush1.bf16.msra.mxu1 %v1816_v56  ;;  %v1821_v55 = vcombine.high %v72_v50, %v80_v51  ;;  %v55_v56 = vld [vmem:[%s2917_s1 + $0xa0] sm:$0xff] }
  0x46   :  { %985 = vmatprep.subr.bf16.mxu0 %v1799_v57  ;;  %1058 = vmatprep.subr.bf16.mxu1 %v1801_v58  ;;  %v63_v57 = vld [vmem:[%s2917_s1 + $0xe0] sm:$0xff]  ;;  %v56_v58 = vld [vmem:[%s2917_s1 + $0xa8] sm:$0xff] }
  0x47   :  { %v1803_v63 = vcombine.high %v55_v56, %v63_v57  ;;  %v1802_v6 = vcombine.low %v55_v56, %v63_v57  ;;  %v1804_v7 = vcombine.low %v56_v58, %v64_v59  ;;  %v82_v56 = vld [vmem:[%s2917_s1 + $0x178] sm:$0xff] }
  0x48   :  { %890 = vmatmul.mubr.bf16.gmra.mxu0 %v2209_v61  ;;  %963 = vmatmul.mubr.bf16.gmra.mxu1 %v2209_v61 }
  0x49   :  { %986 = vmatpush1.bf16.msra.mxu0 %v1798_v1  ;;  %1059 = vmatpush1.bf16.msra.mxu1 %v1800_v2  ;;  %v1805_v1 = vcombine.high %v56_v58, %v64_v59  ;;  %v39_v2 = vld [vmem:[%s2917_s1 + $0x20] sm:$0xff] }
  0x4a   :  { %987 = vmatprep.subr.bf16.mxu0 %v1783_v3  ;;  %1060 = vmatprep.subr.bf16.mxu1 %v1785_v4  ;;  %v47_v3 = vld [vmem:[%s2917_s1 + $0x60] sm:$0xff]  ;;  %v40_v4 = vld [vmem:[%s2917_s1 + $0x28] sm:$0xff] }
  0x4b   :  { %1005 = vmatprep.mubr.bf16.mxu0 %v1967_v0  ;;  %1078 = vmatprep.mubr.bf16.mxu1 %v1967_v0  ;;  %v1787_v8 = vcombine.high %v39_v2, %v47_v3  ;;  %v1786_v15 = vcombine.low %v39_v2, %v47_v3  ;;  %v1788_v16 = vcombine.low %v40_v4, %v48_v5  ;;  %v66_v2 = vld [vmem:[%s2917_s1 + $0xf8] sm:$0xff] }
  0x4d   :  { %988 = vmatpush1.bf16.msra.mxu0 %v1782_v9  ;;  %1061 = vmatpush1.bf16.msra.mxu1 %v1784_v11  ;;  %v1789_v9 = vcombine.high %v40_v4, %v48_v5  ;;  %v153_v11 = vld [vmem:[%s2917_s1 + $0x3b0] sm:$0xff] }
  0x4e   :  { %1119 = vmatprep.subr.bf16.mxu0 %v1899_v12  ;;  %1192 = vmatprep.subr.bf16.mxu1 %v1901_v13  ;;  %v161_v12 = vld [vmem:[%s2917_s1 + $0x3f0] sm:$0xff]  ;;  %v154_v13 = vld [vmem:[%s2917_s1 + $0x3b8] sm:$0xff] }
  0x4f   :  { %v1903_v17 = vcombine.high %v153_v11, %v161_v12  ;;  %v1902_v23 = vcombine.low %v153_v11, %v161_v12  ;;  %v1904_v24 = vcombine.low %v154_v13, %v162_v14  ;;  %v50_v11 = vld [vmem:[%s2917_s1 + $0x78] sm:$0xff] }
  0x50   :  { %1006 = vmatmul.mubr.bf16.vlgmr.msra.gmra.mxu0 %v2110_v10  ;;  %1079 = vmatmul.mubr.bf16.vlgmr.msra.gmra.mxu1 %v2110_v10 }
  0x51   :  { %1120 = vmatpush1.bf16.msra.mxu0 %v1898_v18  ;;  %1193 = vmatpush1.bf16.msra.mxu1 %v1900_v19  ;;  %v1905_v18 = vcombine.high %v154_v13, %v162_v14  ;;  %v137_v19 = vld [vmem:[%s2917_s1 + $0x330] sm:$0xff] }
  0x52   :  { %1121 = vmatprep.subr.bf16.mxu0 %v1883_v20  ;;  %1194 = vmatprep.subr.bf16.mxu1 %v1885_v21  ;;  %v145_v20 = vld [vmem:[%s2917_s1 + $0x370] sm:$0xff]  ;;  %v138_v21 = vld [vmem:[%s2917_s1 + $0x338] sm:$0xff] }
  0x53   :  { %1015 = vmatprep.mubr.bf16.mxu0 %v1967_v0  ;;  %1088 = vmatprep.mubr.bf16.mxu1 %v1967_v0  ;;  %v1887_v25 = vcombine.high %v137_v19, %v145_v20  ;;  %v1886_v32 = vcombine.low %v137_v19, %v145_v20  ;;  %v1888_v33 = vcombine.low %v138_v21, %v146_v22 }
  0x55   :  { %1122 = vmatpush1.bf16.msra.mxu0 %v1882_v26  ;;  %1195 = vmatpush1.bf16.msra.mxu1 %v1884_v28  ;;  %v1889_v26 = vcombine.high %v138_v21, %v146_v22  ;;  %v121_v28 = vld [vmem:[%s2917_s1 + $0x2b0] sm:$0xff] }
  0x56   :  { %1123 = vmatprep.subr.bf16.mxu0 %v1867_v29  ;;  %1196 = vmatprep.subr.bf16.mxu1 %v1869_v30  ;;  %v129_v29 = vld [vmem:[%s2917_s1 + $0x2f0] sm:$0xff]  ;;  %v122_v30 = vld [vmem:[%s2917_s1 + $0x2b8] sm:$0xff] }
  0x57   :  { %v1871_v34 = vcombine.high %v121_v28, %v129_v29  ;;  %v1870_v40 = vcombine.low %v121_v28, %v129_v29  ;;  %v1872_v41 = vcombine.low %v122_v30, %v130_v31 }
  0x58   :  { %1016 = vmatmul.mubr.bf16.gmra.mxu0 %v2143_v27  ;;  %1089 = vmatmul.mubr.bf16.gmra.mxu1 %v2143_v27 }
  0x59   :  { %1124 = vmatpush1.bf16.msra.mxu0 %v1866_v35  ;;  %1197 = vmatpush1.bf16.msra.mxu1 %v1868_v36  ;;  %v1873_v35 = vcombine.high %v122_v30, %v130_v31  ;;  %v105_v36 = vld [vmem:[%s2917_s1 + $0x230] sm:$0xff] }
  0x5a   :  { %1125 = vmatprep.subr.bf16.mxu0 %v1851_v37  ;;  %1198 = vmatprep.subr.bf16.mxu1 %v1853_v38  ;;  %v113_v37 = vld [vmem:[%s2917_s1 + $0x270] sm:$0xff]  ;;  %v106_v38 = vld [vmem:[%s2917_s1 + $0x238] sm:$0xff] }
  0x5b   :  { %1025 = vmatprep.mubr.bf16.mxu0 %v1967_v0  ;;  %1098 = vmatprep.mubr.bf16.mxu1 %v1967_v0  ;;  %v1855_v42 = vcombine.high %v105_v36, %v113_v37  ;;  %v1854_v49 = vcombine.low %v105_v36, %v113_v37  ;;  %v1856_v50 = vcombine.low %v106_v38, %v114_v39 }
  0x5d   :  { %1126 = vmatpush1.bf16.msra.mxu0 %v1850_v43  ;;  %1199 = vmatpush1.bf16.msra.mxu1 %v1852_v45  ;;  %v1857_v43 = vcombine.high %v106_v38, %v114_v39  ;;  %v89_v45 = vld [vmem:[%s2917_s1 + $0x1b0] sm:$0xff] }
  0x5e   :  { %1127 = vmatprep.subr.bf16.mxu0 %v1835_v46  ;;  %1200 = vmatprep.subr.bf16.mxu1 %v1837_v47  ;;  %v97_v46 = vld [vmem:[%s2917_s1 + $0x1f0] sm:$0xff]  ;;  %v90_v47 = vld [vmem:[%s2917_s1 + $0x1b8] sm:$0xff] }
  0x5f   :  { %v1839_v51 = vcombine.high %v89_v45, %v97_v46  ;;  %v1838_v57 = vcombine.low %v89_v45, %v97_v46  ;;  %v1840_v58 = vcombine.low %v90_v47, %v98_v48 }
  0x60   :  { %1026 = vmatmul.mubr.bf16.gmra.mxu0 %v2176_v44  ;;  %1099 = vmatmul.mubr.bf16.gmra.mxu1 %v2176_v44 }
  0x61   :  { %1128 = vmatpush1.bf16.msra.mxu0 %v1834_v52  ;;  %1201 = vmatpush1.bf16.msra.mxu1 %v1836_v53  ;;  %v1841_v52 = vcombine.high %v90_v47, %v98_v48  ;;  %v73_v53 = vld [vmem:[%s2917_s1 + $0x130] sm:$0xff] }
  0x62   :  { %1129 = vmatprep.subr.bf16.mxu0 %v1819_v54  ;;  %1202 = vmatprep.subr.bf16.mxu1 %v1821_v55  ;;  %v81_v54 = vld [vmem:[%s2917_s1 + $0x170] sm:$0xff]  ;;  %v74_v55 = vld [vmem:[%s2917_s1 + $0x138] sm:$0xff] }
  0x63   :  { %1035 = vmatprep.mubr.bf16.mxu0 %v1967_v0  ;;  %1108 = vmatprep.mubr.bf16.mxu1 %v1967_v0  ;;  %v1823_v59 = vcombine.high %v73_v53, %v81_v54  ;;  %v1822_v3 = vcombine.low %v73_v53, %v81_v54  ;;  %v1824_v4 = vcombine.low %v74_v55, %v82_v56 }
  0x65   :  { %1130 = vmatpush1.bf16.msra.mxu0 %v1818_v60  ;;  %1203 = vmatpush1.bf16.msra.mxu1 %v1820_v62  ;;  %v1825_v60 = vcombine.high %v74_v55, %v82_v56  ;;  %v57_v62 = vld [vmem:[%s2917_s1 + $0xb0] sm:$0xff] }
  0x66   :  { %1131 = vmatprep.subr.bf16.mxu0 %v1803_v63  ;;  %1204 = vmatprep.subr.bf16.mxu1 %v1805_v1  ;;  %v65_v63 = vld [vmem:[%s2917_s1 + $0xf0] sm:$0xff]  ;;  %v58_v1 = vld [vmem:[%s2917_s1 + $0xb8] sm:$0xff] }
  0x67   :  { %v1807_v5 = vcombine.high %v57_v62, %v65_v63  ;;  %v1806_v12 = vcombine.low %v57_v62, %v65_v63  ;;  %v1808_v13 = vcombine.low %v58_v1, %v66_v2 }
  0x68   :  { %1036 = vmatmul.mubr.bf16.gmra.mxu0 %v2209_v61  ;;  %1109 = vmatmul.mubr.bf16.gmra.mxu1 %v2209_v61 }
  0x69   :  { %1132 = vmatpush1.bf16.msra.mxu0 %v1802_v6  ;;  %1205 = vmatpush1.bf16.msra.mxu1 %v1804_v7  ;;  %v1809_v6 = vcombine.high %v58_v1, %v66_v2  ;;  %v41_v7 = vld [vmem:[%s2917_s1 + $0x30] sm:$0xff] }
  0x6a   :  { %1133 = vmatprep.subr.bf16.mxu0 %v1787_v8  ;;  %1206 = vmatprep.subr.bf16.mxu1 %v1789_v9  ;;  %v49_v8 = vld [vmem:[%s2917_s1 + $0x70] sm:$0xff]  ;;  %v42_v9 = vld [vmem:[%s2917_s1 + $0x38] sm:$0xff] }
  0x6b   :  { %1151 = vmatprep.mubr.bf16.mxu0 %v1967_v0  ;;  %1224 = vmatprep.mubr.bf16.mxu1 %v1967_v0  ;;  %v1791_v14 = vcombine.high %v41_v7, %v49_v8 }
  0x6d   :  { %1134 = vmatpush1.bf16.msra.mxu0 %v1786_v15  ;;  %1207 = vmatpush1.bf16.msra.mxu1 %v1788_v16  ;;  %v1793_v15 = vcombine.high %v42_v9, %v50_v11  ;;  %v1790_v16 = vcombine.low %v41_v7, %v49_v8 }
  0x6e   :  { %1265 = vmatprep.subr.bf16.mxu0 %v1903_v17  ;;  %1338 = vmatprep.subr.bf16.mxu1 %v1905_v18  ;;  %v1792_v17 = vcombine.low %v42_v9, %v50_v11 }
  0x70   :  { %1152 = vmatmul.mubr.bf16.vlgmr.msra.gmra.mxu0 %v2110_v10  ;;  %1225 = vmatmul.mubr.bf16.vlgmr.msra.gmra.mxu1 %v2110_v10 }
  0x71   :  { %1266 = vmatpush1.bf16.msra.mxu0 %v1902_v23  ;;  %1339 = vmatpush1.bf16.msra.mxu1 %v1904_v24 }
  0x72   :  { %1267 = vmatprep.subr.bf16.mxu0 %v1887_v25  ;;  %1340 = vmatprep.subr.bf16.mxu1 %v1889_v26 }
  0x73   :  { %1161 = vmatprep.mubr.bf16.mxu0 %v1967_v0  ;;  %1234 = vmatprep.mubr.bf16.mxu1 %v1967_v0 }
  0x75   :  { %1268 = vmatpush1.bf16.msra.mxu0 %v1886_v32  ;;  %1341 = vmatpush1.bf16.msra.mxu1 %v1888_v33 }
  0x76   :  { %1269 = vmatprep.subr.bf16.mxu0 %v1871_v34  ;;  %1342 = vmatprep.subr.bf16.mxu1 %v1873_v35 }
  0x78   :  { %1162 = vmatmul.mubr.bf16.gmra.mxu0 %v2143_v27  ;;  %1235 = vmatmul.mubr.bf16.gmra.mxu1 %v2143_v27 }
  0x79   :  { %1270 = vmatpush1.bf16.msra.mxu0 %v1870_v40  ;;  %1343 = vmatpush1.bf16.msra.mxu1 %v1872_v41 }
  0x7a   :  { %1271 = vmatprep.subr.bf16.mxu0 %v1855_v42  ;;  %1344 = vmatprep.subr.bf16.mxu1 %v1857_v43 }
  0x7b   :  { %1171 = vmatprep.mubr.bf16.mxu0 %v1967_v0  ;;  %1244 = vmatprep.mubr.bf16.mxu1 %v1967_v0 }
  0x7d   :  { %1272 = vmatpush1.bf16.msra.mxu0 %v1854_v49  ;;  %1345 = vmatpush1.bf16.msra.mxu1 %v1856_v50 }
  0x7e   :  { %1273 = vmatprep.subr.bf16.mxu0 %v1839_v51  ;;  %1346 = vmatprep.subr.bf16.mxu1 %v1841_v52 }
  0x80   :  { %1172 = vmatmul.mubr.bf16.gmra.mxu0 %v2176_v44  ;;  %1245 = vmatmul.mubr.bf16.gmra.mxu1 %v2176_v44 }
  0x81   :  { %1274 = vmatpush1.bf16.msra.mxu0 %v1838_v57  ;;  %1347 = vmatpush1.bf16.msra.mxu1 %v1840_v58 }
  0x82   :  { %1275 = vmatprep.subr.bf16.mxu0 %v1823_v59  ;;  %1348 = vmatprep.subr.bf16.mxu1 %v1825_v60 }
  0x83   :  { %1181 = vmatprep.mubr.bf16.mxu0 %v1967_v0  ;;  %1254 = vmatprep.mubr.bf16.mxu1 %v1967_v0 }
  0x85   :  { %1276 = vmatpush1.bf16.msra.mxu0 %v1822_v3  ;;  %1349 = vmatpush1.bf16.msra.mxu1 %v1824_v4 }
  0x86   :  { %1277 = vmatprep.subr.bf16.mxu0 %v1807_v5  ;;  %1350 = vmatprep.subr.bf16.mxu1 %v1809_v6 }
  0x88   :  { %1182 = vmatmul.mubr.bf16.gmra.mxu0 %v2209_v61  ;;  %1255 = vmatmul.mubr.bf16.gmra.mxu1 %v2209_v61 }
  0x89   :  { %1278 = vmatpush1.bf16.msra.mxu0 %v1806_v12  ;;  %1351 = vmatpush1.bf16.msra.mxu1 %v1808_v13 }
  0x8a   :  { %1279 = vmatprep.subr.bf16.mxu0 %v1791_v14  ;;  %1352 = vmatprep.subr.bf16.mxu1 %v1793_v15 }
  0x8b   :  { %1297 = vmatprep.mubr.bf16.mxu0 %v1967_v0  ;;  %1370 = vmatprep.mubr.bf16.mxu1 %v1967_v0 }
  0x8d   :  { %1280 = vmatpush1.bf16.msra.mxu0 %v1790_v16  ;;  %1353 = vmatpush1.bf16.msra.mxu1 %v1792_v17 }
  0x90   :  { %1298 = vmatmul.mubr.bf16.vlgmr.msra.gmra.mxu0 %v2110_v10  ;;  %1371 = vmatmul.mubr.bf16.vlgmr.msra.gmra.mxu1 %v2110_v10 }
  0x91   :  { %1307 = vmatprep.mubr.bf16.mxu0 %v1967_v0  ;;  %1380 = vmatprep.mubr.bf16.mxu1 %v1967_v0 }
  0x98   :  { %1308 = vmatmul.mubr.bf16.gmra.mxu0 %v2143_v27  ;;  %1381 = vmatmul.mubr.bf16.gmra.mxu1 %v2143_v27 }
  0x99   :  { %1317 = vmatprep.mubr.bf16.mxu0 %v1967_v0  ;;  %1390 = vmatprep.mubr.bf16.mxu1 %v1967_v0 }
  0xa0   :  { %1318 = vmatmul.mubr.bf16.gmra.mxu0 %v2176_v44  ;;  %1391 = vmatmul.mubr.bf16.gmra.mxu1 %v2176_v44 }
  0xa1   :  { %1327 = vmatprep.mubr.bf16.mxu0 %v1967_v0  ;;  %1400 = vmatprep.mubr.bf16.mxu1 %v1967_v0 }
  0xa8   :  { %1328 = vmatmul.mubr.bf16.gmra.mxu0 %v2209_v61  ;;  %1401 = vmatmul.mubr.bf16.gmra.mxu1 %v2209_v61 }
  0xf0   :  { %v2459_v10 = vpop.f32.mrf.mxu0  ;;  %v2461_v18 = vpop.f32.mrf.mxu1 }
  0xf2   :  { %v2463_v27 = vpop.f32.mrf.mxu0  ;;  %v2465_v19 = vpop.f32.mrf.mxu1 }
  0xf4   :  { %v2467_v20 = vpop.f32.mrf.mxu0  ;;  %v2469_v21 = vpop.f32.mrf.mxu1 }
  0xf6   :  { %v2471_v44 = vpop.f32.mrf.mxu0  ;;  %v2473_v22 = vpop.f32.mrf.mxu1 }
  0xf8   :  { %v2475_v0 = vpop.f32.mrf.mxu0  ;;  %v2477_v23 = vpop.f32.mrf.mxu1 }
  0xfa   :  { %v2479_v61 = vpop.f32.mrf.mxu0  ;;  %v2481_v24 = vpop.f32.mrf.mxu1 }
  0xfc   :  { %v2483_v25 = vpop.f32.mrf.mxu0  ;;  %v2485_v26 = vpop.f32.mrf.mxu1 }
  0xfe   :  { %v2487_v28 = vpop.f32.mrf.mxu0  ;;  %v2489_v29 = vpop.f32.mrf.mxu1 }
  0xff   :  { %2955 = vst [vmem:[#allocation5_spill] sm:$0xff] %v2489_v29 }
 0x100   :  { %v2491_v30 = vpop.f32.mrf.mxu0  ;;  %v2493_v31 = vpop.f32.mrf.mxu1 }
 0x101   :  { %2956 = vst [vmem:[#allocation6_spill] sm:$0xff] %v2491_v30  ;;  %2957 = vst [vmem:[#allocation7_spill] sm:$0xff] %v2493_v31  ;;  %v1507_v30 = vld [vmem:[#allocation2] sm:$0xf] }
 0x102   :  { %v2495_v32 = vpop.f32.mrf.mxu0  ;;  %v2497_v33 = vpop.f32.mrf.mxu1 }
 0x103   :  { %2958 = vst [vmem:[#allocation8_spill] sm:$0xff] %v2495_v32  ;;  %2959 = vst [vmem:[#allocation9_spill] sm:$0xff] %v2497_v33 }
 0x104   :  { %v2499_v34 = vpop.f32.mrf.mxu0  ;;  %v2501_v35 = vpop.f32.mrf.mxu1 }
 0x105   :  { %2960 = vst [vmem:[#allocation10_spill] sm:$0xff] %v2499_v34  ;;  %2961 = vst [vmem:[#allocation11_spill] sm:$0xff] %v2501_v35 }
 0x106   :  { %v2503_v36 = vpop.f32.mrf.mxu0  ;;  %v2505_v37 = vpop.f32.mrf.mxu1 }
 0x107   :  { %2962 = vst [vmem:[#allocation12_spill] sm:$0xff] %v2503_v36  ;;  %2963 = vst [vmem:[#allocation13_spill] sm:$0xff] %v2505_v37 }
 0x108   :  { %v2507_v38 = vpop.f32.mrf.mxu0  ;;  %v2509_v39 = vpop.f32.mrf.mxu1 }
 0x109   :  { %2964 = vst [vmem:[#allocation14_spill] sm:$0xff] %v2507_v38  ;;  %2965 = vst [vmem:[#allocation15_spill] sm:$0xff] %v2509_v39 }
 0x10a   :  { %v2511_v40 = vpop.f32.mrf.mxu0  ;;  %v2513_v41 = vpop.f32.mrf.mxu1 }
 0x10b   :  { %2966 = vst [vmem:[#allocation16_spill] sm:$0xff] %v2511_v40  ;;  %2967 = vst [vmem:[#allocation17_spill] sm:$0xff] %v2513_v41 }
 0x10c   :  { %v2515_v42 = vpop.f32.mrf.mxu0  ;;  %v2517_v43 = vpop.f32.mrf.mxu1 }
 0x10d   :  { %2968 = vst [vmem:[#allocation18_spill] sm:$0xff] %v2515_v42  ;;  %2969 = vst [vmem:[#allocation19_spill] sm:$0xff] %v2517_v43 }
 0x10e   :  { %v2519_v45 = vpop.f32.mrf.mxu0  ;;  %v2521_v46 = vpop.f32.mrf.mxu1 }
 0x10f   :  { %2970 = vst [vmem:[#allocation20_spill] sm:$0xff] %v2519_v45  ;;  %2971 = vst [vmem:[#allocation21_spill] sm:$0xff] %v2521_v46 }
 0x110   :  { %v2523_v47 = vpop.f32.mrf.mxu0  ;;  %v2527_v49 = vpop.f32.mrf.mxu1 }
 0x112   :  { %v2531_v51 = vpop.f32.mrf.mxu0  ;;  %v2535_v53 = vpop.f32.mrf.mxu1 }
 0x114   :  { %v2539_v55 = vpop.f32.mrf.mxu0  ;;  %v2543_v57 = vpop.f32.mrf.mxu1 }
 0x116   :  { %v2547_v59 = vpop.f32.mrf.mxu0  ;;  %v2551_v62 = vpop.f32.mrf.mxu1 }
 0x118   :  { %v2555_v1 = vpop.f32.mrf.mxu0  ;;  %v2559_v3 = vpop.f32.mrf.mxu1 }
 0x11a   :  { %v2563_v5 = vpop.f32.mrf.mxu0  ;;  %v2567_v7 = vpop.f32.mrf.mxu1 }
 0x11c   :  { %v2571_v9 = vpop.f32.mrf.mxu0  ;;  %v2575_v12 = vpop.f32.mrf.mxu1 }
 0x11e   :  { %v2579_v14 = vpop.f32.mrf.mxu0  ;;  %v2583_v16 = vpop.f32.mrf.mxu1 }
 0x11f   :  { %2972 = vst [vmem:[#allocation22_spill] sm:$0xff] %v2579_v14  ;;  %2973 = vst [vmem:[#allocation23_spill] sm:$0xff] %v2583_v16 }
 0x120   :  { %v2587_v8 = vpop.f32.mrf.mxu0  ;;  %v2591_v6 = vpop.f32.mrf.mxu1 }
 0x121   :  { %2974 = vst [vmem:[#allocation24_spill] sm:$0xff] %v2587_v8  ;;  %2975 = vst [vmem:[#allocation25_spill] sm:$0xff] %v2591_v6 }
 0x122   :  { %v2595_v4 = vpop.f32.mrf.mxu0  ;;  %v2599_v2 = vpop.f32.mrf.mxu1 }
 0x123   :  { %2976 = vst [vmem:[#allocation26_spill] sm:$0xff] %v2595_v4  ;;  %2977 = vst [vmem:[#allocation27_spill] sm:$0xff] %v2599_v2 }
 0x124   :  { %v2603_v63 = vpop.f32.mrf.mxu0  ;;  %v2607_v60 = vpop.f32.mrf.mxu1 }
 0x125   :  { %2978 = vst [vmem:[#allocation28_spill] sm:$0xff] %v2603_v63  ;;  %2979 = vst [vmem:[#allocation29_spill] sm:$0xff] %v2607_v60  ;;  %v1509_v63 = vlaneseq }
 0x126   :  { %v2611_v58 = vpop.f32.mrf.mxu0  ;;  %v2615_v56 = vpop.f32.mrf.mxu1 }
 0x127   :  { %2980 = vst [vmem:[#allocation30_spill] sm:$0xff] %v2611_v58  ;;  %2981 = vst [vmem:[#allocation31_spill] sm:$0xff] %v2615_v56  ;;  %v1510_v32 = vshrl.u32 %v1509_v63, 7 }
 0x128   :  { %v2619_v54 = vpop.f32.mrf.mxu0  ;;  %v2623_v52 = vpop.f32.mrf.mxu1 }
 0x129   :  { %2982 = vst [vmem:[#allocation32_spill] sm:$0xff] %v2619_v54  ;;  %2983 = vst [vmem:[#allocation33_spill] sm:$0xff] %v2623_v52 }
 0x12a   :  { %v2627_v50 = vpop.f32.mrf.mxu0  ;;  %v2631_v48 = vpop.f32.mrf.mxu1 }
 0x12b   :  { %2984 = vst [vmem:[#allocation34_spill] sm:$0xff] %v2627_v50  ;;  %2985 = vst [vmem:[#allocation35_spill] sm:$0xff] %v2631_v48 }
 0x12c   :  { %v2635_v56 = vpop.f32.mrf.mxu0  ;;  %v2639_v54 = vpop.f32.mrf.mxu1 }
 0x12d   :  { %2986 = vst [vmem:[#allocation36_spill] sm:$0xff] %v2635_v56  ;;  %2987 = vst [vmem:[#allocation37_spill] sm:$0xff] %v2639_v54 }
 0x12e   :  { %v2643_v52 = vpop.f32.mrf.mxu0  ;;  %v2647_v50 = vpop.f32.mrf.mxu1 }
 0x12f   :  { %2988 = vst [vmem:[#allocation38_spill] sm:$0xff] %v2643_v52  ;;  %2989 = vst [vmem:[#allocation39_spill] sm:$0xff] %v2647_v50 }
 0x130   :  { %v1153_v48 = vpop.f32.mrf.mxu0  ;;  %v1226_v41 = vpop.f32.mrf.mxu1 }
 0x132   :  { %v1155_v40 = vpop.f32.mrf.mxu0  ;;  %v1228_v39 = vpop.f32.mrf.mxu1 }
 0x134   :  { %v1157_v11 = vpop.f32.mrf.mxu0  ;;  %v2651_v56 = vpop.f32.mrf.mxu1 }
 0x136   :  { %v2653_v42 = vpop.f32.mrf.mxu0  ;;  %v2655_v13 = vpop.f32.mrf.mxu1 }
 0x138   :  { %v2657_v54 = vpop.f32.mrf.mxu0  ;;  %v2659_v43 = vpop.f32.mrf.mxu1 }
 0x13a   :  { %v2661_v15 = vpop.f32.mrf.mxu0  ;;  %v2663_v52 = vpop.f32.mrf.mxu1 }
 0x13c   :  { %v2665_v17 = vpop.f32.mrf.mxu0  ;;  %v2667_v50 = vpop.f32.mrf.mxu1 }
 0x13e   :  { %v2669_v46 = vpop.f32.mrf.mxu0  ;;  %v2671_v45 = vpop.f32.mrf.mxu1 }
 0x140   :  { %v2673_v38 = vpop.f32.mrf.mxu0  ;;  %v2675_v37 = vpop.f32.mrf.mxu1 }
 0x141   :  { %2990 = vst [vmem:[#allocation40_spill] sm:$0xff] %v2673_v38  ;;  %2991 = vst [vmem:[#allocation41_spill] sm:$0xff] %v2675_v37  ;;  %v1523_v37 = vsub.s32 3, %v1510_v32 }
 0x142   :  { %v2677_v58 = vpop.f32.mrf.mxu0  ;;  %v2679_v36 = vpop.f32.mrf.mxu1 }
 0x143   :  { %2992 = vst [vmem:[#allocation42_spill] sm:$0xff] %v2677_v58  ;;  %2993 = vst [vmem:[#allocation43_spill] sm:$0xff] %v2679_v36 }
 0x144   :  { %v2681_v60 = vpop.f32.mrf.mxu0  ;;  %v2683_v35 = vpop.f32.mrf.mxu1 }
 0x145   :  { %2994 = vst [vmem:[#allocation44_spill] sm:$0xff] %v2681_v60  ;;  %2995 = vst [vmem:[#allocation45_spill] sm:$0xff] %v2683_v35  ;;  %v1511_v60 = vsub.s32 0, %v1510_v32 }
 0x146   :  { %v2685_v34 = vpop.f32.mrf.mxu0  ;;  %v2687_v2 = vpop.f32.mrf.mxu1 }
 0x147   :  { %2996 = vst [vmem:[#allocation46_spill] sm:$0xff] %v2685_v34  ;;  %2997 = vst [vmem:[#allocation47_spill] sm:$0xff] %v2687_v2  ;;  %v1519_v34 = vsub.s32 2, %v1510_v32  ;;  %v1515_v2 = vsub.s32 1, %v1510_v32  ;;  %v2705_v63 = vrot.slane %v1507_v30, %v1511_v60 }
 0x148   :  { %v2689_v33 = vpop.f32.mrf.mxu0  ;;  %v2691_v4 = vpop.f32.mrf.mxu1 }
 0x149   :  { %2998 = vst [vmem:[#allocation48_spill] sm:$0xff] %v2689_v33  ;;  %2999 = vst [vmem:[#allocation49_spill] sm:$0xff] %v2691_v4  ;;  %v2712_v29 = vrot.slane %v1507_v30, %v1515_v2 }
 0x14a   :  { %v2693_v6 = vpop.f32.mrf.mxu0  ;;  %v2695_v31 = vpop.f32.mrf.mxu1 }
 0x14b   :  { %3000 = vst [vmem:[#allocation50_spill] sm:$0xff] %v2693_v6  ;;  %3001 = vst [vmem:[#allocation51_spill] sm:$0xff] %v2695_v31  ;;  %v2707_v31 = vrot.slane %v1507_v30, %v1519_v34 }
 0x14c   :  { %v2697_v8 = vpop.f32.mrf.mxu0  ;;  %v2699_v36 = vpop.f32.mrf.mxu1 }
 0x14d   :  { %3002 = vst [vmem:[#allocation52_spill] sm:$0xff] %v2697_v8  ;;  %3003 = vst [vmem:[#allocation53_spill] sm:$0xff] %v2699_v36  ;;  %v3006_v36 = vmax.f32 %v2459_v10, %v2523_v47  ;;  %v3009_v47 = vmax.f32 %v2465_v19, %v2535_v53  ;;  %v3011_v19 = vmax.f32 %v2469_v21, %v2543_v57 }
 0x14e   :  { %v2701_v35 = vpop.f32.mrf.mxu0  ;;  %v2703_v58 = vpop.f32.mrf.mxu1 }
 0x14f   :  { %3004 = vst [vmem:[#allocation54_spill] sm:$0xff] %v2701_v35  ;;  %3005 = vst [vmem:[#allocation55_spill] sm:$0xff] %v2703_v58  ;;  %v3007_v58 = vmax.f32 %v2461_v18, %v2527_v49 }
 0x150   :  { %v1299_v33 = vpop.f32.mrf.mxu0  ;;  %v1372_v6 = vpop.f32.mrf.mxu1 }
 0x151   :  { %v1443_v4 = vmax.f32 %v1153_v48, %v1299_v33  ;;  %v1445_v38 = vmax.f32 %v1226_v41, %v1372_v6  ;;  %v2717_v48 = vrot.slane %v1507_v30, %v1523_v37  ;;  %v3008_v41 = vmax.f32 %v2463_v27, %v2531_v51 }
 0x152   :  { %v1301_v8 = vpop.f32.mrf.mxu0  ;;  %v1374_v14 = vpop.f32.mrf.mxu1 }
 0x153   :  { %v1475_v16 = vmax.f32 %v3006_v36, %v1443_v4  ;;  %v1444_v35 = vmax.f32 %v1155_v40, %v1301_v8  ;;  %v1477_v32 = vmax.f32 %v3007_v58, %v1445_v38  ;;  %v1446_v33 = vmax.f32 %v1228_v39, %v1374_v14 }
 0x154   :  { %v1303_v60 = vpop.f32.mrf.mxu0  ;;  %v1376_v36 = vpop.f32.mrf.mxu1  ;;  %v3010_v39 = vmax.f32 %v2467_v20, %v2539_v55 }
 0x155   :  { %v1529_v34 = vadd.f32 %v2705_v63, %v1475_v16  ;;  %v1476_v6 = vmax.f32 %v3008_v41, %v1444_v35  ;;  %v1447_v10 = vmax.f32 %v1157_v11, %v1303_v60  ;;  %v1531_v40 = vadd.f32 %v2707_v31, %v1477_v32 }
 0x156   :  { %v1478_v2 = vmax.f32 %v3009_v47, %v1446_v33  ;;  %v1449_v18 = vmax.f32 %v2651_v56, %v1376_v36  ;;  %v1305_v38 = vpop.f32.mrf.mxu0  ;;  %v1378_v35 = vpop.f32.mrf.mxu1 }
 0x157   :  { %vm1561_vm0 = vcmp.ge.f32.partialorder %v1529_v34, 0.0  ;;  %v1593_v30 = vmul.f32 0.01, %v1529_v34  ;;  %v1530_v37 = vadd.f32 %v2712_v29, %v1476_v6  ;;  %v1479_v27 = vmax.f32 %v3010_v39, %v1447_v10 }
 0x158   :  { %vm1563_vm1 = vcmp.ge.f32.partialorder %v1531_v40, 0.0  ;;  %v1595_v49 = vmul.f32 0.01, %v1531_v40  ;;  %v1532_v51 = vadd.f32 %v2717_v48, %v1478_v2  ;;  %v1481_v53 = vmax.f32 %v3011_v19, %v1449_v18  ;;  %v1309_v58 = vpop.f32.mrf.mxu0  ;;  %v1382_v11 = vpop.f32.mrf.mxu1 }
 0x159   :  { %v1625_v56 = vsel %vm1561_vm0, %v1529_v34, %v1593_v30  ;;  %vm1562_vm2 = vcmp.ge.f32.partialorder %v1530_v37, 0.0  ;;  %v1594_v4 = vmul.f32 0.01, %v1530_v37  ;;  %v1533_v8 = vadd.f32 %v2705_v63, %v1479_v27 }
 0x15a   :  { %v1627_v14 = vsel %vm1563_vm1, %v1531_v40, %v1595_v49  ;;  %vm1564_vm3 = vcmp.ge.f32.partialorder %v1532_v51, 0.0  ;;  %v1596_v20 = vmul.f32 0.01, %v1532_v51  ;;  %v1535_v55 = vadd.f32 %v2707_v31, %v1481_v53  ;;  %v1311_v16 = vpop.f32.mrf.mxu0  ;;  %v1384_v21 = vpop.f32.mrf.mxu1 }
 0x15b   :  { %v1626_v32 = vsel %vm1562_vm2, %v1530_v37, %v1594_v4  ;;  %vm1565_vm4 = vcmp.ge.f32.partialorder %v1533_v8, 0.0  ;;  %v1597_v33 = vmul.f32 0.01, %v1533_v8  ;;  %v1448_v60 = vmax.f32 %v2653_v42, %v1305_v38 }
 0x15c   :  { %v1922_v57 = vpack.c.bf16 %v1626_v32, %v1625_v56  ;;  %v1628_v41 = vsel %vm1564_vm3, %v1532_v51, %v1596_v20  ;;  %vm1567_vm5 = vcmp.ge.f32.partialorder %v1535_v55, 0.0  ;;  %v1599_v34 = vmul.f32 0.01, %v1535_v55  ;;  %v1313_v6 = vpop.f32.mrf.mxu0  ;;  %v1386_v18 = vpop.f32.mrf.mxu1 }
 0x15d   :  { %v1923_v10 = vpack.c.bf16 %v1628_v41, %v1627_v14  ;;  %v1629_v36 = vsel %vm1565_vm4, %v1533_v8, %v1597_v33  ;;  %v3012_v40 = vmax.f32 %v2471_v44, %v2547_v59  ;;  %v1450_v2 = vmax.f32 %v2655_v13, %v1378_v35 }
 0x15e   :  { %1753 = vst [vmem:[%s2919_s3] sm:$0xff] %v1922_v57  ;;  %v1631_v42 = vsel %vm1567_vm5, %v1535_v55, %v1599_v34  ;;  %v1451_v38 = vmax.f32 %v2657_v54, %v1309_v58  ;;  %v1453_v30 = vmax.f32 %v2659_v43, %v1382_v11  ;;  %v1452_v37 = vmax.f32 %v2661_v15, %v1311_v16  ;;  %v1315_v39 = vpop.f32.mrf.mxu0  ;;  %v1388_v54 = vpop.f32.mrf.mxu1 }
 0x15f   :  { %v1480_v47 = vmax.f32 %v3012_v40, %v1448_v60  ;;  %1754 = vst [vmem:[%s2919_s3 + $0x8] sm:$0xff] %v1923_v10  ;;  %v3013_v59 = vmax.f32 %v2473_v22, %v2551_v62  ;;  %v1454_v27 = vmax.f32 %v2663_v52, %v1384_v21  ;;  %v1455_v35 = vmax.f32 %v2665_v17, %v1313_v6 }
 0x160   :  { %v3014_v43 = vmax.f32 %v2475_v0, %v2555_v1  ;;  %v3015_v49 = vmax.f32 %v2477_v23, %v2559_v3  ;;  %v3016_v19 = vmax.f32 %v2479_v61, %v2563_v5  ;;  %v1457_v22 = vmax.f32 %v2667_v50, %v1386_v18  ;;  %v1319_v62 = vpop.f32.mrf.mxu0  ;;  %v1392_v50 = vpop.f32.mrf.mxu1 }
 0x161   :  { %v1534_v44 = vadd.f32 %v2712_v29, %v1480_v47  ;;  %v1482_v13 = vmax.f32 %v3013_v59, %v1450_v2  ;;  %v3017_v58 = vmax.f32 %v2481_v24, %v2567_v7  ;;  %v3018_v61 = vmax.f32 %v2483_v25, %v2571_v9 }
 0x162   :  { %v1483_v15 = vmax.f32 %v3014_v43, %v1451_v38  ;;  %v1485_v51 = vmax.f32 %v3015_v49, %v1453_v30  ;;  %v1484_v53 = vmax.f32 %v3016_v19, %v1452_v37  ;;  %v1321_v11 = vpop.f32.mrf.mxu0  ;;  %v1394_v32 = vpop.f32.mrf.mxu1  ;;  %v3019_v57 = vmax.f32 %v2485_v26, %v2575_v12  ;;  %v3020_v26 = vld [vmem:[#allocation22_spill] sm:$0xff]  ;;  %v3022_v38 = vld [vmem:[#allocation5_spill] sm:$0xff]  ;;  %v3023_v30 = vld [vmem:[#allocation23_spill] sm:$0xff] }
 0x163   :  { %vm1566_vm6 = vcmp.ge.f32.partialorder %v1534_v44, 0.0  ;;  %v1598_v52 = vmul.f32 0.01, %v1534_v44  ;;  %v1536_v17 = vadd.f32 %v2717_v48, %v1482_v13  ;;  %v1486_v0 = vmax.f32 %v3017_v58, %v1454_v27  ;;  %v3029_v19 = vld [vmem:[#allocation24_spill] sm:$0xff] }
 0x164   :  { %v1537_v1 = vadd.f32 %v2705_v63, %v1483_v15  ;;  %v1539_v23 = vadd.f32 %v2707_v31, %v1485_v51  ;;  %v1538_v3 = vadd.f32 %v2712_v29, %v1484_v53  ;;  %v1487_v5 = vmax.f32 %v3018_v61, %v1455_v35  ;;  %v1323_v34 = vpop.f32.mrf.mxu0  ;;  %v1396_v13 = vpop.f32.mrf.mxu1  ;;  %v3028_v51 = vld [vmem:[#allocation6_spill] sm:$0xff] }
 0x165   :  { %v1630_v56 = vsel %vm1566_vm6, %v1534_v44, %v1598_v52  ;;  %vm1568_vm7 = vcmp.ge.f32.partialorder %v1536_v17, 0.0  ;;  %v1600_v4 = vmul.f32 0.01, %v1536_v17  ;;  %v1540_v8 = vadd.f32 %v2717_v48, %v1486_v0  ;;  %v3032_v52 = vld [vmem:[#allocation25_spill] sm:$0xff] }
 0x166   :  { %v1924_v14 = vpack.c.bf16 %v1630_v56, %v1629_v36  ;;  %vm1569_vm8 = vcmp.ge.f32.partialorder %v1537_v1, 0.0  ;;  %v1601_v24 = vmul.f32 0.01, %v1537_v1  ;;  %vm1571_vm9 = vcmp.ge.f32.partialorder %v1539_v23, 0.0  ;;  %v3038_v56 = vld [vmem:[#allocation44_spill] sm:$0xff] }
 0x167   :  { %v1632_v7 = vsel %vm1568_vm7, %v1536_v17, %v1600_v4  ;;  %v1603_v20 = vmul.f32 0.01, %v1539_v23  ;;  %vm1570_vm10 = vcmp.ge.f32.partialorder %v1538_v3, 0.0  ;;  %v1602_v55 = vmul.f32 0.01, %v1538_v3 }
 0x168   :  { %1755 = vst [vmem:[%s2919_s3 + $0x10] sm:$0xff] %v1924_v14  ;;  %v1925_v25 = vpack.c.bf16 %v1632_v7, %v1631_v42  ;;  %v1633_v9 = vsel %vm1569_vm8, %v1537_v1, %v1601_v24  ;;  %vm1572_vm11 = vcmp.ge.f32.partialorder %v1540_v8, 0.0  ;;  %v1604_v16 = vmul.f32 0.01, %v1540_v8  ;;  %v3034_v1 = vld [vmem:[#allocation8_spill] sm:$0xff]  ;;  %v1398_v14 = vpop.f32.mrf.mxu1 }
 0x169   :  { %v1635_v33 = vsel %vm1571_vm9, %v1539_v23, %v1603_v20  ;;  %v1634_v60 = vsel %vm1570_vm10, %v1538_v3, %v1602_v55  ;;  %v1541_v21 = vadd.f32 %v2705_v63, %v1487_v5  ;;  %v1489_v41 = vmax.f32 %v3019_v57, %v1457_v22  ;;  %v3035_v23 = vld [vmem:[#allocation26_spill] sm:$0xff]  ;;  %v3037_v5 = vld [vmem:[#allocation43_spill] sm:$0xff]  ;;  %v3039_v55 = vld [vmem:[#allocation9_spill] sm:$0xff] }
 0x16a   :  { %1756 = vst [vmem:[%s2919_s3 + $0x18] sm:$0xff] %v1925_v25  ;;  %v1926_v6 = vpack.c.bf16 %v1634_v60, %v1633_v9  ;;  %v1636_v10 = vsel %vm1572_vm11, %v1540_v8, %v1604_v16  ;;  %v1456_v36 = vmax.f32 %v2669_v46, %v1315_v39  ;;  %v1458_v40 = vmax.f32 %v2671_v45, %v1388_v54  ;;  %v3025_v46 = vld [vmem:[#allocation40_spill] sm:$0xff]  ;;  %v3026_v45 = vld [vmem:[#allocation41_spill] sm:$0xff]  ;;  %v3027_v54 = vld [vmem:[#allocation42_spill] sm:$0xff] }
 0x16b   :  { %v1927_v47 = vpack.c.bf16 %v1636_v10, %v1635_v33  ;;  %vm1573_vm12 = vcmp.ge.f32.partialorder %v1541_v21, 0.0  ;;  %v1605_v2 = vmul.f32 0.01, %v1541_v21  ;;  %v1543_v18 = vadd.f32 %v2707_v31, %v1489_v41  ;;  %v3040_v25 = vld [vmem:[#allocation27_spill] sm:$0xff]  ;;  %v3043_v57 = vld [vmem:[#allocation28_spill] sm:$0xff] }
 0x16c   :  { %1757 = vst [vmem:[%s2919_s3 + $0x20] sm:$0xff] %v1926_v6  ;;  %v3021_v12 = vmax.f32 %v2487_v28, %v3020_v26  ;;  %v3024_v37 = vmax.f32 %v3022_v38, %v3023_v30  ;;  %v1459_v39 = vmax.f32 %v3025_v46, %v1319_v62  ;;  %v1461_v59 = vmax.f32 %v3026_v45, %v1392_v50  ;;  %v1325_v28 = vpop.f32.mrf.mxu0  ;;  %v3031_v62 = vld [vmem:[#allocation7_spill] sm:$0xff]  ;;  %v3045_v6 = vld [vmem:[#allocation45_spill] sm:$0xff]  ;;  %v1402_v26 = vpop.f32.mrf.mxu1 }
 0x16d   :  { %1758 = vst [vmem:[%s2919_s3 + $0x28] sm:$0xff] %v1927_v47  ;;  %v1637_v27 = vsel %vm1573_vm12, %v1541_v21, %v1605_v2  ;;  %vm1575_vm13 = vcmp.ge.f32.partialorder %v1543_v18, 0.0  ;;  %v1607_v35 = vmul.f32 0.01, %v1543_v18  ;;  %v1460_v43 = vmax.f32 %v3027_v54, %v1321_v11  ;;  %v3042_v21 = vld [vmem:[#allocation10_spill] sm:$0xff]  ;;  %v3046_v30 = vld [vmem:[#allocation11_spill] sm:$0xff] }
 0x16e   :  { %v1488_v42 = vmax.f32 %v3021_v12, %v1456_v36  ;;  %v1490_v44 = vmax.f32 %v3024_v37, %v1458_v40  ;;  %v3030_v53 = vmax.f32 %v3028_v51, %v3029_v19  ;;  %v3033_v17 = vmax.f32 %v3031_v62, %v3032_v52  ;;  %v1329_v33 = vpop.f32.mrf.mxu0  ;;  %v3047_v37 = vld [vmem:[#allocation29_spill] sm:$0xff]  ;;  %v3051_v19 = vld [vmem:[#allocation12_spill] sm:$0xff] }
 0x16f   :  { %v1639_v0 = vsel %vm1575_vm13, %v1543_v18, %v1607_v35  ;;  %v3036_v3 = vmax.f32 %v3034_v1, %v3035_v23  ;;  %v1462_v50 = vmax.f32 %v3037_v5, %v1394_v32  ;;  %v1463_v4 = vmax.f32 %v3038_v56, %v1323_v34  ;;  %v3050_v35 = vld [vmem:[#allocation47_spill] sm:$0xff]  ;;  %v3054_v52 = vld [vmem:[#allocation13_spill] sm:$0xff]  ;;  %v1404_v1 = vpop.f32.mrf.mxu1  ;;  %v3057_v23 = vld [vmem:[#allocation48_spill] sm:$0xff] }
 0x170   :  { %v1542_v15 = vadd.f32 %v2712_v29, %v1488_v42  ;;  %v1544_v49 = vadd.f32 %v2717_v48, %v1490_v44  ;;  %v1491_v22 = vmax.f32 %v3030_v53, %v1459_v39  ;;  %v1493_v58 = vmax.f32 %v3033_v17, %v1461_v59  ;;  %v1331_v39 = vpop.f32.mrf.mxu0  ;;  %v3052_v53 = vld [vmem:[#allocation30_spill] sm:$0xff]  ;;  %v3055_v17 = vld [vmem:[#allocation31_spill] sm:$0xff] }
 0x171   :  { %v1492_v61 = vmax.f32 %v3036_v3, %v1460_v43  ;;  %v3041_v9 = vmax.f32 %v3039_v55, %v3040_v25  ;;  %v3044_v41 = vmax.f32 %v3042_v21, %v3043_v57  ;;  %v1465_v10 = vmax.f32 %v3045_v6, %v1396_v13  ;;  %v3049_v13 = vld [vmem:[#allocation46_spill] sm:$0xff]  ;;  %v3061_v55 = vld [vmem:[#allocation32_spill] sm:$0xff] }
 0x172   :  { %vm1574_vm14 = vcmp.ge.f32.partialorder %v1542_v15, 0.0  ;;  %v1606_v8 = vmul.f32 0.01, %v1542_v15  ;;  %vm1576_vm15 = vcmp.ge.f32.partialorder %v1544_v49, 0.0  ;;  %v1608_v11 = vmul.f32 0.01, %v1544_v49 }
 0x173   :  { %v1545_v24 = vadd.f32 %v2705_v63, %v1491_v22  ;;  %v1547_v7 = vadd.f32 %v2707_v31, %v1493_v58  ;;  %v1546_v20 = vadd.f32 %v2712_v29, %v1492_v61  ;;  %v1494_v16 = vmax.f32 %v3041_v9, %v1462_v50  ;;  %v3058_v61 = vld [vmem:[#allocation49_spill] sm:$0xff]  ;;  %v3059_v50 = vld [vmem:[#allocation50_spill] sm:$0xff]  ;;  %v3066_v57 = vld [vmem:[#allocation16_spill] sm:$0xff] }
 0x174   :  { %v1638_v60 = vsel %vm1574_vm14, %v1542_v15, %v1606_v8  ;;  %v1640_v32 = vsel %vm1576_vm15, %v1544_v49, %v1608_v11  ;;  %v1495_v34 = vmax.f32 %v3044_v41, %v1463_v4  ;;  %v3048_v44 = vmax.f32 %v3046_v30, %v3047_v37  ;;  %v1333_v4 = vpop.f32.mrf.mxu0  ;;  %v3067_v41 = vld [vmem:[#allocation34_spill] sm:$0xff]  ;;  %v3071_v30 = vld [vmem:[#allocation17_spill] sm:$0xff]  ;;  %v3072_v37 = vld [vmem:[#allocation35_spill] sm:$0xff] }
 0x175   :  { %v1928_v36 = vpack.c.bf16 %v1638_v60, %v1637_v27  ;;  %v1929_v40 = vpack.c.bf16 %v1640_v32, %v1639_v0  ;;  %vm1577_vm0 = vcmp.ge.f32.partialorder %v1545_v24, 0.0  ;;  %v1609_v47 = vmul.f32 0.01, %v1545_v24  ;;  %v3064_v60 = vld [vmem:[#allocation33_spill] sm:$0xff] }
 0x176   :  { %vm1579_vm1 = vcmp.ge.f32.partialorder %v1547_v7, 0.0  ;;  %v1611_v2 = vmul.f32 0.01, %v1547_v7  ;;  %vm1578_vm2 = vcmp.ge.f32.partialorder %v1546_v20, 0.0  ;;  %v1610_v18 = vmul.f32 0.01, %v1546_v20 }
 0x177   :  { %1759 = vst [vmem:[%s2919_s3 + $0x30] sm:$0xff] %v1928_v36  ;;  %1760 = vst [vmem:[%s2919_s3 + $0x38] sm:$0xff] %v1929_v40  ;;  %v1641_v12 = vsel %vm1577_vm0, %v1545_v24, %v1609_v47  ;;  %v1548_v42 = vadd.f32 %v2717_v48, %v1494_v16  ;;  %v1549_v38 = vadd.f32 %v2705_v63, %v1495_v34  ;;  %v3063_v16 = vld [vmem:[#allocation15_spill] sm:$0xff]  ;;  %v3070_v40 = vld [vmem:[#allocation52_spill] sm:$0xff] }
 0x178   :  { %v1497_v46 = vmax.f32 %v3048_v44, %v1465_v10  ;;  %v1643_v45 = vsel %vm1579_vm1, %v1547_v7, %v1611_v2  ;;  %v1642_v59 = vsel %vm1578_vm2, %v1546_v20, %v1610_v18  ;;  %v1464_v27 = vmax.f32 %v3049_v13, %v1325_v28  ;;  %v3060_v20 = vld [vmem:[#allocation14_spill] sm:$0xff]  ;;  %v3069_v10 = vld [vmem:[#allocation51_spill] sm:$0xff]  ;;  %v1406_v2 = vpop.f32.mrf.mxu1  ;;  %v3075_v13 = vld [vmem:[#allocation36_spill] sm:$0xff] }
 0x179   :  { %v1466_v54 = vmax.f32 %v3050_v35, %v1398_v14  ;;  %v1930_v43 = vpack.c.bf16 %v1642_v59, %v1641_v12  ;;  %vm1580_vm3 = vcmp.ge.f32.partialorder %v1548_v42, 0.0  ;;  %v1612_v15 = vmul.f32 0.01, %v1548_v42  ;;  %v3074_v59 = vld [vmem:[#allocation18_spill] sm:$0xff] }
 0x17a   :  { %vm1581_vm4 = vcmp.ge.f32.partialorder %v1549_v38, 0.0  ;;  %v1613_v49 = vmul.f32 0.01, %v1549_v38  ;;  %v1551_v51 = vadd.f32 %v2707_v31, %v1497_v46  ;;  %v3053_v22 = vmax.f32 %v3051_v19, %v3052_v53  ;;  %v1335_v19 = vpop.f32.mrf.mxu0  ;;  %v1408_v53 = vpop.f32.mrf.mxu1 }
 0x17b   :  { %v3056_v58 = vmax.f32 %v3054_v52, %v3055_v17  ;;  %1761 = vst [vmem:[%s2919_s3 + $0x40] sm:$0xff] %v1930_v43  ;;  %v1644_v28 = vsel %vm1580_vm3, %v1548_v42, %v1612_v15  ;;  %v1467_v3 = vmax.f32 %v3057_v23, %v1329_v33  ;;  %v1469_v5 = vmax.f32 %v3058_v61, %v1402_v26  ;;  %v3078_v17 = vld [vmem:[#allocation19_spill] sm:$0xff] }
 0x17c   :  { %v1496_v62 = vmax.f32 %v3053_v22, %v1464_v27  ;;  %v1468_v56 = vmax.f32 %v3059_v50, %v1331_v39  ;;  %v1931_v8 = vpack.c.bf16 %v1644_v28, %v1643_v45  ;;  %v1645_v11 = vsel %vm1581_vm4, %v1549_v38, %v1613_v49 }
 0x17d   :  { %v1498_v0 = vmax.f32 %v3056_v58, %v1466_v54  ;;  %vm1583_vm5 = vcmp.ge.f32.partialorder %v1551_v51, 0.0  ;;  %v1615_v14 = vmul.f32 0.01, %v1551_v51  ;;  %v3062_v25 = vmax.f32 %v3060_v20, %v3061_v55  ;;  %v3077_v54 = vld [vmem:[#allocation53_spill] sm:$0xff] }
 0x17e   :  { %v1550_v24 = vadd.f32 %v2712_v29, %v1496_v62  ;;  %v3065_v33 = vmax.f32 %v3063_v16, %v3064_v60  ;;  %1762 = vst [vmem:[%s2919_s3 + $0x48] sm:$0xff] %v1931_v8  ;;  %v3068_v34 = vmax.f32 %v3066_v57, %v3067_v41  ;;  %v1470_v36 = vmax.f32 %v3069_v10, %v1404_v1  ;;  %v3079_v58 = vld [vmem:[#allocation37_spill] sm:$0xff] }
 0x17f   :  { %v1552_v7 = vadd.f32 %v2717_v48, %v1498_v0  ;;  %v1499_v9 = vmax.f32 %v3062_v25, %v1467_v3  ;;  %v1647_v21 = vsel %vm1583_vm5, %v1551_v51, %v1615_v14  ;;  %v1471_v47 = vmax.f32 %v3070_v40, %v1333_v4  ;;  %v3081_v3 = vld [vmem:[#allocation54_spill] sm:$0xff]  ;;  %v3083_v14 = vld [vmem:[#allocation20_spill] sm:$0xff]  ;;  %v3086_v55 = vld [vmem:[#allocation21_spill] sm:$0xff] }
 0x180   :  { %v1501_v32 = vmax.f32 %v3065_v33, %v1469_v5  ;;  %v1500_v6 = vmax.f32 %v3068_v34, %v1468_v56  ;;  %vm1582_vm6 = vcmp.ge.f32.partialorder %v1550_v24, 0.0  ;;  %v1614_v18 = vmul.f32 0.01, %v1550_v24  ;;  %v3082_v5 = vld [vmem:[#allocation55_spill] sm:$0xff] }
 0x181   :  { %vm1584_vm7 = vcmp.ge.f32.partialorder %v1552_v7, 0.0  ;;  %v1616_v26 = vmul.f32 0.01, %v1552_v7  ;;  %v1553_v12 = vadd.f32 %v2705_v63, %v1499_v9  ;;  %v3073_v44 = vmax.f32 %v3071_v30, %v3072_v37  ;;  %v3087_v25 = vld [vmem:[#allocation39_spill] sm:$0xff] }
 0x182   :  { %v1555_v42 = vadd.f32 %v2707_v31, %v1501_v32  ;;  %v1554_v38 = vadd.f32 %v2712_v29, %v1500_v6  ;;  %v1646_v39 = vsel %vm1582_vm6, %v1550_v24, %v1614_v18  ;;  %v3076_v27 = vmax.f32 %v3074_v59, %v3075_v13  ;;  %v3084_v24 = vld [vmem:[#allocation38_spill] sm:$0xff] }
 0x183   :  { %v1502_v46 = vmax.f32 %v3073_v44, %v1470_v36  ;;  %v1648_v45 = vsel %vm1584_vm7, %v1552_v7, %v1616_v26  ;;  %v1473_v43 = vmax.f32 %v3077_v54, %v1406_v2  ;;  %v1932_v15 = vpack.c.bf16 %v1646_v39, %v1645_v11 }
 0x184   :  { %v1503_v35 = vmax.f32 %v3076_v27, %v1471_v47  ;;  %v1933_v49 = vpack.c.bf16 %v1648_v45, %v1647_v21  ;;  %vm1585_vm8 = vcmp.ge.f32.partialorder %v1553_v12, 0.0  ;;  %v1617_v51 = vmul.f32 0.01, %v1553_v12 }
 0x185   :  { %vm1586_vm9 = vcmp.ge.f32.partialorder %v1554_v38, 0.0  ;;  %v1618_v22 = vmul.f32 0.01, %v1554_v38  ;;  %1763 = vst [vmem:[%s2919_s3 + $0x50] sm:$0xff] %v1932_v15  ;;  %vm1587_vm10 = vcmp.ge.f32.partialorder %v1555_v42, 0.0  ;;  %v1556_v52 = vadd.f32 %v2717_v48, %v1502_v46 }
 0x186   :  { %1764 = vst [vmem:[%s2919_s3 + $0x58] sm:$0xff] %v1933_v49  ;;  %v1619_v62 = vmul.f32 0.01, %v1555_v42  ;;  %v3080_v0 = vmax.f32 %v3078_v17, %v3079_v58  ;;  %v1649_v28 = vsel %vm1585_vm8, %v1553_v12, %v1617_v51  ;;  %v1472_v61 = vmax.f32 %v3081_v3, %v1335_v19 }
 0x187   :  { %v1650_v23 = vsel %vm1586_vm9, %v1554_v38, %v1618_v22  ;;  %v1474_v50 = vmax.f32 %v3082_v5, %v1408_v53  ;;  %vm1588_vm11 = vcmp.ge.f32.partialorder %v1556_v52, 0.0  ;;  %v1620_v4 = vmul.f32 0.01, %v1556_v52 }
 0x188   :  { %v1505_v1 = vmax.f32 %v3080_v0, %v1473_v43  ;;  %v1934_v56 = vpack.c.bf16 %v1650_v23, %v1649_v28  ;;  %v1557_v8 = vadd.f32 %v2705_v63, %v1503_v35  ;;  %v3085_v7 = vmax.f32 %v3083_v14, %v3084_v24 }
 0x189   :  { %v3088_v9 = vmax.f32 %v3086_v55, %v3087_v25  ;;  %v1651_v60 = vsel %vm1587_vm10, %v1555_v42, %v1619_v62  ;;  %v1652_v33 = vsel %vm1588_vm11, %v1556_v52, %v1620_v4 }
 0x18a   :  { %v1559_v11 = vadd.f32 %v2707_v31, %v1505_v1  ;;  %v1504_v20 = vmax.f32 %v3085_v7, %v1472_v61  ;;  %1765 = vst [vmem:[%s2919_s3 + $0x60] sm:$0xff] %v1934_v56  ;;  %v1935_v32 = vpack.c.bf16 %v1652_v33, %v1651_v60  ;;  %v1621_v21 = vmul.f32 0.01, %v1557_v8 }
 0x18b   :  { %v1506_v16 = vmax.f32 %v3088_v9, %v1474_v50  ;;  %vm1589_vm12 = vcmp.ge.f32.partialorder %v1557_v8, 0.0 }
 0x18c   :  { %v1623_v57 = vmul.f32 0.01, %v1559_v11  ;;  %v1558_v63 = vadd.f32 %v2712_v29, %v1504_v20  ;;  %1766 = vst [vmem:[%s2919_s3 + $0x68] sm:$0xff] %v1935_v32  ;;  %vm1591_vm13 = vcmp.ge.f32.partialorder %v1559_v11, 0.0  ;;  %v1653_v6 = vsel %vm1589_vm12, %v1557_v8, %v1621_v21 }
 0x18d   :  { %v1560_v31 = vadd.f32 %v2717_v48, %v1506_v16 }
 0x18e   :  { %vm1590_vm14 = vcmp.ge.f32.partialorder %v1558_v63, 0.0  ;;  %v1622_v41 = vmul.f32 0.01, %v1558_v63  ;;  %v1655_v10 = vsel %vm1591_vm13, %v1559_v11, %v1623_v57 }
 0x18f   :  { %vm1592_vm15 = vcmp.ge.f32.partialorder %v1560_v31, 0.0  ;;  %v1624_v34 = vmul.f32 0.01, %v1560_v31 }
 0x190   :  { %v1654_v36 = vsel %vm1590_vm14, %v1558_v63, %v1622_v41 }
 0x191   :  { %v1656_v40 = vsel %vm1592_vm15, %v1560_v31, %v1624_v34  ;;  %v1936_v47 = vpack.c.bf16 %v1654_v36, %v1653_v6 }
 0x192   :  { %v1937_v2 = vpack.c.bf16 %v1656_v40, %v1655_v10 }
 0x193   :  { %1767 = vst [vmem:[%s2919_s3 + $0x70] sm:$0xff] %v1936_v47 }
 0x194   :  { %1768 = vst [vmem:[%s2919_s3 + $0x78] sm:$0xff] %v1937_v2 }
 0x195   :  { %1773 = vsyncpa [#allocation3], 1 }

// kernel: b5_forward.4
= control target key start
LH: loop header
LB: loop body
LE: loop exit
PB: predicated region body
PF: predicated region fallthrough
CT: control target
= control target key end

     0   :  { %vm260_vm0 = vcmask 523264   ;;  %vm1677_vm1 = vcmask 1047552   ;;  %vm1678_vm2 = vsmask.f32 7424  ;;  %vm2910_vm4 = vcmask 1046528   ;;  %s8821_s1 = inlined_call_operand.vmem [shape: bf16[9,64,64], index: 1, kind: input, shape index: {}]   ;;  %s8822_s0 = inlined_call_operand.vmem [shape: bf16[2,16,16,64], index: 0, kind: input, shape index: {}]   ;;  %s8823_s2 = inlined_call_operand.vmem [shape: f32[1,64], index: 2, kind: input, shape index: {}]   ;;  %s8824_s3 = inlined_call_operand.vmem [shape: bf16[2,7,7,64], index: 3, kind: output, shape index: {}]  }
   0x1   :  { %v6118_v0 = vld [vmem:[%s8821_s1 + $0x78] sm:$0xff]   ;;  %v6119_v1 = vld [vmem:[%s8821_s1 + $0x70] sm:$0xff]   ;;  %v6120_v2 = vld [vmem:[%s8821_s1 + $0x68] sm:$0xff]   ;;  %vm4676_vm7 = vcmask 1040384   ;;  %vm4691_vm9 = vcmask 1041408   ;;  %vm4706_vm10 = vcmask 1042432  }
   0x2   :  { %5534 = vmatprep.subr.bf16.mxu0 %v6118_v0  ;;  %6110 = vmatprep.subr.bf16.mxu1 %v6118_v0  ;;  %v6253_v3 = vld [vmem:[%s8822_s0 + $0x8] sm:$0xf]  ;;  %v18_v4 = vld [vmem:[%s8822_s0 + $0xc] sm:$0xf]  ;;  %v6121_v9 = vld [vmem:[%s8821_s1 + $0x60] sm:$0xff]   ;;  %vm4721_vm12 = vcmask 1043456  }
   0x3   :  { %5535 = vmatpush3.bf16.msra.mxu0 %v6118_v0  ;;  %6114 = vmatpush3.bf16.msra.mxu1 %v6118_v0  ;;  %v6261_v5 = vld [vmem:[%s8822_s0 + $0x88] sm:$0xf]  ;;  %v6264_v6 = vcombine.low %v6253_v3, %v18_v4  ;;  %v50_v7 = vld [vmem:[%s8822_s0 + $0x8c] sm:$0xf]  ;;  %v6282_v10 = vld [vmem:[%s8822_s0 + $0x10] sm:$0xf] }
   0x4   :  { %5536 = vmatprep.subr.bf16.mxu0 %v6119_v1  ;;  %6111 = vmatprep.subr.bf16.mxu1 %v6119_v1  ;;  %v6270_v8 = vcombine.low %v6261_v5, %v50_v7  ;;  %v20_v11 = vld [vmem:[%s8822_s0 + $0x14] sm:$0xf]  ;;  %v6290_v12 = vld [vmem:[%s8822_s0 + $0x90] sm:$0xf]  ;;  %v6126_v14 = vld [vmem:[%s8821_s1 + $0x18] sm:$0xff]   ;;  %vm4736_vm13 = vcmask 1044480  }
   0x5   :  { %8932 = vst [vmem:[#allocation2_spill] sm:$0xff] %v6264_v6  ;;  %5542 = vmatprep.mubr.msk.bf16.mxu0 %vm260_vm0, %v6264_v6  ;;  %v52_v13 = vld [vmem:[%s8822_s0 + $0x94] sm:$0xf]  ;;  %v6127_v15 = vld [vmem:[%s8821_s1 + $0xd8] sm:$0xff]   ;;  %v6318_v20 = vcombine.low %v6282_v10, %v20_v11  ;;  %v6332_v24 = vld [vmem:[%s8822_s0 + $0x20] sm:$0xf] }
   0x6   :  { %8933 = vst [vmem:[#allocation3_spill] sm:$0xff] %v6270_v8  ;;  %5570 = vmatprep.mubr.msk.bf16.mxu1 %vm260_vm0, %v6270_v8  ;;  %v6304_v16 = vld [vmem:[%s8822_s0 + $0x18] sm:$0xf]  ;;  %v22_v17 = vld [vmem:[%s8822_s0 + $0x1c] sm:$0xf]  ;;  %v6321_v21 = vcombine.low %v6290_v12, %v52_v13  ;;  %v6132_v28 = vld [vmem:[%s8821_s1 + $0x10] sm:$0xff]  }
   0x7   :  { %5537 = vmatpush3.bf16.msra.mxu0 %v6119_v1  ;;  %6115 = vmatpush3.bf16.msra.mxu1 %v6119_v1  ;;  %v6312_v18 = vld [vmem:[%s8822_s0 + $0x98] sm:$0xf]  ;;  %v54_v19 = vld [vmem:[%s8822_s0 + $0x9c] sm:$0xf]  ;;  %v6324_v22 = vcombine.low %v6304_v16, %v22_v17  ;;  %v24_v25 = vld [vmem:[%s8822_s0 + $0x24] sm:$0xf] }
   0x8   :  { %5538 = vmatprep.subr.bf16.mxu0 %v6120_v2  ;;  %6112 = vmatprep.subr.bf16.mxu1 %v6120_v2  ;;  %8934 = vst [vmem:[#allocation4_spill] sm:$0xff] %v6321_v21  ;;  %v6327_v23 = vcombine.low %v6312_v18, %v54_v19  ;;  %v6340_v26 = vld [vmem:[%s8822_s0 + $0xa0] sm:$0xf]  ;;  %v56_v27 = vld [vmem:[%s8822_s0 + $0xa4] sm:$0xf]  ;;  %v6137_v29 = vld [vmem:[%s8821_s1 + $0xd0] sm:$0xff]   ;;  %v6382_v36 = vcombine.low %v6332_v24, %v24_v25 }
   0x9   :  { %v6358_v30 = vld [vmem:[%s8822_s0 + $0x28] sm:$0xf]  ;;  %v26_v31 = vld [vmem:[%s8822_s0 + $0x2c] sm:$0xf]  ;;  %v6385_v37 = vcombine.low %v6340_v26, %v56_v27  ;;  %v6396_v40 = vld [vmem:[%s8822_s0 + $0x30] sm:$0xf] }
   0xa   :  { %8935 = vst [vmem:[#allocation5_spill] sm:$0xff] %v6327_v23  ;;  %v6366_v32 = vld [vmem:[%s8822_s0 + $0xa8] sm:$0xf]  ;;  %v58_v33 = vld [vmem:[%s8822_s0 + $0xac] sm:$0xf]  ;;  %v6388_v38 = vcombine.low %v6358_v30, %v26_v31  ;;  %v6152_v45 = vld [vmem:[%s8821_s1] sm:$0xff]  }
   0xb   :  { %5539 = vmatpush3.bf16.msra.mxu0 %v6120_v2  ;;  %6116 = vmatpush3.bf16.msra.mxu1 %v6120_v2  ;;  %v6142_v34 = vld [vmem:[%s8821_s1 + $0x8] sm:$0xff]   ;;  %8936 = vst [vmem:[#allocation6_spill] sm:$0xff] %v6385_v37  ;;  %v6391_v39 = vcombine.low %v6366_v32, %v58_v33  ;;  %v28_v41 = vld [vmem:[%s8822_s0 + $0x34] sm:$0xf]  ;;  %v6404_v42 = vld [vmem:[%s8822_s0 + $0xb0] sm:$0xf] }
   0xc   :  { %5540 = vmatprep.subr.bf16.mxu0 %v6121_v9  ;;  %6113 = vmatprep.subr.bf16.mxu1 %v6121_v9  ;;  %v6143_v35 = vld [vmem:[%s8821_s1 + $0xc8] sm:$0xff]   ;;  %v60_v43 = vld [vmem:[%s8822_s0 + $0xb4] sm:$0xf]  ;;  %v6416_v44 = vld [vmem:[%s8822_s0 + $0x38] sm:$0xf]  ;;  %v6440_v50 = vcombine.low %v6396_v40, %v28_v41  ;;  %vm4751_vm14 = vcmask 1045504  }
   0xd   :  { %8937 = vst [vmem:[#allocation7_spill] sm:$0xff] %v6391_v39  ;;  %v6153_v46 = vld [vmem:[%s8821_s1 + $0xc0] sm:$0xff]   ;;  %v30_v47 = vld [vmem:[%s8822_s0 + $0x3c] sm:$0xf]  ;;  %v6434_v48 = vld [vmem:[%s8822_s0 + $0xb8] sm:$0xf]  ;;  %v6443_v51 = vcombine.low %v6404_v42, %v60_v43 }
   0xe   :  { %v62_v49 = vld [vmem:[%s8822_s0 + $0xbc] sm:$0xf]  ;;  %v6446_v52 = vcombine.low %v6416_v44, %v30_v47  ;;  %v6459_v55 = vld [vmem:[%s8822_s0 + $0x40] sm:$0xf]  ;;  %v32_v56 = vld [vmem:[%s8822_s0 + $0x44] sm:$0xf] }
   0xf   :  { %5541 = vmatpush3.bf16.msra.mxu0 %v6121_v9  ;;  %6117 = vmatpush3.bf16.msra.mxu1 %v6121_v9  ;;  %8938 = vst [vmem:[#allocation8_spill] sm:$0xff] %v6443_v51  ;;  %v6449_v53 = vcombine.low %v6434_v48, %v62_v49  ;;  %v6454_v54 = vld [vmem:[%s8821_s1 + $0x38] sm:$0xff]   ;;  %v6476_v58 = vld [vmem:[%s8822_s0 + $0xc0] sm:$0xf]  ;;  %v64_v59 = vld [vmem:[%s8822_s0 + $0xc4] sm:$0xf]  ;;  %v6504_v0 = vcombine.low %v6459_v55, %v32_v56 }
  0x10   :  { %5598 = vmatprep.subr.bf16.mxu1 %v6126_v14  ;;  %5662 = vmatprep.subr.bf16.mxu0 %v6127_v15  ;;  %8939 = vst [vmem:[#allocation9_spill] sm:$0xff] %v6446_v52  ;;  %v6467_v57 = vld [vmem:[%s8821_s1 + $0x98] sm:$0xff]   ;;  %8941 = vst [vmem:[#allocation11_spill] sm:$0xff] %v6476_v58  ;;  %v6488_v60 = vld [vmem:[%s8822_s0 + $0x48] sm:$0xf]  ;;  %v6507_v1 = vcombine.low %v6476_v58, %v64_v59  ;;  %vm4780_vm15 = vcmask 519168  }
  0x11   :  { %8940 = vst [vmem:[#allocation10_spill] sm:$0xff] %v6449_v53  ;;  %v34_v61 = vld [vmem:[%s8822_s0 + $0x4c] sm:$0xf]  ;;  %v6496_v62 = vld [vmem:[%s8822_s0 + $0xc8] sm:$0xf]  ;;  %8943 = vst [vmem:[#allocation13_spill] sm:$0xff] %v6504_v0 }
  0x12   :  { %5543 = vmatmul.mubr.msk.bf16.vlgmr.msra.gmra.mxu0 %vm260_vm0, %v6318_v20  ;;  %5571 = vmatmul.mubr.msk.bf16.vlgmr.msra.gmra.mxu1 %vm260_vm0, %v6321_v21  ;;  %8942 = vst [vmem:[#allocation12_spill] sm:$0xff] %v6496_v62  ;;  %v66_v63 = vld [vmem:[%s8822_s0 + $0xcc] sm:$0xf]  ;;  %8944 = vst [vmem:[#allocation14_spill] sm:$0xff] %v6507_v1  ;;  %v6510_v2 = vcombine.low %v6488_v60, %v34_v61  ;;  %v6518_v7 = vld [vmem:[%s8822_s0 + $0x50] sm:$0xf] }
  0x13   :  { %5599 = vmatpush3.bf16.msra.mxu1 %v6126_v14  ;;  %5663 = vmatpush3.bf16.msra.mxu0 %v6127_v15  ;;  %v6513_v4 = vcombine.low %v6496_v62, %v66_v63  ;;  %v36_v9 = vld [vmem:[%s8822_s0 + $0x54] sm:$0xf]  ;;  %v6526_v11 = vld [vmem:[%s8822_s0 + $0xd0] sm:$0xf]  ;;  %v6538_v14 = vld [vmem:[%s8822_s0 + $0x58] sm:$0xf] }
  0x14   :  { %5546 = vmatprep.mubr.msk.bf16.mxu0 %vm260_vm0, %v6324_v22  ;;  %5574 = vmatprep.mubr.msk.bf16.mxu1 %vm260_vm0, %v6327_v23  ;;  %8945 = vst [vmem:[#allocation15_spill] sm:$0xff] %v6510_v2  ;;  %8947 = vst [vmem:[#allocation17_spill] sm:$0xff] %v6526_v11  ;;  %v68_v13 = vld [vmem:[%s8822_s0 + $0xd4] sm:$0xf]  ;;  %v38_v15 = vld [vmem:[%s8822_s0 + $0x5c] sm:$0xf]  ;;  %v6556_v25 = vcombine.low %v6518_v7, %v36_v9 }
  0x15   :  { %5600 = vmatprep.subr.bf16.mxu1 %v6132_v28  ;;  %5664 = vmatprep.subr.bf16.mxu0 %v6137_v29  ;;  %8946 = vst [vmem:[#allocation16_spill] sm:$0xff] %v6513_v4  ;;  %v6546_v17 = vld [vmem:[%s8822_s0 + $0xd8] sm:$0xf]  ;;  %v70_v19 = vld [vmem:[%s8822_s0 + $0xdc] sm:$0xf]  ;;  %v6559_v27 = vcombine.low %v6526_v11, %v68_v13  ;;  %v1267_v11 = vshrl.u32 %v6264_v6, 16  ;;  %vm6848_vm3 = vmand %vm1677_vm1, %vm1678_vm2 }
  0x16   :  { %8948 = vst [vmem:[#allocation18_spill] sm:$0xff] %v6546_v17  ;;  %8949 = vst [vmem:[#allocation19_spill] sm:$0xff] %v6556_v25  ;;  %v6570_v31 = vld [vmem:[%s8822_s0 + $0x60] sm:$0xf]  ;;  %v40_v33 = vld [vmem:[%s8822_s0 + $0x64] sm:$0xf] }
  0x17   :  { %5601 = vmatpush3.bf16.msra.mxu1 %v6132_v28  ;;  %5665 = vmatpush3.bf16.msra.mxu0 %v6137_v29  ;;  %8950 = vst [vmem:[#allocation20_spill] sm:$0xff] %v6559_v27  ;;  %v6562_v28 = vcombine.low %v6538_v14, %v38_v15  ;;  %v6565_v29 = vcombine.low %v6546_v17, %v70_v19  ;;  %v6594_v41 = vld [vmem:[%s8822_s0 + $0x68] sm:$0xf]  ;;  %v42_v43 = vld [vmem:[%s8822_s0 + $0x6c] sm:$0xf] }
  0x18   :  { %5602 = vmatprep.subr.bf16.mxu1 %v6142_v34  ;;  %5666 = vmatprep.subr.bf16.mxu0 %v6143_v35  ;;  %v6608_v47 = vcombine.low %v6570_v31, %v40_v33  ;;  %v6614_v56 = vcombine.low %v6594_v41, %v42_v43  ;;  %v6626_v61 = vld [vmem:[%s8822_s0 + $0x70] sm:$0xf]  ;;  %v44_v63 = vld [vmem:[%s8822_s0 + $0x74] sm:$0xf]  ;;  %v6646_v15 = vld [vmem:[%s8822_s0] sm:$0xf] }
  0x19   :  { %8951 = vst [vmem:[#allocation21_spill] sm:$0xff] %v6562_v28  ;;  %8952 = vst [vmem:[#allocation22_spill] sm:$0xff] %v6565_v29  ;;  %v6638_v9 = vld [vmem:[%s8822_s0 + $0xf0] sm:$0xf]  ;;  %v76_v13 = vld [vmem:[%s8822_s0 + $0xf4] sm:$0xf]  ;;  %v6652_v33 = vcombine.low %v6626_v61, %v44_v63 }
  0x1a   :  { %5547 = vmatmul.mubr.msk.bf16.gmra.mxu0 %vm260_vm0, %v6382_v36  ;;  %5575 = vmatmul.mubr.msk.bf16.gmra.mxu1 %vm260_vm0, %v6385_v37  ;;  %8955 = vst [vmem:[#allocation25_spill] sm:$0xff] %v6608_v47  ;;  %8957 = vst [vmem:[#allocation27_spill] sm:$0xff] %v6614_v56  ;;  %v16_v19 = vld [vmem:[%s8822_s0 + $0x4] sm:$0xf]  ;;  %v6163_v63 = vld [vmem:[%s8821_s1 + $0x90] sm:$0xff]  }
  0x1b   :  { %5550 = vmatprep.mubr.msk.bf16.mxu0 %vm260_vm0, %v6388_v38  ;;  %5578 = vmatprep.mubr.msk.bf16.mxu1 %vm260_vm0, %v6391_v39  ;;  %8959 = vst [vmem:[#allocation29_spill] sm:$0xff] %v6638_v9  ;;  %8960 = vst [vmem:[#allocation30_spill] sm:$0xff] %v6652_v33  ;;  %v6658_v43 = vcombine.low %v6646_v15, %v16_v19  ;;  %v6169_v19 = vld [vmem:[%s8821_s1 + $0x88] sm:$0xff]  }
  0x1c   :  { %5603 = vmatpush3.bf16.msra.mxu1 %v6142_v34  ;;  %5667 = vmatpush3.bf16.msra.mxu0 %v6143_v35  ;;  %v6582_v34 = vld [vmem:[%s8822_s0 + $0xe0] sm:$0xf]  ;;  %v72_v35 = vld [vmem:[%s8822_s0 + $0xe4] sm:$0xf] }
  0x1d   :  { %5604 = vmatprep.subr.bf16.mxu1 %v6152_v45  ;;  %5668 = vmatprep.subr.bf16.mxu0 %v6153_v46  ;;  %8953 = vst [vmem:[#allocation23_spill] sm:$0xff] %v6582_v34  ;;  %v6611_v49 = vcombine.low %v6582_v34, %v72_v35  ;;  %v6655_v35 = vcombine.low %v6638_v9, %v76_v13  ;;  %8962 = vst [vmem:[#allocation32_spill] sm:$0xff] %v6658_v43  ;;  %v6168_v13 = vld [vmem:[%s8821_s1 + $0x28] sm:$0xff]   ;;  %v1261_v34 = vshrl.u32 %v6658_v43, 16 }
  0x1f   :  { %8956 = vst [vmem:[#allocation26_spill] sm:$0xff] %v6611_v49  ;;  %8961 = vst [vmem:[#allocation31_spill] sm:$0xff] %v6655_v35 }
  0x20   :  { %5605 = vmatpush3.bf16.msra.mxu1 %v6152_v45  ;;  %5669 = vmatpush3.bf16.msra.mxu0 %v6153_v46  ;;  %v6602_v45 = vld [vmem:[%s8822_s0 + $0xe8] sm:$0xf]  ;;  %v74_v46 = vld [vmem:[%s8822_s0 + $0xec] sm:$0xf] }
  0x21   :  { %5726 = vmatprep.subr.bf16.mxu1 %v6454_v54  ;;  %5790 = vmatprep.subr.bf16.mxu0 %v6467_v57  ;;  %8954 = vst [vmem:[#allocation24_spill] sm:$0xff] %v6602_v45  ;;  %v6617_v59 = vcombine.low %v6602_v45, %v74_v46  ;;  %v6162_v46 = vld [vmem:[%s8821_s1 + $0x30] sm:$0xff]  }
  0x22   :  { %5551 = vmatmul.mubr.msk.bf16.gmra.mxu0 %vm260_vm0, %v6440_v50  ;;  %5579 = vmatmul.mubr.msk.bf16.gmra.mxu1 %vm260_vm0, %v6443_v51 }
  0x23   :  { %5554 = vmatprep.mubr.msk.bf16.mxu0 %vm260_vm0, %v6446_v52  ;;  %5582 = vmatprep.mubr.msk.bf16.mxu1 %vm260_vm0, %v6449_v53  ;;  %8958 = vst [vmem:[#allocation28_spill] sm:$0xff] %v6617_v59 }
  0x2a   :  { %5555 = vmatmul.mubr.msk.bf16.gmra.mxu0 %vm260_vm0, %v6504_v0  ;;  %5583 = vmatmul.mubr.msk.bf16.gmra.mxu1 %vm260_vm0, %v6507_v1 }
  0x2b   :  { %5558 = vmatprep.mubr.msk.bf16.mxu0 %vm260_vm0, %v6510_v2  ;;  %5586 = vmatprep.mubr.msk.bf16.mxu1 %vm260_vm0, %v6513_v4 }
  0x32   :  { %5559 = vmatmul.mubr.msk.bf16.gmra.mxu0 %vm260_vm0, %v6556_v25  ;;  %5587 = vmatmul.mubr.msk.bf16.gmra.mxu1 %vm260_vm0, %v6559_v27 }
  0x33   :  { %5562 = vmatprep.mubr.msk.bf16.mxu0 %vm260_vm0, %v6562_v28  ;;  %5590 = vmatprep.mubr.msk.bf16.mxu1 %vm260_vm0, %v6565_v29 }
  0x3a   :  { %5563 = vmatmul.mubr.msk.bf16.gmra.mxu0 %vm260_vm0, %v6608_v47  ;;  %5591 = vmatmul.mubr.msk.bf16.gmra.mxu1 %vm260_vm0, %v6611_v49 }
  0x3b   :  { %5566 = vmatprep.mubr.msk.bf16.mxu0 %vm260_vm0, %v6614_v56  ;;  %5594 = vmatprep.mubr.msk.bf16.mxu1 %vm260_vm0, %v6617_v59 }
  0x42   :  { %5567 = vmatmul.mubr.msk.bf16.gmra.mxu0 %vm260_vm0, %v6652_v33  ;;  %5595 = vmatmul.mubr.msk.bf16.gmra.mxu1 %vm260_vm0, %v6655_v35 }
  0x43   :  { %5606 = vmatprep.mubr.msk.bf16.mxu1 %vm260_vm0, %v6658_v43  ;;  %5670 = vmatprep.mubr.msk.bf16.mxu0 %vm260_vm0, %v6318_v20 }
  0x4a   :  { %5607 = vmatmul.mubr.msk.bf16.vlgmr.msra.gmra.mxu1 %vm260_vm0, %v6264_v6  ;;  %5671 = vmatmul.mubr.msk.bf16.vlgmr.msra.gmra.mxu0 %vm260_vm0, %v6324_v22 }
  0x4b   :  { %5727 = vmatpush3.bf16.msra.mxu1 %v6454_v54  ;;  %5791 = vmatpush3.bf16.msra.mxu0 %v6467_v57  ;;  %v6170_v54 = vld [vmem:[%s8821_s1 + $0x20] sm:$0xff]  }
  0x4c   :  { %5610 = vmatprep.mubr.msk.bf16.mxu1 %vm260_vm0, %v6318_v20  ;;  %5674 = vmatprep.mubr.msk.bf16.mxu0 %vm260_vm0, %v6382_v36  ;;  %v6171_v57 = vld [vmem:[%s8821_s1 + $0x80] sm:$0xff]  }
  0x4d   :  { %5728 = vmatprep.subr.bf16.mxu1 %v6162_v46  ;;  %5792 = vmatprep.subr.bf16.mxu0 %v6163_v63 }
  0x4f   :  { %5729 = vmatpush3.bf16.msra.mxu1 %v6162_v46  ;;  %5793 = vmatpush3.bf16.msra.mxu0 %v6163_v63  ;;  %v6707_v46 = vld [vmem:[%s8821_s1 + $0xf8] sm:$0xff]  }
  0x50   :  { %5730 = vmatprep.subr.bf16.mxu1 %v6168_v13  ;;  %5794 = vmatprep.subr.bf16.mxu0 %v6169_v19  ;;  %v6712_v63 = vld [vmem:[%s8821_s1 + $0x58] sm:$0xff]  }
  0x52   :  { %5611 = vmatmul.mubr.msk.bf16.gmra.mxu1 %vm260_vm0, %v6324_v22  ;;  %5675 = vmatmul.mubr.msk.bf16.gmra.mxu0 %vm260_vm0, %v6388_v38 }
  0x53   :  { %5614 = vmatprep.mubr.msk.bf16.mxu1 %vm260_vm0, %v6382_v36  ;;  %5678 = vmatprep.mubr.msk.bf16.mxu0 %vm260_vm0, %v6440_v50 }
  0x54   :  { %5731 = vmatpush3.bf16.msra.mxu1 %v6168_v13  ;;  %5795 = vmatpush3.bf16.msra.mxu0 %v6169_v19  ;;  %v45_v13 = vld [vmem:[%s8822_s0 + $0x78] sm:$0xf]  ;;  %v46_v19 = vld [vmem:[%s8822_s0 + $0x7c] sm:$0xf] }
  0x55   :  { %5732 = vmatprep.subr.bf16.mxu1 %v6170_v54  ;;  %5796 = vmatprep.subr.bf16.mxu0 %v6171_v57  ;;  %v6762_v9 = vcombine.low %v45_v13, %v46_v19  ;;  %v6813_v13 = vcombine.low %v6646_v15, %v6646_v15  ;;  %v1263_v19 = vshll.u32 %v6658_v43, 16 }
  0x57   :  { %8963 = vst [vmem:[#allocation33_spill] sm:$0xff] %v6762_v9  ;;  %8965 = vst [vmem:[#allocation35_spill] sm:$0xff] %v6813_v13  ;;  %v1518_v17 = vshll.u32 %v6813_v13, 16  ;;  %v1265_v15 = vrot.slane %v1263_v19, 1  ;;  %v78_v19 = vld [vmem:[%s8822_s0 + $0xfc] sm:$0xf] }
  0x58   :  { %5733 = vmatpush3.bf16.msra.mxu1 %v6170_v54  ;;  %5797 = vmatpush3.bf16.msra.mxu0 %v6171_v57  ;;  %v6757_v54 = vld [vmem:[%s8822_s0 + $0x80] sm:$0xf]  ;;  %v48_v57 = vld [vmem:[%s8822_s0 + $0x84] sm:$0xf] }
  0x59   :  { %5854 = vmatprep.subr.bf16.mxu1 %v6707_v46  ;;  %5918 = vmatprep.subr.bf16.mxu0 %v6712_v63  ;;  %v6765_v45 = vcombine.low %v6757_v54, %v48_v57  ;;  %v1269_v57 = vshll.u32 %v6264_v6, 16  ;;  %v6846_v6 = vcombine.low %v6282_v10, %v6282_v10  ;;  %v1520_v13 = vrot.slane %v1518_v17, 1 }
  0x5a   :  { %5615 = vmatmul.mubr.msk.bf16.gmra.mxu1 %vm260_vm0, %v6388_v38  ;;  %5679 = vmatmul.mubr.msk.bf16.gmra.mxu0 %vm260_vm0, %v6446_v52  ;;  %v1279_v17 = vshrl.u32 %v6324_v22, 16 }
  0x5b   :  { %5618 = vmatprep.mubr.msk.bf16.mxu1 %vm260_vm0, %v6440_v50  ;;  %5682 = vmatprep.mubr.msk.bf16.mxu0 %vm260_vm0, %v6504_v0  ;;  %8964 = vst [vmem:[#allocation34_spill] sm:$0xff] %v6765_v45  ;;  %v1271_v62 = vrot.slane %v1269_v57, 1  ;;  %v1275_v57 = vshll.u32 %v6318_v20, 16 }
  0x5d   :  { %v1272_v43 = vor.u32 %v1271_v62, %v1267_v11  ;;  %v1277_v10 = vrot.slane %v1275_v57, 1 }
  0x62   :  { %5619 = vmatmul.mubr.msk.bf16.gmra.mxu1 %vm260_vm0, %v6446_v52  ;;  %5683 = vmatmul.mubr.msk.bf16.gmra.mxu0 %vm260_vm0, %v6510_v2 }
  0x63   :  { %5622 = vmatprep.mubr.msk.bf16.mxu1 %vm260_vm0, %v6504_v0  ;;  %5686 = vmatprep.mubr.msk.bf16.mxu0 %vm260_vm0, %v6556_v25 }
  0x6a   :  { %5623 = vmatmul.mubr.msk.bf16.gmra.mxu1 %vm260_vm0, %v6510_v2  ;;  %5687 = vmatmul.mubr.msk.bf16.gmra.mxu0 %vm260_vm0, %v6562_v28 }
  0x6b   :  { %5626 = vmatprep.mubr.msk.bf16.mxu1 %vm260_vm0, %v6556_v25  ;;  %5690 = vmatprep.mubr.msk.bf16.mxu0 %vm260_vm0, %v6608_v47 }
  0x72   :  { %5627 = vmatmul.mubr.msk.bf16.gmra.mxu1 %vm260_vm0, %v6562_v28  ;;  %5691 = vmatmul.mubr.msk.bf16.gmra.mxu0 %vm260_vm0, %v6614_v56 }
  0x73   :  { %5630 = vmatprep.mubr.msk.bf16.mxu1 %vm260_vm0, %v6608_v47  ;;  %5694 = vmatprep.mubr.msk.bf16.mxu0 %vm260_vm0, %v6652_v33 }
  0x7a   :  { %5631 = vmatmul.mubr.msk.bf16.gmra.mxu1 %vm260_vm0, %v6614_v56  ;;  %5695 = vmatmul.mubr.msk.bf16.gmra.mxu0 %vm260_vm0, %v6762_v9  ;;  %v6823_v9 = vcombine.low %v6253_v3, %v6253_v3  ;;  %v77_v3 = vld [vmem:[%s8822_s0 + $0xf8] sm:$0xf] }
  0x7b   :  { %5634 = vmatprep.mubr.msk.bf16.mxu1 %vm260_vm0, %v6765_v45  ;;  %5698 = vmatprep.mubr.msk.bf16.mxu0 %vm260_vm0, %v6321_v21  ;;  %v6857_v58 = vcombine.low %v77_v3, %v78_v19 }
  0x7c   :  { %8966 = vst [vmem:[#allocation36_spill] sm:$0xff] %v6823_v9 }
  0x7d   :  { %8969 = vst [vmem:[#allocation37_spill] sm:$0xff] %v6857_v58 }
  0x82   :  { %5635 = vmatmul.mubr.msk.bf16.gmra.mxu1 %vm260_vm0, %v6270_v8  ;;  %5699 = vmatmul.mubr.msk.bf16.gmra.mxu0 %vm260_vm0, %v6327_v23 }
  0x83   :  { %5638 = vmatprep.mubr.msk.bf16.mxu1 %vm260_vm0, %v6321_v21  ;;  %5702 = vmatprep.mubr.msk.bf16.mxu0 %vm260_vm0, %v6385_v37 }
  0x8a   :  { %5639 = vmatmul.mubr.msk.bf16.gmra.mxu1 %vm260_vm0, %v6327_v23  ;;  %5703 = vmatmul.mubr.msk.bf16.gmra.mxu0 %vm260_vm0, %v6391_v39 }
  0x8b   :  { %5642 = vmatprep.mubr.msk.bf16.mxu1 %vm260_vm0, %v6385_v37  ;;  %5706 = vmatprep.mubr.msk.bf16.mxu0 %vm260_vm0, %v6443_v51 }
  0x92   :  { %5643 = vmatmul.mubr.msk.bf16.gmra.mxu1 %vm260_vm0, %v6391_v39  ;;  %5707 = vmatmul.mubr.msk.bf16.gmra.mxu0 %vm260_vm0, %v6449_v53 }
  0x93   :  { %5646 = vmatprep.mubr.msk.bf16.mxu1 %vm260_vm0, %v6443_v51  ;;  %5710 = vmatprep.mubr.msk.bf16.mxu0 %vm260_vm0, %v6507_v1 }
  0x9a   :  { %5647 = vmatmul.mubr.msk.bf16.gmra.mxu1 %vm260_vm0, %v6449_v53  ;;  %5711 = vmatmul.mubr.msk.bf16.gmra.mxu0 %vm260_vm0, %v6513_v4 }
  0x9b   :  { %5650 = vmatprep.mubr.msk.bf16.mxu1 %vm260_vm0, %v6507_v1  ;;  %5714 = vmatprep.mubr.msk.bf16.mxu0 %vm260_vm0, %v6559_v27  ;;  %v1273_v1 = vshrl.u32 %v6318_v20, 16 }
  0xa2   :  { %5651 = vmatmul.mubr.msk.bf16.gmra.mxu1 %vm260_vm0, %v6513_v4  ;;  %5715 = vmatmul.mubr.msk.bf16.gmra.mxu0 %vm260_vm0, %v6565_v29  ;;  %v6855_v4 = vcombine.low %v6304_v16, %v6304_v16  ;;  %v1278_v16 = vor.u32 %v1277_v10, %v1273_v1  ;;  %v1285_v1 = vshrl.u32 %v6382_v36, 16 }
  0xa3   :  { %5654 = vmatprep.mubr.msk.bf16.mxu1 %vm260_vm0, %v6559_v27  ;;  %5718 = vmatprep.mubr.msk.bf16.mxu0 %vm260_vm0, %v6611_v49  ;;  %v1522_v27 = vshll.u32 %v6823_v9, 16  ;;  %v1266_v9 = vor.u32 %v1265_v15, %v1261_v34  ;;  %v1526_v34 = vshll.u32 %v6846_v6, 16 }
  0xa4   :  { %v1530_v15 = vshll.u32 %v6855_v4, 16 }
  0xa5   :  { %v1680_v62 = vsel %vm6848_vm3, %v1266_v9, %v1520_v13  ;;  %v1528_v9 = vrot.slane %v1526_v34, 1  ;;  %v1287_v13 = vshll.u32 %v6382_v36, 16 }
  0xa6   :  { %v1532_v19 = vrot.slane %v1530_v15, 1 }
  0xa7   :  { %v6885_v57 = vsel %vm6848_vm3, %v1278_v16, %v1528_v9  ;;  %v1289_v10 = vrot.slane %v1287_v13, 1  ;;  %v1299_v9 = vshll.u32 %v6440_v50, 16  ;;  %v6909_v13 = vcombine.low %v6396_v40, %v6396_v40  ;;  %v6195_v40 = vld [vmem:[%s8821_s1 + $0x48] sm:$0xff]  }
  0xa9   :  { %v1290_v15 = vor.u32 %v1289_v10, %v1285_v1  ;;  %8970 = vst [vmem:[#allocation38_spill] sm:$0xff] %v6909_v13  ;;  %v1301_v1 = vrot.slane %v1299_v9, 1  ;;  %v1311_v9 = vshll.u32 %v6504_v0, 16 }
  0xaa   :  { %5655 = vmatmul.mubr.msk.bf16.gmra.mxu1 %vm260_vm0, %v6565_v29  ;;  %5719 = vmatmul.mubr.msk.bf16.gmra.mxu0 %vm260_vm0, %v6617_v59  ;;  %v1281_v29 = vshll.u32 %v6324_v22, 16 }
  0xab   :  { %5658 = vmatprep.mubr.msk.bf16.mxu1 %vm260_vm0, %v6611_v49  ;;  %5722 = vmatprep.mubr.msk.bf16.mxu0 %vm260_vm0, %v6655_v35  ;;  %v1524_v49 = vrot.slane %v1522_v27, 1 }
  0xac   :  { %v1283_v27 = vrot.slane %v1281_v29, 1  ;;  %v1293_v29 = vshll.u32 %v6388_v38, 16 }
  0xad   :  { %v1681_v11 = vsel %vm6848_vm3, %v1272_v43, %v1524_v49  ;;  %v6876_v49 = vcombine.low %v6332_v24, %v6332_v24  ;;  %v6881_v43 = vcombine.low %v6358_v30, %v6358_v30  ;;  %v1291_v24 = vshrl.u32 %v6388_v38, 16 }
  0xae   :  { %v1284_v3 = vor.u32 %v1283_v27, %v1279_v17  ;;  %v6184_v17 = vld [vmem:[%s8821_s1 + $0xf0] sm:$0xff]  }
  0xaf   :  { %v1534_v34 = vshll.u32 %v6876_v49, 16  ;;  %v6185_v27 = vld [vmem:[%s8821_s1 + $0x50] sm:$0xff]  }
  0xb0   :  { %v6893_v30 = vsel %vm6848_vm3, %v1284_v3, %v1532_v19  ;;  %v6194_v3 = vld [vmem:[%s8821_s1 + $0xe8] sm:$0xff]  }
  0xb1   :  { %v1536_v16 = vrot.slane %v1534_v34, 1  ;;  %v1303_v34 = vshrl.u32 %v6446_v52, 16 }
  0xb2   :  { %5659 = vmatmul.mubr.msk.bf16.gmra.mxu1 %vm260_vm0, %v6617_v59  ;;  %5723 = vmatmul.mubr.msk.bf16.gmra.mxu0 %vm260_vm0, %v6857_v58  ;;  %v1538_v58 = vshll.u32 %v6881_v43, 16 }
  0xb3   :  { %5734 = vmatprep.mubr.msk.bf16.mxu1 %vm260_vm0, %v1680_v62  ;;  %5798 = vmatprep.mubr.msk.bf16.mxu0 %vm260_vm0, %v1681_v11  ;;  %v1295_v62 = vrot.slane %v1293_v29, 1  ;;  %v6928_v19 = vsel %vm6848_vm3, %v1290_v15, %v1536_v16  ;;  %v6202_v15 = vld [vmem:[%s8821_s1 + $0xe0] sm:$0xff]  }
  0xb4   :  { %v1540_v29 = vrot.slane %v1538_v58, 1  ;;  %v1297_v58 = vshrl.u32 %v6440_v50, 16 }
  0xba   :  { %5735 = vmatmul.mubr.msk.bf16.vlgmr.msra.gmra.mxu1 %vm260_vm0, %v1681_v11  ;;  %5799 = vmatmul.mubr.msk.bf16.vlgmr.msra.gmra.mxu0 %vm260_vm0, %v6885_v57  ;;  %v1296_v11 = vor.u32 %v1295_v62, %v1291_v24 }
  0xbb   :  { %5855 = vmatpush3.bf16.msra.mxu1 %v6707_v46  ;;  %5919 = vmatpush3.bf16.msra.mxu0 %v6712_v63  ;;  %v1305_v46 = vshll.u32 %v6446_v52, 16  ;;  %v6918_v63 = vcombine.low %v6416_v44, %v6416_v44  ;;  %v1542_v44 = vshll.u32 %v6909_v13, 16  ;;  %v6960_v52 = vcombine.low %v6488_v60, %v6488_v60 }
  0xbc   :  { %5738 = vmatprep.mubr.msk.bf16.mxu1 %vm260_vm0, %v6885_v57  ;;  %5802 = vmatprep.mubr.msk.bf16.mxu0 %vm260_vm0, %v6893_v30  ;;  %v6934_v10 = vsel %vm6848_vm3, %v1296_v11, %v1540_v29  ;;  %v6955_v11 = vcombine.low %v6459_v55, %v6459_v55  ;;  %v6970_v55 = vld [vmem:[%s8821_s1 + $0x118] sm:$0xff]   ;;  %v1309_v60 = vshrl.u32 %v6504_v0, 16 }
  0xbd   :  { %8971 = vst [vmem:[#allocation39_spill] sm:$0xff] %v6918_v63  ;;  %5856 = vmatprep.subr.bf16.mxu1 %v6184_v17  ;;  %5920 = vmatprep.subr.bf16.mxu0 %v6185_v27  ;;  %v1307_v24 = vrot.slane %v1305_v46, 1  ;;  %v1546_v62 = vshll.u32 %v6918_v63, 16  ;;  %v1544_v16 = vrot.slane %v1542_v44, 1  ;;  %v1317_v63 = vshll.u32 %v6510_v2, 16  ;;  %8973 = vst [vmem:[#allocation41_spill] sm:$0xff] %v6960_v52 }
  0xbe   :  { %8972 = vst [vmem:[#allocation40_spill] sm:$0xff] %v6955_v11 }
  0xbf   :  { %5857 = vmatpush3.bf16.msra.mxu1 %v6184_v17  ;;  %5921 = vmatpush3.bf16.msra.mxu0 %v6185_v27  ;;  %v6203_v17 = vld [vmem:[%s8821_s1 + $0x40] sm:$0xff]   ;;  %v1302_v27 = vor.u32 %v1301_v1, %v1297_v58  ;;  %v1308_v29 = vor.u32 %v1307_v24, %v1303_v34  ;;  %v1548_v46 = vrot.slane %v1546_v62, 1  ;;  %v6965_v58 = vld [vmem:[%s8821_s1 + $0xb8] sm:$0xff]   ;;  %v1315_v34 = vshrl.u32 %v6510_v2, 16 }
  0xc0   :  { %5858 = vmatprep.subr.bf16.mxu1 %v6194_v3  ;;  %5922 = vmatprep.subr.bf16.mxu0 %v6195_v40  ;;  %v1319_v24 = vrot.slane %v1317_v63, 1  ;;  %v1554_v62 = vshll.u32 %v6960_v52, 16 }
  0xc1   :  { %v6974_v1 = vsel %vm6848_vm3, %v1302_v27, %v1544_v16  ;;  %v6980_v44 = vsel %vm6848_vm3, %v1308_v29, %v1548_v46  ;;  %v1329_v29 = vshll.u32 %v6562_v28, 16  ;;  %v7002_v46 = vcombine.low %v6538_v14, %v6538_v14 }
  0xc2   :  { %5739 = vmatmul.mubr.msk.bf16.gmra.mxu1 %vm260_vm0, %v6893_v30  ;;  %5803 = vmatmul.mubr.msk.bf16.gmra.mxu0 %vm260_vm0, %v6928_v19  ;;  %8974 = vst [vmem:[#allocation42_spill] sm:$0xff] %v6980_v44  ;;  %v1320_v16 = vor.u32 %v1319_v24, %v1315_v34  ;;  %v1327_v34 = vshrl.u32 %v6562_v28, 16 }
  0xc3   :  { %5742 = vmatprep.mubr.msk.bf16.mxu1 %vm260_vm0, %v6928_v19  ;;  %5806 = vmatprep.mubr.msk.bf16.mxu0 %vm260_vm0, %v6934_v10  ;;  %8976 = vst [vmem:[#allocation44_spill] sm:$0xff] %v7002_v46  ;;  %v1331_v24 = vrot.slane %v1329_v29, 1 }
  0xc4   :  { %5859 = vmatpush3.bf16.msra.mxu1 %v6194_v3  ;;  %5923 = vmatpush3.bf16.msra.mxu0 %v6195_v40  ;;  %v1313_v3 = vrot.slane %v1311_v9, 1  ;;  %v1550_v40 = vshll.u32 %v6955_v11, 16  ;;  %v1556_v9 = vrot.slane %v1554_v62, 1  ;;  %v1562_v62 = vshll.u32 %v7002_v46, 16 }
  0xc5   :  { %5860 = vmatprep.subr.bf16.mxu1 %v6202_v15  ;;  %5924 = vmatprep.subr.bf16.mxu0 %v6203_v17  ;;  %v1332_v46 = vor.u32 %v1331_v24, %v1327_v34 }
  0xc6   :  { %v1314_v63 = vor.u32 %v1313_v3, %v1309_v60  ;;  %v1552_v27 = vrot.slane %v1550_v40, 1  ;;  %v1321_v60 = vshrl.u32 %v6556_v25, 16  ;;  %v1564_v28 = vrot.slane %v1562_v62, 1 }
  0xc8   :  { %5861 = vmatpush3.bf16.msra.mxu1 %v6202_v15  ;;  %5925 = vmatpush3.bf16.msra.mxu0 %v6203_v17  ;;  %v1323_v15 = vshll.u32 %v6556_v25, 16  ;;  %v6997_v17 = vcombine.low %v6518_v7, %v6518_v7  ;;  %v7006_v52 = vsel %vm6848_vm3, %v1314_v63, %v1552_v27  ;;  %v7012_v7 = vsel %vm6848_vm3, %v1320_v16, %v1556_v9 }
  0xc9   :  { %5982 = vmatprep.subr.bf16.mxu1 %v6965_v58  ;;  %6046 = vmatprep.subr.bf16.mxu0 %v6970_v55  ;;  %8977 = vst [vmem:[#allocation45_spill] sm:$0xff] %v7006_v52  ;;  %8978 = vst [vmem:[#allocation46_spill] sm:$0xff] %v7012_v7  ;;  %v7031_v16 = vcombine.low %v6570_v31, %v6570_v31  ;;  %v7040_v25 = vcombine.low %v6594_v41, %v6594_v41 }
  0xca   :  { %5743 = vmatmul.mubr.msk.bf16.gmra.mxu1 %vm260_vm0, %v6934_v10  ;;  %5807 = vmatmul.mubr.msk.bf16.gmra.mxu0 %vm260_vm0, %v6974_v1  ;;  %8975 = vst [vmem:[#allocation43_spill] sm:$0xff] %v6997_v17  ;;  %v1325_v3 = vrot.slane %v1323_v15, 1  ;;  %v1558_v40 = vshll.u32 %v6997_v17, 16  ;;  %v1335_v15 = vshll.u32 %v6608_v47, 16  ;;  %v1341_v17 = vshll.u32 %v6614_v56, 16 }
  0xcb   :  { %5746 = vmatprep.mubr.msk.bf16.mxu1 %vm260_vm0, %v6974_v1  ;;  %5810 = vmatprep.mubr.msk.bf16.mxu0 %vm260_vm0, %v6980_v44  ;;  %8980 = vst [vmem:[#allocation48_spill] sm:$0xff] %v7031_v16  ;;  %8982 = vst [vmem:[#allocation50_spill] sm:$0xff] %v7040_v25  ;;  %v1566_v34 = vshll.u32 %v7031_v16, 16  ;;  %v7058_v41 = vsel %vm6848_vm3, %v1332_v46, %v1564_v28  ;;  %v1570_v11 = vshll.u32 %v7040_v25, 16 }
  0xcc   :  { %v1326_v63 = vor.u32 %v1325_v3, %v1321_v60  ;;  %v1560_v27 = vrot.slane %v1558_v40, 1  ;;  %v1333_v40 = vshrl.u32 %v6608_v47, 16  ;;  %8986 = vst [vmem:[#allocation54_spill] sm:$0xff] %v7058_v41  ;;  %v7073_v28 = vcombine.low %v6626_v61, %v6626_v61 }
  0xcd   :  { %v1568_v25 = vrot.slane %v1566_v34, 1 }
  0xce   :  { %v7048_v31 = vsel %vm6848_vm3, %v1326_v63, %v1560_v27  ;;  %8988 = vst [vmem:[#allocation56_spill] sm:$0xff] %v7073_v28  ;;  %v1574_v34 = vshll.u32 %v7073_v28, 16 }
  0xcf   :  { %8984 = vst [vmem:[#allocation52_spill] sm:$0xff] %v7048_v31 }
  0xd2   :  { %v7016_v14 = vpop.f32.mrf.mxu0  ;;  %v7018_v2 = vpop.f32.mrf.mxu1  ;;  %5747 = vmatmul.mubr.msk.bf16.gmra.mxu1 %vm260_vm0, %v6980_v44  ;;  %5811 = vmatmul.mubr.msk.bf16.gmra.mxu0 %vm260_vm0, %v7006_v52 }
  0xd3   :  { %8979 = vst [vmem:[#allocation47_spill] sm:$0xff] %v7018_v2  ;;  %5750 = vmatprep.mubr.msk.bf16.mxu1 %vm260_vm0, %v7006_v52  ;;  %5814 = vmatprep.mubr.msk.bf16.mxu0 %vm260_vm0, %v7012_v7  ;;  %v1337_v2 = vrot.slane %v1335_v15, 1  ;;  %v1347_v15 = vshll.u32 %v6652_v33, 16 }
  0xd4   :  { %v7033_v9 = vpop.f32.mrf.mxu0  ;;  %v7035_v29 = vpop.f32.mrf.mxu1 }
  0xd5   :  { %8981 = vst [vmem:[#allocation49_spill] sm:$0xff] %v7035_v29  ;;  %v1339_v29 = vshrl.u32 %v6614_v56, 16  ;;  %v1338_v46 = vor.u32 %v1337_v2, %v1333_v40  ;;  %v1359_v56 = vshll.u32 %v6765_v45, 16  ;;  %v1345_v2 = vshrl.u32 %v6652_v33, 16 }
  0xd6   :  { %v7042_v60 = vpop.f32.mrf.mxu0  ;;  %v7044_v3 = vpop.f32.mrf.mxu1  ;;  %v1349_v40 = vrot.slane %v1347_v15, 1  ;;  %v1363_v15 = vshrl.u32 %v6270_v8, 16 }
  0xd7   :  { %8983 = vst [vmem:[#allocation51_spill] sm:$0xff] %v7044_v3  ;;  %v1343_v3 = vrot.slane %v1341_v17, 1  ;;  %v7077_v17 = vcombine.low %v6757_v54, %v6757_v54  ;;  %v7091_v54 = vcombine.low %v6261_v5, %v6261_v5 }
  0xd8   :  { %v7052_v24 = vpop.f32.mrf.mxu0  ;;  %v7054_v62 = vpop.f32.mrf.mxu1 }
  0xd9   :  { %8985 = vst [vmem:[#allocation53_spill] sm:$0xff] %v7054_v62  ;;  %8989 = vst [vmem:[#allocation57_spill] sm:$0xff] %v7077_v17  ;;  %v1344_v61 = vor.u32 %v1343_v3, %v1339_v29  ;;  %v1365_v62 = vshll.u32 %v6270_v8, 16  ;;  %v1361_v29 = vrot.slane %v1359_v56, 1  ;;  %v1582_v3 = vshll.u32 %v7077_v17, 16 }
  0xda   :  { %v7062_v63 = vpop.f32.mrf.mxu0  ;;  %v7064_v27 = vpop.f32.mrf.mxu1  ;;  %5751 = vmatmul.mubr.msk.bf16.gmra.mxu1 %vm260_vm0, %v7012_v7  ;;  %5815 = vmatmul.mubr.msk.bf16.gmra.mxu0 %vm260_vm0, %v7048_v31  ;;  %8991 = vst [vmem:[#allocation59_spill] sm:$0xff] %v7091_v54  ;;  %v1586_v33 = vshll.u32 %v7091_v54, 16  ;;  %v1350_v56 = vor.u32 %v1349_v40, %v1345_v2  ;;  %v1576_v17 = vrot.slane %v1574_v34, 1  ;;  %v7130_v54 = vcombine.low %v6290_v12, %v6290_v12 }
  0xdb   :  { %8987 = vst [vmem:[#allocation55_spill] sm:$0xff] %v7064_v27  ;;  %5754 = vmatprep.mubr.msk.bf16.mxu1 %vm260_vm0, %v7048_v31  ;;  %5818 = vmatprep.mubr.msk.bf16.mxu0 %vm260_vm0, %v7058_v41  ;;  %v1572_v27 = vrot.slane %v1570_v11, 1  ;;  %v1357_v11 = vshrl.u32 %v6765_v45, 16  ;;  %v1367_v28 = vrot.slane %v1365_v62, 1  ;;  %v1377_v34 = vshll.u32 %v6327_v23, 16 }
  0xdc   :  { %v7084_v16 = vpop.f32.mrf.mxu0  ;;  %v7086_v47 = vpop.f32.mrf.mxu1  ;;  %8997 = vst [vmem:[#allocation65_spill] sm:$0xff] %v7130_v54  ;;  %v1588_v40 = vrot.slane %v1586_v33, 1  ;;  %v7147_v12 = vsel %vm6848_vm3, %v1350_v56, %v1576_v17 }
  0xdd   :  { %8990 = vst [vmem:[#allocation58_spill] sm:$0xff] %v7086_v47  ;;  %v7101_v47 = vsel %vm6848_vm3, %v1338_v46, %v1568_v25  ;;  %v1362_v62 = vor.u32 %v1361_v29, %v1357_v11  ;;  %v1368_v2 = vor.u32 %v1367_v28, %v1363_v15  ;;  %9001 = vst [vmem:[#allocation69_spill] sm:$0xff] %v7147_v12  ;;  %v1369_v28 = vshrl.u32 %v6321_v21, 16 }
  0xde   :  { %v7093_v31 = vpop.f32.mrf.mxu0  ;;  %v7095_v7 = vpop.f32.mrf.mxu1  ;;  %8993 = vst [vmem:[#allocation61_spill] sm:$0xff] %v7101_v47  ;;  %v1590_v15 = vshll.u32 %v7130_v54, 16 }
  0xdf   :  { %8992 = vst [vmem:[#allocation60_spill] sm:$0xff] %v7095_v7  ;;  %v7111_v7 = vsel %vm6848_vm3, %v1344_v61, %v1572_v27  ;;  %v1584_v27 = vrot.slane %v1582_v3, 1  ;;  %v1371_v61 = vshll.u32 %v6321_v21, 16  ;;  %v1389_v21 = vshll.u32 %v6391_v39, 16 }
  0xe0   :  { %v7105_v5 = vpop.f32.mrf.mxu0  ;;  %v7107_v0 = vpop.f32.mrf.mxu1  ;;  %8995 = vst [vmem:[#allocation63_spill] sm:$0xff] %v7111_v7 }
  0xe1   :  { %8994 = vst [vmem:[#allocation62_spill] sm:$0xff] %v7107_v0  ;;  %v1696_v3 = vsel %vm6848_vm3, %v1362_v62, %v1584_v27  ;;  %v1373_v33 = vrot.slane %v1371_v61, 1  ;;  %v1697_v0 = vsel %vm6848_vm3, %v1368_v2, %v1588_v40  ;;  %v1592_v61 = vrot.slane %v1590_v15, 1 }
  0xe2   :  { %v7115_v25 = vpop.f32.mrf.mxu0  ;;  %v7117_v46 = vpop.f32.mrf.mxu1  ;;  %5755 = vmatmul.mubr.msk.bf16.gmra.mxu1 %vm260_vm0, %v7058_v41  ;;  %5819 = vmatmul.mubr.msk.bf16.gmra.mxu0 %vm260_vm0, %v7101_v47  ;;  %v1383_v2 = vshll.u32 %v6385_v37, 16  ;;  %v7174_v40 = vcombine.low %v6340_v26, %v6340_v26  ;;  %v1381_v15 = vshrl.u32 %v6385_v37, 16  ;;  %v1401_v37 = vshll.u32 %v6449_v53, 16 }
  0xe3   :  { %8996 = vst [vmem:[#allocation64_spill] sm:$0xff] %v7117_v46  ;;  %5758 = vmatprep.mubr.msk.bf16.mxu1 %vm260_vm0, %v7101_v47  ;;  %5822 = vmatprep.mubr.msk.bf16.mxu0 %vm260_vm0, %v7111_v7  ;;  %v7139_v46 = vcombine.low %v6312_v18, %v6312_v18  ;;  %v1379_v47 = vrot.slane %v1377_v34, 1  ;;  %v1374_v27 = vor.u32 %v1373_v33, %v1369_v28 }
  0xe4   :  { %v7132_v8 = vpop.f32.mrf.mxu0  ;;  %v7134_v45 = vpop.f32.mrf.mxu1  ;;  %9004 = vst [vmem:[#allocation72_spill] sm:$0xff] %v7174_v40 }
  0xe5   :  { %8998 = vst [vmem:[#allocation66_spill] sm:$0xff] %v7134_v45  ;;  %8999 = vst [vmem:[#allocation67_spill] sm:$0xff] %v7139_v46  ;;  %v1594_v17 = vshll.u32 %v7139_v46, 16  ;;  %v7191_v26 = vsel %vm6848_vm3, %v1374_v27, %v1592_v61 }
  0xe6   :  { %v7141_v11 = vpop.f32.mrf.mxu0  ;;  %v7143_v29 = vpop.f32.mrf.mxu1  ;;  %9008 = vst [vmem:[#allocation76_spill] sm:$0xff] %v7191_v26 }
  0xe7   :  { %9000 = vst [vmem:[#allocation68_spill] sm:$0xff] %v7143_v29  ;;  %v1375_v29 = vshrl.u32 %v6327_v23, 16  ;;  %v1596_v54 = vrot.slane %v1594_v17, 1 }
  0xe8   :  { %v7153_v45 = vpop.f32.mrf.mxu0  ;;  %v7155_v18 = vpop.f32.mrf.mxu1 }
  0xe9   :  { %9002 = vst [vmem:[#allocation70_spill] sm:$0xff] %v7155_v18  ;;  %v1380_v23 = vor.u32 %v1379_v47, %v1375_v29  ;;  %v1598_v47 = vshll.u32 %v7174_v40, 16 }
  0xea   :  { %v7161_v56 = vpop.f32.mrf.mxu0  ;;  %v7163_v62 = vpop.f32.mrf.mxu1  ;;  %5759 = vmatmul.mubr.msk.bf16.gmra.mxu1 %vm260_vm0, %v7111_v7  ;;  %5823 = vmatmul.mubr.msk.bf16.gmra.mxu0 %vm260_vm0, %v7147_v12 }
  0xeb   :  { %9003 = vst [vmem:[#allocation71_spill] sm:$0xff] %v7163_v62  ;;  %5762 = vmatprep.mubr.msk.bf16.mxu1 %vm260_vm0, %v1696_v3  ;;  %5826 = vmatprep.mubr.msk.bf16.mxu0 %vm260_vm0, %v1697_v0  ;;  %v7183_v3 = vcombine.low %v6366_v32, %v6366_v32  ;;  %v1385_v62 = vrot.slane %v1383_v2, 1  ;;  %v7201_v32 = vsel %vm6848_vm3, %v1380_v23, %v1596_v54  ;;  %v1600_v54 = vrot.slane %v1598_v47, 1 }
  0xec   :  { %v7176_v34 = vpop.f32.mrf.mxu0  ;;  %v7178_v46 = vpop.f32.mrf.mxu1  ;;  %9010 = vst [vmem:[#allocation78_spill] sm:$0xff] %v7201_v32  ;;  %v7219_v2 = vcombine.low %v6404_v42, %v6404_v42  ;;  %v1393_v47 = vshrl.u32 %v6443_v51, 16 }
  0xed   :  { %9005 = vst [vmem:[#allocation73_spill] sm:$0xff] %v7178_v46  ;;  %9006 = vst [vmem:[#allocation74_spill] sm:$0xff] %v7183_v3  ;;  %v1387_v46 = vshrl.u32 %v6391_v39, 16  ;;  %v1602_v18 = vshll.u32 %v7183_v3, 16  ;;  %v1386_v23 = vor.u32 %v1385_v62, %v1381_v15 }
  0xee   :  { %v7185_v28 = vpop.f32.mrf.mxu0  ;;  %v7187_v33 = vpop.f32.mrf.mxu1  ;;  %9012 = vst [vmem:[#allocation80_spill] sm:$0xff] %v7219_v2 }
  0xef   :  { %9007 = vst [vmem:[#allocation75_spill] sm:$0xff] %v7187_v33  ;;  %v1391_v33 = vrot.slane %v1389_v21, 1  ;;  %v1395_v21 = vshll.u32 %v6443_v51, 16  ;;  %v1604_v40 = vrot.slane %v1602_v18, 1  ;;  %v7236_v42 = vsel %vm6848_vm3, %v1386_v23, %v1600_v54 }
  0xf0   :  { %v7195_v29 = vpop.f32.mrf.mxu0  ;;  %v7197_v17 = vpop.f32.mrf.mxu1  ;;  %9016 = vst [vmem:[#allocation84_spill] sm:$0xff] %v7236_v42 }
  0xf1   :  { %9009 = vst [vmem:[#allocation77_spill] sm:$0xff] %v7197_v17  ;;  %v1392_v39 = vor.u32 %v1391_v33, %v1387_v46  ;;  %v1397_v17 = vrot.slane %v1395_v21, 1  ;;  %v1606_v46 = vshll.u32 %v7219_v2, 16 }
  0xf2   :  { %v7205_v27 = vpop.f32.mrf.mxu0  ;;  %v7207_v61 = vpop.f32.mrf.mxu1  ;;  %5763 = vmatmul.mubr.msk.bf16.gmra.mxu1 %vm260_vm0, %v1697_v0  ;;  %5827 = vmatmul.mubr.msk.bf16.gmra.mxu0 %vm260_vm0, %v7191_v26 }
  0xf3   :  { %9011 = vst [vmem:[#allocation79_spill] sm:$0xff] %v7207_v61  ;;  %5766 = vmatprep.mubr.msk.bf16.mxu1 %vm260_vm0, %v7191_v26  ;;  %5830 = vmatprep.mubr.msk.bf16.mxu0 %vm260_vm0, %v7201_v32  ;;  %v7228_v61 = vcombine.low %v6434_v48, %v6434_v48  ;;  %v7246_v48 = vsel %vm6848_vm3, %v1392_v39, %v1604_v40  ;;  %v9020_v40 = vld [vmem:[#allocation14_spill] sm:$0xff] }
  0xf4   :  { %v7221_v3 = vpop.f32.mrf.mxu0  ;;  %v7223_v0 = vpop.f32.mrf.mxu1  ;;  %9018 = vst [vmem:[#allocation86_spill] sm:$0xff] %v7246_v48  ;;  %v1398_v39 = vor.u32 %v1397_v17, %v1393_v47  ;;  %v1407_v21 = vshll.u32 %v9020_v40, 16 }
  0xf5   :  { %9013 = vst [vmem:[#allocation81_spill] sm:$0xff] %v7223_v0  ;;  %9014 = vst [vmem:[#allocation82_spill] sm:$0xff] %v7228_v61  ;;  %v1399_v0 = vshrl.u32 %v6449_v53, 16  ;;  %v1610_v26 = vshll.u32 %v7228_v61, 16  ;;  %v9021_v61 = vld [vmem:[#allocation11_spill] sm:$0xff] }
  0xf6   :  { %v7230_v62 = vpop.f32.mrf.mxu0  ;;  %v7232_v15 = vpop.f32.mrf.mxu1  ;;  %v7265_v53 = vcombine.low %v9021_v61, %v9021_v61  ;;  %v1409_v41 = vrot.slane %v1407_v21, 1 }
  0xf7   :  { %9015 = vst [vmem:[#allocation83_spill] sm:$0xff] %v7232_v15  ;;  %v1403_v15 = vrot.slane %v1401_v37, 1  ;;  %v1608_v37 = vrot.slane %v1606_v46, 1  ;;  %v1405_v46 = vshrl.u32 %v9020_v40, 16 }
  0xf8   :  { %v7240_v18 = vpop.f32.mrf.mxu0  ;;  %v7242_v33 = vpop.f32.mrf.mxu1  ;;  %9022 = vst [vmem:[#allocation11_spill] sm:$0xff] %v7265_v53 }
  0xf9   :  { %9017 = vst [vmem:[#allocation85_spill] sm:$0xff] %v7242_v33  ;;  %v1612_v33 = vrot.slane %v1610_v26, 1  ;;  %v7282_v61 = vsel %vm6848_vm3, %v1398_v39, %v1608_v37 }
  0xfa   :  { %v7250_v23 = vpop.f32.mrf.mxu0  ;;  %v7252_v54 = vpop.f32.mrf.mxu1  ;;  %5767 = vmatmul.mubr.msk.bf16.gmra.mxu1 %vm260_vm0, %v7201_v32  ;;  %5831 = vmatmul.mubr.msk.bf16.gmra.mxu0 %vm260_vm0, %v7236_v42  ;;  %v9025_v32 = vld [vmem:[#allocation16_spill] sm:$0xff]  ;;  %9030 = vst [vmem:[#allocation92_spill] sm:$0xff] %v7282_v61 }
  0xfb   :  { %9019 = vst [vmem:[#allocation87_spill] sm:$0xff] %v7252_v54  ;;  %5770 = vmatprep.mubr.msk.bf16.mxu1 %vm260_vm0, %v7236_v42  ;;  %5834 = vmatprep.mubr.msk.bf16.mxu0 %vm260_vm0, %v7246_v48  ;;  %v1404_v54 = vor.u32 %v1403_v15, %v1399_v0  ;;  %v1413_v12 = vshll.u32 %v9025_v32, 16  ;;  %v9026_v42 = vld [vmem:[#allocation12_spill] sm:$0xff]  ;;  %v1614_v0 = vshll.u32 %v7265_v53, 16 }
  0xfc   :  { %v7267_v2 = vpop.f32.mrf.mxu0  ;;  %v7269_v51 = vpop.f32.mrf.mxu1  ;;  %v7274_v7 = vcombine.low %v9026_v42, %v9026_v42 }
  0xfd   :  { %9023 = vst [vmem:[#allocation88_spill] sm:$0xff] %v7267_v2  ;;  %9024 = vst [vmem:[#allocation89_spill] sm:$0xff] %v7269_v51  ;;  %v7292_v42 = vsel %vm6848_vm3, %v1404_v54, %v1612_v33  ;;  %v1411_v51 = vshrl.u32 %v9025_v32, 16  ;;  %v1410_v33 = vor.u32 %v1409_v41, %v1405_v46  ;;  %v9036_v54 = vld [vmem:[#allocation20_spill] sm:$0xff] }
  0xfe   :  { %9027 = vst [vmem:[#allocation12_spill] sm:$0xff] %v7274_v7  ;;  %v7276_v17 = vpop.f32.mrf.mxu0  ;;  %v7278_v47 = vpop.f32.mrf.mxu1  ;;  %9033 = vst [vmem:[#allocation95_spill] sm:$0xff] %v7292_v42  ;;  %v1618_v52 = vshll.u32 %v7274_v7, 16  ;;  %v1419_v21 = vshll.u32 %v9036_v54, 16  ;;  %v9037_v7 = vld [vmem:[#allocation17_spill] sm:$0xff] }
  0xff   :  { %9028 = vst [vmem:[#allocation90_spill] sm:$0xff] %v7276_v17  ;;  %9029 = vst [vmem:[#allocation91_spill] sm:$0xff] %v7278_v47  ;;  %v1415_v47 = vrot.slane %v1413_v12, 1  ;;  %v1616_v12 = vrot.slane %v1614_v0, 1  ;;  %v7311_v32 = vcombine.low %v9037_v7, %v9037_v7  ;;  %v1417_v0 = vshrl.u32 %v9036_v54, 16  ;;  %v9050_v54 = vld [vmem:[#allocation23_spill] sm:$0xff] }
 0x100   :  { %v7286_v26 = vpop.f32.mrf.mxu0  ;;  %v7288_v15 = vpop.f32.mrf.mxu1  ;;  %v9052_v17 = vld [vmem:[#allocation24_spill] sm:$0xff] }
 0x101   :  { %9031 = vst [vmem:[#allocation93_spill] sm:$0xff] %v7286_v26  ;;  %9032 = vst [vmem:[#allocation94_spill] sm:$0xff] %v7288_v15  ;;  %v1620_v15 = vrot.slane %v1618_v52, 1  ;;  %v7328_v7 = vsel %vm6848_vm3, %v1410_v33, %v1616_v12  ;;  %v1437_v26 = vshll.u32 %v6617_v59, 16 }
 0x102   :  { %v7296_v39 = vpop.f32.mrf.mxu0  ;;  %v7298_v37 = vpop.f32.mrf.mxu1  ;;  %5771 = vmatmul.mubr.msk.bf16.gmra.mxu1 %vm260_vm0, %v7246_v48  ;;  %5835 = vmatmul.mubr.msk.bf16.gmra.mxu0 %vm260_vm0, %v7282_v61  ;;  %9038 = vst [vmem:[#allocation17_spill] sm:$0xff] %v7311_v32  ;;  %v9041_v48 = vld [vmem:[#allocation22_spill] sm:$0xff]  ;;  %9046 = vst [vmem:[#allocation102_spill] sm:$0xff] %v7328_v7 }
 0x103   :  { %9034 = vst [vmem:[#allocation96_spill] sm:$0xff] %v7296_v39  ;;  %9035 = vst [vmem:[#allocation97_spill] sm:$0xff] %v7298_v37  ;;  %5774 = vmatprep.mubr.msk.bf16.mxu1 %vm260_vm0, %v7282_v61  ;;  %5838 = vmatprep.mubr.msk.bf16.mxu0 %vm260_vm0, %v7292_v42  ;;  %v1416_v37 = vor.u32 %v1415_v47, %v1411_v51  ;;  %v1425_v39 = vshll.u32 %v9041_v48, 16  ;;  %v9042_v61 = vld [vmem:[#allocation18_spill] sm:$0xff]  ;;  %v1622_v51 = vshll.u32 %v7311_v32, 16 }
 0x104   :  { %v7313_v53 = vpop.f32.mrf.mxu0  ;;  %v7315_v40 = vpop.f32.mrf.mxu1  ;;  %v7320_v44 = vcombine.low %v9042_v61, %v9042_v61 }
 0x105   :  { %9039 = vst [vmem:[#allocation98_spill] sm:$0xff] %v7313_v53  ;;  %9040 = vst [vmem:[#allocation99_spill] sm:$0xff] %v7315_v40  ;;  %v1421_v53 = vrot.slane %v1419_v21, 1  ;;  %v7338_v61 = vsel %vm6848_vm3, %v1416_v37, %v1620_v15  ;;  %v1423_v40 = vshrl.u32 %v9041_v48, 16  ;;  %v9049_v21 = vld [vmem:[#allocation26_spill] sm:$0xff]  ;;  %v1624_v37 = vrot.slane %v1622_v51, 1 }
 0x106   :  { %9043 = vst [vmem:[#allocation18_spill] sm:$0xff] %v7320_v44  ;;  %v7322_v41 = vpop.f32.mrf.mxu0  ;;  %v7324_v46 = vpop.f32.mrf.mxu1  ;;  %v1431_v32 = vshll.u32 %v9049_v21, 16  ;;  %v1429_v13 = vshrl.u32 %v9049_v21, 16 }
 0x107   :  { %9044 = vst [vmem:[#allocation100_spill] sm:$0xff] %v7322_v41  ;;  %9045 = vst [vmem:[#allocation101_spill] sm:$0xff] %v7324_v46  ;;  %v1427_v46 = vrot.slane %v1425_v39, 1  ;;  %v1626_v41 = vshll.u32 %v7320_v44, 16  ;;  %v1422_v39 = vor.u32 %v1421_v53, %v1417_v0 }
 0x108   :  { %v7332_v52 = vpop.f32.mrf.mxu0  ;;  %v7334_v47 = vpop.f32.mrf.mxu1  ;;  %v1433_v53 = vrot.slane %v1431_v32, 1 }
 0x109   :  { %9047 = vst [vmem:[#allocation103_spill] sm:$0xff] %v7332_v52  ;;  %9048 = vst [vmem:[#allocation104_spill] sm:$0xff] %v7334_v47  ;;  %v7349_v47 = vcombine.low %v9050_v54, %v9050_v54  ;;  %v1628_v52 = vrot.slane %v1626_v41, 1  ;;  %v7359_v54 = vcombine.low %v9052_v17, %v9052_v17  ;;  %v7371_v41 = vsel %vm6848_vm3, %v1422_v39, %v1624_v37  ;;  %v9055_v37 = vld [vmem:[#allocation29_spill] sm:$0xff] }
 0x10a   :  { %v5608_v33 = vpop.f32.mrf.mxu1  ;;  %v5672_v12 = vpop.f32.mrf.mxu0  ;;  %5775 = vmatmul.mubr.msk.bf16.gmra.mxu1 %vm260_vm0, %v7292_v42  ;;  %5839 = vmatmul.mubr.msk.bf16.gmra.mxu0 %vm260_vm0, %v7328_v7  ;;  %v1428_v42 = vor.u32 %v1427_v46, %v1423_v40  ;;  %v1434_v39 = vor.u32 %v1433_v53, %v1429_v13 }
 0x10b   :  { %9051 = vst [vmem:[#allocation26_spill] sm:$0xff] %v7349_v47  ;;  %v685_v15 = vadd.f32 %v5608_v33, %v7016_v14  ;;  %5778 = vmatprep.mubr.msk.bf16.mxu1 %vm260_vm0, %v7328_v7  ;;  %5842 = vmatprep.mubr.msk.bf16.mxu0 %vm260_vm0, %v7338_v61  ;;  %9053 = vst [vmem:[#allocation23_spill] sm:$0xff] %v7359_v54  ;;  %v1630_v0 = vshll.u32 %v7349_v47, 16  ;;  %v1634_v32 = vshll.u32 %v7359_v54, 16 }
 0x10c   :  { %v676_v44 = vpop.f32.mrf.mxu1  ;;  %v982_v48 = vpop.f32.mrf.mxu0 }
 0x10d   :  { %v7361_v2 = vadd.f32 %v5672_v12, %v685_v15  ;;  %v677_v14 = vadd.f32 %v676_v44, %v7033_v9  ;;  %v7375_v44 = vsel %vm6848_vm3, %v1428_v42, %v1628_v52  ;;  %v1435_v9 = vshrl.u32 %v6617_v59, 16 }
 0x10e   :  { %v5609_v33 = vpop.f32.mrf.mxu1  ;;  %v5673_v7 = vpop.f32.mrf.mxu0  ;;  %v1439_v12 = vrot.slane %v1437_v26, 1  ;;  %v1632_v42 = vrot.slane %v1630_v0, 1  ;;  %v1636_v53 = vrot.slane %v1634_v32, 1 }
 0x10f   :  { %v7366_v51 = vadd.f32 %v982_v48, %v677_v14  ;;  %v688_v40 = vadd.f32 %v5609_v33, %v7042_v60  ;;  %v7396_v33 = vcombine.low %v9055_v37, %v9055_v37 }
 0x110   :  { %v679_v17 = vpop.f32.mrf.mxu1  ;;  %v985_v46 = vpop.f32.mrf.mxu0  ;;  %v1440_v13 = vor.u32 %v1439_v12, %v1435_v9 }
 0x111   :  { %v7379_v15 = vadd.f32 %v5673_v7, %v688_v40  ;;  %v680_v48 = vadd.f32 %v679_v17, %v7052_v24  ;;  %v9054_v24 = vld [vmem:[#allocation31_spill] sm:$0xff]  ;;  %9056 = vst [vmem:[#allocation24_spill] sm:$0xff] %v7396_v33  ;;  %v1638_v9 = vshll.u32 %v7396_v33, 16 }
 0x112   :  { %v5612_v60 = vpop.f32.mrf.mxu1  ;;  %v5676_v14 = vpop.f32.mrf.mxu0  ;;  %5779 = vmatmul.mubr.msk.bf16.gmra.mxu1 %vm260_vm0, %v7338_v61  ;;  %5843 = vmatmul.mubr.msk.bf16.gmra.mxu0 %vm260_vm0, %v7371_v41  ;;  %v1443_v7 = vshll.u32 %v9054_v24, 16  ;;  %v1441_v54 = vshrl.u32 %v9054_v24, 16  ;;  %v9090_v33 = vld [vmem:[#allocation51_spill] sm:$0xff] }
 0x113   :  { %v7386_v52 = vadd.f32 %v985_v46, %v680_v48  ;;  %v701_v26 = vadd.f32 %v5612_v60, %v7062_v63  ;;  %5782 = vmatprep.mubr.msk.bf16.mxu1 %vm260_vm0, %v7371_v41  ;;  %5846 = vmatprep.mubr.msk.bf16.mxu0 %vm260_vm0, %v7375_v44  ;;  %v7403_v60 = vsel %vm6848_vm3, %v1434_v39, %v1632_v42 }
 0x114   :  { %v692_v40 = vpop.f32.mrf.mxu1  ;;  %v998_v17 = vpop.f32.mrf.mxu0  ;;  %v1445_v47 = vrot.slane %v1443_v7, 1 }
 0x115   :  { %v7398_v0 = vadd.f32 %v5676_v14, %v701_v26  ;;  %v693_v63 = vadd.f32 %v692_v40, %v7084_v16  ;;  %v7412_v16 = vsel %vm6848_vm3, %v1440_v13, %v1636_v53  ;;  %v9057_v53 = vld [vmem:[#allocation32_spill] sm:$0xff] }
 0x116   :  { %v5613_v46 = vpop.f32.mrf.mxu1  ;;  %v5677_v48 = vpop.f32.mrf.mxu0  ;;  %v1446_v40 = vor.u32 %v1445_v47, %v1441_v54 }
 0x117   :  { %v7406_v59 = vadd.f32 %v998_v17, %v693_v63  ;;  %v704_v37 = vadd.f32 %v5613_v46, %v7093_v31  ;;  %v2846_v63 = vrot.slane %v9057_v53, 1  ;;  %v9058_v46 = vld [vmem:[#allocation35_spill] sm:$0xff] }
 0x118   :  { %v695_v12 = vpop.f32.mrf.mxu1  ;;  %v1001_v32 = vpop.f32.mrf.mxu0 }
 0x119   :  { %v7414_v14 = vadd.f32 %v5677_v48, %v704_v37  ;;  %v696_v39 = vadd.f32 %v695_v12, %v7105_v5  ;;  %v1640_v5 = vrot.slane %v1638_v9, 1  ;;  %v2878_v48 = vrot.slane %v9058_v46, 1 }
 0x11a   :  { %v5616_v42 = vpop.f32.mrf.mxu1  ;;  %v5680_v26 = vpop.f32.mrf.mxu0  ;;  %5783 = vmatmul.mubr.msk.bf16.gmra.mxu1 %vm260_vm0, %v7375_v44  ;;  %5847 = vmatmul.mubr.msk.bf16.gmra.mxu0 %vm260_vm0, %v7403_v60 }
 0x11b   :  { %v7421_v31 = vadd.f32 %v1001_v32, %v696_v39  ;;  %v717_v7 = vadd.f32 %v5616_v42, %v7115_v25  ;;  %5786 = vmatprep.mubr.msk.bf16.mxu1 %vm260_vm0, %v7403_v60  ;;  %5850 = vmatprep.mubr.msk.bf16.mxu0 %vm260_vm0, %v7412_v16  ;;  %v7438_v47 = vsel %vm6848_vm3, %v1446_v40, %v1640_v5 }
 0x11c   :  { %v708_v17 = vpop.f32.mrf.mxu1  ;;  %v1014_v13 = vpop.f32.mrf.mxu0  ;;  %v2913_v53 = vsel %vm2910_vm4, %v2846_v63, %v2878_v48 }
 0x11d   :  { %v7430_v37 = vadd.f32 %v5680_v26, %v717_v7  ;;  %v709_v12 = vadd.f32 %v708_v17, %v7132_v8 }
 0x11e   :  { %v5617_v25 = vpop.f32.mrf.mxu1  ;;  %v5681_v32 = vpop.f32.mrf.mxu0 }
 0x11f   :  { %v7433_v39 = vadd.f32 %v1014_v13, %v709_v12  ;;  %v720_v42 = vadd.f32 %v5617_v25, %v7141_v11  ;;  %v9059_v11 = vld [vmem:[#allocation36_spill] sm:$0xff] }
 0x120   :  { %v711_v54 = vpop.f32.mrf.mxu1  ;;  %v1017_v9 = vpop.f32.mrf.mxu0  ;;  %v2879_v17 = vrot.slane %v9059_v11, 1 }
 0x121   :  { %v7441_v46 = vadd.f32 %v5681_v32, %v720_v42  ;;  %v712_v26 = vadd.f32 %v711_v54, %v7153_v45  ;;  %v9060_v45 = vld [vmem:[#allocation2_spill] sm:$0xff]  ;;  %v2848_v32 = vrot.slane %v6318_v20, 1  ;;  %v2880_v42 = vrot.slane %v6846_v6, 1  ;;  %v6212_v6 = vld [vmem:[%s8821_s1 + $0xb0] sm:$0xff]  }
 0x122   :  { %v5620_v8 = vpop.f32.mrf.mxu1  ;;  %v5684_v7 = vpop.f32.mrf.mxu0  ;;  %5787 = vmatmul.mubr.msk.bf16.gmra.mxu1 %vm260_vm0, %v7412_v16  ;;  %5851 = vmatmul.mubr.msk.bf16.gmra.mxu0 %vm260_vm0, %v7438_v47  ;;  %v2847_v13 = vrot.slane %v9060_v45, 1  ;;  %v6213_v20 = vld [vmem:[%s8821_s1 + $0x110] sm:$0xff]   ;;  %v2849_v45 = vrot.slane %v6324_v22, 1  ;;  %v6215_v22 = vld [vmem:[%s8821_s1 + $0x108] sm:$0xff]  }
 0x123   :  { %v7449_v40 = vadd.f32 %v1017_v9, %v712_v26  ;;  %v733_v5 = vadd.f32 %v5620_v8, %v7161_v56  ;;  %5862 = vmatprep.mubr.msk.bf16.mxu1 %vm260_vm0, %v6885_v57  ;;  %5926 = vmatprep.mubr.msk.bf16.mxu0 %vm260_vm0, %v2913_v53 }
 0x124   :  { %v724_v63 = vpop.f32.mrf.mxu1  ;;  %v1030_v48 = vpop.f32.mrf.mxu0  ;;  %v7465_v53 = vsel %vm2910_vm4, %v2847_v13, %v2879_v17  ;;  %v2881_v13 = vrot.slane %v6855_v4, 1 }
 0x125   :  { %v7456_v12 = vadd.f32 %v5684_v7, %v733_v5  ;;  %v725_v25 = vadd.f32 %v724_v63, %v7176_v34  ;;  %v7471_v34 = vsel %vm2910_vm4, %v2848_v32, %v2880_v42 }
 0x126   :  { %v5621_v54 = vpop.f32.mrf.mxu1  ;;  %v5685_v9 = vpop.f32.mrf.mxu0 }
 0x127   :  { %v7461_v56 = vadd.f32 %v1030_v48, %v725_v25  ;;  %v736_v57 = vadd.f32 %v5621_v54, %v7185_v28 }
 0x128   :  { %v727_v26 = vpop.f32.mrf.mxu1  ;;  %v1033_v8 = vpop.f32.mrf.mxu0 }
 0x129   :  { %v7467_v11 = vadd.f32 %v5685_v9, %v736_v57  ;;  %v728_v7 = vadd.f32 %v727_v26, %v7195_v29  ;;  %v6217_v26 = vld [vmem:[%s8821_s1 + $0x100] sm:$0xff]  }
 0x12a   :  { %v5624_v28 = vpop.f32.mrf.mxu1  ;;  %v5688_v17 = vpop.f32.mrf.mxu0  ;;  %5863 = vmatmul.mubr.msk.bf16.vlgmr.msra.gmra.mxu1 %vm260_vm0, %v6893_v30  ;;  %5927 = vmatmul.mubr.msk.bf16.vlgmr.msra.gmra.mxu0 %vm260_vm0, %v7465_v53  ;;  %v2850_v30 = vrot.slane %v6382_v36, 1 }
 0x12b   :  { %v7483_v29 = vadd.f32 %v1033_v8, %v728_v7  ;;  %v749_v5 = vadd.f32 %v5624_v28, %v7205_v27  ;;  %5983 = vmatpush3.bf16.msra.mxu1 %v6965_v58  ;;  %6047 = vmatpush3.bf16.msra.mxu0 %v6970_v55  ;;  %v2882_v27 = vrot.slane %v6876_v49, 1  ;;  %v6214_v58 = vld [vmem:[%s8821_s1 + $0xa8] sm:$0xff]   ;;  %v7509_v49 = vsel %vm2910_vm4, %v2849_v45, %v2881_v13  ;;  %v9061_v45 = vld [vmem:[#allocation38_spill] sm:$0xff] }
 0x12c   :  { %v740_v63 = vpop.f32.mrf.mxu1  ;;  %v1046_v48 = vpop.f32.mrf.mxu0  ;;  %5866 = vmatprep.mubr.msk.bf16.mxu1 %vm260_vm0, %v6928_v19  ;;  %5930 = vmatprep.mubr.msk.bf16.mxu0 %vm260_vm0, %v7471_v34  ;;  %v2883_v28 = vrot.slane %v6881_v43, 1  ;;  %v2884_v13 = vrot.slane %v9061_v45, 1  ;;  %v9070_v45 = vld [vmem:[#allocation13_spill] sm:$0xff] }
 0x12d   :  { %v7502_v4 = vadd.f32 %v5688_v17, %v749_v5  ;;  %v741_v55 = vadd.f32 %v740_v63, %v7221_v3  ;;  %5984 = vmatprep.subr.bf16.mxu1 %v6212_v6  ;;  %6048 = vmatprep.subr.bf16.mxu0 %v6213_v20  ;;  %v7512_v9 = vsel %vm2910_vm4, %v2850_v30, %v2882_v27 }
 0x12e   :  { %v5625_v19 = vpop.f32.mrf.mxu1  ;;  %v5689_v25 = vpop.f32.mrf.mxu0 }
 0x12f   :  { %v7505_v32 = vadd.f32 %v1046_v48, %v741_v55  ;;  %v752_v36 = vadd.f32 %v5625_v19, %v7230_v62  ;;  %5985 = vmatpush3.bf16.msra.mxu1 %v6212_v6  ;;  %6049 = vmatpush3.bf16.msra.mxu0 %v6213_v20  ;;  %v6216_v62 = vld [vmem:[%s8821_s1 + $0xa0] sm:$0xff]   ;;  %v2851_v20 = vrot.slane %v6388_v38, 1 }
 0x130   :  { %v743_v42 = vpop.f32.mrf.mxu1  ;;  %v1049_v54 = vpop.f32.mrf.mxu0  ;;  %5986 = vmatprep.subr.bf16.mxu1 %v6214_v58  ;;  %6050 = vmatprep.subr.bf16.mxu0 %v6215_v22  ;;  %v9063_v38 = vld [vmem:[#allocation90_spill] sm:$0xff] }
 0x131   :  { %v7514_v3 = vadd.f32 %v5689_v25, %v752_v36  ;;  %v744_v57 = vadd.f32 %v743_v42, %v7240_v18  ;;  %v7545_v55 = vsel %vm2910_vm4, %v2851_v20, %v2883_v28  ;;  %v9064_v25 = vld [vmem:[#allocation93_spill] sm:$0xff]  ;;  %v9069_v28 = vld [vmem:[#allocation39_spill] sm:$0xff] }
 0x132   :  { %v5628_v8 = vpop.f32.mrf.mxu1  ;;  %v5692_v7 = vpop.f32.mrf.mxu0  ;;  %5867 = vmatmul.mubr.msk.bf16.gmra.mxu1 %vm260_vm0, %v6934_v10  ;;  %5931 = vmatmul.mubr.msk.bf16.gmra.mxu0 %vm260_vm0, %v7509_v49  ;;  %v2852_v10 = vrot.slane %v6440_v50, 1  ;;  %v9067_v20 = vld [vmem:[#allocation45_spill] sm:$0xff] }
 0x133   :  { %v7527_v6 = vadd.f32 %v1049_v54, %v744_v57  ;;  %v765_v18 = vadd.f32 %v5628_v8, %v7250_v23  ;;  %5870 = vmatprep.mubr.msk.bf16.mxu1 %vm260_vm0, %v6974_v1  ;;  %5934 = vmatprep.mubr.msk.bf16.mxu0 %vm260_vm0, %v7512_v9  ;;  %v9062_v23 = vld [vmem:[#allocation88_spill] sm:$0xff]  ;;  %v9065_v57 = vld [vmem:[#allocation42_spill] sm:$0xff] }
 0x134   :  { %v756_v17 = vpop.f32.mrf.mxu1  ;;  %v1062_v5 = vpop.f32.mrf.mxu0  ;;  %5987 = vmatpush3.bf16.msra.mxu1 %v6214_v58  ;;  %6051 = vmatpush3.bf16.msra.mxu0 %v6215_v22  ;;  %v7548_v58 = vsel %vm2910_vm4, %v2852_v10, %v2884_v13  ;;  %v2854_v13 = vrot.slane %v9070_v45, 1  ;;  %v9079_v45 = vld [vmem:[#allocation46_spill] sm:$0xff] }
 0x135   :  { %v7538_v63 = vadd.f32 %v5692_v7, %v765_v18  ;;  %v757_v48 = vadd.f32 %v756_v17, %v9062_v23  ;;  %5988 = vmatprep.subr.bf16.mxu1 %v6216_v62  ;;  %6052 = vmatprep.subr.bf16.mxu0 %v6217_v26  ;;  %v9066_v7 = vld [vmem:[#allocation96_spill] sm:$0xff]  ;;  %v2885_v17 = vrot.slane %v9069_v28, 1 }
 0x136   :  { %v5629_v1 = vpop.f32.mrf.mxu1  ;;  %v5693_v30 = vpop.f32.mrf.mxu0  ;;  %v9071_v23 = vld [vmem:[#allocation40_spill] sm:$0xff] }
 0x137   :  { %v7541_v27 = vadd.f32 %v1062_v5, %v757_v48  ;;  %v768_v43 = vadd.f32 %v5629_v1, %v9063_v38  ;;  %v2886_v48 = vrot.slane %v9071_v23, 1  ;;  %v9082_v23 = vld [vmem:[#allocation52_spill] sm:$0xff] }
 0x138   :  { %v759_v50 = vpop.f32.mrf.mxu1  ;;  %v1065_v19 = vpop.f32.mrf.mxu0  ;;  %5989 = vmatpush3.bf16.msra.mxu1 %v6216_v62  ;;  %6053 = vmatpush3.bf16.msra.mxu0 %v6217_v26  ;;  %v9068_v62 = vld [vmem:[#allocation9_spill] sm:$0xff] }
 0x139   :  { %v7550_v22 = vadd.f32 %v5693_v30, %v768_v43  ;;  %v760_v36 = vadd.f32 %v759_v50, %v9064_v25  ;;  %v2853_v26 = vrot.slane %v9068_v62, 1  ;;  %v9073_v30 = vld [vmem:[#allocation98_spill] sm:$0xff]  ;;  %v9075_v25 = vld [vmem:[#allocation100_spill] sm:$0xff] }
 0x13a   :  { %v5632_v42 = vpop.f32.mrf.mxu1  ;;  %v5696_v54 = vpop.f32.mrf.mxu0  ;;  %5871 = vmatmul.mubr.msk.bf16.gmra.mxu1 %vm260_vm0, %v9065_v57  ;;  %5935 = vmatmul.mubr.msk.bf16.gmra.mxu0 %vm260_vm0, %v7545_v55 }
 0x13b   :  { %v7557_v8 = vadd.f32 %v1065_v19, %v760_v36  ;;  %v781_v18 = vadd.f32 %v5632_v42, %v9066_v7  ;;  %5874 = vmatprep.mubr.msk.bf16.mxu1 %vm260_vm0, %v9067_v20  ;;  %5938 = vmatprep.mubr.msk.bf16.mxu0 %vm260_vm0, %v7548_v58  ;;  %v7575_v42 = vsel %vm2910_vm4, %v2853_v26, %v2885_v17  ;;  %v9081_v26 = vld [vmem:[#allocation47_spill] sm:$0xff] }
 0x13c   :  { %v772_v5 = vpop.f32.mrf.mxu1  ;;  %v1078_v10 = vpop.f32.mrf.mxu0  ;;  %v7578_v20 = vsel %vm2910_vm4, %v2854_v13, %v2886_v48  ;;  %v9083_v13 = vld [vmem:[#allocation15_spill] sm:$0xff] }
 0x13d   :  { %v7568_v1 = vadd.f32 %v5696_v54, %v781_v18  ;;  %v773_v38 = vadd.f32 %v772_v5, %v9073_v30  ;;  %9076 = vst [vmem:[#allocation35_spill] sm:$0xff] %v7578_v20  ;;  %v9078_v54 = vld [vmem:[#allocation103_spill] sm:$0xff]  ;;  %v2855_v48 = vrot.slane %v9083_v13, 1  ;;  %v9084_v30 = vld [vmem:[#allocation41_spill] sm:$0xff] }
 0x13e   :  { %v5633_v43 = vpop.f32.mrf.mxu1  ;;  %v5697_v50 = vpop.f32.mrf.mxu0 }
 0x13f   :  { %9072 = vst [vmem:[#allocation29_spill] sm:$0xff] %v7568_v1  ;;  %v7571_v19 = vadd.f32 %v1078_v10, %v773_v38  ;;  %v784_v36 = vadd.f32 %v5633_v43, %v9075_v25  ;;  %v2887_v38 = vrot.slane %v9084_v30, 1  ;;  %v9085_v25 = vld [vmem:[#allocation19_spill] sm:$0xff] }
 0x140   :  { %v775_v57 = vpop.f32.mrf.mxu1  ;;  %v1081_v7 = vpop.f32.mrf.mxu0 }
 0x141   :  { %9074 = vst [vmem:[#allocation32_spill] sm:$0xff] %v7571_v19  ;;  %v7580_v62 = vadd.f32 %v5697_v50, %v784_v36  ;;  %v776_v18 = vadd.f32 %v775_v57, %v9078_v54  ;;  %v2856_v36 = vrot.slane %v9085_v25, 1  ;;  %v9086_v57 = vld [vmem:[#allocation43_spill] sm:$0xff]  ;;  %v7605_v13 = vsel %vm2910_vm4, %v2855_v48, %v2887_v38  ;;  %v9097_v48 = vld [vmem:[#allocation33_spill] sm:$0xff] }
 0x142   :  { %v5636_v28 = vpop.f32.mrf.mxu1  ;;  %v5700_v5 = vpop.f32.mrf.mxu0  ;;  %5875 = vmatmul.mubr.msk.bf16.gmra.mxu1 %vm260_vm0, %v9079_v45  ;;  %5939 = vmatmul.mubr.msk.bf16.gmra.mxu0 %vm260_vm0, %v7575_v42  ;;  %v2888_v54 = vrot.slane %v9086_v57, 1  ;;  %9091 = vst [vmem:[#allocation90_spill] sm:$0xff] %v7605_v13  ;;  %v1353_v38 = vshll.u32 %v9097_v48, 16 }
 0x143   :  { %9077 = vst [vmem:[#allocation36_spill] sm:$0xff] %v7580_v62  ;;  %v7587_v10 = vadd.f32 %v1081_v7, %v776_v18  ;;  %v797_v17 = vadd.f32 %v5636_v28, %v9081_v26  ;;  %5878 = vmatprep.mubr.msk.bf16.mxu1 %vm260_vm0, %v9082_v23  ;;  %5942 = vmatprep.mubr.msk.bf16.mxu0 %vm260_vm0, %v7578_v20  ;;  %v9088_v18 = vld [vmem:[#allocation49_spill] sm:$0xff] }
 0x144   :  { %v788_v43 = vpop.f32.mrf.mxu1  ;;  %v1094_v50 = vpop.f32.mrf.mxu0  ;;  %v7608_v62 = vsel %vm2910_vm4, %v2856_v36, %v2888_v54  ;;  %v9099_v36 = vld [vmem:[#allocation55_spill] sm:$0xff]  ;;  %v1355_v19 = vrot.slane %v1353_v38, 1 }
 0x145   :  { %9080 = vst [vmem:[#allocation2_spill] sm:$0xff] %v7587_v10  ;;  %v7598_v7 = vadd.f32 %v5700_v5, %v797_v17  ;;  %v789_v28 = vadd.f32 %v788_v43, %v9088_v18  ;;  %9092 = vst [vmem:[#allocation93_spill] sm:$0xff] %v7608_v62  ;;  %v9094_v5 = vld [vmem:[#allocation53_spill] sm:$0xff]  ;;  %v9096_v18 = vld [vmem:[#allocation54_spill] sm:$0xff] }
 0x146   :  { %v5637_v45 = vpop.f32.mrf.mxu1  ;;  %v5701_v26 = vpop.f32.mrf.mxu0  ;;  %v6218_v43 = vld [vmem:[%s8822_s0 + $0x78] sm:$0xf] }
 0x147   :  { %9087 = vst [vmem:[#allocation38_spill] sm:$0xff] %v7598_v7  ;;  %v7601_v23 = vadd.f32 %v1094_v50, %v789_v28  ;;  %v800_v24 = vadd.f32 %v5637_v45, %v9090_v33  ;;  %v7616_v50 = vcombine.low %v6218_v43, %v6218_v43  ;;  %v9100_v28 = vld [vmem:[#allocation61_spill] sm:$0xff]  ;;  %v9104_v7 = vld [vmem:[#allocation48_spill] sm:$0xff] }
 0x148   :  { %v791_v30 = vpop.f32.mrf.mxu1  ;;  %v1097_v10 = vpop.f32.mrf.mxu0  ;;  %v9101_v45 = vld [vmem:[#allocation21_spill] sm:$0xff] }
 0x149   :  { %9089 = vst [vmem:[#allocation88_spill] sm:$0xff] %v7601_v23  ;;  %v7610_v25 = vadd.f32 %v5701_v26, %v800_v24  ;;  %v792_v17 = vadd.f32 %v791_v30, %v9094_v5  ;;  %9095 = vst [vmem:[#allocation96_spill] sm:$0xff] %v7616_v50  ;;  %v2857_v26 = vrot.slane %v9101_v45, 1  ;;  %v9102_v30 = vld [vmem:[#allocation44_spill] sm:$0xff] }
 0x14a   :  { %v5640_v57 = vpop.f32.mrf.mxu1  ;;  %v5704_v33 = vpop.f32.mrf.mxu0  ;;  %5879 = vmatmul.mubr.msk.bf16.gmra.mxu1 %vm260_vm0, %v9096_v18  ;;  %5943 = vmatmul.mubr.msk.bf16.gmra.mxu0 %vm260_vm0, %v7605_v13  ;;  %v2889_v5 = vrot.slane %v9102_v30, 1  ;;  %v2890_v13 = vrot.slane %v9104_v7, 1  ;;  %v9108_v30 = vld [vmem:[#allocation60_spill] sm:$0xff] }
 0x14b   :  { %9093 = vst [vmem:[#allocation42_spill] sm:$0xff] %v7610_v25  ;;  %v7623_v24 = vadd.f32 %v1097_v10, %v792_v17  ;;  %v813_v54 = vadd.f32 %v5640_v57, %v9099_v36  ;;  %5882 = vmatprep.mubr.msk.bf16.mxu1 %vm260_vm0, %v9100_v28  ;;  %5946 = vmatprep.mubr.msk.bf16.mxu0 %vm260_vm0, %v7608_v62  ;;  %v9103_v25 = vld [vmem:[#allocation25_spill] sm:$0xff]  ;;  %v9106_v17 = vld [vmem:[#allocation58_spill] sm:$0xff]  ;;  %v1351_v28 = vshrl.u32 %v9097_v48, 16  ;;  %v1578_v62 = vshll.u32 %v7616_v50, 16 }
 0x14c   :  { %v804_v43 = vpop.f32.mrf.mxu1  ;;  %v1110_v18 = vpop.f32.mrf.mxu0  ;;  %v2858_v23 = vrot.slane %v9103_v25, 1  ;;  %v7643_v1 = vsel %vm2910_vm4, %v2857_v26, %v2889_v5 }
 0x14d   :  { %9098 = vst [vmem:[#allocation45_spill] sm:$0xff] %v7623_v24  ;;  %v7634_v10 = vadd.f32 %v5704_v33, %v813_v54  ;;  %v805_v57 = vadd.f32 %v804_v43, %v9106_v17  ;;  %v9110_v43 = vld [vmem:[#allocation62_spill] sm:$0xff]  ;;  %v1580_v26 = vrot.slane %v1578_v62, 1 }
 0x14e   :  { %v5641_v36 = vpop.f32.mrf.mxu1  ;;  %v5705_v24 = vpop.f32.mrf.mxu0  ;;  %v7646_v33 = vsel %vm2910_vm4, %v2858_v23, %v2890_v13  ;;  %v9114_v23 = vld [vmem:[#allocation69_spill] sm:$0xff] }
 0x14f   :  { %9105 = vst [vmem:[#allocation9_spill] sm:$0xff] %v7634_v10  ;;  %v7639_v45 = vadd.f32 %v1110_v18, %v805_v57  ;;  %v816_v20 = vadd.f32 %v5641_v36, %v9108_v30  ;;  %v9111_v10 = vld [vmem:[#allocation63_spill] sm:$0xff]  ;;  %v1356_v18 = vor.u32 %v1355_v19, %v1351_v28  ;;  %v9113_v57 = vld [vmem:[#allocation64_spill] sm:$0xff]  ;;  %v9118_v19 = vld [vmem:[#allocation57_spill] sm:$0xff] }
 0x150   :  { %v807_v25 = vpop.f32.mrf.mxu1  ;;  %v1113_v7 = vpop.f32.mrf.mxu0  ;;  %v2894_v62 = vrot.slane %v9118_v19, 1 }
 0x151   :  { %9107 = vst [vmem:[#allocation39_spill] sm:$0xff] %v7639_v45  ;;  %v7648_v54 = vadd.f32 %v5705_v24, %v816_v20  ;;  %v808_v17 = vadd.f32 %v807_v25, %v9110_v43  ;;  %v9115_v20 = vld [vmem:[#allocation27_spill] sm:$0xff]  ;;  %v9116_v24 = vld [vmem:[#allocation50_spill] sm:$0xff] }
 0x152   :  { %v5644_v48 = vpop.f32.mrf.mxu1  ;;  %v5708_v38 = vpop.f32.mrf.mxu0  ;;  %5883 = vmatmul.mubr.msk.bf16.gmra.mxu1 %vm260_vm0, %v9111_v10  ;;  %5947 = vmatmul.mubr.msk.bf16.gmra.mxu0 %vm260_vm0, %v7643_v1  ;;  %v2859_v13 = vrot.slane %v9115_v20, 1  ;;  %v2891_v30 = vrot.slane %v9116_v24, 1  ;;  %v9117_v43 = vld [vmem:[#allocation34_spill] sm:$0xff]  ;;  %v1695_v20 = vsel %vm6848_vm3, %v1356_v18, %v1580_v26  ;;  %v9126_v18 = vld [vmem:[#allocation71_spill] sm:$0xff] }
 0x153   :  { %9109 = vst [vmem:[#allocation13_spill] sm:$0xff] %v7648_v54  ;;  %v7655_v5 = vadd.f32 %v1113_v7, %v808_v17  ;;  %v829_v36 = vadd.f32 %v5644_v48, %v9113_v57  ;;  %5886 = vmatprep.mubr.msk.bf16.mxu1 %vm260_vm0, %v9114_v23  ;;  %5950 = vmatprep.mubr.msk.bf16.mxu0 %vm260_vm0, %v7646_v33  ;;  %v2862_v50 = vrot.slane %v9117_v43, 1  ;;  %v9120_v7 = vld [vmem:[#allocation66_spill] sm:$0xff] }
 0x154   :  { %v820_v10 = vpop.f32.mrf.mxu1  ;;  %v1126_v25 = vpop.f32.mrf.mxu0  ;;  %v7675_v24 = vsel %vm2910_vm4, %v2859_v13, %v2891_v30  ;;  %v9127_v13 = vld [vmem:[#allocation76_spill] sm:$0xff]  ;;  %v9129_v30 = vld [vmem:[#allocation59_spill] sm:$0xff] }
 0x155   :  { %9112 = vst [vmem:[#allocation40_spill] sm:$0xff] %v7655_v5  ;;  %v7666_v28 = vadd.f32 %v5708_v38, %v829_v36  ;;  %v821_v48 = vadd.f32 %v820_v10, %v9120_v7  ;;  %v9122_v5 = vld [vmem:[#allocation68_spill] sm:$0xff]  ;;  %v2961_v19 = vsel %vm2910_vm4, %v2862_v50, %v2894_v62  ;;  %v9124_v36 = vld [vmem:[#allocation70_spill] sm:$0xff]  ;;  %v9128_v50 = vld [vmem:[#allocation3_spill] sm:$0xff] }
 0x156   :  { %v5645_v17 = vpop.f32.mrf.mxu1  ;;  %v5709_v57 = vpop.f32.mrf.mxu0 }
 0x157   :  { %9119 = vst [vmem:[#allocation98_spill] sm:$0xff] %v7666_v28  ;;  %v7669_v23 = vadd.f32 %v1126_v25, %v821_v48  ;;  %v832_v54 = vadd.f32 %v5645_v17, %v9122_v5  ;;  %v9130_v48 = vld [vmem:[#allocation4_spill] sm:$0xff] }
 0x158   :  { %v823_v45 = vpop.f32.mrf.mxu1  ;;  %v1129_v43 = vpop.f32.mrf.mxu0  ;;  %v2864_v17 = vrot.slane %v9130_v48, 1 }
 0x159   :  { %9121 = vst [vmem:[#allocation100_spill] sm:$0xff] %v7669_v23  ;;  %v7678_v38 = vadd.f32 %v5709_v57, %v832_v54  ;;  %v824_v10 = vadd.f32 %v823_v45, %v9124_v36  ;;  %v2863_v54 = vrot.slane %v9128_v50, 1  ;;  %v2895_v45 = vrot.slane %v9129_v30, 1  ;;  %v9131_v57 = vld [vmem:[#allocation65_spill] sm:$0xff] }
 0x15a   :  { %v5648_v7 = vpop.f32.mrf.mxu1  ;;  %v5712_v28 = vpop.f32.mrf.mxu0  ;;  %5887 = vmatmul.mubr.msk.bf16.gmra.mxu1 %vm260_vm0, %v1695_v20  ;;  %5951 = vmatmul.mubr.msk.bf16.gmra.mxu0 %vm260_vm0, %v7675_v24  ;;  %v2896_v20 = vrot.slane %v9131_v57, 1 }
 0x15b   :  { %9123 = vst [vmem:[#allocation103_spill] sm:$0xff] %v7678_v38  ;;  %v7684_v5 = vadd.f32 %v1129_v43, %v824_v10  ;;  %v845_v26 = vadd.f32 %v5648_v7, %v9126_v18  ;;  %5890 = vmatprep.mubr.msk.bf16.mxu1 %vm260_vm0, %v9127_v13  ;;  %5954 = vmatprep.mubr.msk.bf16.mxu0 %vm260_vm0, %v2961_v19  ;;  %v9133_v43 = vld [vmem:[#allocation73_spill] sm:$0xff]  ;;  %v9135_v13 = vld [vmem:[#allocation75_spill] sm:$0xff] }
 0x15c   :  { %v836_v25 = vpop.f32.mrf.mxu1  ;;  %v1142_v62 = vpop.f32.mrf.mxu0  ;;  %v7701_v50 = vsel %vm2910_vm4, %v2863_v54, %v2895_v45  ;;  %v7704_v23 = vsel %vm2910_vm4, %v2864_v17, %v2896_v20  ;;  %v9142_v54 = vld [vmem:[#allocation79_spill] sm:$0xff]  ;;  %v9144_v17 = vld [vmem:[#allocation5_spill] sm:$0xff] }
 0x15d   :  { %9125 = vst [vmem:[#allocation46_spill] sm:$0xff] %v7684_v5  ;;  %v7694_v36 = vadd.f32 %v5712_v28, %v845_v26  ;;  %v837_v10 = vadd.f32 %v836_v25, %v9133_v43  ;;  %9136 = vst [vmem:[#allocation15_spill] sm:$0xff] %v7701_v50  ;;  %v9139_v28 = vld [vmem:[#allocation77_spill] sm:$0xff]  ;;  %v9140_v43 = vld [vmem:[#allocation78_spill] sm:$0xff]  ;;  %v2865_v20 = vrot.slane %v9144_v17, 1 }
 0x15e   :  { %v5649_v7 = vpop.f32.mrf.mxu1  ;;  %v5713_v18 = vpop.f32.mrf.mxu0  ;;  %9137 = vst [vmem:[#allocation41_spill] sm:$0xff] %v7704_v23 }
 0x15f   :  { %9132 = vst [vmem:[#allocation47_spill] sm:$0xff] %v7694_v36  ;;  %v7697_v5 = vadd.f32 %v1142_v62, %v837_v10  ;;  %v848_v19 = vadd.f32 %v5649_v7, %v9135_v13  ;;  %v9143_v10 = vld [vmem:[#allocation84_spill] sm:$0xff]  ;;  %v9145_v7 = vld [vmem:[#allocation67_spill] sm:$0xff] }
 0x160   :  { %v839_v30 = vpop.f32.mrf.mxu1  ;;  %v1145_v38 = vpop.f32.mrf.mxu0 }
 0x161   :  { %9134 = vst [vmem:[#allocation52_spill] sm:$0xff] %v7697_v5  ;;  %v7706_v48 = vadd.f32 %v5713_v18, %v848_v19  ;;  %v840_v26 = vadd.f32 %v839_v30, %v9139_v28  ;;  %v2897_v18 = vrot.slane %v9145_v7, 1  ;;  %v9146_v30 = vld [vmem:[#allocation6_spill] sm:$0xff]  ;;  %v9151_v5 = vld [vmem:[#allocation83_spill] sm:$0xff] }
 0x162   :  { %v5652_v57 = vpop.f32.mrf.mxu1  ;;  %v5716_v25 = vpop.f32.mrf.mxu0  ;;  %5891 = vmatmul.mubr.msk.bf16.gmra.mxu1 %vm260_vm0, %v9140_v43  ;;  %5955 = vmatmul.mubr.msk.bf16.gmra.mxu0 %vm260_vm0, %v7701_v50  ;;  %v2866_v28 = vrot.slane %v9146_v30, 1  ;;  %v9147_v43 = vld [vmem:[#allocation72_spill] sm:$0xff] }
 0x163   :  { %9138 = vst [vmem:[#allocation19_spill] sm:$0xff] %v7706_v48  ;;  %v7713_v62 = vadd.f32 %v1145_v38, %v840_v26  ;;  %v861_v45 = vadd.f32 %v5652_v57, %v9142_v54  ;;  %5894 = vmatprep.mubr.msk.bf16.mxu1 %vm260_vm0, %v9143_v10  ;;  %5958 = vmatprep.mubr.msk.bf16.mxu0 %vm260_vm0, %v7704_v23  ;;  %v2898_v48 = vrot.slane %v9147_v43, 1  ;;  %v9149_v26 = vld [vmem:[#allocation81_spill] sm:$0xff] }
 0x164   :  { %v852_v13 = vpop.f32.mrf.mxu1  ;;  %v1158_v19 = vpop.f32.mrf.mxu0  ;;  %v7731_v17 = vsel %vm2910_vm4, %v2865_v20, %v2897_v18  ;;  %v9158_v20 = vld [vmem:[#allocation87_spill] sm:$0xff] }
 0x165   :  { %9141 = vst [vmem:[#allocation43_spill] sm:$0xff] %v7713_v62  ;;  %v7724_v38 = vadd.f32 %v5716_v25, %v861_v45  ;;  %v853_v57 = vadd.f32 %v852_v13, %v9149_v26  ;;  %9152 = vst [vmem:[#allocation53_spill] sm:$0xff] %v7731_v17  ;;  %v7734_v36 = vsel %vm2910_vm4, %v2866_v28, %v2898_v48  ;;  %v9155_v25 = vld [vmem:[#allocation85_spill] sm:$0xff]  ;;  %v9156_v26 = vld [vmem:[#allocation86_spill] sm:$0xff] }
 0x166   :  { %v5653_v54 = vpop.f32.mrf.mxu1  ;;  %v5717_v62 = vpop.f32.mrf.mxu0  ;;  %9153 = vst [vmem:[#allocation54_spill] sm:$0xff] %v7734_v36 }
 0x167   :  { %9148 = vst [vmem:[#allocation49_spill] sm:$0xff] %v7724_v38  ;;  %v7727_v10 = vadd.f32 %v1158_v19, %v853_v57  ;;  %v864_v23 = vadd.f32 %v5653_v54, %v9151_v5  ;;  %v9159_v19 = vld [vmem:[#allocation92_spill] sm:$0xff] }
 0x168   :  { %v855_v7 = vpop.f32.mrf.mxu1  ;;  %v1161_v50 = vpop.f32.mrf.mxu0 }
 0x169   :  { %9150 = vst [vmem:[#allocation51_spill] sm:$0xff] %v7727_v10  ;;  %v7736_v30 = vadd.f32 %v5717_v62, %v864_v23  ;;  %v856_v45 = vadd.f32 %v855_v7, %v9155_v25  ;;  %v9160_v23 = vld [vmem:[#allocation7_spill] sm:$0xff]  ;;  %v9161_v62 = vld [vmem:[#allocation74_spill] sm:$0xff]  ;;  %v9162_v7 = vld [vmem:[#allocation8_spill] sm:$0xff] }
 0x16a   :  { %v5656_v43 = vpop.f32.mrf.mxu1  ;;  %v5720_v13 = vpop.f32.mrf.mxu0  ;;  %5895 = vmatmul.mubr.msk.bf16.gmra.mxu1 %vm260_vm0, %v9156_v26  ;;  %5959 = vmatmul.mubr.msk.bf16.gmra.mxu0 %vm260_vm0, %v7731_v17  ;;  %v2867_v48 = vrot.slane %v9160_v23, 1  ;;  %v2899_v28 = vrot.slane %v9161_v62, 1  ;;  %v2868_v25 = vrot.slane %v9162_v7, 1  ;;  %v9163_v26 = vld [vmem:[#allocation80_spill] sm:$0xff]  ;;  %v9167_v10 = vld [vmem:[#allocation91_spill] sm:$0xff] }
 0x16b   :  { %9154 = vst [vmem:[#allocation55_spill] sm:$0xff] %v7736_v30  ;;  %v7743_v5 = vadd.f32 %v1161_v50, %v856_v45  ;;  %v877_v18 = vadd.f32 %v5656_v43, %v9158_v20  ;;  %5898 = vmatprep.mubr.msk.bf16.mxu1 %vm260_vm0, %v9159_v19  ;;  %5962 = vmatprep.mubr.msk.bf16.mxu0 %vm260_vm0, %v7734_v36  ;;  %v2900_v30 = vrot.slane %v9163_v26, 1  ;;  %v9165_v45 = vld [vmem:[#allocation89_spill] sm:$0xff] }
 0x16c   :  { %v868_v57 = vpop.f32.mrf.mxu1  ;;  %v1174_v54 = vpop.f32.mrf.mxu0  ;;  %v7761_v23 = vsel %vm2910_vm4, %v2867_v48, %v2899_v28  ;;  %v9174_v48 = vld [vmem:[#allocation97_spill] sm:$0xff] }
 0x16d   :  { %9157 = vst [vmem:[#allocation61_spill] sm:$0xff] %v7743_v5  ;;  %v7754_v50 = vadd.f32 %v5720_v13, %v877_v18  ;;  %v869_v43 = vadd.f32 %v868_v57, %v9165_v45  ;;  %9168 = vst [vmem:[#allocation25_spill] sm:$0xff] %v7761_v23  ;;  %v7764_v17 = vsel %vm2910_vm4, %v2868_v25, %v2900_v30  ;;  %v9171_v13 = vld [vmem:[#allocation94_spill] sm:$0xff]  ;;  %v9172_v45 = vld [vmem:[#allocation95_spill] sm:$0xff] }
 0x16e   :  { %v5657_v20 = vpop.f32.mrf.mxu1  ;;  %v5721_v5 = vpop.f32.mrf.mxu0  ;;  %9169 = vst [vmem:[#allocation48_spill] sm:$0xff] %v7764_v17 }
 0x16f   :  { %9164 = vst [vmem:[#allocation21_spill] sm:$0xff] %v7754_v50  ;;  %v7757_v19 = vadd.f32 %v1174_v54, %v869_v43  ;;  %v880_v36 = vadd.f32 %v5657_v20, %v9167_v10  ;;  %v9175_v54 = vld [vmem:[#allocation102_spill] sm:$0xff] }
 0x170   :  { %v871_v62 = vpop.f32.mrf.mxu1  ;;  %v1177_v38 = vpop.f32.mrf.mxu0 }
 0x171   :  { %9166 = vst [vmem:[#allocation44_spill] sm:$0xff] %v7757_v19  ;;  %v7766_v7 = vadd.f32 %v5721_v5, %v880_v36  ;;  %v872_v18 = vadd.f32 %v871_v62, %v9171_v13  ;;  %v9176_v36 = vld [vmem:[#allocation10_spill] sm:$0xff]  ;;  %v9181_v19 = vld [vmem:[#allocation101_spill] sm:$0xff] }
 0x172   :  { %v5660_v26 = vpop.f32.mrf.mxu1  ;;  %v5724_v57 = vpop.f32.mrf.mxu0  ;;  %5899 = vmatmul.mubr.msk.bf16.gmra.mxu1 %vm260_vm0, %v9172_v45  ;;  %5963 = vmatmul.mubr.msk.bf16.gmra.mxu0 %vm260_vm0, %v7761_v23  ;;  %v2869_v30 = vrot.slane %v9176_v36, 1  ;;  %v9177_v5 = vld [vmem:[#allocation82_spill] sm:$0xff]  ;;  %v9179_v45 = vld [vmem:[#allocation11_spill] sm:$0xff] }
 0x173   :  { %9170 = vst [vmem:[#allocation58_spill] sm:$0xff] %v7766_v7  ;;  %v7773_v10 = vadd.f32 %v1177_v38, %v872_v18  ;;  %v893_v28 = vadd.f32 %v5660_v26, %v9174_v48  ;;  %5902 = vmatprep.mubr.msk.bf16.mxu1 %vm260_vm0, %v9175_v54  ;;  %5966 = vmatprep.mubr.msk.bf16.mxu0 %vm260_vm0, %v7764_v17  ;;  %v2901_v25 = vrot.slane %v9177_v5, 1  ;;  %v9178_v62 = vld [vmem:[#allocation14_spill] sm:$0xff]  ;;  %v2902_v7 = vrot.slane %v9179_v45, 1  ;;  %v9180_v18 = vld [vmem:[#allocation99_spill] sm:$0xff] }
 0x174   :  { %v884_v43 = vpop.f32.mrf.mxu1  ;;  %v1190_v20 = vpop.f32.mrf.mxu0  ;;  %v2870_v13 = vrot.slane %v9178_v62, 1 }
 0x175   :  { %9173 = vst [vmem:[#allocation60_spill] sm:$0xff] %v7773_v10  ;;  %v7784_v38 = vadd.f32 %v5724_v57, %v893_v28  ;;  %v885_v26 = vadd.f32 %v884_v43, %v9180_v18  ;;  %v7791_v36 = vsel %vm2910_vm4, %v2869_v30, %v2901_v25  ;;  %v9182_v57 = vld [vmem:[#allocation104_spill] sm:$0xff] }
 0x176   :  { %v5661_v48 = vpop.f32.mrf.mxu1  ;;  %v5725_v10 = vpop.f32.mrf.mxu0  ;;  %v7794_v23 = vsel %vm2910_vm4, %v2870_v13, %v2902_v7 }
 0x177   :  { %v7787_v54 = vadd.f32 %v1190_v20, %v885_v26  ;;  %v896_v17 = vadd.f32 %v5661_v48, %v9181_v19  ;;  %v9187_v26 = vld [vmem:[#allocation17_spill] sm:$0xff] }
 0x178   :  { %v887_v5 = vpop.f32.mrf.mxu1  ;;  %v1193_v50 = vpop.f32.mrf.mxu0  ;;  %v2904_v48 = vrot.slane %v9187_v26, 1 }
 0x179   :  { %v7796_v62 = vadd.f32 %v5725_v10, %v896_v17  ;;  %v888_v28 = vadd.f32 %v887_v5, %v9182_v57  ;;  %v9184_v17 = vld [vmem:[#allocation16_spill] sm:$0xff] }
 0x17a   :  { %v5736_v45 = vpop.f32.mrf.mxu1  ;;  %v5800_v43 = vpop.f32.mrf.mxu0  ;;  %5903 = vmatmul.mubr.msk.bf16.gmra.mxu1 %vm260_vm0, %v7338_v61  ;;  %5967 = vmatmul.mubr.msk.bf16.gmra.mxu0 %vm260_vm0, %v7791_v36  ;;  %v2871_v7 = vrot.slane %v9184_v17, 1  ;;  %v9185_v10 = vld [vmem:[#allocation12_spill] sm:$0xff] }
 0x17b   :  { %v7803_v19 = vadd.f32 %v1193_v50, %v888_v28  ;;  %v2088_v30 = vadd.f32 %v5736_v45, %v7361_v2  ;;  %5906 = vmatprep.mubr.msk.bf16.mxu1 %vm260_vm0, %v7371_v41  ;;  %5970 = vmatprep.mubr.msk.bf16.mxu0 %vm260_vm0, %v7794_v23  ;;  %v2903_v25 = vrot.slane %v9185_v10, 1  ;;  %v9186_v61 = vld [vmem:[#allocation20_spill] sm:$0xff] }
 0x17c   :  { %v1863_v20 = vpop.f32.mrf.mxu1  ;;  %v2215_v13 = vpop.f32.mrf.mxu0  ;;  %v2872_v18 = vrot.slane %v9186_v61, 1 }
 0x17d   :  { %9183 = vst [vmem:[#allocation62_spill] sm:$0xff] %v7803_v19  ;;  %v7814_v50 = vadd.f32 %v5800_v43, %v2088_v30  ;;  %v2086_v2 = vadd.f32 %v1863_v20, %v7366_v51  ;;  %v7821_v45 = vsel %vm2910_vm4, %v2871_v7, %v2903_v25  ;;  %v6219_v51 = vld [vmem:[%s8822_s0 + $0xf8] sm:$0xf] }
 0x17e   :  { %v5737_v5 = vpop.f32.mrf.mxu1  ;;  %v5801_v57 = vpop.f32.mrf.mxu0  ;;  %v7824_v19 = vsel %vm2910_vm4, %v2872_v18, %v2904_v48  ;;  %v7832_v30 = vcombine.low %v6219_v51, %v6219_v51  ;;  %v9189_v7 = vld [vmem:[#allocation37_spill] sm:$0xff]  ;;  %v9191_v18 = vld [vmem:[#allocation22_spill] sm:$0xff] }
 0x17f   :  { %v7817_v41 = vadd.f32 %v2215_v13, %v2086_v2  ;;  %v2089_v28 = vadd.f32 %v5737_v5, %v7379_v15  ;;  %v1449_v25 = vshll.u32 %v9189_v7, 16  ;;  %v2873_v26 = vrot.slane %v9191_v18, 1  ;;  %v9192_v48 = vld [vmem:[#allocation18_spill] sm:$0xff] }
 0x180   :  { %v1866_v17 = vpop.f32.mrf.mxu1  ;;  %v2218_v10 = vpop.f32.mrf.mxu0  ;;  %v2905_v2 = vrot.slane %v9192_v48, 1 }
 0x181   :  { %v7826_v61 = vadd.f32 %v5801_v57, %v2089_v28  ;;  %v2087_v43 = vadd.f32 %v1866_v17, %v7386_v52  ;;  %v2874_v57 = vrot.slane %v9049_v21, 1  ;;  %v9193_v28 = vld [vmem:[#allocation26_spill] sm:$0xff]  ;;  %v1642_v21 = vshll.u32 %v7832_v30, 16 }
 0x182   :  { %v5740_v20 = vpop.f32.mrf.mxu1  ;;  %v5804_v15 = vpop.f32.mrf.mxu0  ;;  %5907 = vmatmul.mubr.msk.bf16.gmra.mxu1 %vm260_vm0, %v7375_v44  ;;  %5971 = vmatmul.mubr.msk.bf16.gmra.mxu0 %vm260_vm0, %v7821_v45  ;;  %v2906_v17 = vrot.slane %v9193_v28, 1  ;;  %v7858_v48 = vsel %vm2910_vm4, %v2873_v26, %v2905_v2  ;;  %v9194_v26 = vld [vmem:[#allocation28_spill] sm:$0xff] }
 0x183   :  { %9188 = vst [vmem:[#allocation63_spill] sm:$0xff] %v7826_v61  ;;  %v7839_v13 = vadd.f32 %v2218_v10, %v2087_v43  ;;  %v2092_v52 = vadd.f32 %v5740_v20, %v7398_v0  ;;  %5910 = vmatprep.mubr.msk.bf16.mxu1 %vm260_vm0, %v7403_v60  ;;  %5974 = vmatprep.mubr.msk.bf16.mxu0 %vm260_vm0, %v7824_v19  ;;  %v1447_v60 = vshrl.u32 %v9189_v7, 16  ;;  %v1451_v20 = vrot.slane %v1449_v25, 1 }
 0x184   :  { %v1879_v44 = vpop.f32.mrf.mxu1  ;;  %v2231_v5 = vpop.f32.mrf.mxu0  ;;  %v2875_v2 = vrot.slane %v9194_v26, 1 }
 0x185   :  { %9190 = vst [vmem:[#allocation64_spill] sm:$0xff] %v7839_v13  ;;  %v7850_v10 = vadd.f32 %v5804_v15, %v2092_v52  ;;  %v2090_v0 = vadd.f32 %v1879_v44, %v7406_v59  ;;  %v7862_v15 = vsel %vm2910_vm4, %v2874_v57, %v2906_v17 }
 0x186   :  { %v5741_v43 = vpop.f32.mrf.mxu1  ;;  %v5805_v51 = vpop.f32.mrf.mxu0 }
 0x187   :  { %v7854_v13 = vadd.f32 %v2231_v5, %v2090_v0  ;;  %v2093_v18 = vadd.f32 %v5741_v43, %v7414_v14  ;;  %v1452_v14 = vor.u32 %v1451_v20, %v1447_v60 }
 0x188   :  { %v1882_v61 = vpop.f32.mrf.mxu1  ;;  %v2234_v28 = vpop.f32.mrf.mxu0 }
 0x189   :  { %v7864_v59 = vadd.f32 %v5805_v51, %v2093_v18  ;;  %v2091_v52 = vadd.f32 %v1882_v61, %v7421_v31  ;;  %v1644_v31 = vrot.slane %v1642_v21, 1  ;;  %v9195_v61 = vld [vmem:[#allocation23_spill] sm:$0xff] }
 0x18a   :  { %v5744_v44 = vpop.f32.mrf.mxu1  ;;  %v5808_v25 = vpop.f32.mrf.mxu0  ;;  %5911 = vmatmul.mubr.msk.bf16.gmra.mxu1 %vm260_vm0, %v7412_v16  ;;  %5975 = vmatmul.mubr.msk.bf16.gmra.mxu0 %vm260_vm0, %v7858_v48  ;;  %v2907_v17 = vrot.slane %v9195_v61, 1 }
 0x18b   :  { %v7872_v5 = vadd.f32 %v2234_v28, %v2091_v52  ;;  %v2096_v57 = vadd.f32 %v5744_v44, %v7430_v37  ;;  %5914 = vmatprep.mubr.msk.bf16.mxu1 %vm260_vm0, %v7438_v47  ;;  %5978 = vmatprep.mubr.msk.bf16.mxu0 %vm260_vm0, %v7862_v15  ;;  %v1711_v47 = vsel %vm6848_vm3, %v1452_v14, %v1644_v31 }
 0x18c   :  { %v1895_v16 = vpop.f32.mrf.mxu1  ;;  %v2247_v0 = vpop.f32.mrf.mxu0  ;;  %v7889_v28 = vsel %vm2910_vm4, %v2875_v2, %v2907_v17 }
 0x18d   :  { %v7880_v43 = vadd.f32 %v5808_v25, %v2096_v57  ;;  %v2094_v51 = vadd.f32 %v1895_v16, %v7433_v39 }
 0x18e   :  { %v5745_v60 = vpop.f32.mrf.mxu1  ;;  %v5809_v20 = vpop.f32.mrf.mxu0 }
 0x18f   :  { %v7883_v18 = vadd.f32 %v2247_v0, %v2094_v51  ;;  %v2097_v37 = vadd.f32 %v5745_v60, %v7441_v46 }
 0x190   :  { %v1898_v21 = vpop.f32.mrf.mxu1  ;;  %v2250_v52 = vpop.f32.mrf.mxu0 }
 0x191   :  { %v7891_v44 = vadd.f32 %v5809_v20, %v2097_v37  ;;  %v2095_v25 = vadd.f32 %v1898_v21, %v7449_v40 }
 0x192   :  { %v5748_v26 = vpop.f32.mrf.mxu1  ;;  %v5812_v39 = vpop.f32.mrf.mxu0  ;;  %5915 = vmatmul.mubr.msk.bf16.gmra.mxu1 %vm260_vm0, %v1711_v47  ;;  %5979 = vmatmul.mubr.msk.bf16.gmra.mxu0 %vm260_vm0, %v7889_v28 }
 0x193   :  { %v7897_v46 = vadd.f32 %v2250_v52, %v2095_v25  ;;  %v2100_v35 = vadd.f32 %v5748_v26, %v7456_v12  ;;  %5990 = vmatprep.mubr.msk.bf16.mxu1 %vm260_vm0, %v7465_v53  ;;  %6054 = vmatprep.mubr.msk.bf16.mxu0 %vm260_vm0, %v7471_v34 }
 0x194   :  { %v1911_v14 = vpop.f32.mrf.mxu1  ;;  %v2263_v2 = vpop.f32.mrf.mxu0 }
 0x195   :  { %v7904_v40 = vadd.f32 %v5812_v39, %v2100_v35  ;;  %v2098_v57 = vadd.f32 %v1911_v14, %v7461_v56 }
 0x196   :  { %v5749_v31 = vpop.f32.mrf.mxu1  ;;  %v5813_v61 = vpop.f32.mrf.mxu0 }
 0x197   :  { %v7907_v17 = vadd.f32 %v2263_v2, %v2098_v57  ;;  %v2101_v16 = vadd.f32 %v5749_v31, %v7467_v11 }
 0x198   :  { %v1914_v0 = vpop.f32.mrf.mxu1  ;;  %v2266_v12 = vpop.f32.mrf.mxu0 }
 0x199   :  { %v7910_v51 = vadd.f32 %v5813_v61, %v2101_v16  ;;  %v2099_v53 = vadd.f32 %v1914_v0, %v7483_v29 }
 0x19a   :  { %v5752_v60 = vpop.f32.mrf.mxu1  ;;  %v5816_v20 = vpop.f32.mrf.mxu0  ;;  %5991 = vmatmul.mubr.msk.bf16.vlgmr.msra.gmra.mxu1 %vm260_vm0, %v7471_v34  ;;  %6055 = vmatmul.mubr.msk.bf16.vlgmr.msra.gmra.mxu0 %vm260_vm0, %v7509_v49 }
 0x19b   :  { %v7917_v56 = vadd.f32 %v2266_v12, %v2099_v53  ;;  %v2104_v37 = vadd.f32 %v5752_v60, %v7502_v4  ;;  %5994 = vmatprep.mubr.msk.bf16.mxu1 %vm260_vm0, %v7509_v49  ;;  %6058 = vmatprep.mubr.msk.bf16.mxu0 %vm260_vm0, %v7512_v9 }
 0x19c   :  { %v1927_v11 = vpop.f32.mrf.mxu1  ;;  %v2279_v29 = vpop.f32.mrf.mxu0 }
 0x19d   :  { %v7924_v47 = vadd.f32 %v5816_v20, %v2104_v37  ;;  %v2102_v21 = vadd.f32 %v1927_v11, %v7505_v32  ;;  %v9196_v11 = vld [vmem:[#allocation29_spill] sm:$0xff] }
 0x19e   :  { %v5753_v34 = vpop.f32.mrf.mxu1  ;;  %v5817_v52 = vpop.f32.mrf.mxu0 }
 0x19f   :  { %v7927_v25 = vadd.f32 %v2279_v29, %v2102_v21  ;;  %v2105_v26 = vadd.f32 %v5753_v34, %v7514_v3 }
 0x1a0   :  { %v1930_v39 = vpop.f32.mrf.mxu1  ;;  %v2282_v4 = vpop.f32.mrf.mxu0 }
 0x1a1   :  { %v7930_v35 = vadd.f32 %v5817_v52, %v2105_v26  ;;  %v2103_v49 = vadd.f32 %v1930_v39, %v7527_v6  ;;  %v9198_v52 = vld [vmem:[#allocation32_spill] sm:$0xff] }
 0x1a2   :  { %v5756_v14 = vpop.f32.mrf.mxu1  ;;  %v5820_v2 = vpop.f32.mrf.mxu0  ;;  %5995 = vmatmul.mubr.msk.bf16.gmra.mxu1 %vm260_vm0, %v7512_v9  ;;  %6059 = vmatmul.mubr.msk.bf16.gmra.mxu0 %vm260_vm0, %v7545_v55 }
 0x1a3   :  { %v7937_v32 = vadd.f32 %v2282_v4, %v2103_v49  ;;  %v2108_v57 = vadd.f32 %v5756_v14, %v7538_v63  ;;  %5998 = vmatprep.mubr.msk.bf16.mxu1 %vm260_vm0, %v7545_v55  ;;  %6062 = vmatprep.mubr.msk.bf16.mxu0 %vm260_vm0, %v7548_v58  ;;  %v9199_v49 = vld [vmem:[#allocation36_spill] sm:$0xff] }
 0x1a4   :  { %v1943_v3 = vpop.f32.mrf.mxu1  ;;  %v2295_v6 = vpop.f32.mrf.mxu0 }
 0x1a5   :  { %v7944_v31 = vadd.f32 %v5820_v2, %v2108_v57  ;;  %v2106_v61 = vadd.f32 %v1943_v3, %v7541_v27 }
 0x1a6   :  { %v5757_v9 = vpop.f32.mrf.mxu1  ;;  %v5821_v16 = vpop.f32.mrf.mxu0 }
 0x1a7   :  { %v7947_v0 = vadd.f32 %v2295_v6, %v2106_v61  ;;  %v2109_v12 = vadd.f32 %v5757_v9, %v7550_v22  ;;  %v9197_v22 = vld [vmem:[#allocation35_spill] sm:$0xff] }
 0x1a8   :  { %v1946_v53 = vpop.f32.mrf.mxu1  ;;  %v2298_v63 = vpop.f32.mrf.mxu0 }
 0x1a9   :  { %v7950_v60 = vadd.f32 %v5821_v16, %v2109_v12  ;;  %v2107_v55 = vadd.f32 %v1946_v53, %v7557_v8  ;;  %v9201_v16 = vld [vmem:[#allocation90_spill] sm:$0xff] }
 0x1aa   :  { %v5760_v20 = vpop.f32.mrf.mxu1  ;;  %v5824_v37 = vpop.f32.mrf.mxu0  ;;  %5999 = vmatmul.mubr.msk.bf16.gmra.mxu1 %vm260_vm0, %v7548_v58  ;;  %6063 = vmatmul.mubr.msk.bf16.gmra.mxu0 %vm260_vm0, %v7575_v42  ;;  %v9202_v53 = vld [vmem:[#allocation38_spill] sm:$0xff] }
 0x1ab   :  { %v7957_v27 = vadd.f32 %v2298_v63, %v2107_v55  ;;  %v2112_v29 = vadd.f32 %v5760_v20, %v9196_v11  ;;  %6002 = vmatprep.mubr.msk.bf16.mxu1 %vm260_vm0, %v7575_v42  ;;  %6066 = vmatprep.mubr.msk.bf16.mxu0 %vm260_vm0, %v9197_v22  ;;  %v9200_v42 = vld [vmem:[#allocation2_spill] sm:$0xff]  ;;  %v9203_v55 = vld [vmem:[#allocation93_spill] sm:$0xff] }
 0x1ac   :  { %v1959_v21 = vpop.f32.mrf.mxu1  ;;  %v2311_v8 = vpop.f32.mrf.mxu0 }
 0x1ad   :  { %v7964_v34 = vadd.f32 %v5824_v37, %v2112_v29  ;;  %v2110_v26 = vadd.f32 %v1959_v21, %v9198_v52  ;;  %v9204_v29 = vld [vmem:[#allocation88_spill] sm:$0xff] }
 0x1ae   :  { %v5761_v58 = vpop.f32.mrf.mxu1  ;;  %v5825_v39 = vpop.f32.mrf.mxu0 }
 0x1af   :  { %v7967_v4 = vadd.f32 %v2311_v8, %v2110_v26  ;;  %v2113_v14 = vadd.f32 %v5761_v58, %v9199_v49  ;;  %v9205_v26 = vld [vmem:[#allocation42_spill] sm:$0xff] }
 0x1b0   :  { %v1962_v2 = vpop.f32.mrf.mxu1  ;;  %v2314_v57 = vpop.f32.mrf.mxu0 }
 0x1b1   :  { %v7970_v3 = vadd.f32 %v5825_v39, %v2113_v14  ;;  %v2111_v6 = vadd.f32 %v1962_v2, %v9200_v42  ;;  %v9207_v2 = vld [vmem:[#allocation45_spill] sm:$0xff] }
 0x1b2   :  { %v5764_v61 = vpop.f32.mrf.mxu1  ;;  %v5828_v9 = vpop.f32.mrf.mxu0  ;;  %6003 = vmatmul.mubr.msk.bf16.gmra.mxu1 %vm260_vm0, %v9197_v22  ;;  %6067 = vmatmul.mubr.msk.bf16.gmra.mxu0 %vm260_vm0, %v9201_v16 }
 0x1b3   :  { %v7977_v12 = vadd.f32 %v2314_v57, %v2111_v6  ;;  %v2116_v63 = vadd.f32 %v5764_v61, %v9202_v53  ;;  %6006 = vmatprep.mubr.msk.bf16.mxu1 %vm260_vm0, %v9201_v16  ;;  %6070 = vmatprep.mubr.msk.bf16.mxu0 %vm260_vm0, %v9203_v55 }
 0x1b4   :  { %v1975_v20 = vpop.f32.mrf.mxu1  ;;  %v2327_v37 = vpop.f32.mrf.mxu0 }
 0x1b5   :  { %v7984_v11 = vadd.f32 %v5828_v9, %v2116_v63  ;;  %v2114_v21 = vadd.f32 %v1975_v20, %v9204_v29  ;;  %v9209_v9 = vld [vmem:[#allocation9_spill] sm:$0xff]  ;;  %v9210_v20 = vld [vmem:[#allocation30_spill] sm:$0xff]  ;;  %v9211_v29 = vld [vmem:[#allocation56_spill] sm:$0xff] }
 0x1b6   :  { %v5765_v22 = vpop.f32.mrf.mxu1  ;;  %v5829_v8 = vpop.f32.mrf.mxu0 }
 0x1b7   :  { %v7987_v52 = vadd.f32 %v2327_v37, %v2114_v21  ;;  %v2117_v58 = vadd.f32 %v5765_v22, %v9205_v26  ;;  %v2860_v37 = vrot.slane %v9210_v20, 1  ;;  %v2892_v21 = vrot.slane %v9211_v29, 1  ;;  %v9212_v22 = vld [vmem:[#allocation39_spill] sm:$0xff] }
 0x1b8   :  { %v1978_v39 = vpop.f32.mrf.mxu1  ;;  %v2330_v49 = vpop.f32.mrf.mxu0 }
 0x1b9   :  { %v7990_v14 = vadd.f32 %v5829_v8, %v2117_v58  ;;  %v2115_v57 = vadd.f32 %v1978_v39, %v9207_v2 }
 0x1ba   :  { %v5768_v42 = vpop.f32.mrf.mxu1  ;;  %v5832_v6 = vpop.f32.mrf.mxu0  ;;  %6007 = vmatmul.mubr.msk.bf16.gmra.mxu1 %vm260_vm0, %v9203_v55  ;;  %6071 = vmatmul.mubr.msk.bf16.gmra.mxu0 %vm260_vm0, %v7643_v1 }
 0x1bb   :  { %9206 = vst [vmem:[#allocation69_spill] sm:$0xff] %v7990_v14  ;;  %v7997_v61 = vadd.f32 %v2330_v49, %v2115_v57  ;;  %v2120_v16 = vadd.f32 %v5768_v42, %v9209_v9  ;;  %6010 = vmatprep.mubr.msk.bf16.mxu1 %vm260_vm0, %v7643_v1  ;;  %6074 = vmatprep.mubr.msk.bf16.mxu0 %vm260_vm0, %v7646_v33  ;;  %v9214_v49 = vld [vmem:[#allocation13_spill] sm:$0xff] }
 0x1bc   :  { %v1991_v53 = vpop.f32.mrf.mxu1  ;;  %v2343_v63 = vpop.f32.mrf.mxu0  ;;  %v2955_v42 = vsel %vm2910_vm4, %v2860_v37, %v2892_v21 }
 0x1bd   :  { %9208 = vst [vmem:[#allocation27_spill] sm:$0xff] %v7997_v61  ;;  %v8006_v55 = vadd.f32 %v5832_v6, %v2120_v16  ;;  %v2118_v8 = vadd.f32 %v1991_v53, %v9212_v22  ;;  %v9216_v61 = vld [vmem:[#allocation40_spill] sm:$0xff]  ;;  %v9218_v16 = vld [vmem:[#allocation98_spill] sm:$0xff] }
 0x1be   :  { %v5769_v26 = vpop.f32.mrf.mxu1  ;;  %v5833_v58 = vpop.f32.mrf.mxu0 }
 0x1bf   :  { %v8009_v39 = vadd.f32 %v2343_v63, %v2118_v8  ;;  %v2121_v2 = vadd.f32 %v5769_v26, %v9214_v49  ;;  %v9219_v63 = vld [vmem:[#allocation33_spill] sm:$0xff] }
 0x1c0   :  { %v1994_v1 = vpop.f32.mrf.mxu1  ;;  %v2346_v57 = vpop.f32.mrf.mxu0  ;;  %v2861_v37 = vrot.slane %v9219_v63, 1  ;;  %v9223_v63 = vld [vmem:[#allocation46_spill] sm:$0xff] }
 0x1c1   :  { %9213 = vst [vmem:[#allocation50_spill] sm:$0xff] %v8009_v39  ;;  %v8013_v9 = vadd.f32 %v5833_v58, %v2121_v2  ;;  %v2119_v20 = vadd.f32 %v1994_v1, %v9216_v61  ;;  %v9220_v61 = vld [vmem:[#allocation96_spill] sm:$0xff] }
 0x1c2   :  { %v5772_v14 = vpop.f32.mrf.mxu1  ;;  %v5836_v29 = vpop.f32.mrf.mxu0  ;;  %6011 = vmatmul.mubr.msk.bf16.gmra.mxu1 %vm260_vm0, %v7646_v33  ;;  %6075 = vmatmul.mubr.msk.bf16.gmra.mxu0 %vm260_vm0, %v7675_v24  ;;  %v2893_v21 = vrot.slane %v9220_v61, 1  ;;  %v9221_v33 = vld [vmem:[#allocation100_spill] sm:$0xff] }
 0x1c3   :  { %9215 = vst [vmem:[#allocation34_spill] sm:$0xff] %v8013_v9  ;;  %v8020_v6 = vadd.f32 %v2346_v57, %v2119_v20  ;;  %v2124_v53 = vadd.f32 %v5772_v14, %v9218_v16  ;;  %6014 = vmatprep.mubr.msk.bf16.mxu1 %vm260_vm0, %v7675_v24  ;;  %6078 = vmatprep.mubr.msk.bf16.mxu0 %vm260_vm0, %v2955_v42  ;;  %v9222_v14 = vld [vmem:[#allocation103_spill] sm:$0xff] }
 0x1c4   :  { %v2007_v22 = vpop.f32.mrf.mxu1  ;;  %v2359_v8 = vpop.f32.mrf.mxu0  ;;  %v2958_v24 = vsel %vm2910_vm4, %v2861_v37, %v2893_v21  ;;  %v9227_v37 = vld [vmem:[#allocation41_spill] sm:$0xff] }
 0x1c5   :  { %9217 = vst [vmem:[#allocation57_spill] sm:$0xff] %v8020_v6  ;;  %v8028_v26 = vadd.f32 %v5836_v29, %v2124_v53  ;;  %v2122_v58 = vadd.f32 %v2007_v22, %v9221_v33  ;;  %v9225_v53 = vld [vmem:[#allocation47_spill] sm:$0xff] }
 0x1c6   :  { %v5773_v49 = vpop.f32.mrf.mxu1  ;;  %v5837_v2 = vpop.f32.mrf.mxu0 }
 0x1c7   :  { %v8031_v1 = vadd.f32 %v2359_v8, %v2122_v58  ;;  %v2125_v57 = vadd.f32 %v5773_v49, %v9222_v14  ;;  %v9226_v8 = vld [vmem:[#allocation15_spill] sm:$0xff]  ;;  %v9229_v49 = vld [vmem:[#allocation52_spill] sm:$0xff] }
 0x1c8   :  { %v2010_v20 = vpop.f32.mrf.mxu1  ;;  %v2362_v16 = vpop.f32.mrf.mxu0 }
 0x1c9   :  { %v8035_v6 = vadd.f32 %v5837_v2, %v2125_v57  ;;  %v2123_v61 = vadd.f32 %v2010_v20, %v9223_v63 }
 0x1ca   :  { %v5776_v9 = vpop.f32.mrf.mxu1  ;;  %v5840_v39 = vpop.f32.mrf.mxu0  ;;  %6015 = vmatmul.mubr.msk.bf16.gmra.mxu1 %vm260_vm0, %v2955_v42  ;;  %6079 = vmatmul.mubr.msk.bf16.gmra.mxu0 %vm260_vm0, %v2958_v24  ;;  %v9231_v24 = vld [vmem:[#allocation19_spill] sm:$0xff] }
 0x1cb   :  { %v8040_v29 = vadd.f32 %v2362_v16, %v2123_v61  ;;  %v2128_v22 = vadd.f32 %v5776_v9, %v9225_v53  ;;  %6018 = vmatprep.mubr.msk.bf16.mxu1 %vm260_vm0, %v9226_v8  ;;  %6082 = vmatprep.mubr.msk.bf16.mxu0 %vm260_vm0, %v9227_v37  ;;  %v9233_v61 = vld [vmem:[#allocation43_spill] sm:$0xff] }
 0x1cc   :  { %v2023_v21 = vpop.f32.mrf.mxu1  ;;  %v2375_v33 = vpop.f32.mrf.mxu0 }
 0x1cd   :  { %9224 = vst [vmem:[#allocation66_spill] sm:$0xff] %v8040_v29  ;;  %v8047_v58 = vadd.f32 %v5840_v39, %v2128_v22  ;;  %v2126_v2 = vadd.f32 %v2023_v21, %v9229_v49  ;;  %v9234_v39 = vld [vmem:[#allocation53_spill] sm:$0xff]  ;;  %v9237_v49 = vld [vmem:[#allocation54_spill] sm:$0xff] }
 0x1ce   :  { %v5777_v14 = vpop.f32.mrf.mxu1  ;;  %v5841_v42 = vpop.f32.mrf.mxu0  ;;  %v9236_v21 = vld [vmem:[#allocation49_spill] sm:$0xff] }
 0x1cf   :  { %9228 = vst [vmem:[#allocation68_spill] sm:$0xff] %v8047_v58  ;;  %v8050_v57 = vadd.f32 %v2375_v33, %v2126_v2  ;;  %v2129_v20 = vadd.f32 %v5777_v14, %v9231_v24  ;;  %v9239_v24 = vld [vmem:[#allocation51_spill] sm:$0xff] }
 0x1d0   :  { %v2026_v16 = vpop.f32.mrf.mxu1  ;;  %v2378_v9 = vpop.f32.mrf.mxu0 }
 0x1d1   :  { %9230 = vst [vmem:[#allocation70_spill] sm:$0xff] %v8050_v57  ;;  %v8053_v63 = vadd.f32 %v5841_v42, %v2129_v20  ;;  %v2127_v53 = vadd.f32 %v2026_v16, %v9233_v61 }
 0x1d2   :  { %v5780_v8 = vpop.f32.mrf.mxu1  ;;  %v5844_v29 = vpop.f32.mrf.mxu0  ;;  %6019 = vmatmul.mubr.msk.bf16.gmra.mxu1 %vm260_vm0, %v9227_v37  ;;  %6083 = vmatmul.mubr.msk.bf16.gmra.mxu0 %vm260_vm0, %v9234_v39 }
 0x1d3   :  { %9232 = vst [vmem:[#allocation71_spill] sm:$0xff] %v8053_v63  ;;  %v8060_v22 = vadd.f32 %v2378_v9, %v2127_v53  ;;  %v2132_v33 = vadd.f32 %v5780_v8, %v9236_v21  ;;  %6022 = vmatprep.mubr.msk.bf16.mxu1 %vm260_vm0, %v9234_v39  ;;  %6086 = vmatprep.mubr.msk.bf16.mxu0 %vm260_vm0, %v9237_v49  ;;  %v9241_v9 = vld [vmem:[#allocation55_spill] sm:$0xff]  ;;  %v9243_v39 = vld [vmem:[#allocation61_spill] sm:$0xff] }
 0x1d4   :  { %v2039_v2 = vpop.f32.mrf.mxu1  ;;  %v2391_v14 = vpop.f32.mrf.mxu0 }
 0x1d5   :  { %9235 = vst [vmem:[#allocation76_spill] sm:$0xff] %v8060_v22  ;;  %v8067_v42 = vadd.f32 %v5844_v29, %v2132_v33  ;;  %v2130_v20 = vadd.f32 %v2039_v2, %v9239_v24  ;;  %v9244_v29 = vld [vmem:[#allocation25_spill] sm:$0xff]  ;;  %v9247_v24 = vld [vmem:[#allocation48_spill] sm:$0xff] }
 0x1d6   :  { %v5781_v37 = vpop.f32.mrf.mxu1  ;;  %v5845_v16 = vpop.f32.mrf.mxu0  ;;  %v9246_v2 = vld [vmem:[#allocation21_spill] sm:$0xff] }
 0x1d7   :  { %9238 = vst [vmem:[#allocation3_spill] sm:$0xff] %v8067_v42  ;;  %v8070_v61 = vadd.f32 %v2391_v14, %v2130_v20  ;;  %v2133_v53 = vadd.f32 %v5781_v37, %v9241_v9 }
 0x1d8   :  { %v2042_v22 = vpop.f32.mrf.mxu1  ;;  %v2394_v8 = vpop.f32.mrf.mxu0 }
 0x1d9   :  { %9240 = vst [vmem:[#allocation59_spill] sm:$0xff] %v8070_v61  ;;  %v8073_v21 = vadd.f32 %v5845_v16, %v2133_v53  ;;  %v2131_v63 = vadd.f32 %v2042_v22, %v9243_v39  ;;  %v9248_v16 = vld [vmem:[#allocation44_spill] sm:$0xff] }
 0x1da   :  { %v5784_v57 = vpop.f32.mrf.mxu1  ;;  %v5848_v58 = vpop.f32.mrf.mxu0  ;;  %6023 = vmatmul.mubr.msk.bf16.gmra.mxu1 %vm260_vm0, %v9237_v49  ;;  %6087 = vmatmul.mubr.msk.bf16.gmra.mxu0 %vm260_vm0, %v9244_v29 }
 0x1db   :  { %9242 = vst [vmem:[#allocation4_spill] sm:$0xff] %v8073_v21  ;;  %v8080_v33 = vadd.f32 %v2394_v8, %v2131_v63  ;;  %v2136_v14 = vadd.f32 %v5784_v57, %v9246_v2  ;;  %6026 = vmatprep.mubr.msk.bf16.mxu1 %vm260_vm0, %v9244_v29  ;;  %6090 = vmatprep.mubr.msk.bf16.mxu0 %vm260_vm0, %v9247_v24  ;;  %v9249_v63 = vld [vmem:[#allocation58_spill] sm:$0xff]  ;;  %v9250_v29 = vld [vmem:[#allocation60_spill] sm:$0xff] }
 0x1dc   :  { %v2055_v20 = vpop.f32.mrf.mxu1  ;;  %v2407_v22 = vpop.f32.mrf.mxu0 }
 0x1dd   :  { %9245 = vst [vmem:[#allocation65_spill] sm:$0xff] %v8080_v33  ;;  %v8087_v37 = vadd.f32 %v5848_v58, %v2136_v14  ;;  %v2134_v9 = vadd.f32 %v2055_v20, %v9248_v16 }
 0x1de   :  { %v5785_v49 = vpop.f32.mrf.mxu1  ;;  %v5849_v53 = vpop.f32.mrf.mxu0 }
 0x1df   :  { %v8090_v39 = vadd.f32 %v2407_v22, %v2134_v9  ;;  %v2137_v8 = vadd.f32 %v5785_v49, %v9249_v63 }
 0x1e0   :  { %v2058_v33 = vpop.f32.mrf.mxu1  ;;  %v2410_v57 = vpop.f32.mrf.mxu0 }
 0x1e1   :  { %v8093_v2 = vadd.f32 %v5849_v53, %v2137_v8  ;;  %v2135_v21 = vadd.f32 %v2058_v33, %v9250_v29 }
 0x1e2   :  { %v5788_v61 = vpop.f32.mrf.mxu1  ;;  %v5852_v42 = vpop.f32.mrf.mxu0  ;;  %6027 = vmatmul.mubr.msk.bf16.gmra.mxu1 %vm260_vm0, %v9247_v24  ;;  %6091 = vmatmul.mubr.msk.bf16.gmra.mxu0 %vm260_vm0, %v7791_v36 }
 0x1e3   :  { %v8100_v58 = vadd.f32 %v2410_v57, %v2135_v21  ;;  %v2140_v14 = vadd.f32 %v5788_v61, %v7784_v38  ;;  %6030 = vmatprep.mubr.msk.bf16.mxu1 %vm260_vm0, %v7791_v36  ;;  %6094 = vmatprep.mubr.msk.bf16.mxu0 %vm260_vm0, %v7794_v23  ;;  %v9251_v36 = vld [vmem:[#allocation62_spill] sm:$0xff] }
 0x1e4   :  { %v2071_v20 = vpop.f32.mrf.mxu1  ;;  %v2423_v33 = vpop.f32.mrf.mxu0 }
 0x1e5   :  { %v8107_v22 = vadd.f32 %v5852_v42, %v2140_v14  ;;  %v2138_v16 = vadd.f32 %v2071_v20, %v7787_v54 }
 0x1e6   :  { %v5789_v24 = vpop.f32.mrf.mxu1  ;;  %v5853_v9 = vpop.f32.mrf.mxu0 }
 0x1e7   :  { %v8110_v49 = vadd.f32 %v2423_v33, %v2138_v16  ;;  %v2141_v21 = vadd.f32 %v5789_v24, %v7796_v62  ;;  %v9252_v24 = vld [vmem:[#allocation63_spill] sm:$0xff] }
 0x1e8   :  { %v2074_v53 = vpop.f32.mrf.mxu1  ;;  %v2426_v38 = vpop.f32.mrf.mxu0 }
 0x1e9   :  { %v8113_v61 = vadd.f32 %v5853_v9, %v2141_v21  ;;  %v2139_v63 = vadd.f32 %v2074_v53, %v9251_v36 }
 0x1ea   :  { %v5864_v8 = vpop.f32.mrf.mxu1  ;;  %v5928_v57 = vpop.f32.mrf.mxu0  ;;  %6031 = vmatmul.mubr.msk.bf16.gmra.mxu1 %vm260_vm0, %v7794_v23  ;;  %6095 = vmatmul.mubr.msk.bf16.gmra.mxu0 %vm260_vm0, %v7821_v45 }
 0x1eb   :  { %v8120_v54 = vadd.f32 %v2426_v38, %v2139_v63  ;;  %v2792_v42 = vadd.f32 %v5864_v8, %v7814_v50  ;;  %6034 = vmatprep.mubr.msk.bf16.mxu1 %vm260_vm0, %v7821_v45  ;;  %6098 = vmatprep.mubr.msk.bf16.mxu0 %vm260_vm0, %v7824_v19  ;;  %v9253_v45 = vld [vmem:[#allocation64_spill] sm:$0xff] }
 0x1ec   :  { %v2567_v62 = vpop.f32.mrf.mxu1  ;;  %v3130_v29 = vpop.f32.mrf.mxu0 }
 0x1ed   :  { %v8127_v14 = vadd.f32 %v5928_v57, %v2792_v42  ;;  %v2790_v20 = vadd.f32 %v2567_v62, %v7817_v41  ;;  %v9254_v62 = vld [vmem:[#allocation31_spill] sm:$0xff] }
 0x1ee   :  { %v5865_v23 = vpop.f32.mrf.mxu1  ;;  %v5929_v33 = vpop.f32.mrf.mxu0 }
 0x1ef   :  { %v8130_v16 = vadd.f32 %v3130_v29, %v2790_v20  ;;  %v2793_v9 = vadd.f32 %v5865_v23, %v9252_v24  ;;  %v2876_v29 = vrot.slane %v9254_v62, 1  ;;  %v9255_v20 = vld [vmem:[#allocation24_spill] sm:$0xff] }
 0x1f0   :  { %v2570_v21 = vpop.f32.mrf.mxu1  ;;  %v3133_v50 = vpop.f32.mrf.mxu0  ;;  %v2908_v23 = vrot.slane %v9255_v20, 1 }
 0x1f1   :  { %v8133_v53 = vadd.f32 %v5929_v33, %v2793_v9  ;;  %v2791_v38 = vadd.f32 %v2570_v21, %v9253_v45 }
 0x1f2   :  { %v5868_v36 = vpop.f32.mrf.mxu1  ;;  %v5932_v63 = vpop.f32.mrf.mxu0  ;;  %6035 = vmatmul.mubr.msk.bf16.gmra.mxu1 %vm260_vm0, %v7824_v19  ;;  %6099 = vmatmul.mubr.msk.bf16.gmra.mxu0 %vm260_vm0, %v7858_v48  ;;  %v3003_v45 = vsel %vm2910_vm4, %v2876_v29, %v2908_v23 }
 0x1f3   :  { %v8140_v41 = vadd.f32 %v3133_v50, %v2791_v38  ;;  %v2796_v8 = vadd.f32 %v5868_v36, %v7850_v10  ;;  %6038 = vmatprep.mubr.msk.bf16.mxu1 %vm260_vm0, %v7858_v48  ;;  %6102 = vmatprep.mubr.msk.bf16.mxu0 %vm260_vm0, %v7862_v15 }
 0x1f4   :  { %v2583_v57 = vpop.f32.mrf.mxu1  ;;  %v3146_v42 = vpop.f32.mrf.mxu0 }
 0x1f5   :  { %v8149_v19 = vadd.f32 %v5932_v63, %v2796_v8  ;;  %v2794_v33 = vadd.f32 %v2583_v57, %v7854_v13  ;;  %v2877_v63 = vrot.slane %v9189_v7, 1 }
 0x1f6   :  { %v5869_v24 = vpop.f32.mrf.mxu1  ;;  %v5933_v9 = vpop.f32.mrf.mxu0 }
 0x1f7   :  { %v8152_v21 = vadd.f32 %v3146_v42, %v2794_v33  ;;  %v2797_v10 = vadd.f32 %v5869_v24, %v7864_v59 }
 0x1f8   :  { %v2586_v48 = vpop.f32.mrf.mxu1  ;;  %v3149_v50 = vpop.f32.mrf.mxu0 }
 0x1f9   :  { %v8156_v38 = vadd.f32 %v5933_v9, %v2797_v10  ;;  %v2795_v36 = vadd.f32 %v2586_v48, %v7872_v5  ;;  %v2909_v5 = vrot.slane %v7832_v30, 1 }
 0x1fa   :  { %v5872_v62 = vpop.f32.mrf.mxu1  ;;  %v5936_v20 = vpop.f32.mrf.mxu0  ;;  %6039 = vmatmul.mubr.msk.bf16.gmra.mxu1 %vm260_vm0, %v7862_v15  ;;  %6103 = vmatmul.mubr.msk.bf16.gmra.mxu0 %vm260_vm0, %v7889_v28 }
 0x1fb   :  { %v8163_v13 = vadd.f32 %v3149_v50, %v2795_v36  ;;  %v2800_v59 = vadd.f32 %v5872_v62, %v7880_v43  ;;  %6042 = vmatprep.mubr.msk.bf16.mxu1 %vm260_vm0, %v7889_v28  ;;  %6106 = vmatprep.mubr.msk.bf16.mxu0 %vm260_vm0, %v3003_v45  ;;  %v3006_v28 = vsel %vm2910_vm4, %v2877_v63, %v2909_v5 }
 0x1fc   :  { %v2599_v8 = vpop.f32.mrf.mxu1  ;;  %v3162_v57 = vpop.f32.mrf.mxu0 }
 0x1fd   :  { %v8171_v42 = vadd.f32 %v5936_v20, %v2800_v59  ;;  %v2798_v15 = vadd.f32 %v2599_v8, %v7883_v18 }
 0x1fe   :  { %v5873_v29 = vpop.f32.mrf.mxu1  ;;  %v5937_v23 = vpop.f32.mrf.mxu0 }
 0x1ff   :  { %v8174_v33 = vadd.f32 %v3162_v57, %v2798_v15  ;;  %v2801_v43 = vadd.f32 %v5873_v29, %v7891_v44 }
 0x200   :  { %v2602_v24 = vpop.f32.mrf.mxu1  ;;  %v3165_v9 = vpop.f32.mrf.mxu0 }
 0x201   :  { %v8178_v10 = vadd.f32 %v5937_v23, %v2801_v43  ;;  %v2799_v30 = vadd.f32 %v2602_v24, %v7897_v46 }
 0x202   :  { %v5876_v7 = vpop.f32.mrf.mxu1  ;;  %v5940_v48 = vpop.f32.mrf.mxu0  ;;  %6043 = vmatmul.mubr.msk.bf16.gmra.mxu1 %vm260_vm0, %v3003_v45  ;;  %6107 = vmatmul.mubr.msk.bf16.gmra.mxu0 %vm260_vm0, %v3006_v28  ;;  %vm4781_vm0 = vsmask.f32 3328 }
 0x203   :  { %v8183_v18 = vadd.f32 %v3165_v9, %v2799_v30  ;;  %v2804_v50 = vadd.f32 %v5876_v7, %v7904_v40 }
 0x204   :  { %v2615_v36 = vpop.f32.mrf.mxu1  ;;  %v3178_v44 = vpop.f32.mrf.mxu0 }
 0x205   :  { %v8186_v62 = vadd.f32 %v5940_v48, %v2804_v50  ;;  %v2802_v20 = vadd.f32 %v2615_v36, %v7907_v17 }
 0x206   :  { %v5877_v59 = vpop.f32.mrf.mxu1  ;;  %v5941_v63 = vpop.f32.mrf.mxu0 }
 0x207   :  { %v8189_v5 = vadd.f32 %v3178_v44, %v2802_v20  ;;  %v2805_v46 = vadd.f32 %v5877_v59, %v7910_v51 }
 0x208   :  { %v2618_v8 = vpop.f32.mrf.mxu1  ;;  %v3181_v45 = vpop.f32.mrf.mxu0 }
 0x209   :  { %v8192_v57 = vadd.f32 %v5941_v63, %v2805_v46  ;;  %v2803_v15 = vadd.f32 %v2618_v8, %v7917_v56 }
 0x20a   :  { %v5880_v29 = vpop.f32.mrf.mxu1  ;;  %v5944_v40 = vpop.f32.mrf.mxu0 }
 0x20b   :  { %v8195_v23 = vadd.f32 %v3181_v45, %v2803_v15  ;;  %v2808_v43 = vadd.f32 %v5880_v29, %v7924_v47 }
 0x20c   :  { %v2631_v28 = vpop.f32.mrf.mxu1  ;;  %v3194_v17 = vpop.f32.mrf.mxu0 }
 0x20d   :  { %v8198_v24 = vadd.f32 %v5944_v40, %v2808_v43  ;;  %v2806_v9 = vadd.f32 %v2631_v28, %v7927_v25 }
 0x20e   :  { %v5881_v30 = vpop.f32.mrf.mxu1  ;;  %v5945_v51 = vpop.f32.mrf.mxu0 }
 0x20f   :  { %v8201_v7 = vadd.f32 %v3194_v17, %v2806_v9  ;;  %v2809_v48 = vadd.f32 %v5881_v30, %v7930_v35 }
 0x210   :  { %v2634_v50 = vpop.f32.mrf.mxu1  ;;  %v3197_v56 = vpop.f32.mrf.mxu0 }
 0x211   :  { %v8204_v36 = vadd.f32 %v5945_v51, %v2809_v48  ;;  %v2807_v44 = vadd.f32 %v2634_v50, %v7937_v32 }
 0x212   :  { %v5884_v20 = vpop.f32.mrf.mxu1  ;;  %v5948_v47 = vpop.f32.mrf.mxu0 }
 0x213   :  { %v8207_v59 = vadd.f32 %v3197_v56, %v2807_v44  ;;  %v2812_v63 = vadd.f32 %v5884_v20, %v7944_v31 }
 0x214   :  { %v2647_v46 = vpop.f32.mrf.mxu1  ;;  %v3210_v25 = vpop.f32.mrf.mxu0 }
 0x215   :  { %v8210_v8 = vadd.f32 %v5948_v47, %v2812_v63  ;;  %v2810_v45 = vadd.f32 %v2647_v46, %v7947_v0 }
 0x216   :  { %v5885_v15 = vpop.f32.mrf.mxu1  ;;  %v5949_v35 = vpop.f32.mrf.mxu0 }
 0x217   :  { %v8213_v29 = vadd.f32 %v3210_v25, %v2810_v45  ;;  %v2813_v40 = vadd.f32 %v5885_v15, %v7950_v60 }
 0x218   :  { %v2650_v43 = vpop.f32.mrf.mxu1  ;;  %v3213_v32 = vpop.f32.mrf.mxu0 }
 0x219   :  { %v8216_v28 = vadd.f32 %v5949_v35, %v2813_v40  ;;  %v2811_v17 = vadd.f32 %v2650_v43, %v7957_v27 }
 0x21a   :  { %v5888_v9 = vpop.f32.mrf.mxu1  ;;  %v5952_v31 = vpop.f32.mrf.mxu0 }
 0x21b   :  { %v8219_v30 = vadd.f32 %v3213_v32, %v2811_v17  ;;  %v2816_v51 = vadd.f32 %v5888_v9, %v7964_v34 }
 0x21c   :  { %v2663_v48 = vpop.f32.mrf.mxu1  ;;  %v3226_v0 = vpop.f32.mrf.mxu0 }
 0x21d   :  { %v8222_v50 = vadd.f32 %v5952_v31, %v2816_v51  ;;  %v2814_v56 = vadd.f32 %v2663_v48, %v7967_v4  ;;  %v9256_v31 = vld [vmem:[#allocation69_spill] sm:$0xff] }
 0x21e   :  { %v5889_v44 = vpop.f32.mrf.mxu1  ;;  %v5953_v60 = vpop.f32.mrf.mxu0 }
 0x21f   :  { %v8225_v20 = vadd.f32 %v3226_v0, %v2814_v56  ;;  %v2817_v47 = vadd.f32 %v5889_v44, %v7970_v3  ;;  %v9257_v56 = vld [vmem:[#allocation27_spill] sm:$0xff] }
 0x220   :  { %v2666_v63 = vpop.f32.mrf.mxu1  ;;  %v3229_v27 = vpop.f32.mrf.mxu0 }
 0x221   :  { %v8228_v46 = vadd.f32 %v5953_v60, %v2817_v47  ;;  %v2815_v25 = vadd.f32 %v2666_v63, %v7977_v12 }
 0x222   :  { %v5892_v45 = vpop.f32.mrf.mxu1  ;;  %v5956_v34 = vpop.f32.mrf.mxu0 }
 0x223   :  { %v8231_v15 = vadd.f32 %v3229_v27, %v2815_v25  ;;  %v2820_v35 = vadd.f32 %v5892_v45, %v7984_v11  ;;  %v9258_v45 = vld [vmem:[#allocation50_spill] sm:$0xff] }
 0x224   :  { %v2679_v40 = vpop.f32.mrf.mxu1  ;;  %v3242_v4 = vpop.f32.mrf.mxu0 }
 0x225   :  { %v8234_v43 = vadd.f32 %v5956_v34, %v2820_v35  ;;  %v2818_v32 = vadd.f32 %v2679_v40, %v7987_v52 }
 0x226   :  { %v5893_v17 = vpop.f32.mrf.mxu1  ;;  %v5957_v3 = vpop.f32.mrf.mxu0 }
 0x227   :  { %v8237_v9 = vadd.f32 %v3242_v4, %v2818_v32  ;;  %v2821_v51 = vadd.f32 %v5893_v17, %v9256_v31  ;;  %v9259_v32 = vld [vmem:[#allocation34_spill] sm:$0xff] }
 0x228   :  { %v2682_v48 = vpop.f32.mrf.mxu1  ;;  %v3245_v12 = vpop.f32.mrf.mxu0 }
 0x229   :  { %v8240_v0 = vadd.f32 %v5957_v3, %v2821_v51  ;;  %v2819_v44 = vadd.f32 %v2682_v48, %v9257_v56  ;;  %v9260_v48 = vld [vmem:[#allocation57_spill] sm:$0xff] }
 0x22a   :  { %v5896_v60 = vpop.f32.mrf.mxu1  ;;  %v5960_v11 = vpop.f32.mrf.mxu0 }
 0x22b   :  { %v8243_v47 = vadd.f32 %v3245_v12, %v2819_v44  ;;  %v2824_v63 = vadd.f32 %v5896_v60, %v8006_v55 }
 0x22c   :  { %v2695_v27 = vpop.f32.mrf.mxu1  ;;  %v3258_v52 = vpop.f32.mrf.mxu0 }
 0x22d   :  { %v8246_v25 = vadd.f32 %v5960_v11, %v2824_v63  ;;  %v2822_v34 = vadd.f32 %v2695_v27, %v9258_v45 }
 0x22e   :  { %v5897_v35 = vpop.f32.mrf.mxu1  ;;  %v5961_v40 = vpop.f32.mrf.mxu0 }
 0x22f   :  { %v8249_v4 = vadd.f32 %v3258_v52, %v2822_v34  ;;  %v2825_v17 = vadd.f32 %v5897_v35, %v9259_v32 }
 0x230   :  { %v2698_v3 = vpop.f32.mrf.mxu1  ;;  %v3261_v31 = vpop.f32.mrf.mxu0 }
 0x231   :  { %v8252_v51 = vadd.f32 %v5961_v40, %v2825_v17  ;;  %v2823_v12 = vadd.f32 %v2698_v3, %v9260_v48 }
 0x232   :  { %v5900_v56 = vpop.f32.mrf.mxu1  ;;  %v5964_v55 = vpop.f32.mrf.mxu0 }
 0x233   :  { %v8255_v44 = vadd.f32 %v3261_v31, %v2823_v12  ;;  %v2828_v60 = vadd.f32 %v5900_v56, %v8028_v26  ;;  %v9264_v31 = vld [vmem:[#allocation66_spill] sm:$0xff] }
 0x234   :  { %v2711_v11 = vpop.f32.mrf.mxu1  ;;  %v3274_v63 = vpop.f32.mrf.mxu0 }
 0x235   :  { %v8258_v27 = vadd.f32 %v5964_v55, %v2828_v60  ;;  %v2826_v52 = vadd.f32 %v2711_v11, %v8031_v1  ;;  %v9266_v55 = vld [vmem:[#allocation68_spill] sm:$0xff] }
 0x236   :  { %v5901_v45 = vpop.f32.mrf.mxu1  ;;  %v5965_v34 = vpop.f32.mrf.mxu0 }
 0x237   :  { %9261 = vst [vmem:[#allocation73_spill] sm:$0xff] %v8258_v27  ;;  %v8261_v35 = vadd.f32 %v3274_v63, %v2826_v52  ;;  %v2829_v40 = vadd.f32 %v5901_v45, %v8035_v6  ;;  %v9268_v63 = vld [vmem:[#allocation70_spill] sm:$0xff] }
 0x238   :  { %v2714_v32 = vpop.f32.mrf.mxu1  ;;  %v3277_v17 = vpop.f32.mrf.mxu0 }
 0x239   :  { %9262 = vst [vmem:[#allocation75_spill] sm:$0xff] %v8261_v35  ;;  %v8264_v3 = vadd.f32 %v5965_v34, %v2829_v40  ;;  %v2827_v48 = vadd.f32 %v2714_v32, %v9264_v31  ;;  %v9270_v34 = vld [vmem:[#allocation71_spill] sm:$0xff] }
 0x23a   :  { %v5904_v12 = vpop.f32.mrf.mxu1  ;;  %v5968_v26 = vpop.f32.mrf.mxu0 }
 0x23b   :  { %9263 = vst [vmem:[#allocation77_spill] sm:$0xff] %v8264_v3  ;;  %v8267_v56 = vadd.f32 %v3277_v17, %v2827_v48  ;;  %v2832_v60 = vadd.f32 %v5904_v12, %v9266_v55  ;;  %v9272_v17 = vld [vmem:[#allocation76_spill] sm:$0xff] }
 0x23c   :  { %v2727_v27 = vpop.f32.mrf.mxu1  ;;  %v3290_v1 = vpop.f32.mrf.mxu0 }
 0x23d   :  { %9265 = vst [vmem:[#allocation78_spill] sm:$0xff] %v8267_v56  ;;  %v8270_v11 = vadd.f32 %v5968_v26, %v2832_v60  ;;  %v2830_v52 = vadd.f32 %v2727_v27, %v9268_v63  ;;  %v9274_v26 = vld [vmem:[#allocation3_spill] sm:$0xff] }
 0x23e   :  { %v5905_v35 = vpop.f32.mrf.mxu1  ;;  %v5969_v6 = vpop.f32.mrf.mxu0 }
 0x23f   :  { %9267 = vst [vmem:[#allocation79_spill] sm:$0xff] %v8270_v11  ;;  %v8273_v45 = vadd.f32 %v3290_v1, %v2830_v52  ;;  %v2833_v40 = vadd.f32 %v5905_v35, %v9270_v34  ;;  %v9275_v1 = vld [vmem:[#allocation59_spill] sm:$0xff] }
 0x240   :  { %v2730_v3 = vpop.f32.mrf.mxu1  ;;  %v3293_v32 = vpop.f32.mrf.mxu0 }
 0x241   :  { %9269 = vst [vmem:[#allocation84_spill] sm:$0xff] %v8273_v45  ;;  %v8276_v31 = vadd.f32 %v5969_v6, %v2833_v40  ;;  %v2831_v48 = vadd.f32 %v2730_v3, %v9272_v17  ;;  %v9276_v6 = vld [vmem:[#allocation4_spill] sm:$0xff] }
 0x242   :  { %v5908_v56 = vpop.f32.mrf.mxu1  ;;  %v5972_v12 = vpop.f32.mrf.mxu0 }
 0x243   :  { %9271 = vst [vmem:[#allocation5_spill] sm:$0xff] %v8276_v31  ;;  %v8279_v55 = vadd.f32 %v3293_v32, %v2831_v48  ;;  %v2836_v60 = vadd.f32 %v5908_v56, %v9274_v26  ;;  %v9277_v32 = vld [vmem:[#allocation65_spill] sm:$0xff] }
 0x244   :  { %v2743_v11 = vpop.f32.mrf.mxu1  ;;  %v3306_v27 = vpop.f32.mrf.mxu0 }
 0x245   :  { %9273 = vst [vmem:[#allocation67_spill] sm:$0xff] %v8279_v55  ;;  %v8282_v63 = vadd.f32 %v5972_v12, %v2836_v60  ;;  %v2834_v52 = vadd.f32 %v2743_v11, %v9275_v1 }
 0x246   :  { %v5909_v45 = vpop.f32.mrf.mxu1  ;;  %v5973_v35 = vpop.f32.mrf.mxu0 }
 0x247   :  { %v8285_v34 = vadd.f32 %v3306_v27, %v2834_v52  ;;  %v2837_v40 = vadd.f32 %v5909_v45, %v9276_v6 }
 0x248   :  { %v2746_v31 = vpop.f32.mrf.mxu1  ;;  %v3309_v3 = vpop.f32.mrf.mxu0 }
 0x249   :  { %v8288_v17 = vadd.f32 %v5973_v35, %v2837_v40  ;;  %v2835_v48 = vadd.f32 %v2746_v31, %v9277_v32 }
 0x24a   :  { %v5912_v55 = vpop.f32.mrf.mxu1  ;;  %v5976_v56 = vpop.f32.mrf.mxu0 }
 0x24b   :  { %v8291_v26 = vadd.f32 %v3309_v3, %v2835_v48  ;;  %v2840_v12 = vadd.f32 %v5912_v55, %v8087_v37 }
 0x24c   :  { %v2759_v60 = vpop.f32.mrf.mxu1  ;;  %v3322_v11 = vpop.f32.mrf.mxu0 }
 0x24d   :  { %v8294_v1 = vadd.f32 %v5976_v56, %v2840_v12  ;;  %v2838_v27 = vadd.f32 %v2759_v60, %v8090_v39 }
 0x24e   :  { %v5913_v52 = vpop.f32.mrf.mxu1  ;;  %v5977_v45 = vpop.f32.mrf.mxu0 }
 0x24f   :  { %9278 = vst [vmem:[#allocation6_spill] sm:$0xff] %v8294_v1  ;;  %v8297_v6 = vadd.f32 %v3322_v11, %v2838_v27  ;;  %v2841_v35 = vadd.f32 %v5913_v52, %v8093_v2 }
 0x250   :  { %v2762_v40 = vpop.f32.mrf.mxu1  ;;  %v3325_v31 = vpop.f32.mrf.mxu0 }
 0x251   :  { %9279 = vst [vmem:[#allocation72_spill] sm:$0xff] %v8297_v6  ;;  %v8300_v32 = vadd.f32 %v5977_v45, %v2841_v35  ;;  %v2839_v3 = vadd.f32 %v2762_v40, %v8100_v58 }
 0x252   :  { %v5916_v48 = vpop.f32.mrf.mxu1  ;;  %v5980_v37 = vpop.f32.mrf.mxu0 }
 0x253   :  { %9280 = vst [vmem:[#allocation81_spill] sm:$0xff] %v8300_v32  ;;  %v8303_v55 = vadd.f32 %v3325_v31, %v2839_v3  ;;  %v2844_v56 = vadd.f32 %v5916_v48, %v8107_v22 }
 0x254   :  { %v2775_v12 = vpop.f32.mrf.mxu1  ;;  %v3338_v39 = vpop.f32.mrf.mxu0 }
 0x255   :  { %9281 = vst [vmem:[#allocation83_spill] sm:$0xff] %v8303_v55  ;;  %v8306_v60 = vadd.f32 %v5980_v37, %v2844_v56  ;;  %v2842_v11 = vadd.f32 %v2775_v12, %v8110_v49  ;;  %v8321_v49 = vld [vmem:[%s8823_s2] ss:$0 sm:$0xff] }
 0x256   :  { %v5917_v27 = vpop.f32.mrf.mxu1  ;;  %v5981_v2 = vpop.f32.mrf.mxu0 }
 0x257   :  { %9282 = vst [vmem:[#allocation85_spill] sm:$0xff] %v8306_v60  ;;  %v8309_v52 = vadd.f32 %v3338_v39, %v2842_v11  ;;  %v2845_v45 = vadd.f32 %v5917_v27, %v8113_v61 }
 0x258   :  { %v2778_v35 = vpop.f32.mrf.mxu1  ;;  %v3341_v58 = vpop.f32.mrf.mxu0 }
 0x259   :  { %9283 = vst [vmem:[#allocation86_spill] sm:$0xff] %v8309_v52  ;;  %v8312_v40 = vadd.f32 %v5981_v2, %v2845_v45  ;;  %v2843_v31 = vadd.f32 %v2778_v35, %v8120_v54 }
 0x25a   :  { %v5992_v3 = vpop.f32.mrf.mxu1  ;;  %v6056_v22 = vpop.f32.mrf.mxu0 }
 0x25b   :  { %9284 = vst [vmem:[#allocation87_spill] sm:$0xff] %v8312_v40  ;;  %v8315_v48 = vadd.f32 %v3341_v58, %v2843_v31  ;;  %v3705_v37 = vadd.f32 %v5992_v3, %v8127_v14 }
 0x25c   :  { %v3480_v56 = vpop.f32.mrf.mxu1  ;;  %v3830_v12 = vpop.f32.mrf.mxu0 }
 0x25d   :  { %9285 = vst [vmem:[#allocation92_spill] sm:$0xff] %v8315_v48  ;;  %v4055_v61 = vadd.f32 %v6056_v22, %v3705_v37  ;;  %v3703_v39 = vadd.f32 %v3480_v56, %v8130_v16 }
 0x25e   :  { %v5993_v11 = vpop.f32.mrf.mxu1  ;;  %v6057_v27 = vpop.f32.mrf.mxu0 }
 0x25f   :  { %v4118_v54 = vadd.f32 %v8321_v49, %v4055_v61  ;;  %v4053_v2 = vadd.f32 %v3830_v12, %v3703_v39  ;;  %v3706_v45 = vadd.f32 %v5993_v11, %v8133_v53 }
 0x260   :  { %v3483_v35 = vpop.f32.mrf.mxu1  ;;  %v3833_v58 = vpop.f32.mrf.mxu0 }
 0x261   :  { %v4230_v14 = vmul.f32 0.01, %v4118_v54  ;;  %v4116_v31 = vadd.f32 %v8321_v49, %v4053_v2  ;;  %v4056_v3 = vadd.f32 %v6057_v27, %v3706_v45  ;;  %vm4174_vm5 = vcmp.ge.f32.partialorder %v4118_v54, 0.0 }
 0x262   :  { %v3704_v48 = vadd.f32 %v3483_v35, %v8140_v41  ;;  %v5996_v40 = vpop.f32.mrf.mxu1  ;;  %v6060_v22 = vpop.f32.mrf.mxu0 }
 0x263   :  { %vm4172_vm6 = vcmp.ge.f32.partialorder %v4116_v31, 0.0  ;;  %v4228_v16 = vmul.f32 0.01, %v4116_v31  ;;  %v4119_v37 = vadd.f32 %v8321_v49, %v4056_v3  ;;  %v3709_v12 = vadd.f32 %v5996_v40, %v8149_v19 }
 0x264   :  { %v4054_v56 = vadd.f32 %v3833_v58, %v3704_v48  ;;  %v3496_v53 = vpop.f32.mrf.mxu1  ;;  %v3846_v61 = vpop.f32.mrf.mxu0  ;;  %v4286_v39 = vsel %vm4174_vm5, %v4118_v54, %v4230_v14  ;;  %vm8353_vm5 = vmand %vm4780_vm15, %vm4781_vm0 }
 0x265   :  { %v4284_v11 = vsel %vm4172_vm6, %v4116_v31, %v4228_v16  ;;  %v4231_v52 = vmul.f32 0.01, %v4119_v37  ;;  %v3707_v27 = vadd.f32 %v3496_v53, %v8152_v21  ;;  %vm4175_vm8 = vcmp.ge.f32.partialorder %v4119_v37, 0.0 }
 0x266   :  { %v4340_v2 = vmax.f32 %v4284_v11, %v4286_v39  ;;  %v4117_v41 = vadd.f32 %v8321_v49, %v4054_v56  ;;  %v4059_v45 = vadd.f32 %v6060_v22, %v3709_v12  ;;  %v5997_v35 = vpop.f32.mrf.mxu1  ;;  %v6061_v60 = vpop.f32.mrf.mxu0 }
 0x267   :  { %v4057_v3 = vadd.f32 %v3846_v61, %v3707_v27  ;;  %v3710_v48 = vadd.f32 %v5997_v35, %v8156_v38  ;;  %v4287_v14 = vsel %vm4175_vm8, %v4119_v37, %v4231_v52 }
 0x268   :  { %v4382_v19 = vrot.slane %v4340_v2, 1  ;;  %vm4173_vm11 = vcmp.ge.f32.partialorder %v4117_v41, 0.0  ;;  %v4229_v40 = vmul.f32 0.01, %v4117_v41  ;;  %v4122_v54 = vadd.f32 %v8321_v49, %v4059_v45  ;;  %v3499_v58 = vpop.f32.mrf.mxu1  ;;  %v3849_v21 = vpop.f32.mrf.mxu0 }
 0x269   :  { %v4120_v31 = vadd.f32 %v8321_v49, %v4057_v3  ;;  %v4060_v22 = vadd.f32 %v6061_v60, %v3710_v48  ;;  %v3708_v16 = vadd.f32 %v3499_v58, %v8163_v13 }
 0x26a   :  { %v4410_v56 = vmax.f32 %v4340_v2, %v4382_v19  ;;  %v4285_v12 = vsel %vm4173_vm11, %v4117_v41, %v4229_v40  ;;  %vm4178_vm1 = vcmp.ge.f32.partialorder %v4122_v54, 0.0  ;;  %v4234_v38 = vmul.f32 0.01, %v4122_v54  ;;  %v6000_v53 = vpop.f32.mrf.mxu1  ;;  %v6064_v61 = vpop.f32.mrf.mxu0 }
 0x26b   :  { %v4341_v39 = vmax.f32 %v4285_v12, %v4287_v14  ;;  %vm4176_vm2 = vcmp.ge.f32.partialorder %v4120_v31, 0.0  ;;  %v4232_v11 = vmul.f32 0.01, %v4120_v31  ;;  %v4123_v52 = vadd.f32 %v8321_v49, %v4060_v22 }
 0x26c   :  { %v4494_v37 = vrot.slane %v4410_v56, 1  ;;  %v4522_v27 = vrot.slane %v4410_v56, 2  ;;  %v4550_v45 = vrot.slane %v4410_v56, 3  ;;  %v4290_v60 = vsel %vm4178_vm1, %v4122_v54, %v4234_v38  ;;  %v3512_v35 = vpop.f32.mrf.mxu1  ;;  %v3862_v13 = vpop.f32.mrf.mxu0 }
 0x26d   :  { %v4438_v2 = vrot.slane %v4341_v39, 1  ;;  %v4288_v41 = vsel %vm4176_vm2, %v4120_v31, %v4232_v11  ;;  %vm4179_vm3 = vcmp.ge.f32.partialorder %v4123_v52, 0.0  ;;  %v4235_v3 = vmul.f32 0.01, %v4123_v52 }
 0x26e   :  { %v4677_v48 = vsel %vm4676_vm7, %v4410_v56, %v4494_v37  ;;  %v4342_v19 = vmax.f32 %v4288_v41, %v4290_v60  ;;  %v4058_v40 = vadd.f32 %v3849_v21, %v3708_v16  ;;  %v3713_v58 = vadd.f32 %v6000_v53, %v8171_v42  ;;  %v6001_v14 = vpop.f32.mrf.mxu1  ;;  %v6065_v12 = vpop.f32.mrf.mxu0 }
 0x26f   :  { %v4692_v22 = vsel %vm4691_vm9, %v4677_v48, %v4522_v27  ;;  %v4466_v55 = vmax.f32 %v4341_v39, %v4438_v2  ;;  %v4291_v32 = vsel %vm4179_vm3, %v4123_v52, %v4235_v3  ;;  %v3711_v54 = vadd.f32 %v3512_v35, %v8174_v33 }
 0x270   :  { %v4707_v38 = vsel %vm4706_vm10, %v4692_v22, %v4550_v45  ;;  %v4383_v6 = vrot.slane %v4342_v19, 1  ;;  %v4121_v31 = vadd.f32 %v8321_v49, %v4058_v40  ;;  %v4063_v11 = vadd.f32 %v6064_v61, %v3713_v58  ;;  %v3515_v1 = vpop.f32.mrf.mxu1  ;;  %v3865_v56 = vpop.f32.mrf.mxu0 }
 0x271   :  { %v4592_v37 = vrot.slane %v4466_v55, 4  ;;  %v4620_v21 = vrot.slane %v4466_v55, 5  ;;  %v4648_v16 = vrot.slane %v4466_v55, 6  ;;  %v4061_v42 = vadd.f32 %v3862_v13, %v3711_v54 }
 0x272   :  { %v4411_v53 = vmax.f32 %v4342_v19, %v4383_v6  ;;  %vm4177_vm4 = vcmp.ge.f32.partialorder %v4121_v31, 0.0  ;;  %v4233_v60 = vmul.f32 0.01, %v4121_v31  ;;  %v4126_v39 = vadd.f32 %v8321_v49, %v4063_v11  ;;  %v6004_v52 = vpop.f32.mrf.mxu1  ;;  %v6068_v27 = vpop.f32.mrf.mxu0 }
 0x273   :  { %v4722_v33 = vsel %vm4721_vm12, %v4707_v38, %v4592_v37  ;;  %v4124_v45 = vadd.f32 %v8321_v49, %v4061_v42  ;;  %v3714_v35 = vadd.f32 %v6001_v14, %v8178_v10  ;;  %v3712_v61 = vadd.f32 %v3515_v1, %v8183_v18  ;;  %v4783_v10 = vld [vmem:[%s8824_s3] sm:$0xf] }
 0x274   :  { %v4737_v2 = vsel %vm4736_vm13, %v4722_v33, %v4620_v21  ;;  %v4495_v41 = vrot.slane %v4411_v53, 1  ;;  %v4523_v55 = vrot.slane %v4411_v53, 2  ;;  %v4551_v13 = vrot.slane %v4411_v53, 3  ;;  %v3528_v6 = vpop.f32.mrf.mxu1  ;;  %v3878_v3 = vpop.f32.mrf.mxu0 }
 0x275   :  { %v4752_v48 = vsel %vm4751_vm14, %v4737_v2, %v4648_v16  ;;  %v4289_v18 = vsel %vm4177_vm4, %v4121_v31, %v4233_v60  ;;  %vm4182_vm6 = vcmp.ge.f32.partialorder %v4126_v39, 0.0  ;;  %v4238_v1 = vmul.f32 0.01, %v4126_v39 }
 0x276   :  { %v4766_v40 = vpack.c.bf16 %v4752_v48, %v4752_v48  ;;  %v4678_v58 = vsel %vm4676_vm7, %v4411_v53, %v4495_v41  ;;  %v4343_v14 = vmax.f32 %v4289_v18, %v4291_v32  ;;  %vm4180_vm8 = vcmp.ge.f32.partialorder %v4124_v45, 0.0  ;;  %v6005_v22 = vpop.f32.mrf.mxu1  ;;  %v6069_v54 = vpop.f32.mrf.mxu0 }
 0x277   :  { %v4693_v38 = vsel %vm4691_vm9, %v4678_v58, %v4523_v55  ;;  %v4294_v11 = vsel %vm4182_vm6, %v4126_v39, %v4238_v1  ;;  %v4236_v37 = vmul.f32 0.01, %v4124_v45  ;;  %v4064_v21 = vadd.f32 %v6065_v12, %v3714_v35 }
 0x278   :  { %v4784_v16 = vsel %vm8353_vm5, %v4766_v40, %v4783_v10  ;;  %v4439_v42 = vrot.slane %v4343_v14, 1  ;;  %v4708_v31 = vsel %vm4706_vm10, %v4693_v38, %v4551_v13  ;;  %v4062_v60 = vadd.f32 %v3865_v56, %v3712_v61  ;;  %v3531_v33 = vpop.f32.mrf.mxu1  ;;  %v8366_v2 = vpop.f32.mrf.mxu0 }
 0x279   :  { %4785 = vst [vmem:[%s8824_s3] sm:$0xf] %v4784_v16  ;;  %v4292_v32 = vsel %vm4180_vm8, %v4124_v45, %v4236_v37  ;;  %v4127_v53 = vadd.f32 %v8321_v49, %v4064_v21  ;;  %v3717_v39 = vadd.f32 %v6004_v52, %v8186_v62  ;;  %v3715_v12 = vadd.f32 %v3528_v6, %v8189_v5 }
 0x27a   :  { %v4467_v35 = vmax.f32 %v4343_v14, %v4439_v42  ;;  %v4344_v41 = vmax.f32 %v4292_v32, %v4294_v11  ;;  %v4125_v55 = vadd.f32 %v8321_v49, %v4062_v60  ;;  %v3718_v56 = vadd.f32 %v6005_v22, %v8192_v57  ;;  %v6008_v61 = vpop.f32.mrf.mxu1  ;;  %v6072_v13 = vpop.f32.mrf.mxu0  ;;  %v4786_v60 = vld [vmem:[%s8824_s3 + $0x4] sm:$0xf] }
 0x27b   :  { %vm4183_vm11 = vcmp.ge.f32.partialorder %v4127_v53, 0.0  ;;  %v4239_v48 = vmul.f32 0.01, %v4127_v53  ;;  %v4067_v10 = vadd.f32 %v6068_v27, %v3717_v39  ;;  %v4065_v18 = vadd.f32 %v3878_v3, %v3715_v12 }
 0x27c   :  { %v4593_v1 = vrot.slane %v4467_v35, 4  ;;  %v4621_v45 = vrot.slane %v4467_v35, 5  ;;  %v4649_v40 = vrot.slane %v4467_v35, 6  ;;  %v4384_v58 = vrot.slane %v4344_v41, 1  ;;  %v3544_v38 = vpop.f32.mrf.mxu1  ;;  %v3894_v62 = vpop.f32.mrf.mxu0 }
 0x27d   :  { %v4295_v52 = vsel %vm4183_vm11, %v4127_v53, %v4239_v48  ;;  %vm4181_vm15 = vcmp.ge.f32.partialorder %v4125_v55, 0.0  ;;  %v4237_v5 = vmul.f32 0.01, %v4125_v55  ;;  %v4130_v6 = vadd.f32 %v8321_v49, %v4067_v10 }
 0x27e   :  { %v4723_v14 = vsel %vm4721_vm12, %v4708_v31, %v4593_v1  ;;  %v4412_v57 = vmax.f32 %v4344_v41, %v4384_v58  ;;  %v4128_v22 = vadd.f32 %v8321_v49, %v4065_v18  ;;  %v4068_v11 = vadd.f32 %v6069_v54, %v3718_v56  ;;  %v6009_v37 = vpop.f32.mrf.mxu1  ;;  %v6073_v27 = vpop.f32.mrf.mxu0 }
 0x27f   :  { %v4738_v3 = vsel %vm4736_vm13, %v4723_v14, %v4621_v45  ;;  %v4293_v21 = vsel %vm4181_vm15, %v4125_v55, %v4237_v5  ;;  %vm4186_vm0 = vcmp.ge.f32.partialorder %v4130_v6, 0.0  ;;  %v4242_v16 = vmul.f32 0.01, %v4130_v6 }
 0x280   :  { %v4753_v42 = vsel %vm4751_vm14, %v4738_v3, %v4649_v40  ;;  %v4496_v32 = vrot.slane %v4412_v57, 1  ;;  %v4524_v53 = vrot.slane %v4412_v57, 2  ;;  %v4552_v31 = vrot.slane %v4412_v57, 3  ;;  %v3547_v39 = vpop.f32.mrf.mxu1  ;;  %v3897_v12 = vpop.f32.mrf.mxu0 }
 0x281   :  { %v4767_v35 = vpack.c.bf16 %v4753_v42, %v4753_v42  ;;  %v4345_v54 = vmax.f32 %v4293_v21, %v4295_v52  ;;  %v4298_v41 = vsel %vm4186_vm0, %v4130_v6, %v4242_v16  ;;  %vm4184_vm1 = vcmp.ge.f32.partialorder %v4128_v22, 0.0 }
 0x282   :  { %v4679_v56 = vsel %vm4676_vm7, %v4412_v57, %v4496_v32  ;;  %v4240_v55 = vmul.f32 0.01, %v4128_v22  ;;  %v4131_v48 = vadd.f32 %v8321_v49, %v4068_v11  ;;  %v3716_v10 = vadd.f32 %v3531_v33, %v8195_v23  ;;  %v6012_v18 = vpop.f32.mrf.mxu1  ;;  %v8387_v1 = vpop.f32.mrf.mxu0 }
 0x283   :  { %v4787_v45 = vsel %vm8353_vm5, %v4767_v35, %v4786_v60  ;;  %v4694_v40 = vsel %vm4691_vm9, %v4679_v56, %v4524_v53  ;;  %v4440_v58 = vrot.slane %v4345_v54, 1  ;;  %v3721_v52 = vadd.f32 %v6008_v61, %v8198_v24 }
 0x284   :  { %4788 = vst [vmem:[%s8824_s3 + $0x4] sm:$0xf] %v4787_v45  ;;  %v4709_v5 = vsel %vm4706_vm10, %v4694_v40, %v4552_v31  ;;  %v4296_v6 = vsel %vm4184_vm1, %v4128_v22, %v4240_v55  ;;  %vm4187_vm2 = vcmp.ge.f32.partialorder %v4131_v48, 0.0  ;;  %v4243_v23 = vmul.f32 0.01, %v4131_v48  ;;  %v8397_v33 = vpop.f32.mrf.mxu1  ;;  %v8399_v14 = vpop.f32.mrf.mxu0 }
 0x285   :  { %v4468_v57 = vmax.f32 %v4345_v54, %v4440_v58  ;;  %v4346_v11 = vmax.f32 %v4296_v6, %v4298_v41  ;;  %v4066_v3 = vadd.f32 %v8366_v2, %v3716_v10  ;;  %v4071_v21 = vadd.f32 %v6072_v13, %v3721_v52 }
 0x286   :  { %v4299_v16 = vsel %vm4187_vm2, %v4131_v48, %v4243_v23  ;;  %v3719_v24 = vadd.f32 %v3544_v38, %v8201_v7  ;;  %v3722_v61 = vadd.f32 %v6009_v37, %v8204_v36  ;;  %v3720_v42 = vadd.f32 %v3547_v39, %v8207_v59  ;;  %v6013_v60 = vpop.f32.mrf.mxu1  ;;  %v8405_v22 = vpop.f32.mrf.mxu0 }
 0x287   :  { %v4594_v32 = vrot.slane %v4468_v57, 4  ;;  %v4622_v53 = vrot.slane %v4468_v57, 5  ;;  %v4650_v31 = vrot.slane %v4468_v57, 6  ;;  %v4385_v35 = vrot.slane %v4346_v11, 1 }
 0x288   :  { %v4129_v54 = vadd.f32 %v8321_v49, %v4066_v3  ;;  %v4134_v41 = vadd.f32 %v8321_v49, %v4071_v21  ;;  %v4069_v2 = vadd.f32 %v3894_v62, %v3719_v24  ;;  %v4072_v13 = vadd.f32 %v6073_v27, %v3722_v61  ;;  %v8409_v56 = vpop.f32.mrf.mxu1  ;;  %v8411_v7 = vpop.f32.mrf.mxu0  ;;  %v4789_v27 = vld [vmem:[%s8824_s3 + $0x8] sm:$0xf] }
 0x289   :  { %v4724_v36 = vsel %vm4721_vm12, %v4709_v5, %v4594_v32  ;;  %v4413_v59 = vmax.f32 %v4346_v11, %v4385_v35  ;;  %v4070_v38 = vadd.f32 %v3897_v12, %v3720_v42  ;;  %v3725_v37 = vadd.f32 %v6012_v18, %v8210_v8 }
 0x28a   :  { %v4739_v39 = vsel %vm4736_vm13, %v4724_v36, %v4622_v53  ;;  %vm4185_vm3 = vcmp.ge.f32.partialorder %v4129_v54, 0.0  ;;  %v4241_v55 = vmul.f32 0.01, %v4129_v54  ;;  %vm4190_vm4 = vcmp.ge.f32.partialorder %v4134_v41, 0.0  ;;  %v8416_v48 = vpop.f32.mrf.mxu1  ;;  %v8418_v10 = vpop.f32.mrf.mxu0 }
 0x28b   :  { %v4754_v62 = vsel %vm4751_vm14, %v4739_v39, %v4650_v31  ;;  %v4497_v45 = vrot.slane %v4413_v59, 1  ;;  %v4525_v40 = vrot.slane %v4413_v59, 2  ;;  %v4553_v12 = vrot.slane %v4413_v59, 3 }
 0x28c   :  { %v4768_v58 = vpack.c.bf16 %v4754_v62, %v4754_v62  ;;  %v4297_v8 = vsel %vm4185_vm3, %v4129_v54, %v4241_v55  ;;  %v4246_v18 = vmul.f32 0.01, %v4134_v41  ;;  %v4132_v52 = vadd.f32 %v8321_v49, %v4069_v2  ;;  %v8425_v5 = vpop.f32.mrf.mxu1  ;;  %v8427_v6 = vpop.f32.mrf.mxu0 }
 0x28d   :  { %v4680_v23 = vsel %vm4676_vm7, %v4413_v59, %v4497_v45  ;;  %v4347_v57 = vmax.f32 %v4297_v8, %v4299_v16  ;;  %v4135_v11 = vadd.f32 %v8321_v49, %v4072_v13  ;;  %v4133_v3 = vadd.f32 %v8321_v49, %v4070_v38 }
 0x28e   :  { %v4790_v21 = vsel %vm8353_vm5, %v4768_v58, %v4789_v27  ;;  %v4695_v24 = vsel %vm4691_vm9, %v4680_v23, %v4525_v40  ;;  %v4302_v61 = vsel %vm4190_vm4, %v4134_v41, %v4246_v18  ;;  %vm4188_vm6 = vcmp.ge.f32.partialorder %v4132_v52, 0.0  ;;  %v8436_v42 = vpop.f32.mrf.mxu1  ;;  %v8438_v32 = vpop.f32.mrf.mxu0 }
 0x28f   :  { %4791 = vst [vmem:[%s8824_s3 + $0x8] sm:$0xf] %v4790_v21  ;;  %v4441_v16 = vrot.slane %v4347_v57, 1  ;;  %v4710_v53 = vsel %vm4706_vm10, %v4695_v24, %v4553_v12  ;;  %v4244_v31 = vmul.f32 0.01, %v4132_v52  ;;  %vm4191_vm8 = vcmp.ge.f32.partialorder %v4135_v11, 0.0 }
 0x290   :  { %v4247_v35 = vmul.f32 0.01, %v4135_v11  ;;  %vm4189_vm11 = vcmp.ge.f32.partialorder %v4133_v3, 0.0  ;;  %v4245_v54 = vmul.f32 0.01, %v4133_v3  ;;  %v4075_v2 = vadd.f32 %v8387_v1, %v3725_v37  ;;  %v8445_v41 = vpop.f32.mrf.mxu1  ;;  %v8447_v13 = vpop.f32.mrf.mxu0 }
 0x291   :  { %v4469_v36 = vmax.f32 %v4347_v57, %v4441_v16  ;;  %v4300_v59 = vsel %vm4188_vm6, %v4132_v52, %v4244_v31  ;;  %v3723_v38 = vadd.f32 %v8397_v33, %v8213_v29  ;;  %v3726_v39 = vadd.f32 %v6013_v60, %v8216_v28 }
 0x292   :  { %v4348_v55 = vmax.f32 %v4300_v59, %v4302_v61  ;;  %v4303_v62 = vsel %vm4191_vm8, %v4135_v11, %v4247_v35  ;;  %v4301_v27 = vsel %vm4189_vm11, %v4133_v3, %v4245_v54  ;;  %v4138_v45 = vadd.f32 %v8321_v49, %v4075_v2  ;;  %v8453_v40 = vpop.f32.mrf.mxu1  ;;  %v8455_v12 = vpop.f32.mrf.mxu0 }
 0x293   :  { %v4595_v1 = vrot.slane %v4469_v36, 4  ;;  %v4623_v37 = vrot.slane %v4469_v36, 5  ;;  %v4651_v58 = vrot.slane %v4469_v36, 6  ;;  %v4349_v8 = vmax.f32 %v4301_v27, %v4303_v62 }
 0x294   :  { %v4386_v18 = vrot.slane %v4348_v55, 1  ;;  %vm4194_vm15 = vcmp.ge.f32.partialorder %v4138_v45, 0.0  ;;  %v4250_v52 = vmul.f32 0.01, %v4138_v45  ;;  %v4073_v29 = vadd.f32 %v8399_v14, %v3723_v38  ;;  %v8458_v33 = vpop.f32.mrf.mxu1  ;;  %v8460_v28 = vpop.f32.mrf.mxu0 }
 0x295   :  { %v4725_v60 = vsel %vm4721_vm12, %v4710_v53, %v4595_v1  ;;  %v4442_v23 = vrot.slane %v4349_v8, 1  ;;  %v4076_v57 = vadd.f32 %v8405_v22, %v3726_v39  ;;  %v3724_v11 = vadd.f32 %v8409_v56, %v8219_v30  ;;  %v4792_v53 = vld [vmem:[%s8824_s3 + $0xc] sm:$0xf] }
 0x296   :  { %v4740_v3 = vsel %vm4736_vm13, %v4725_v60, %v4623_v37  ;;  %v4414_v21 = vmax.f32 %v4348_v55, %v4386_v18  ;;  %v4306_v24 = vsel %vm4194_vm15, %v4138_v45, %v4250_v52  ;;  %v4136_v61 = vadd.f32 %v8321_v49, %v4073_v29  ;;  %v8468_v16 = vpop.f32.mrf.mxu1  ;;  %v8470_v14 = vpop.f32.mrf.mxu0 }
 0x297   :  { %v4755_v31 = vsel %vm4751_vm14, %v4740_v3, %v4651_v58  ;;  %v4470_v22 = vmax.f32 %v4349_v8, %v4442_v23  ;;  %v4139_v35 = vadd.f32 %v8321_v49, %v4076_v57  ;;  %v4074_v30 = vadd.f32 %v8411_v7, %v3724_v11 }
 0x298   :  { %v4769_v56 = vpack.c.bf16 %v4755_v31, %v4755_v31  ;;  %v4498_v54 = vrot.slane %v4414_v21, 1  ;;  %v4526_v2 = vrot.slane %v4414_v21, 2  ;;  %v4554_v36 = vrot.slane %v4414_v21, 3  ;;  %v8478_v59 = vpop.f32.mrf.mxu1  ;;  %v8480_v38 = vpop.f32.mrf.mxu0 }
 0x299   :  { %v4596_v39 = vrot.slane %v4470_v22, 4  ;;  %v4624_v55 = vrot.slane %v4470_v22, 5  ;;  %v4652_v62 = vrot.slane %v4470_v22, 6  ;;  %vm4192_vm0 = vcmp.ge.f32.partialorder %v4136_v61, 0.0 }
 0x29a   :  { %v4793_v27 = vsel %vm8353_vm5, %v4769_v56, %v4792_v53  ;;  %v4681_v45 = vsel %vm4676_vm7, %v4414_v21, %v4498_v54  ;;  %v4248_v1 = vmul.f32 0.01, %v4136_v61  ;;  %vm4195_vm1 = vcmp.ge.f32.partialorder %v4139_v35, 0.0  ;;  %v8485_v7 = vpop.f32.mrf.mxu1  ;;  %v8487_v37 = vpop.f32.mrf.mxu0 }
 0x29b   :  { %4794 = vst [vmem:[%s8824_s3 + $0xc] sm:$0xf] %v4793_v27  ;;  %v4696_v58 = vsel %vm4691_vm9, %v4681_v45, %v4526_v2  ;;  %v4251_v8 = vmul.f32 0.01, %v4139_v35  ;;  %v4137_v18 = vadd.f32 %v8321_v49, %v4074_v30  ;;  %v3729_v52 = vadd.f32 %v8416_v48, %v8222_v50 }
 0x29c   :  { %v4711_v29 = vsel %vm4706_vm10, %v4696_v58, %v4554_v36  ;;  %v4304_v60 = vsel %vm4192_vm0, %v4136_v61, %v4248_v1  ;;  %v3727_v23 = vadd.f32 %v8425_v5, %v8225_v20  ;;  %v3730_v57 = vadd.f32 %v8436_v42, %v8228_v46  ;;  %v8501_v11 = vpop.f32.mrf.mxu1  ;;  %v8503_v3 = vpop.f32.mrf.mxu0 }
 0x29d   :  { %v4726_v21 = vsel %vm4721_vm12, %v4711_v29, %v4596_v39  ;;  %v4350_v31 = vmax.f32 %v4304_v60, %v4306_v24  ;;  %v4307_v53 = vsel %vm4195_vm1, %v4139_v35, %v4251_v8  ;;  %vm4193_vm2 = vcmp.ge.f32.partialorder %v4137_v18, 0.0  ;;  %v4795_v24 = vld [vmem:[%s8824_s3 + $0x10] sm:$0xf] }
 0x29e   :  { %v4741_v50 = vsel %vm4736_vm13, %v4726_v21, %v4624_v55  ;;  %v4249_v48 = vmul.f32 0.01, %v4137_v18  ;;  %v4079_v61 = vadd.f32 %v8418_v10, %v3729_v52  ;;  %v4077_v20 = vadd.f32 %v8427_v6, %v3727_v23  ;;  %v8510_v5 = vpop.f32.mrf.mxu1  ;;  %v8512_v46 = vpop.f32.mrf.mxu0 }
 0x29f   :  { %v4756_v42 = vsel %vm4751_vm14, %v4741_v50, %v4652_v62  ;;  %v4387_v22 = vrot.slane %v4350_v31, 1  ;;  %v4080_v35 = vadd.f32 %v8438_v32, %v3730_v57  ;;  %v3728_v30 = vadd.f32 %v8445_v41, %v8231_v15 }
 0x2a0   :  { %v4770_v56 = vpack.c.bf16 %v4756_v42, %v4756_v42  ;;  %v4305_v10 = vsel %vm4193_vm2, %v4137_v18, %v4249_v48  ;;  %v4142_v6 = vadd.f32 %v8321_v49, %v4079_v61  ;;  %v4140_v54 = vadd.f32 %v8321_v49, %v4077_v20  ;;  %v8523_v2 = vpop.f32.mrf.mxu1  ;;  %v8525_v36 = vpop.f32.mrf.mxu0 }
 0x2a1   :  { %v4415_v39 = vmax.f32 %v4350_v31, %v4387_v22  ;;  %v4351_v55 = vmax.f32 %v4305_v10, %v4307_v53  ;;  %v4143_v62 = vadd.f32 %v8321_v49, %v4080_v35  ;;  %v4078_v27 = vadd.f32 %v8447_v13, %v3728_v30 }
 0x2a2   :  { %v4796_v32 = vsel %vm8353_vm5, %v4770_v56, %v4795_v24  ;;  %vm4198_vm3 = vcmp.ge.f32.partialorder %v4142_v6, 0.0  ;;  %v4254_v15 = vmul.f32 0.01, %v4142_v6  ;;  %vm4196_vm4 = vcmp.ge.f32.partialorder %v4140_v54, 0.0  ;;  %v8531_v41 = vpop.f32.mrf.mxu1  ;;  %v8533_v45 = vpop.f32.mrf.mxu0 }
 0x2a3   :  { %4797 = vst [vmem:[%s8824_s3 + $0x10] sm:$0xf] %v4796_v32  ;;  %v4499_v1 = vrot.slane %v4415_v39, 1  ;;  %v4527_v58 = vrot.slane %v4415_v39, 2  ;;  %v4555_v8 = vrot.slane %v4415_v39, 3  ;;  %v4443_v18 = vrot.slane %v4351_v55, 1 }
 0x2a4   :  { %v4310_v52 = vsel %vm4198_vm3, %v4142_v6, %v4254_v15  ;;  %v4252_v13 = vmul.f32 0.01, %v4140_v54  ;;  %vm4199_vm6 = vcmp.ge.f32.partialorder %v4143_v62, 0.0  ;;  %v4255_v29 = vmul.f32 0.01, %v4143_v62  ;;  %v8538_v60 = vpop.f32.mrf.mxu1  ;;  %v8540_v23 = vpop.f32.mrf.mxu0 }
 0x2a5   :  { %v4682_v57 = vsel %vm4676_vm7, %v4415_v39, %v4499_v1  ;;  %v4471_v21 = vmax.f32 %v4351_v55, %v4443_v18  ;;  %v4141_v31 = vadd.f32 %v8321_v49, %v4078_v27  ;;  %v3733_v53 = vadd.f32 %v8453_v40, %v8234_v43 }
 0x2a6   :  { %v4697_v50 = vsel %vm4691_vm9, %v4682_v57, %v4527_v58  ;;  %v4308_v48 = vsel %vm4196_vm4, %v4140_v54, %v4252_v13  ;;  %v4311_v61 = vsel %vm4199_vm6, %v4143_v62, %v4255_v29  ;;  %v3731_v20 = vadd.f32 %v8458_v33, %v8237_v9  ;;  %v8550_v42 = vpop.f32.mrf.mxu1  ;;  %v8553_v56 = vpop.f32.mrf.mxu0 }
 0x2a7   :  { %v4597_v24 = vrot.slane %v4471_v21, 4  ;;  %v4625_v22 = vrot.slane %v4471_v21, 5  ;;  %v4653_v35 = vrot.slane %v4471_v21, 6  ;;  %v4712_v30 = vsel %vm4706_vm10, %v4697_v50, %v4555_v8 }
 0x2a8   :  { %v4352_v10 = vmax.f32 %v4308_v48, %v4310_v52  ;;  %vm4197_vm8 = vcmp.ge.f32.partialorder %v4141_v31, 0.0  ;;  %v4253_v43 = vmul.f32 0.01, %v4141_v31  ;;  %v4083_v40 = vadd.f32 %v8455_v12, %v3733_v53  ;;  %v8556_v6 = vpop.f32.mrf.mxu1 }
 0x2a9   :  { %v4727_v54 = vsel %vm4721_vm12, %v4712_v30, %v4597_v24  ;;  %v4081_v9 = vadd.f32 %v8460_v28, %v3731_v20  ;;  %v3734_v33 = vadd.f32 %v8468_v16, %v8240_v0  ;;  %v3732_v39 = vadd.f32 %v8478_v59, %v8243_v47  ;;  %v4798_v28 = vld [vmem:[%s8824_s3 + $0x14] sm:$0xf]  ;;  %v8574_v47 = vpop.f32.mrf.mxu0 }
 0x2aa   :  { %v4742_v55 = vsel %vm4736_vm13, %v4727_v54, %v4625_v22  ;;  %v4388_v62 = vrot.slane %v4352_v10, 1  ;;  %v4309_v27 = vsel %vm4197_vm8, %v4141_v31, %v4253_v43  ;;  %v4146_v32 = vadd.f32 %v8321_v49, %v4083_v40  ;;  %v8566_v15 = vpop.f32.mrf.mxu1 }
 0x2ab   :  { %v4757_v12 = vsel %vm4751_vm14, %v4742_v55, %v4653_v35  ;;  %v4353_v1 = vmax.f32 %v4309_v27, %v4311_v61  ;;  %v4144_v0 = vadd.f32 %v8321_v49, %v4081_v9  ;;  %v4084_v16 = vadd.f32 %v8470_v14, %v3734_v33  ;;  %v8584_v61 = vpop.f32.mrf.mxu0 }
 0x2ac   :  { %v4771_v59 = vpack.c.bf16 %v4757_v12, %v4757_v12  ;;  %v4416_v58 = vmax.f32 %v4352_v10, %v4388_v62  ;;  %vm4202_vm11 = vcmp.ge.f32.partialorder %v4146_v32, 0.0  ;;  %v4258_v8 = vmul.f32 0.01, %v4146_v32  ;;  %v8579_v53 = vpop.f32.mrf.mxu1 }
 0x2ad   :  { %v4444_v18 = vrot.slane %v4353_v1, 1  ;;  %vm4200_vm15 = vcmp.ge.f32.partialorder %v4144_v0, 0.0  ;;  %v4256_v52 = vmul.f32 0.01, %v4144_v0  ;;  %v4147_v13 = vadd.f32 %v8321_v49, %v4084_v16  ;;  %v8600_v12 = vpop.f32.mrf.mxu0 }
 0x2ae   :  { %v4799_v29 = vsel %vm8353_vm5, %v4771_v59, %v4798_v28  ;;  %v4500_v57 = vrot.slane %v4416_v58, 1  ;;  %v4528_v21 = vrot.slane %v4416_v58, 2  ;;  %v4556_v31 = vrot.slane %v4416_v58, 3  ;;  %v8591_v62 = vpop.f32.mrf.mxu1  ;;  %v4801_v59 = vld [vmem:[%s8824_s3 + $0x18] sm:$0xf] }
 0x2af   :  { %4800 = vst [vmem:[%s8824_s3 + $0x14] sm:$0xf] %v4799_v29  ;;  %v4472_v14 = vmax.f32 %v4353_v1, %v4444_v18  ;;  %v4314_v50 = vsel %vm4202_vm11, %v4146_v32, %v4258_v8  ;;  %v4312_v48 = vsel %vm4200_vm15, %v4144_v0, %v4256_v52  ;;  %vm4203_vm0 = vcmp.ge.f32.partialorder %v4147_v13, 0.0 }
 0x2b0   :  { %v4683_v20 = vsel %vm4676_vm7, %v4416_v58, %v4500_v57  ;;  %v4354_v24 = vmax.f32 %v4312_v48, %v4314_v50  ;;  %v4259_v22 = vmul.f32 0.01, %v4147_v13  ;;  %v4082_v35 = vadd.f32 %v8480_v38, %v3732_v39  ;;  %v8610_v8 = vpop.f32.mrf.mxu1  ;;  %v8615_v57 = vpop.f32.mrf.mxu0 }
 0x2b1   :  { %v4698_v30 = vsel %vm4691_vm9, %v4683_v20, %v4528_v21  ;;  %v4598_v10 = vrot.slane %v4472_v14, 4  ;;  %v4626_v43 = vrot.slane %v4472_v14, 5  ;;  %v4654_v40 = vrot.slane %v4472_v14, 6 }
 0x2b2   :  { %v4713_v54 = vsel %vm4706_vm10, %v4698_v30, %v4556_v31  ;;  %v4389_v9 = vrot.slane %v4354_v24, 1  ;;  %v4315_v33 = vsel %vm4203_vm0, %v4147_v13, %v4259_v22  ;;  %v4145_v55 = vadd.f32 %v8321_v49, %v4082_v35 }
 0x2b3   :  { %v4728_v27 = vsel %vm4721_vm12, %v4713_v54, %v4598_v10  ;;  %v3737_v32 = vadd.f32 %v8485_v7, %v8246_v25  ;;  %v3735_v38 = vadd.f32 %v8501_v11, %v8249_v4  ;;  %v3738_v39 = vadd.f32 %v8510_v5, %v8252_v51  ;;  %v8632_v10 = vpop.f32.mrf.mxu0  ;;  %v9289_v54 = vld [vmem:[#allocation75_spill] sm:$0xff] }
 0x2b4   :  { %v4743_v28 = vsel %vm4736_vm13, %v4728_v27, %v4626_v43  ;;  %v4417_v1 = vmax.f32 %v4354_v24, %v4389_v9  ;;  %vm4201_vm1 = vcmp.ge.f32.partialorder %v4145_v55, 0.0  ;;  %v4257_v0 = vmul.f32 0.01, %v4145_v55  ;;  %v8627_v24 = vpop.f32.mrf.mxu1 }
 0x2b5   :  { %v4758_v16 = vsel %vm4751_vm14, %v4743_v28, %v4654_v40  ;;  %v4087_v25 = vadd.f32 %v8487_v37, %v3737_v32  ;;  %v4085_v4 = vadd.f32 %v8503_v3, %v3735_v38  ;;  %v4088_v7 = vadd.f32 %v8512_v46, %v3738_v39 }
 0x2b6   :  { %v4772_v51 = vpack.c.bf16 %v4758_v16, %v4758_v16  ;;  %v4501_v11 = vrot.slane %v4417_v1, 1  ;;  %v4529_v5 = vrot.slane %v4417_v1, 2  ;;  %v4557_v58 = vrot.slane %v4417_v1, 3 }
 0x2b7   :  { %v4313_v18 = vsel %vm4201_vm1, %v4145_v55, %v4257_v0  ;;  %v4150_v52 = vadd.f32 %v8321_v49, %v4087_v25  ;;  %v4148_v13 = vadd.f32 %v8321_v49, %v4085_v4  ;;  %v4151_v29 = vadd.f32 %v8321_v49, %v4088_v7  ;;  %v8641_v0 = vpop.f32.mrf.mxu1  ;;  %v8644_v25 = vpop.f32.mrf.mxu0  ;;  %v9291_v7 = vld [vmem:[#allocation78_spill] sm:$0xff] }
 0x2b8   :  { %v4802_v37 = vsel %vm8353_vm5, %v4772_v51, %v4801_v59  ;;  %v4684_v3 = vsel %vm4676_vm7, %v4417_v1, %v4501_v11  ;;  %v4355_v46 = vmax.f32 %v4313_v18, %v4315_v33  ;;  %v3736_v21 = vadd.f32 %v8523_v2, %v8255_v44  ;;  %v9288_v2 = vld [vmem:[#allocation73_spill] sm:$0xff] }
 0x2b9   :  { %4803 = vst [vmem:[%s8824_s3 + $0x18] sm:$0xf] %v4802_v37  ;;  %v4699_v31 = vsel %vm4691_vm9, %v4684_v3, %v4529_v5  ;;  %vm4206_vm2 = vcmp.ge.f32.partialorder %v4150_v52, 0.0  ;;  %v4262_v14 = vmul.f32 0.01, %v4150_v52  ;;  %vm4204_vm3 = vcmp.ge.f32.partialorder %v4148_v13, 0.0  ;;  %v8658_v3 = vpop.f32.mrf.mxu0 }
 0x2ba   :  { %v4445_v50 = vrot.slane %v4355_v46, 1  ;;  %v4714_v48 = vsel %vm4706_vm10, %v4699_v31, %v4557_v58  ;;  %v4260_v20 = vmul.f32 0.01, %v4148_v13  ;;  %vm4207_vm4 = vcmp.ge.f32.partialorder %v4151_v29, 0.0  ;;  %v9290_v33 = vld [vmem:[#allocation77_spill] sm:$0xff] }
 0x2bb   :  { %v4318_v22 = vsel %vm4206_vm2, %v4150_v52, %v4262_v14  ;;  %v4263_v35 = vmul.f32 0.01, %v4151_v29  ;;  %v4086_v44 = vadd.f32 %v8525_v36, %v3736_v21  ;;  %v3741_v30 = vadd.f32 %v8531_v41, %v9288_v2  ;;  %v4804_v18 = vld [vmem:[%s8824_s3 + $0x1c] sm:$0xf]  ;;  %v8663_v14 = vld [vmem:[%s8823_s2] ss:$0 sm:$0xff] }
 0x2bc   :  { %v4473_v43 = vmax.f32 %v4355_v46, %v4445_v50  ;;  %v4316_v40 = vsel %vm4204_vm3, %v4148_v13, %v4260_v20  ;;  %v3739_v9 = vadd.f32 %v8538_v60, %v9289_v54  ;;  %v3742_v55 = vadd.f32 %v8550_v42, %v9290_v33 }
 0x2bd   :  { %v4356_v27 = vmax.f32 %v4316_v40, %v4318_v22  ;;  %v4319_v32 = vsel %vm4207_vm4, %v4151_v29, %v4263_v35  ;;  %v4149_v38 = vadd.f32 %v8321_v49, %v4086_v44  ;;  %v4091_v39 = vadd.f32 %v8533_v45, %v3741_v30  ;;  %v9292_v35 = vld [vmem:[#allocation79_spill] sm:$0xff] }
 0x2be   :  { %v4599_v36 = vrot.slane %v4473_v43, 4  ;;  %v4627_v28 = vrot.slane %v4473_v43, 5  ;;  %v4655_v1 = vrot.slane %v4473_v43, 6  ;;  %v4089_v41 = vadd.f32 %v8540_v23, %v3739_v9 }
 0x2bf   :  { %v4390_v16 = vrot.slane %v4356_v27, 1  ;;  %vm4205_vm6 = vcmp.ge.f32.partialorder %v4149_v38, 0.0  ;;  %v4261_v59 = vmul.f32 0.01, %v4149_v38  ;;  %v4154_v60 = vadd.f32 %v8321_v49, %v4091_v39 }
 0x2c0   :  { %v4729_v42 = vsel %vm4721_vm12, %v4714_v48, %v4599_v36  ;;  %v4152_v4 = vadd.f32 %v8321_v49, %v4089_v41  ;;  %v4092_v45 = vadd.f32 %v8553_v56, %v3742_v55  ;;  %v3740_v51 = vadd.f32 %v8556_v6, %v9291_v7  ;;  %v8656_v49 = vpop.f32.mrf.mxu1  ;;  %v8681_v55 = vpop.f32.mrf.mxu0 }
 0x2c1   :  { %v4744_v23 = vsel %vm4736_vm13, %v4729_v42, %v4627_v28  ;;  %v4418_v11 = vmax.f32 %v4356_v27, %v4390_v16  ;;  %v4317_v5 = vsel %vm4205_vm6, %v4149_v38, %v4261_v59  ;;  %vm4210_vm8 = vcmp.ge.f32.partialorder %v4154_v60, 0.0  ;;  %v9293_v16 = vld [vmem:[#allocation84_spill] sm:$0xff] }
 0x2c2   :  { %v4759_v58 = vsel %vm4751_vm14, %v4744_v23, %v4655_v1  ;;  %v4357_v52 = vmax.f32 %v4317_v5, %v4319_v32  ;;  %v4266_v13 = vmul.f32 0.01, %v4154_v60  ;;  %vm4208_vm11 = vcmp.ge.f32.partialorder %v4152_v4, 0.0  ;;  %v8677_v40 = vpop.f32.mrf.mxu1 }
 0x2c3   :  { %v4773_v56 = vpack.c.bf16 %v4759_v58, %v4759_v58  ;;  %v4502_v29 = vrot.slane %v4418_v11, 1  ;;  %v4530_v37 = vrot.slane %v4418_v11, 2  ;;  %v4558_v6 = vrot.slane %v4418_v11, 3 }
 0x2c4   :  { %v4446_v46 = vrot.slane %v4357_v52, 1  ;;  %v4322_v21 = vsel %vm4210_vm8, %v4154_v60, %v4266_v13  ;;  %v4264_v31 = vmul.f32 0.01, %v4152_v4  ;;  %v4155_v50 = vadd.f32 %v8663_v14, %v4092_v45  ;;  %v9294_v60 = vld [vmem:[#allocation5_spill] sm:$0xff] }
 0x2c5   :  { %v4805_v48 = vsel %vm8353_vm5, %v4773_v56, %v4804_v18  ;;  %v4685_v20 = vsel %vm4676_vm7, %v4418_v11, %v4502_v29  ;;  %v4090_v22 = vadd.f32 %v8574_v47, %v3740_v51  ;;  %v3745_v44 = vadd.f32 %v8566_v15, %v9292_v35  ;;  %v9295_v51 = vld [vmem:[#allocation67_spill] sm:$0xff]  ;;  %v8695_v11 = vpop.f32.mrf.mxu0 }
 0x2c6   :  { %4806 = vst [vmem:[%s8824_s3 + $0x1c] sm:$0xf] %v4805_v48  ;;  %v4700_v2 = vsel %vm4691_vm9, %v4685_v20, %v4530_v37  ;;  %v4474_v30 = vmax.f32 %v4357_v52, %v4446_v46  ;;  %v4320_v43 = vsel %vm4208_vm11, %v4152_v4, %v4264_v31  ;;  %vm4211_vm15 = vcmp.ge.f32.partialorder %v4155_v50, 0.0  ;;  %v8690_v4 = vpop.f32.mrf.mxu1 }
 0x2c7   :  { %v4715_v54 = vsel %vm4706_vm10, %v4700_v2, %v4558_v6  ;;  %v4358_v9 = vmax.f32 %v4320_v43, %v4322_v21  ;;  %v4267_v33 = vmul.f32 0.01, %v4155_v50  ;;  %v4153_v47 = vadd.f32 %v8663_v14, %v4090_v22  ;;  %v6104_v20 = vpop.f32.mrf.mxu0 }
 0x2c8   :  { %v4600_v15 = vrot.slane %v4474_v30, 4  ;;  %v4628_v27 = vrot.slane %v4474_v30, 5  ;;  %v4656_v32 = vrot.slane %v4474_v30, 6  ;;  %v4095_v38 = vadd.f32 %v8584_v61, %v3745_v44  ;;  %v3672_v46 = vpop.f32.mrf.mxu1 }
 0x2c9   :  { %v4391_v39 = vrot.slane %v4358_v9, 1  ;;  %v4323_v36 = vsel %vm4211_vm15, %v4155_v50, %v4267_v33  ;;  %vm4209_vm0 = vcmp.ge.f32.partialorder %v4153_v47, 0.0  ;;  %v4265_v28 = vmul.f32 0.01, %v4153_v47 }
 0x2ca   :  { %v4730_v1 = vsel %vm4721_vm12, %v4715_v54, %v4600_v15  ;;  %v4158_v41 = vadd.f32 %v8663_v14, %v4095_v38  ;;  %v3743_v59 = vadd.f32 %v8579_v53, %v9293_v16  ;;  %v3746_v42 = vadd.f32 %v8591_v62, %v9294_v60  ;;  %v4807_v53 = vld [vmem:[%s8824_s3 + $0x20] sm:$0xf]  ;;  %v6041_v54 = vpop.f32.mrf.mxu1 }
 0x2cb   :  { %v4745_v45 = vsel %vm4736_vm13, %v4730_v1, %v4628_v27  ;;  %v4419_v7 = vmax.f32 %v4358_v9, %v4391_v39  ;;  %v4321_v61 = vsel %vm4209_vm0, %v4153_v47, %v4265_v28  ;;  %v3744_v23 = vadd.f32 %v8610_v8, %v9295_v51  ;;  %v4022_v47 = vpop.f32.mrf.mxu0  ;;  %v4810_v28 = vld [vmem:[%s8824_s3 + $0x24] sm:$0xf] }
 0x2cc   :  { %v4760_v5 = vsel %vm4751_vm14, %v4745_v45, %v4656_v32  ;;  %v4359_v58 = vmax.f32 %v4321_v61, %v4323_v36  ;;  %vm4214_vm1 = vcmp.ge.f32.partialorder %v4158_v41, 0.0  ;;  %v4270_v62 = vmul.f32 0.01, %v4158_v41  ;;  %v8730_v16 = vpop.f32.mrf.mxu1  ;;  %v9296_v61 = vld [vmem:[#allocation6_spill] sm:$0xff] }
 0x2cd   :  { %v4774_v18 = vpack.c.bf16 %v4760_v5, %v4760_v5  ;;  %v4503_v52 = vrot.slane %v4419_v7, 1  ;;  %v4531_v13 = vrot.slane %v4419_v7, 2  ;;  %v4559_v56 = vrot.slane %v4419_v7, 3  ;;  %v6105_v45 = vpop.f32.mrf.mxu0 }
 0x2ce   :  { %v4447_v29 = vrot.slane %v4359_v58, 1  ;;  %v4326_v37 = vsel %vm4214_vm1, %v4158_v41, %v4270_v62  ;;  %v4093_v6 = vadd.f32 %v8600_v12, %v3743_v59  ;;  %v4096_v8 = vadd.f32 %v8615_v57, %v3746_v42 }
 0x2cf   :  { %v4808_v21 = vsel %vm8353_vm5, %v4774_v18, %v4807_v53  ;;  %v4686_v31 = vsel %vm4676_vm7, %v4419_v7, %v4503_v52  ;;  %v4094_v50 = vadd.f32 %v8632_v10, %v3744_v23  ;;  %v3749_v48 = vadd.f32 %v8627_v24, %v8282_v63  ;;  %v6044_v18 = vpop.f32.mrf.mxu1  ;;  %v9297_v52 = vld [vmem:[#allocation72_spill] sm:$0xff] }
 0x2d0   :  { %4809 = vst [vmem:[%s8824_s3 + $0x20] sm:$0xf] %v4808_v21  ;;  %v4701_v12 = vsel %vm4691_vm9, %v4686_v31, %v4531_v13  ;;  %v4475_v22 = vmax.f32 %v4359_v58, %v4447_v29  ;;  %v4156_v57 = vadd.f32 %v8663_v14, %v4093_v6  ;;  %v4159_v35 = vadd.f32 %v8663_v14, %v4096_v8  ;;  %v9298_v8 = vld [vmem:[#allocation81_spill] sm:$0xff] }
 0x2d1   :  { %v4716_v44 = vsel %vm4706_vm10, %v4701_v12, %v4559_v56  ;;  %v4157_v2 = vadd.f32 %v8663_v14, %v4094_v50  ;;  %v4099_v10 = vadd.f32 %v8644_v25, %v3749_v48  ;;  %v3747_v63 = vadd.f32 %v8641_v0, %v8285_v34  ;;  %v4025_v56 = vpop.f32.mrf.mxu0 }
 0x2d2   :  { %v4601_v24 = vrot.slane %v4475_v22, 4  ;;  %v4629_v30 = vrot.slane %v4475_v22, 5  ;;  %v4657_v43 = vrot.slane %v4475_v22, 6  ;;  %vm4212_vm2 = vcmp.ge.f32.partialorder %v4156_v57, 0.0 }
 0x2d3   :  { %v4268_v9 = vmul.f32 0.01, %v4156_v57  ;;  %vm4215_vm3 = vcmp.ge.f32.partialorder %v4159_v35, 0.0  ;;  %v4271_v33 = vmul.f32 0.01, %v4159_v35  ;;  %vm4213_vm4 = vcmp.ge.f32.partialorder %v4157_v2, 0.0 }
 0x2d4   :  { %v4731_v15 = vsel %vm4721_vm12, %v4716_v44, %v4601_v24  ;;  %v4269_v27 = vmul.f32 0.01, %v4157_v2  ;;  %v4162_v32 = vadd.f32 %v8663_v14, %v4099_v10  ;;  %v4097_v25 = vadd.f32 %v8658_v3, %v3747_v63  ;;  %v6108_v10 = vpop.f32.mrf.mxu0 }
 0x2d5   :  { %v4746_v38 = vsel %vm4736_vm13, %v4731_v15, %v4629_v30  ;;  %v4324_v34 = vsel %vm4212_vm2, %v4156_v57, %v4268_v9  ;;  %v4327_v0 = vsel %vm4215_vm3, %v4159_v35, %v4271_v33  ;;  %v3750_v39 = vadd.f32 %v8656_v49, %v8288_v17  ;;  %v3688_v35 = vpop.f32.mrf.mxu1 }
 0x2d6   :  { %v4761_v36 = vsel %vm4751_vm14, %v4746_v38, %v4657_v43  ;;  %v4360_v1 = vmax.f32 %v4324_v34, %v4326_v37  ;;  %v4325_v41 = vsel %vm4213_vm4, %v4157_v2, %v4269_v27  ;;  %vm4218_vm6 = vcmp.ge.f32.partialorder %v4162_v32, 0.0  ;;  %v4813_v38 = vld [vmem:[%s8824_s3 + $0x28] sm:$0xf] }
 0x2d7   :  { %v4775_v59 = vpack.c.bf16 %v4761_v36, %v4761_v36  ;;  %v4361_v3 = vmax.f32 %v4325_v41, %v4327_v0  ;;  %v4274_v60 = vmul.f32 0.01, %v4162_v32  ;;  %v4160_v42 = vadd.f32 %v8663_v14, %v4097_v25  ;;  %v6045_v25 = vpop.f32.mrf.mxu1  ;;  %v4038_v36 = vpop.f32.mrf.mxu0 }
 0x2d8   :  { %v4392_v7 = vrot.slane %v4360_v1, 1  ;;  %v4100_v17 = vadd.f32 %v8681_v55, %v3750_v39  ;;  %v3748_v49 = vadd.f32 %v8677_v40, %v8291_v26  ;;  %v3753_v51 = vadd.f32 %v8690_v4, %v9296_v61  ;;  %v9300_v61 = vld [vmem:[#allocation85_spill] sm:$0xff] }
 0x2d9   :  { %v4811_v23 = vsel %vm8353_vm5, %v4775_v59, %v4810_v28  ;;  %v4448_v5 = vrot.slane %v4361_v3, 1  ;;  %vm4216_vm8 = vcmp.ge.f32.partialorder %v4160_v42, 0.0  ;;  %v4272_v58 = vmul.f32 0.01, %v4160_v42 }
 0x2da   :  { %4812 = vst [vmem:[%s8824_s3 + $0x24] sm:$0xf] %v4811_v23  ;;  %v4420_v53 = vmax.f32 %v4360_v1, %v4392_v7  ;;  %v4163_v62 = vadd.f32 %v8663_v14, %v4100_v17  ;;  %v4098_v55 = vadd.f32 %v8695_v11, %v3748_v49  ;;  %v4330_v40 = vsel %vm4218_vm6, %v4162_v32, %v4274_v60  ;;  %v3691_v23 = vpop.f32.mrf.mxu1 }
 0x2db   :  { %v4476_v26 = vmax.f32 %v4361_v3, %v4448_v5  ;;  %v4103_v4 = vadd.f32 %v6104_v20, %v3753_v51  ;;  %v3751_v13 = vadd.f32 %v3672_v46, %v9297_v52  ;;  %v4328_v6 = vsel %vm4216_vm8, %v4160_v42, %v4272_v58  ;;  %v9299_v42 = vld [vmem:[#allocation83_spill] sm:$0xff] }
 0x2dc   :  { %v4504_v29 = vrot.slane %v4420_v53, 1  ;;  %v4532_v37 = vrot.slane %v4420_v53, 2  ;;  %v3754_v21 = vadd.f32 %v6041_v54, %v9298_v8  ;;  %v4560_v31 = vrot.slane %v4420_v53, 3 }
 0x2dd   :  { %v4602_v50 = vrot.slane %v4476_v26, 4  ;;  %v4630_v48 = vrot.slane %v4476_v26, 5  ;;  %v4362_v12 = vmax.f32 %v4328_v6, %v4330_v40  ;;  %vm4219_vm11 = vcmp.ge.f32.partialorder %v4163_v62, 0.0 }
 0x2de   :  { %v4687_v22 = vsel %vm4676_vm7, %v4420_v53, %v4504_v29  ;;  %v4275_v11 = vmul.f32 0.01, %v4163_v62  ;;  %v4161_v57 = vadd.f32 %v8663_v14, %v4098_v55  ;;  %v4166_v44 = vadd.f32 %v8663_v14, %v4103_v4  ;;  %v9301_v4 = vld [vmem:[#allocation86_spill] sm:$0xff]  ;;  %v9303_v29 = vld [vmem:[#allocation92_spill] sm:$0xff] }
 0x2df   :  { %v4702_v20 = vsel %vm4691_vm9, %v4687_v22, %v4532_v37  ;;  %v4393_v46 = vrot.slane %v4362_v12, 1  ;;  %v4101_v2 = vadd.f32 %v4022_v47, %v3751_v13  ;;  %v4658_v63 = vrot.slane %v4476_v26, 6  ;;  %v9302_v13 = vld [vmem:[#allocation87_spill] sm:$0xff] }
 0x2e0   :  { %v4717_v24 = vsel %vm4706_vm10, %v4702_v20, %v4560_v31  ;;  %vm4217_vm15 = vcmp.ge.f32.partialorder %v4161_v57, 0.0  ;;  %v4273_v30 = vmul.f32 0.01, %v4161_v57  ;;  %v4331_v9 = vsel %vm4219_vm11, %v4163_v62, %v4275_v11  ;;  %v6109_v62 = vpop.f32.mrf.mxu0 }
 0x2e1   :  { %v4732_v43 = vsel %vm4721_vm12, %v4717_v24, %v4602_v50  ;;  %v4421_v54 = vmax.f32 %v4362_v12, %v4393_v46  ;;  %vm4222_vm0 = vcmp.ge.f32.partialorder %v4166_v44, 0.0  ;;  %v4164_v27 = vadd.f32 %v8663_v14, %v4101_v2 }
 0x2e2   :  { %v4747_v33 = vsel %vm4736_vm13, %v4732_v43, %v4630_v48  ;;  %v4329_v15 = vsel %vm4217_vm15, %v4161_v57, %v4273_v30  ;;  %v4104_v32 = vadd.f32 %v6105_v45, %v3754_v21  ;;  %v4278_v39 = vmul.f32 0.01, %v4166_v44  ;;  %v4041_v11 = vpop.f32.mrf.mxu0 }
 0x2e3   :  { %v4762_v47 = vsel %vm4751_vm14, %v4747_v33, %v4658_v63  ;;  %v4505_v34 = vrot.slane %v4421_v54, 1  ;;  %v4533_v0 = vrot.slane %v4421_v54, 2  ;;  %v4561_v1 = vrot.slane %v4421_v54, 3 }
 0x2e4   :  { %v4776_v28 = vpack.c.bf16 %v4762_v47, %v4762_v47  ;;  %v4363_v41 = vmax.f32 %v4329_v15, %v4331_v9  ;;  %vm4220_vm1 = vcmp.ge.f32.partialorder %v4164_v27, 0.0  ;;  %v4276_v3 = vmul.f32 0.01, %v4164_v27 }
 0x2e5   :  { %v4688_v59 = vsel %vm4676_vm7, %v4421_v54, %v4505_v34  ;;  %v4167_v60 = vadd.f32 %v8663_v14, %v4104_v32  ;;  %v3752_v45 = vadd.f32 %v8730_v16, %v9299_v42  ;;  %v3757_v51 = vadd.f32 %v6044_v18, %v9300_v61 }
 0x2e6   :  { %v4814_v7 = vsel %vm8353_vm5, %v4776_v28, %v4813_v38  ;;  %v4703_v17 = vsel %vm4691_vm9, %v4688_v59, %v4533_v0  ;;  %v4449_v49 = vrot.slane %v4363_v41, 1  ;;  %v4334_v53 = vsel %vm4222_vm0, %v4166_v44, %v4278_v39 }
 0x2e7   :  { %4815 = vst [vmem:[%s8824_s3 + $0x28] sm:$0xf] %v4814_v7  ;;  %v4718_v5 = vsel %vm4706_vm10, %v4703_v17, %v4561_v1  ;;  %v4332_v58 = vsel %vm4220_vm1, %v4164_v27, %v4276_v3  ;;  %v4102_v26 = vadd.f32 %v4025_v56, %v3752_v45  ;;  %v4107_v40 = vadd.f32 %v6108_v10, %v3757_v51  ;;  %v4816_v10 = vld [vmem:[%s8824_s3 + $0x2c] sm:$0xf] }
 0x2e8   :  { %v4477_v16 = vmax.f32 %v4363_v41, %v4449_v49  ;;  %v4364_v55 = vmax.f32 %v4332_v58, %v4334_v53  ;;  %vm4223_vm2 = vcmp.ge.f32.partialorder %v4167_v60, 0.0  ;;  %v3755_v52 = vadd.f32 %v3688_v35, %v9301_v4 }
 0x2e9   :  { %v3758_v18 = vadd.f32 %v6045_v25, %v9302_v13  ;;  %v3756_v37 = vadd.f32 %v3691_v23, %v9303_v29  ;;  %v4279_v31 = vmul.f32 0.01, %v4167_v60  ;;  %v4165_v48 = vadd.f32 %v8663_v14, %v4102_v26 }
 0x2ea   :  { %v4603_v6 = vrot.slane %v4477_v16, 4  ;;  %v4631_v8 = vrot.slane %v4477_v16, 5  ;;  %v4394_v21 = vrot.slane %v4364_v55, 1  ;;  %v4659_v50 = vrot.slane %v4477_v16, 6 }
 0x2eb   :  { %v4170_v12 = vadd.f32 %v8663_v14, %v4107_v40  ;;  %v4105_v22 = vadd.f32 %v4038_v36, %v3755_v52  ;;  %v4108_v20 = vadd.f32 %v6109_v62, %v3758_v18  ;;  %v4106_v35 = vadd.f32 %v4041_v11, %v3756_v37  ;;  %v4819_v62 = vld [vmem:[%s8824_s3 + $0x30] sm:$0xf] }
 0x2ec   :  { %v4733_v56 = vsel %vm4721_vm12, %v4718_v5, %v4603_v6  ;;  %v4422_v57 = vmax.f32 %v4364_v55, %v4394_v21  ;;  %vm4221_vm3 = vcmp.ge.f32.partialorder %v4165_v48, 0.0  ;;  %v4277_v44 = vmul.f32 0.01, %v4165_v48 }
 0x2ed   :  { %v4748_v46 = vsel %vm4736_vm13, %v4733_v56, %v4631_v8  ;;  %v4335_v30 = vsel %vm4223_vm2, %v4167_v60, %v4279_v31  ;;  %v4282_v9 = vmul.f32 0.01, %v4170_v12  ;;  %v4168_v33 = vadd.f32 %v8663_v14, %v4105_v22 }
 0x2ee   :  { %v4763_v2 = vsel %vm4751_vm14, %v4748_v46, %v4659_v50  ;;  %v4506_v63 = vrot.slane %v4422_v57, 1  ;;  %v4534_v24 = vrot.slane %v4422_v57, 2  ;;  %v4333_v54 = vsel %vm4221_vm3, %v4165_v48, %v4277_v44  ;;  %v4822_v48 = vld [vmem:[%s8824_s3 + $0x34] sm:$0xf] }
 0x2ef   :  { %v4777_v43 = vpack.c.bf16 %v4763_v2, %v4763_v2  ;;  %v4365_v27 = vmax.f32 %v4333_v54, %v4335_v30  ;;  %v4171_v32 = vadd.f32 %v8663_v14, %v4108_v20  ;;  %v4169_v25 = vadd.f32 %v8663_v14, %v4106_v35 }
 0x2f0   :  { %v4689_v15 = vsel %vm4676_vm7, %v4422_v57, %v4506_v63  ;;  %vm4226_vm4 = vcmp.ge.f32.partialorder %v4170_v12, 0.0  ;;  %vm4224_vm6 = vcmp.ge.f32.partialorder %v4168_v33, 0.0  ;;  %v4280_v0 = vmul.f32 0.01, %v4168_v33 }
 0x2f1   :  { %v4817_v47 = vsel %vm8353_vm5, %v4777_v43, %v4816_v10  ;;  %v4704_v38 = vsel %vm4691_vm9, %v4689_v15, %v4534_v24  ;;  %v4450_v34 = vrot.slane %v4365_v27, 1  ;;  %vm4227_vm8 = vcmp.ge.f32.partialorder %v4171_v32, 0.0 }
 0x2f2   :  { %4818 = vst [vmem:[%s8824_s3 + $0x2c] sm:$0xf] %v4817_v47  ;;  %v4562_v39 = vrot.slane %v4422_v57, 3  ;;  %v4283_v36 = vmul.f32 0.01, %v4171_v32  ;;  %vm4225_vm11 = vcmp.ge.f32.partialorder %v4169_v25, 0.0  ;;  %v4338_v14 = vsel %vm4226_vm4, %v4170_v12, %v4282_v9 }
 0x2f3   :  { %v4281_v28 = vmul.f32 0.01, %v4169_v25  ;;  %v4478_v1 = vmax.f32 %v4365_v27, %v4450_v34  ;;  %v4336_v41 = vsel %vm4224_vm6, %v4168_v33, %v4280_v0 }
 0x2f4   :  { %v4719_v59 = vsel %vm4706_vm10, %v4704_v38, %v4562_v39  ;;  %v4366_v3 = vmax.f32 %v4336_v41, %v4338_v14  ;;  %v4339_v60 = vsel %vm4227_vm8, %v4171_v32, %v4283_v36 }
 0x2f5   :  { %v4337_v42 = vsel %vm4225_vm11, %v4169_v25, %v4281_v28  ;;  %v4604_v45 = vrot.slane %v4478_v1, 4  ;;  %v4632_v7 = vrot.slane %v4478_v1, 5  ;;  %v4660_v61 = vrot.slane %v4478_v1, 6 }
 0x2f6   :  { %v4367_v17 = vmax.f32 %v4337_v42, %v4339_v60  ;;  %v4395_v49 = vrot.slane %v4366_v3, 1 }
 0x2f7   :  { %v4734_v51 = vsel %vm4721_vm12, %v4719_v59, %v4604_v45 }
 0x2f8   :  { %v4451_v23 = vrot.slane %v4367_v17, 1  ;;  %v4749_v5 = vsel %vm4736_vm13, %v4734_v51, %v4632_v7  ;;  %v4423_v53 = vmax.f32 %v4366_v3, %v4395_v49 }
 0x2f9   :  { %v4764_v58 = vsel %vm4751_vm14, %v4749_v5, %v4660_v61 }
 0x2fa   :  { %v4479_v16 = vmax.f32 %v4367_v17, %v4451_v23  ;;  %v4778_v55 = vpack.c.bf16 %v4764_v58, %v4764_v58  ;;  %v4507_v26 = vrot.slane %v4423_v53, 1  ;;  %v4535_v40 = vrot.slane %v4423_v53, 2 }
 0x2fb   :  { %v4563_v13 = vrot.slane %v4423_v53, 3 }
 0x2fc   :  { %v4605_v4 = vrot.slane %v4479_v16, 4  ;;  %v4820_v52 = vsel %vm8353_vm5, %v4778_v55, %v4819_v62  ;;  %v4690_v18 = vsel %vm4676_vm7, %v4423_v53, %v4507_v26  ;;  %v4633_v29 = vrot.slane %v4479_v16, 5 }
 0x2fd   :  { %4821 = vst [vmem:[%s8824_s3 + $0x30] sm:$0xf] %v4820_v52  ;;  %v4705_v37 = vsel %vm4691_vm9, %v4690_v18, %v4535_v40  ;;  %v4661_v8 = vrot.slane %v4479_v16, 6 }
 0x2fe   :  { %v4720_v6 = vsel %vm4706_vm10, %v4705_v37, %v4563_v13 }
 0x2ff   :  { %v4735_v21 = vsel %vm4721_vm12, %v4720_v6, %v4605_v4 }
 0x300   :  { %v4750_v31 = vsel %vm4736_vm13, %v4735_v21, %v4633_v29 }
 0x301   :  { %v4765_v50 = vsel %vm4751_vm14, %v4750_v31, %v4661_v8 }
 0x302   :  { %v4779_v12 = vpack.c.bf16 %v4765_v50, %v4765_v50 }
 0x304   :  { %v4823_v22 = vsel %vm8353_vm5, %v4779_v12, %v4822_v48 }
 0x305   :  { %4824 = vst [vmem:[%s8824_s3 + $0x34] sm:$0xf] %v4823_v22 }

// kernel: b5_forward.5
= control target key start
LH: loop header
LB: loop body
LE: loop exit
PB: predicated region body
PF: predicated region fallthrough
CT: control target
= control target key end

     0   :  { %v426_v35 = vlaneseq  ;;  %v4648_v36 = vmov 1966171168   ;;  %s6173_s0 = inlined_call_operand.vmem [shape: bf16[2,3136], index: 0, kind: input, shape index: {}]   ;;  %s6174_s1 = inlined_call_operand.vmem [shape: bf16[3136,256], index: 1, kind: input, shape index: {}]   ;;  %s6175_s2 = inlined_call_operand.vmem [shape: f32[1,256], index: 2, kind: input, shape index: {}]   ;;  %s6176_s3 = inlined_call_operand.vmem [shape: bf16[256,256], index: 3, kind: input, shape index: {}]   ;;  %s6177_s4 = inlined_call_operand.vmem [shape: f32[1,256], index: 4, kind: input, shape index: {}]   ;;  %s6178_s5 = inlined_call_operand.vmem [shape: f32[256,10], index: 5, kind: input, shape index: {}]   ;;  %s6179_s6 = inlined_call_operand.vmem [shape: f32[1,10], index: 6, kind: input, shape index: {}]   ;;  %s6180_s7 = inlined_call_operand.hbm [shape: f32[2,10], index: 7, kind: output, shape index: {}]  }
   0x1   :  { %v3983_v0 = vld [vmem:[%s6174_s1 + $0x74] ss:$8 sps:$4 sm:$0xff]   ;;  %v3985_v1 = vld [vmem:[%s6174_s1 + $0x70] ss:$8 sps:$4 sm:$0xff]   ;;  %v3989_v4 = vld [vmem:[%s6174_s1 + $0x64] ss:$8 sps:$4 sm:$0xff]   ;;  %v442_v37 = vunpack.c.l.s4 %v4648_v36 }
   0x2   :  { %2589 = vmatprep.subr.bf16.mxu0 %v3983_v0  ;;  %v3986_v2 = vld [vmem:[%s6174_s1 + $0x174] ss:$8 sps:$4 sm:$0xff]   ;;  %v3988_v3 = vld [vmem:[%s6174_s1 + $0x170] ss:$8 sps:$4 sm:$0xff]   ;;  %v3991_v5 = vld [vmem:[%s6174_s1 + $0x60] ss:$8 sps:$4 sm:$0xff]  }
   0x3   :  { %2590 = vmatpush1.bf16.msra.mxu0 %v3985_v1  ;;  %2630 = vmatprep.subr.bf16.mxu1 %v3986_v2  ;;  %v3992_v6 = vld [vmem:[%s6174_s1 + $0x164] ss:$8 sps:$4 sm:$0xff]   ;;  %v3994_v7 = vld [vmem:[%s6174_s1 + $0x160] ss:$8 sps:$4 sm:$0xff]   ;;  %v3995_v8 = vld [vmem:[%s6174_s1 + $0x54] ss:$8 sps:$4 sm:$0xff]   ;;  %v443_v43 = vunpack.c.0.s8 %v442_v37 }
   0x4   :  { %2631 = vmatpush1.bf16.msra.mxu1 %v3988_v3  ;;  %2591 = vmatprep.subr.bf16.mxu0 %v3989_v4  ;;  %v3997_v9 = vld [vmem:[%s6174_s1 + $0x50] ss:$8 sps:$4 sm:$0xff]   ;;  %v3998_v10 = vld [vmem:[%s6174_s1 + $0x154] ss:$8 sps:$4 sm:$0xff]   ;;  %v4001_v11 = vld [vmem:[%s6174_s1 + $0x44] ss:$8 sps:$4 sm:$0xff]  }
   0x5   :  { %2632 = vmatprep.subr.bf16.mxu1 %v3992_v6  ;;  %v4000_v12 = vld [vmem:[%s6174_s1 + $0x150] ss:$8 sps:$4 sm:$0xff]   ;;  %v4004_v13 = vld [vmem:[%s6174_s1 + $0x144] ss:$8 sps:$4 sm:$0xff]   ;;  %v4003_v14 = vld [vmem:[%s6174_s1 + $0x40] ss:$8 sps:$4 sm:$0xff]  }
   0x6   :  { %v4007_v15 = vld [vmem:[%s6174_s1 + $0x34] ss:$8 sps:$4 sm:$0xff]   ;;  %v4006_v16 = vld [vmem:[%s6174_s1 + $0x140] ss:$8 sps:$4 sm:$0xff]   ;;  %v4009_v18 = vld [vmem:[%s6174_s1 + $0x30] ss:$8 sps:$4 sm:$0xff]  }
   0x7   :  { %2592 = vmatpush1.bf16.msra.mxu0 %v3991_v5  ;;  %v4010_v17 = vld [vmem:[%s6174_s1 + $0x134] ss:$8 sps:$4 sm:$0xff]   ;;  %v4013_v19 = vld [vmem:[%s6174_s1 + $0x24] ss:$8 sps:$4 sm:$0xff]   ;;  %v4012_v20 = vld [vmem:[%s6174_s1 + $0x130] ss:$8 sps:$4 sm:$0xff]  }
   0x8   :  { %2593 = vmatprep.subr.bf16.mxu0 %v3995_v8  ;;  %2633 = vmatpush1.bf16.msra.mxu1 %v3994_v7  ;;  %v4016_v21 = vld [vmem:[%s6174_s1 + $0x124] ss:$8 sps:$4 sm:$0xff]   ;;  %v4015_v22 = vld [vmem:[%s6174_s1 + $0x20] ss:$8 sps:$4 sm:$0xff]   ;;  %v4019_v23 = vld [vmem:[%s6174_s1 + $0x14] ss:$8 sps:$4 sm:$0xff]  }
   0x9   :  { %2634 = vmatprep.subr.bf16.mxu1 %v3998_v10  ;;  %v4018_v24 = vld [vmem:[%s6174_s1 + $0x120] ss:$8 sps:$4 sm:$0xff]   ;;  %v4022_v25 = vld [vmem:[%s6174_s1 + $0x114] ss:$8 sps:$4 sm:$0xff]   ;;  %v4021_v26 = vld [vmem:[%s6174_s1 + $0x10] ss:$8 sps:$4 sm:$0xff]  }
   0xa   :  { %v4025_v27 = vld [vmem:[%s6174_s1 + $0x4] ss:$8 sps:$4 sm:$0xff]   ;;  %v4024_v28 = vld [vmem:[%s6174_s1 + $0x110] ss:$8 sps:$4 sm:$0xff]   ;;  %v4027_v30 = vld [vmem:[%s6174_s1] ss:$8 sps:$4 sm:$0xff]  }
   0xb   :  { %2594 = vmatpush1.bf16.msra.mxu0 %v3997_v9  ;;  %v4028_v29 = vld [vmem:[%s6174_s1 + $0x104] ss:$8 sps:$4 sm:$0xff]   ;;  %v4031_v31 = vld [vmem:[%s6174_s1 + $0xf4] ss:$8 sps:$4 sm:$0xff]   ;;  %v4030_v32 = vld [vmem:[%s6174_s1 + $0x100] ss:$8 sps:$4 sm:$0xff]  }
   0xc   :  { %2595 = vmatprep.subr.bf16.mxu0 %v4001_v11  ;;  %2635 = vmatpush1.bf16.msra.mxu1 %v4000_v12  ;;  %v4034_v33 = vld [vmem:[%s6174_s1 + $0x1f4] ss:$8 sps:$4 sm:$0xff]   ;;  %v4033_v34 = vld [vmem:[%s6174_s1 + $0xf0] ss:$8 sps:$4 sm:$0xff]   ;;  %v4037_v38 = vld [vmem:[%s6174_s1 + $0xe4] ss:$8 sps:$4 sm:$0xff]  }
   0xd   :  { %2636 = vmatprep.subr.bf16.mxu1 %v4004_v13  ;;  %v4036_v39 = vld [vmem:[%s6174_s1 + $0x1f0] ss:$8 sps:$4 sm:$0xff]   ;;  %v4040_v40 = vld [vmem:[%s6174_s1 + $0x1e4] ss:$8 sps:$4 sm:$0xff]   ;;  %v4039_v41 = vld [vmem:[%s6174_s1 + $0xe0] ss:$8 sps:$4 sm:$0xff]  }
   0xe   :  { %v4808_v42 = vshrl.u32 %v426_v35, 7  ;;  %v4043_v44 = vld [vmem:[%s6174_s1 + $0xd4] ss:$8 sps:$4 sm:$0xff]   ;;  %v4042_v45 = vld [vmem:[%s6174_s1 + $0x1e0] ss:$8 sps:$4 sm:$0xff]  }
   0xf   :  { %2596 = vmatpush1.bf16.msra.mxu0 %v4003_v14  ;;  %v4046_v46 = vld [vmem:[%s6174_s1 + $0x1d4] ss:$8 sps:$4 sm:$0xff]   ;;  %v4045_v47 = vld [vmem:[%s6174_s1 + $0xd0] ss:$8 sps:$4 sm:$0xff]   ;;  %v4049_v49 = vld [vmem:[%s6174_s1 + $0xc4] ss:$8 sps:$4 sm:$0xff]  }
  0x10   :  { %2597 = vmatprep.subr.bf16.mxu0 %v4007_v15  ;;  %2637 = vmatpush1.bf16.msra.mxu1 %v4006_v16  ;;  %v4823_v48 = vsub.s32 %v443_v43, %v4808_v42  ;;  %v4048_v50 = vld [vmem:[%s6174_s1 + $0x1d0] ss:$8 sps:$4 sm:$0xff]   ;;  %v4052_v51 = vld [vmem:[%s6174_s1 + $0x1c4] ss:$8 sps:$4 sm:$0xff]   ;;  %v4051_v53 = vld [vmem:[%s6174_s1 + $0xc0] ss:$8 sps:$4 sm:$0xff]  }
  0x11   :  { %2638 = vmatprep.subr.bf16.mxu1 %v4010_v17  ;;  %v28_v52 = vld [vmem:[%s6173_s0] sm:$0xff]  ;;  %v4055_v55 = vld [vmem:[%s6174_s1 + $0xb4] ss:$8 sps:$4 sm:$0xff]   ;;  %v4057_v59 = vld [vmem:[%s6174_s1 + $0xb0] ss:$8 sps:$4 sm:$0xff]  }
  0x12   :  { %v447_v54 = vrot.slane %v28_v52, %v4823_v48  ;;  %v4054_v56 = vld [vmem:[%s6174_s1 + $0x1c0] ss:$8 sps:$4 sm:$0xff]   ;;  %v4058_v58 = vld [vmem:[%s6174_s1 + $0x1b4] ss:$8 sps:$4 sm:$0xff]   ;;  %v4061_v61 = vld [vmem:[%s6174_s1 + $0xa4] ss:$8 sps:$4 sm:$0xff]   ;;  %v440_v63 = vcombine.high %v28_v52, %v28_v52 }
  0x13   :  { %2598 = vmatpush1.bf16.msra.mxu0 %v4009_v18  ;;  %v4060_v62 = vld [vmem:[%s6174_s1 + $0x1b0] ss:$8 sps:$4 sm:$0xff]   ;;  %v4064_v1 = vld [vmem:[%s6174_s1 + $0x1a4] ss:$8 sps:$4 sm:$0xff]   ;;  %v4063_v2 = vld [vmem:[%s6174_s1 + $0xa0] ss:$8 sps:$4 sm:$0xff]  }
  0x14   :  { %2599 = vmatprep.subr.bf16.mxu0 %v4013_v19  ;;  %2639 = vmatpush1.bf16.msra.mxu1 %v4012_v20  ;;  %v455_v57 = vcombine.high %v447_v54, %v447_v54  ;;  %v4067_v3 = vld [vmem:[%s6174_s1 + $0x94] ss:$8 sps:$4 sm:$0xff]   ;;  %v4066_v4 = vld [vmem:[%s6174_s1 + $0x1a0] ss:$8 sps:$4 sm:$0xff]   ;;  %v4873_v5 = vrot.slane %v440_v63, %v4823_v48  ;;  %v4069_v7 = vld [vmem:[%s6174_s1 + $0x90] ss:$8 sps:$4 sm:$0xff]   ;;  %v463_v13 = vrot.slane %v447_v54, %v4823_v48 }
  0x15   :  { %2640 = vmatprep.subr.bf16.mxu1 %v4016_v21  ;;  %v4070_v6 = vld [vmem:[%s6174_s1 + $0x194] ss:$8 sps:$4 sm:$0xff]   ;;  %v4073_v8 = vld [vmem:[%s6174_s1 + $0x84] ss:$8 sps:$4 sm:$0xff]   ;;  %v4072_v9 = vld [vmem:[%s6174_s1 + $0x190] ss:$8 sps:$4 sm:$0xff]  }
  0x16   :  { %v477_v60 = vrot.slane %v455_v57, %v4823_v48  ;;  %v456_v10 = vcombine.high %v4873_v5, %v4873_v5  ;;  %v4076_v11 = vld [vmem:[%s6174_s1 + $0x184] ss:$8 sps:$4 sm:$0xff]   ;;  %v4075_v12 = vld [vmem:[%s6174_s1 + $0x80] ss:$8 sps:$4 sm:$0xff]   ;;  %v4082_v14 = vld [vmem:[%s6174_s1 + $0x274] ss:$8 sps:$4 sm:$0xff]   ;;  %v485_v19 = vcombine.high %v463_v13, %v463_v13 }
  0x17   :  { %2600 = vmatpush1.bf16.msra.mxu0 %v4015_v22  ;;  %v4079_v15 = vld [vmem:[%s6174_s1 + $0x180] ss:$8 sps:$4 sm:$0xff]   ;;  %v4085_v17 = vld [vmem:[%s6174_s1 + $0x374] ss:$8 sps:$4 sm:$0xff]   ;;  %v4080_v18 = vld [vmem:[%s6174_s1 + $0x270] ss:$8 sps:$4 sm:$0xff]  }
  0x18   :  { %2601 = vmatprep.subr.bf16.mxu0 %v4019_v23  ;;  %2641 = vmatpush1.bf16.msra.mxu1 %v4018_v24  ;;  %v487_v0 = vcombine.high %v477_v60, %v477_v60  ;;  %v484_v16 = vrot.slane %v456_v10, %v4823_v48  ;;  %v4088_v20 = vld [vmem:[%s6174_s1 + $0x264] ss:$8 sps:$4 sm:$0xff]   ;;  %v4083_v21 = vld [vmem:[%s6174_s1 + $0x370] ss:$8 sps:$4 sm:$0xff]   ;;  %v4086_v24 = vld [vmem:[%s6174_s1 + $0x260] ss:$8 sps:$4 sm:$0xff]  }
  0x19   :  { %2642 = vmatprep.subr.bf16.mxu1 %v4022_v25  ;;  %2621 = vmatprep.mubr.bf16.mxu0 %v477_v60  ;;  %v4091_v23 = vld [vmem:[%s6174_s1 + $0x364] ss:$8 sps:$4 sm:$0xff]   ;;  %v4094_v25 = vld [vmem:[%s6174_s1 + $0x254] ss:$8 sps:$4 sm:$0xff]   ;;  %v4104_v36 = vld [vmem:[%s6174_s1 + $0x230] ss:$8 sps:$4 sm:$0xff]  }
  0x1a   :  { %2662 = vmatprep.mubr.bf16.mxu1 %v487_v0  ;;  %v488_v22 = vcombine.high %v484_v16, %v484_v16  ;;  %v4109_v35 = vld [vmem:[%s6174_s1 + $0x334] ss:$8 sps:$4 sm:$0xff]   ;;  %v4112_v37 = vld [vmem:[%s6174_s1 + $0x224] ss:$8 sps:$4 sm:$0xff]   ;;  %v4113_v43 = vld [vmem:[%s6174_s1 + $0x320] ss:$8 sps:$4 sm:$0xff]  }
  0x1b   :  { %2602 = vmatpush1.bf16.msra.mxu0 %v4021_v26  ;;  %v4089_v26 = vld [vmem:[%s6174_s1 + $0x360] ss:$8 sps:$4 sm:$0xff]   ;;  %v4128_v54 = vld [vmem:[%s6174_s1 + $0x2f0] ss:$8 sps:$4 sm:$0xff]   ;;  %v4139_v57 = vld [vmem:[%s6174_s1 + $0x3e4] ss:$8 sps:$4 sm:$0xff]  }
  0x1c   :  { %2603 = vmatprep.subr.bf16.mxu0 %v4025_v27  ;;  %2643 = vmatpush1.bf16.msra.mxu1 %v4024_v28  ;;  %v4097_v27 = vld [vmem:[%s6174_s1 + $0x354] ss:$8 sps:$4 sm:$0xff]   ;;  %v4092_v28 = vld [vmem:[%s6174_s1 + $0x250] ss:$8 sps:$4 sm:$0xff]   ;;  %v4125_v52 = vld [vmem:[%s6174_s1 + $0x300] ss:$8 sps:$4 sm:$0xff]  }
  0x1d   :  { %2644 = vmatprep.subr.bf16.mxu1 %v4028_v29  ;;  %v4100_v29 = vld [vmem:[%s6174_s1 + $0x244] ss:$8 sps:$4 sm:$0xff]   ;;  %v4137_v60 = vld [vmem:[%s6174_s1 + $0x3e0] ss:$8 sps:$4 sm:$0xff]   ;;  %v4143_v0 = vld [vmem:[%s6174_s1 + $0x3d0] ss:$8 sps:$4 sm:$0xff]  }
  0x1e   :  { %v4148_v63 = vld [vmem:[%s6174_s1 + $0x2c4] ss:$8 sps:$4 sm:$0xff]  }
  0x1f   :  { %2604 = vmatpush1.bf16.msra.mxu0 %v4027_v30  ;;  %v4095_v30 = vld [vmem:[%s6174_s1 + $0x350] ss:$8 sps:$4 sm:$0xff]   ;;  %v4163_v10 = vld [vmem:[%s6174_s1 + $0x3a4] ss:$8 sps:$4 sm:$0xff]  }
  0x20   :  { %2605 = vmatprep.subr.bf16.mxu0 %v4031_v31  ;;  %2645 = vmatpush1.bf16.msra.mxu1 %v4030_v32  ;;  %v4103_v31 = vld [vmem:[%s6174_s1 + $0x344] ss:$8 sps:$4 sm:$0xff]   ;;  %v4098_v32 = vld [vmem:[%s6174_s1 + $0x240] ss:$8 sps:$4 sm:$0xff]  }
  0x21   :  { %2646 = vmatprep.subr.bf16.mxu1 %v4034_v33  ;;  %v4106_v33 = vld [vmem:[%s6174_s1 + $0x234] ss:$8 sps:$4 sm:$0xff]  }
  0x23   :  { %2606 = vmatpush2.bf16.msra.mxu0 %v4033_v34  ;;  %v4101_v34 = vld [vmem:[%s6174_s1 + $0x340] ss:$8 sps:$4 sm:$0xff]  }
  0x24   :  { %2607 = vmatprep.subr.bf16.mxu0 %v4037_v38  ;;  %2647 = vmatpush2.bf16.msra.mxu1 %v4036_v39  ;;  %v4107_v38 = vld [vmem:[%s6174_s1 + $0x330] ss:$8 sps:$4 sm:$0xff]   ;;  %v4115_v39 = vld [vmem:[%s6174_s1 + $0x324] ss:$8 sps:$4 sm:$0xff]  }
  0x25   :  { %2648 = vmatprep.subr.bf16.mxu1 %v4040_v40  ;;  %v4110_v40 = vld [vmem:[%s6174_s1 + $0x220] ss:$8 sps:$4 sm:$0xff]  }
  0x27   :  { %2608 = vmatpush2.bf16.msra.mxu0 %v4039_v41  ;;  %v4118_v41 = vld [vmem:[%s6174_s1 + $0x214] ss:$8 sps:$4 sm:$0xff]  }
  0x28   :  { %2609 = vmatprep.subr.bf16.mxu0 %v4043_v44  ;;  %2649 = vmatpush2.bf16.msra.mxu1 %v4042_v45  ;;  %v4121_v44 = vld [vmem:[%s6174_s1 + $0x314] ss:$8 sps:$4 sm:$0xff]   ;;  %v4116_v45 = vld [vmem:[%s6174_s1 + $0x210] ss:$8 sps:$4 sm:$0xff]  }
  0x29   :  { %2650 = vmatprep.subr.bf16.mxu1 %v4046_v46  ;;  %v4124_v46 = vld [vmem:[%s6174_s1 + $0x204] ss:$8 sps:$4 sm:$0xff]  }
  0x2b   :  { %2610 = vmatpush2.bf16.msra.mxu0 %v4045_v47  ;;  %v4119_v47 = vld [vmem:[%s6174_s1 + $0x310] ss:$8 sps:$4 sm:$0xff]  }
  0x2c   :  { %2611 = vmatprep.subr.bf16.mxu0 %v4049_v49  ;;  %2651 = vmatpush2.bf16.msra.mxu1 %v4048_v50  ;;  %v4127_v49 = vld [vmem:[%s6174_s1 + $0x304] ss:$8 sps:$4 sm:$0xff]   ;;  %v4122_v50 = vld [vmem:[%s6174_s1 + $0x200] ss:$8 sps:$4 sm:$0xff]  }
  0x2d   :  { %2652 = vmatprep.subr.bf16.mxu1 %v4052_v51  ;;  %v4130_v51 = vld [vmem:[%s6174_s1 + $0x2f4] ss:$8 sps:$4 sm:$0xff]  }
  0x2f   :  { %2612 = vmatpush2.bf16.msra.mxu0 %v4051_v53  ;;  %v4133_v53 = vld [vmem:[%s6174_s1 + $0x3f4] ss:$8 sps:$4 sm:$0xff]  }
  0x30   :  { %2613 = vmatprep.subr.bf16.mxu0 %v4055_v55  ;;  %2653 = vmatpush2.bf16.msra.mxu1 %v4054_v56  ;;  %v4136_v55 = vld [vmem:[%s6174_s1 + $0x2e4] ss:$8 sps:$4 sm:$0xff]   ;;  %v4131_v56 = vld [vmem:[%s6174_s1 + $0x3f0] ss:$8 sps:$4 sm:$0xff]  }
  0x31   :  { %2654 = vmatprep.subr.bf16.mxu1 %v4058_v58  ;;  %v4134_v58 = vld [vmem:[%s6174_s1 + $0x2e0] ss:$8 sps:$4 sm:$0xff]  }
  0x33   :  { %2614 = vmatpush2.bf16.msra.mxu0 %v4057_v59  ;;  %v4142_v59 = vld [vmem:[%s6174_s1 + $0x2d4] ss:$8 sps:$4 sm:$0xff]  }
  0x34   :  { %2615 = vmatprep.subr.bf16.mxu0 %v4061_v61  ;;  %2655 = vmatpush2.bf16.msra.mxu1 %v4060_v62  ;;  %v4145_v61 = vld [vmem:[%s6174_s1 + $0x3d4] ss:$8 sps:$4 sm:$0xff]   ;;  %v4140_v62 = vld [vmem:[%s6174_s1 + $0x2d0] ss:$8 sps:$4 sm:$0xff]  }
  0x35   :  { %2656 = vmatprep.subr.bf16.mxu1 %v4064_v1  ;;  %v4151_v1 = vld [vmem:[%s6174_s1 + $0x3c4] ss:$8 sps:$4 sm:$0xff]  }
  0x37   :  { %2616 = vmatpush2.bf16.msra.mxu0 %v4063_v2  ;;  %v4146_v2 = vld [vmem:[%s6174_s1 + $0x2c0] ss:$8 sps:$4 sm:$0xff]  }
  0x38   :  { %2617 = vmatprep.subr.bf16.mxu0 %v4067_v3  ;;  %2657 = vmatpush2.bf16.msra.mxu1 %v4066_v4  ;;  %v4154_v3 = vld [vmem:[%s6174_s1 + $0x2b4] ss:$8 sps:$4 sm:$0xff]   ;;  %v4149_v4 = vld [vmem:[%s6174_s1 + $0x3c0] ss:$8 sps:$4 sm:$0xff]  }
  0x39   :  { %2658 = vmatprep.subr.bf16.mxu1 %v4070_v6  ;;  %v4157_v6 = vld [vmem:[%s6174_s1 + $0x3b4] ss:$8 sps:$4 sm:$0xff]  }
  0x3b   :  { %2618 = vmatpush2.bf16.msra.mxu0 %v4069_v7  ;;  %v4152_v7 = vld [vmem:[%s6174_s1 + $0x2b0] ss:$8 sps:$4 sm:$0xff]  }
  0x3c   :  { %2619 = vmatprep.subr.bf16.mxu0 %v4073_v8  ;;  %2659 = vmatpush2.bf16.msra.mxu1 %v4072_v9  ;;  %v4160_v8 = vld [vmem:[%s6174_s1 + $0x2a4] ss:$8 sps:$4 sm:$0xff]   ;;  %v4155_v9 = vld [vmem:[%s6174_s1 + $0x3b0] ss:$8 sps:$4 sm:$0xff]  }
  0x3d   :  { %2660 = vmatprep.subr.bf16.mxu1 %v4076_v11  ;;  %v4158_v11 = vld [vmem:[%s6174_s1 + $0x2a0] ss:$8 sps:$4 sm:$0xff]  }
  0x3f   :  { %2620 = vmatpush2.bf16.msra.mxu0 %v4075_v12  ;;  %v4166_v12 = vld [vmem:[%s6174_s1 + $0x294] ss:$8 sps:$4 sm:$0xff]  }
  0x40   :  { %2671 = vmatprep.subr.bf16.mxu0 %v4082_v14  ;;  %2661 = vmatpush2.bf16.msra.mxu1 %v4079_v15  ;;  %v4169_v14 = vld [vmem:[%s6174_s1 + $0x394] ss:$8 sps:$4 sm:$0xff]   ;;  %v4164_v15 = vld [vmem:[%s6174_s1 + $0x290] ss:$8 sps:$4 sm:$0xff]  }
  0x41   :  { %2712 = vmatprep.subr.bf16.mxu1 %v4085_v17  ;;  %v4167_v17 = vld [vmem:[%s6174_s1 + $0x390] ss:$8 sps:$4 sm:$0xff]  }
  0x42   :  { %2622 = vmatmul.mubr.bf16.vlgmr.msra.gmra.mxu0 %v463_v13  ;;  %v4161_v13 = vld [vmem:[%s6174_s1 + $0x3a0] ss:$8 sps:$4 sm:$0xff]  }
  0x43   :  { %2672 = vmatpush1.bf16.msra.mxu0 %v4080_v18  ;;  %2703 = vmatprep.mubr.bf16.mxu0 %v484_v16  ;;  %v4172_v16 = vld [vmem:[%s6174_s1 + $0x284] ss:$8 sps:$4 sm:$0xff]  }
  0x44   :  { %2663 = vmatmul.mubr.bf16.vlgmr.msra.gmra.mxu1 %v485_v19  ;;  %2673 = vmatprep.subr.bf16.mxu0 %v4088_v20  ;;  %v4175_v18 = vld [vmem:[%s6174_s1 + $0x384] ss:$8 sps:$4 sm:$0xff]   ;;  %v4170_v19 = vld [vmem:[%s6174_s1 + $0x280] ss:$8 sps:$4 sm:$0xff]   ;;  %v470_v20 = vrot.slane %v4873_v5, %v4823_v48 }
  0x45   :  { %2713 = vmatpush1.bf16.msra.mxu1 %v4083_v21  ;;  %2744 = vmatprep.mubr.bf16.mxu1 %v488_v22  ;;  %v4178_v21 = vld [vmem:[%s6174_s1 + $0x474] ss:$8 sps:$4 sm:$0xff]   ;;  %v4173_v22 = vld [vmem:[%s6174_s1 + $0x380] ss:$8 sps:$4 sm:$0xff]  }
  0x46   :  { %2714 = vmatprep.subr.bf16.mxu1 %v4091_v23  ;;  %v4181_v23 = vld [vmem:[%s6174_s1 + $0x574] ss:$8 sps:$4 sm:$0xff]   ;;  %v486_v5 = vcombine.high %v470_v20, %v470_v20 }
  0x47   :  { %2674 = vmatpush1.bf16.msra.mxu0 %v4086_v24  ;;  %v4176_v24 = vld [vmem:[%s6174_s1 + $0x470] ss:$8 sps:$4 sm:$0xff]  }
  0x48   :  { %2675 = vmatprep.subr.bf16.mxu0 %v4094_v25  ;;  %v4184_v25 = vld [vmem:[%s6174_s1 + $0x464] ss:$8 sps:$4 sm:$0xff]  }
  0x49   :  { %2715 = vmatpush1.bf16.msra.mxu1 %v4089_v26  ;;  %v5109_v26 = vld [vmem:[%s6173_s0 + $0x8] sm:$0xff] }
  0x4a   :  { %2716 = vmatprep.subr.bf16.mxu1 %v4097_v27  ;;  %v4179_v27 = vld [vmem:[%s6174_s1 + $0x570] ss:$8 sps:$4 sm:$0xff]  }
  0x4b   :  { %2676 = vmatpush1.bf16.msra.mxu0 %v4092_v28  ;;  %v5116_v28 = vrot.slane %v5109_v26, %v4823_v48 }
  0x4c   :  { %2677 = vmatprep.subr.bf16.mxu0 %v4100_v29  ;;  %v4187_v29 = vld [vmem:[%s6174_s1 + $0x564] ss:$8 sps:$4 sm:$0xff]  }
  0x4d   :  { %2717 = vmatpush1.bf16.msra.mxu1 %v4095_v30  ;;  %v4182_v30 = vld [vmem:[%s6174_s1 + $0x460] ss:$8 sps:$4 sm:$0xff]  }
  0x4e   :  { %2718 = vmatprep.subr.bf16.mxu1 %v4103_v31  ;;  %v504_v31 = vcombine.high %v5116_v28, %v5116_v28 }
  0x4f   :  { %2678 = vmatpush1.bf16.msra.mxu0 %v4098_v32  ;;  %v4190_v32 = vld [vmem:[%s6174_s1 + $0x454] ss:$8 sps:$4 sm:$0xff]  }
  0x50   :  { %2679 = vmatprep.subr.bf16.mxu0 %v4106_v33  ;;  %v4185_v33 = vld [vmem:[%s6174_s1 + $0x560] ss:$8 sps:$4 sm:$0xff]  }
  0x51   :  { %2719 = vmatpush1.bf16.msra.mxu1 %v4101_v34  ;;  %v526_v34 = vrot.slane %v504_v31, %v4823_v48  ;;  %v4266_v31 = vld [vmem:[%s6174_s1 + $0x480] ss:$8 sps:$4 sm:$0xff]  }
  0x52   :  { %2720 = vmatprep.subr.bf16.mxu1 %v4109_v35  ;;  %v4193_v35 = vld [vmem:[%s6174_s1 + $0x554] ss:$8 sps:$4 sm:$0xff]  }
  0x53   :  { %2680 = vmatpush1.bf16.msra.mxu0 %v4104_v36  ;;  %v4188_v36 = vld [vmem:[%s6174_s1 + $0x450] ss:$8 sps:$4 sm:$0xff]  }
  0x54   :  { %2681 = vmatprep.subr.bf16.mxu0 %v4112_v37  ;;  %v536_v37 = vcombine.high %v526_v34, %v526_v34 }
  0x55   :  { %2721 = vmatpush1.bf16.msra.mxu1 %v4107_v38  ;;  %v4196_v38 = vld [vmem:[%s6174_s1 + $0x444] ss:$8 sps:$4 sm:$0xff]  }
  0x56   :  { %2722 = vmatprep.subr.bf16.mxu1 %v4115_v39  ;;  %v4191_v39 = vld [vmem:[%s6174_s1 + $0x550] ss:$8 sps:$4 sm:$0xff]  }
  0x57   :  { %2682 = vmatpush1.bf16.msra.mxu0 %v4110_v40  ;;  %v4199_v40 = vld [vmem:[%s6174_s1 + $0x544] ss:$8 sps:$4 sm:$0xff]  }
  0x58   :  { %2683 = vmatprep.subr.bf16.mxu0 %v4118_v41  ;;  %v4194_v41 = vld [vmem:[%s6174_s1 + $0x440] ss:$8 sps:$4 sm:$0xff]  }
  0x59   :  { %2723 = vmatpush1.bf16.msra.mxu1 %v4113_v43  ;;  %v4202_v43 = vld [vmem:[%s6174_s1 + $0x434] ss:$8 sps:$4 sm:$0xff]  }
  0x5a   :  { %2724 = vmatprep.subr.bf16.mxu1 %v4121_v44  ;;  %v4197_v44 = vld [vmem:[%s6174_s1 + $0x540] ss:$8 sps:$4 sm:$0xff]  }
  0x5b   :  { %2684 = vmatpush1.bf16.msra.mxu0 %v4116_v45  ;;  %v4205_v45 = vld [vmem:[%s6174_s1 + $0x534] ss:$8 sps:$4 sm:$0xff]  }
  0x5c   :  { %2685 = vmatprep.subr.bf16.mxu0 %v4124_v46  ;;  %v4200_v46 = vld [vmem:[%s6174_s1 + $0x430] ss:$8 sps:$4 sm:$0xff]  }
  0x5d   :  { %2725 = vmatpush1.bf16.msra.mxu1 %v4119_v47  ;;  %v4208_v47 = vld [vmem:[%s6174_s1 + $0x424] ss:$8 sps:$4 sm:$0xff]  }
  0x5e   :  { %2726 = vmatprep.subr.bf16.mxu1 %v4127_v49  ;;  %v4203_v49 = vld [vmem:[%s6174_s1 + $0x530] ss:$8 sps:$4 sm:$0xff]  }
  0x5f   :  { %2686 = vmatpush1.bf16.msra.mxu0 %v4122_v50  ;;  %v4211_v50 = vld [vmem:[%s6174_s1 + $0x524] ss:$8 sps:$4 sm:$0xff]  }
  0x60   :  { %2687 = vmatprep.subr.bf16.mxu0 %v4130_v51  ;;  %v4206_v51 = vld [vmem:[%s6174_s1 + $0x420] ss:$8 sps:$4 sm:$0xff]  }
  0x61   :  { %2727 = vmatpush1.bf16.msra.mxu1 %v4125_v52  ;;  %v4214_v52 = vld [vmem:[%s6174_s1 + $0x414] ss:$8 sps:$4 sm:$0xff]  }
  0x62   :  { %2728 = vmatprep.subr.bf16.mxu1 %v4133_v53  ;;  %v4209_v53 = vld [vmem:[%s6174_s1 + $0x520] ss:$8 sps:$4 sm:$0xff]  }
  0x63   :  { %2688 = vmatpush2.bf16.msra.mxu0 %v4128_v54  ;;  %v4217_v54 = vld [vmem:[%s6174_s1 + $0x514] ss:$8 sps:$4 sm:$0xff]  }
  0x64   :  { %2689 = vmatprep.subr.bf16.mxu0 %v4136_v55  ;;  %v4212_v55 = vld [vmem:[%s6174_s1 + $0x410] ss:$8 sps:$4 sm:$0xff]  }
  0x65   :  { %2729 = vmatpush2.bf16.msra.mxu1 %v4131_v56  ;;  %v4220_v56 = vld [vmem:[%s6174_s1 + $0x404] ss:$8 sps:$4 sm:$0xff]  }
  0x66   :  { %2730 = vmatprep.subr.bf16.mxu1 %v4139_v57  ;;  %v4215_v57 = vld [vmem:[%s6174_s1 + $0x510] ss:$8 sps:$4 sm:$0xff]  }
  0x67   :  { %2690 = vmatpush2.bf16.msra.mxu0 %v4134_v58  ;;  %v4223_v58 = vld [vmem:[%s6174_s1 + $0x504] ss:$8 sps:$4 sm:$0xff]  }
  0x68   :  { %2691 = vmatprep.subr.bf16.mxu0 %v4142_v59  ;;  %v4218_v59 = vld [vmem:[%s6174_s1 + $0x400] ss:$8 sps:$4 sm:$0xff]  }
  0x69   :  { %2731 = vmatpush2.bf16.msra.mxu1 %v4137_v60  ;;  %v4226_v60 = vld [vmem:[%s6174_s1 + $0x4f4] ss:$8 sps:$4 sm:$0xff]  }
  0x6a   :  { %2732 = vmatprep.subr.bf16.mxu1 %v4145_v61  ;;  %v4221_v61 = vld [vmem:[%s6174_s1 + $0x500] ss:$8 sps:$4 sm:$0xff]  }
  0x6b   :  { %2692 = vmatpush2.bf16.msra.mxu0 %v4140_v62  ;;  %v4229_v62 = vld [vmem:[%s6174_s1 + $0x5f4] ss:$8 sps:$4 sm:$0xff]  }
  0x6c   :  { %2693 = vmatprep.subr.bf16.mxu0 %v4148_v63  ;;  %v4224_v63 = vld [vmem:[%s6174_s1 + $0x4f0] ss:$8 sps:$4 sm:$0xff]  }
  0x6d   :  { %2733 = vmatpush2.bf16.msra.mxu1 %v4143_v0  ;;  %v4232_v0 = vld [vmem:[%s6174_s1 + $0x4e4] ss:$8 sps:$4 sm:$0xff]  }
  0x6e   :  { %2734 = vmatprep.subr.bf16.mxu1 %v4151_v1  ;;  %v4227_v1 = vld [vmem:[%s6174_s1 + $0x5f0] ss:$8 sps:$4 sm:$0xff]  }
  0x6f   :  { %2694 = vmatpush2.bf16.msra.mxu0 %v4146_v2  ;;  %v4235_v2 = vld [vmem:[%s6174_s1 + $0x5e4] ss:$8 sps:$4 sm:$0xff]  }
  0x70   :  { %2695 = vmatprep.subr.bf16.mxu0 %v4154_v3  ;;  %v4230_v3 = vld [vmem:[%s6174_s1 + $0x4e0] ss:$8 sps:$4 sm:$0xff]  }
  0x71   :  { %2735 = vmatpush2.bf16.msra.mxu1 %v4149_v4  ;;  %v4238_v4 = vld [vmem:[%s6174_s1 + $0x4d4] ss:$8 sps:$4 sm:$0xff]  }
  0x72   :  { %2736 = vmatprep.subr.bf16.mxu1 %v4157_v6  ;;  %v4233_v6 = vld [vmem:[%s6174_s1 + $0x5e0] ss:$8 sps:$4 sm:$0xff]  }
  0x73   :  { %2696 = vmatpush2.bf16.msra.mxu0 %v4152_v7  ;;  %v4241_v7 = vld [vmem:[%s6174_s1 + $0x5d4] ss:$8 sps:$4 sm:$0xff]  }
  0x74   :  { %2697 = vmatprep.subr.bf16.mxu0 %v4160_v8  ;;  %v4236_v8 = vld [vmem:[%s6174_s1 + $0x4d0] ss:$8 sps:$4 sm:$0xff]  }
  0x75   :  { %2737 = vmatpush2.bf16.msra.mxu1 %v4155_v9  ;;  %v4244_v9 = vld [vmem:[%s6174_s1 + $0x4c4] ss:$8 sps:$4 sm:$0xff]  }
  0x76   :  { %2738 = vmatprep.subr.bf16.mxu1 %v4163_v10  ;;  %v4239_v10 = vld [vmem:[%s6174_s1 + $0x5d0] ss:$8 sps:$4 sm:$0xff]  }
  0x77   :  { %2698 = vmatpush2.bf16.msra.mxu0 %v4158_v11  ;;  %v4247_v11 = vld [vmem:[%s6174_s1 + $0x5c4] ss:$8 sps:$4 sm:$0xff]  }
  0x78   :  { %2699 = vmatprep.subr.bf16.mxu0 %v4166_v12  ;;  %v4242_v12 = vld [vmem:[%s6174_s1 + $0x4c0] ss:$8 sps:$4 sm:$0xff]  }
  0x79   :  { %2739 = vmatpush2.bf16.msra.mxu1 %v4161_v13  ;;  %v4250_v13 = vld [vmem:[%s6174_s1 + $0x4b4] ss:$8 sps:$4 sm:$0xff]  }
  0x7a   :  { %2740 = vmatprep.subr.bf16.mxu1 %v4169_v14  ;;  %v4245_v14 = vld [vmem:[%s6174_s1 + $0x5c0] ss:$8 sps:$4 sm:$0xff]  }
  0x7b   :  { %2700 = vmatpush2.bf16.msra.mxu0 %v4164_v15  ;;  %v4253_v15 = vld [vmem:[%s6174_s1 + $0x5b4] ss:$8 sps:$4 sm:$0xff]  }
  0x7c   :  { %2701 = vmatprep.subr.bf16.mxu0 %v4172_v16  ;;  %v4248_v16 = vld [vmem:[%s6174_s1 + $0x4b0] ss:$8 sps:$4 sm:$0xff]  }
  0x7d   :  { %2741 = vmatpush2.bf16.msra.mxu1 %v4167_v17  ;;  %v4256_v17 = vld [vmem:[%s6174_s1 + $0x4a4] ss:$8 sps:$4 sm:$0xff]  }
  0x7e   :  { %2742 = vmatprep.subr.bf16.mxu1 %v4175_v18  ;;  %v4251_v18 = vld [vmem:[%s6174_s1 + $0x5b0] ss:$8 sps:$4 sm:$0xff]  }
  0x7f   :  { %2702 = vmatpush2.bf16.msra.mxu0 %v4170_v19  ;;  %v489_v19 = vcombine.high %v5109_v26, %v5109_v26  ;;  %v4268_v26 = vld [vmem:[%s6174_s1 + $0x484] ss:$8 sps:$4 sm:$0xff]  }
  0x80   :  { %2753 = vmatprep.subr.bf16.mxu0 %v4178_v21  ;;  %v4254_v21 = vld [vmem:[%s6174_s1 + $0x4a0] ss:$8 sps:$4 sm:$0xff]  }
  0x81   :  { %2743 = vmatpush2.bf16.msra.mxu1 %v4173_v22  ;;  %v4262_v22 = vld [vmem:[%s6174_s1 + $0x494] ss:$8 sps:$4 sm:$0xff]  }
  0x82   :  { %2704 = vmatmul.mubr.bf16.vlgmr.msra.gmra.mxu0 %v470_v20  ;;  %2794 = vmatprep.subr.bf16.mxu1 %v4181_v23  ;;  %v4259_v20 = vld [vmem:[%s6174_s1 + $0x5a4] ss:$8 sps:$4 sm:$0xff]   ;;  %v4257_v23 = vld [vmem:[%s6174_s1 + $0x5a0] ss:$8 sps:$4 sm:$0xff]  }
  0x83   :  { %2754 = vmatpush1.bf16.msra.mxu0 %v4176_v24  ;;  %2785 = vmatprep.mubr.bf16.mxu0 %v526_v34  ;;  %v5280_v24 = vrot.slane %v489_v19, %v4823_v48  ;;  %v4269_v34 = vld [vmem:[%s6174_s1 + $0x580] ss:$8 sps:$4 sm:$0xff]   ;;  %v4335_v19 = vld [vmem:[%s6174_s1 + $0x7d0] ss:$8 sps:$4 sm:$0xff]  }
  0x84   :  { %2745 = vmatmul.mubr.bf16.vlgmr.msra.gmra.mxu1 %v486_v5  ;;  %2755 = vmatprep.subr.bf16.mxu0 %v4184_v25  ;;  %v4265_v5 = vld [vmem:[%s6174_s1 + $0x594] ss:$8 sps:$4 sm:$0xff]   ;;  %v4260_v25 = vld [vmem:[%s6174_s1 + $0x490] ss:$8 sps:$4 sm:$0xff]  }
  0x85   :  { %2795 = vmatpush1.bf16.msra.mxu1 %v4179_v27  ;;  %2826 = vmatprep.mubr.bf16.mxu1 %v536_v37  ;;  %v4263_v27 = vld [vmem:[%s6174_s1 + $0x590] ss:$8 sps:$4 sm:$0xff]  }
  0x86   :  { %2796 = vmatprep.subr.bf16.mxu1 %v4187_v29  ;;  %v505_v29 = vcombine.high %v5280_v24, %v5280_v24 }
  0x87   :  { %2756 = vmatpush1.bf16.msra.mxu0 %v4182_v30  ;;  %v4271_v30 = vld [vmem:[%s6174_s1 + $0x584] ss:$8 sps:$4 sm:$0xff]  }
  0x88   :  { %2757 = vmatprep.subr.bf16.mxu0 %v4190_v32  ;;  %v512_v32 = vrot.slane %v5116_v28, %v4823_v48  ;;  %v4272_v28 = vld [vmem:[%s6174_s1 + $0x670] ss:$8 sps:$4 sm:$0xff]  }
  0x89   :  { %2797 = vmatpush1.bf16.msra.mxu1 %v4185_v33  ;;  %v4274_v33 = vld [vmem:[%s6174_s1 + $0x674] ss:$8 sps:$4 sm:$0xff]  }
  0x8a   :  { %2798 = vmatprep.subr.bf16.mxu1 %v4193_v35  ;;  %v533_v35 = vrot.slane %v505_v29, %v4823_v48  ;;  %v534_v37 = vcombine.high %v512_v32, %v512_v32  ;;  %v4355_v29 = vld [vmem:[%s6174_s1 + $0x7a4] ss:$8 sps:$4 sm:$0xff]  }
  0x8b   :  { %2758 = vmatpush1.bf16.msra.mxu0 %v4188_v36  ;;  %v4277_v36 = vld [vmem:[%s6174_s1 + $0x774] ss:$8 sps:$4 sm:$0xff]  }
  0x8c   :  { %2759 = vmatprep.subr.bf16.mxu0 %v4196_v38  ;;  %v4280_v38 = vld [vmem:[%s6174_s1 + $0x664] ss:$8 sps:$4 sm:$0xff]  }
  0x8d   :  { %2799 = vmatpush1.bf16.msra.mxu1 %v4191_v39  ;;  %v4275_v39 = vld [vmem:[%s6174_s1 + $0x770] ss:$8 sps:$4 sm:$0xff]  }
  0x8e   :  { %2800 = vmatprep.subr.bf16.mxu1 %v4199_v40  ;;  %v537_v40 = vcombine.high %v533_v35, %v533_v35 }
  0x8f   :  { %2760 = vmatpush1.bf16.msra.mxu0 %v4194_v41  ;;  %v4283_v41 = vld [vmem:[%s6174_s1 + $0x764] ss:$8 sps:$4 sm:$0xff]  }
  0x90   :  { %2761 = vmatprep.subr.bf16.mxu0 %v4202_v43  ;;  %v4278_v43 = vld [vmem:[%s6174_s1 + $0x660] ss:$8 sps:$4 sm:$0xff]  }
  0x91   :  { %2801 = vmatpush1.bf16.msra.mxu1 %v4197_v44  ;;  %v4286_v44 = vld [vmem:[%s6174_s1 + $0x654] ss:$8 sps:$4 sm:$0xff]  }
  0x92   :  { %2802 = vmatprep.subr.bf16.mxu1 %v4205_v45  ;;  %v4281_v45 = vld [vmem:[%s6174_s1 + $0x760] ss:$8 sps:$4 sm:$0xff]  }
  0x93   :  { %2762 = vmatpush1.bf16.msra.mxu0 %v4200_v46  ;;  %v4289_v46 = vld [vmem:[%s6174_s1 + $0x754] ss:$8 sps:$4 sm:$0xff]  }
  0x94   :  { %2763 = vmatprep.subr.bf16.mxu0 %v4208_v47  ;;  %v4284_v47 = vld [vmem:[%s6174_s1 + $0x650] ss:$8 sps:$4 sm:$0xff]  }
  0x95   :  { %2803 = vmatpush1.bf16.msra.mxu1 %v4203_v49  ;;  %v4292_v49 = vld [vmem:[%s6174_s1 + $0x644] ss:$8 sps:$4 sm:$0xff]  }
  0x96   :  { %2804 = vmatprep.subr.bf16.mxu1 %v4211_v50  ;;  %v4287_v50 = vld [vmem:[%s6174_s1 + $0x750] ss:$8 sps:$4 sm:$0xff]  }
  0x97   :  { %2764 = vmatpush1.bf16.msra.mxu0 %v4206_v51  ;;  %v4295_v51 = vld [vmem:[%s6174_s1 + $0x744] ss:$8 sps:$4 sm:$0xff]  }
  0x98   :  { %2765 = vmatprep.subr.bf16.mxu0 %v4214_v52  ;;  %v4290_v52 = vld [vmem:[%s6174_s1 + $0x640] ss:$8 sps:$4 sm:$0xff]  }
  0x99   :  { %2805 = vmatpush1.bf16.msra.mxu1 %v4209_v53  ;;  %v4298_v53 = vld [vmem:[%s6174_s1 + $0x634] ss:$8 sps:$4 sm:$0xff]  }
  0x9a   :  { %2806 = vmatprep.subr.bf16.mxu1 %v4217_v54  ;;  %v4293_v54 = vld [vmem:[%s6174_s1 + $0x740] ss:$8 sps:$4 sm:$0xff]  }
  0x9b   :  { %2766 = vmatpush1.bf16.msra.mxu0 %v4212_v55  ;;  %v4301_v55 = vld [vmem:[%s6174_s1 + $0x734] ss:$8 sps:$4 sm:$0xff]  }
  0x9c   :  { %2767 = vmatprep.subr.bf16.mxu0 %v4220_v56  ;;  %v4296_v56 = vld [vmem:[%s6174_s1 + $0x630] ss:$8 sps:$4 sm:$0xff]  }
  0x9d   :  { %2807 = vmatpush1.bf16.msra.mxu1 %v4215_v57  ;;  %v4304_v57 = vld [vmem:[%s6174_s1 + $0x624] ss:$8 sps:$4 sm:$0xff]  }
  0x9e   :  { %2808 = vmatprep.subr.bf16.mxu1 %v4223_v58  ;;  %v4299_v58 = vld [vmem:[%s6174_s1 + $0x730] ss:$8 sps:$4 sm:$0xff]  }
  0x9f   :  { %2768 = vmatpush1.bf16.msra.mxu0 %v4218_v59  ;;  %v4307_v59 = vld [vmem:[%s6174_s1 + $0x724] ss:$8 sps:$4 sm:$0xff]  }
  0xa0   :  { %2769 = vmatprep.subr.bf16.mxu0 %v4226_v60  ;;  %v4302_v60 = vld [vmem:[%s6174_s1 + $0x620] ss:$8 sps:$4 sm:$0xff]  }
  0xa1   :  { %2809 = vmatpush1.bf16.msra.mxu1 %v4221_v61  ;;  %v4310_v61 = vld [vmem:[%s6174_s1 + $0x614] ss:$8 sps:$4 sm:$0xff]  }
  0xa2   :  { %2810 = vmatprep.subr.bf16.mxu1 %v4229_v62  ;;  %v4305_v62 = vld [vmem:[%s6174_s1 + $0x720] ss:$8 sps:$4 sm:$0xff]  }
  0xa3   :  { %2770 = vmatpush2.bf16.msra.mxu0 %v4224_v63  ;;  %v4313_v63 = vld [vmem:[%s6174_s1 + $0x714] ss:$8 sps:$4 sm:$0xff]  }
  0xa4   :  { %2771 = vmatprep.subr.bf16.mxu0 %v4232_v0  ;;  %v4308_v0 = vld [vmem:[%s6174_s1 + $0x610] ss:$8 sps:$4 sm:$0xff]  }
  0xa5   :  { %2811 = vmatpush2.bf16.msra.mxu1 %v4227_v1  ;;  %v4316_v1 = vld [vmem:[%s6174_s1 + $0x604] ss:$8 sps:$4 sm:$0xff]  }
  0xa6   :  { %2812 = vmatprep.subr.bf16.mxu1 %v4235_v2  ;;  %v4311_v2 = vld [vmem:[%s6174_s1 + $0x710] ss:$8 sps:$4 sm:$0xff]  }
  0xa7   :  { %2772 = vmatpush2.bf16.msra.mxu0 %v4230_v3  ;;  %v4319_v3 = vld [vmem:[%s6174_s1 + $0x704] ss:$8 sps:$4 sm:$0xff]  }
  0xa8   :  { %2773 = vmatprep.subr.bf16.mxu0 %v4238_v4  ;;  %v4314_v4 = vld [vmem:[%s6174_s1 + $0x600] ss:$8 sps:$4 sm:$0xff]  }
  0xa9   :  { %2813 = vmatpush2.bf16.msra.mxu1 %v4233_v6  ;;  %v4322_v6 = vld [vmem:[%s6174_s1 + $0x6f4] ss:$8 sps:$4 sm:$0xff]  }
  0xaa   :  { %2814 = vmatprep.subr.bf16.mxu1 %v4241_v7  ;;  %v4317_v7 = vld [vmem:[%s6174_s1 + $0x700] ss:$8 sps:$4 sm:$0xff]  }
  0xab   :  { %2774 = vmatpush2.bf16.msra.mxu0 %v4236_v8  ;;  %v4325_v8 = vld [vmem:[%s6174_s1 + $0x7f4] ss:$8 sps:$4 sm:$0xff]  }
  0xac   :  { %2775 = vmatprep.subr.bf16.mxu0 %v4244_v9  ;;  %v4320_v9 = vld [vmem:[%s6174_s1 + $0x6f0] ss:$8 sps:$4 sm:$0xff]  }
  0xad   :  { %2815 = vmatpush2.bf16.msra.mxu1 %v4239_v10  ;;  %v4328_v10 = vld [vmem:[%s6174_s1 + $0x6e4] ss:$8 sps:$4 sm:$0xff]  }
  0xae   :  { %2816 = vmatprep.subr.bf16.mxu1 %v4247_v11  ;;  %v4323_v11 = vld [vmem:[%s6174_s1 + $0x7f0] ss:$8 sps:$4 sm:$0xff]  }
  0xaf   :  { %2776 = vmatpush2.bf16.msra.mxu0 %v4242_v12  ;;  %v4331_v12 = vld [vmem:[%s6174_s1 + $0x7e4] ss:$8 sps:$4 sm:$0xff]  }
  0xb0   :  { %2777 = vmatprep.subr.bf16.mxu0 %v4250_v13  ;;  %v4326_v13 = vld [vmem:[%s6174_s1 + $0x6e0] ss:$8 sps:$4 sm:$0xff]  }
  0xb1   :  { %2817 = vmatpush2.bf16.msra.mxu1 %v4245_v14  ;;  %v4334_v14 = vld [vmem:[%s6174_s1 + $0x6d4] ss:$8 sps:$4 sm:$0xff]  }
  0xb2   :  { %2818 = vmatprep.subr.bf16.mxu1 %v4253_v15  ;;  %v4329_v15 = vld [vmem:[%s6174_s1 + $0x7e0] ss:$8 sps:$4 sm:$0xff]  }
  0xb3   :  { %2778 = vmatpush2.bf16.msra.mxu0 %v4248_v16  ;;  %v4337_v16 = vld [vmem:[%s6174_s1 + $0x7d4] ss:$8 sps:$4 sm:$0xff]  }
  0xb4   :  { %2779 = vmatprep.subr.bf16.mxu0 %v4256_v17  ;;  %v4332_v17 = vld [vmem:[%s6174_s1 + $0x6d0] ss:$8 sps:$4 sm:$0xff]  }
  0xb5   :  { %2819 = vmatpush2.bf16.msra.mxu1 %v4251_v18  ;;  %v4340_v18 = vld [vmem:[%s6174_s1 + $0x6c4] ss:$8 sps:$4 sm:$0xff]  }
  0xb6   :  { %2820 = vmatprep.subr.bf16.mxu1 %v4259_v20  ;;  %v4343_v20 = vld [vmem:[%s6174_s1 + $0x7c4] ss:$8 sps:$4 sm:$0xff]  }
  0xb7   :  { %2780 = vmatpush2.bf16.msra.mxu0 %v4254_v21  ;;  %v4338_v21 = vld [vmem:[%s6174_s1 + $0x6c0] ss:$8 sps:$4 sm:$0xff]  }
  0xb8   :  { %2781 = vmatprep.subr.bf16.mxu0 %v4262_v22  ;;  %v4346_v22 = vld [vmem:[%s6174_s1 + $0x6b4] ss:$8 sps:$4 sm:$0xff]  }
  0xb9   :  { %2821 = vmatpush2.bf16.msra.mxu1 %v4257_v23  ;;  %v4341_v23 = vld [vmem:[%s6174_s1 + $0x7c0] ss:$8 sps:$4 sm:$0xff]  }
  0xba   :  { %2822 = vmatprep.subr.bf16.mxu1 %v4265_v5  ;;  %v4349_v5 = vld [vmem:[%s6174_s1 + $0x7b4] ss:$8 sps:$4 sm:$0xff]  }
  0xbb   :  { %2782 = vmatpush2.bf16.msra.mxu0 %v4260_v25  ;;  %v4344_v25 = vld [vmem:[%s6174_s1 + $0x6b0] ss:$8 sps:$4 sm:$0xff]  }
  0xbc   :  { %2783 = vmatprep.subr.bf16.mxu0 %v4268_v26  ;;  %v4352_v26 = vld [vmem:[%s6174_s1 + $0x6a4] ss:$8 sps:$4 sm:$0xff]  }
  0xbd   :  { %2823 = vmatpush2.bf16.msra.mxu1 %v4263_v27  ;;  %v4347_v27 = vld [vmem:[%s6174_s1 + $0x7b0] ss:$8 sps:$4 sm:$0xff]  }
  0xbe   :  { %2824 = vmatprep.subr.bf16.mxu1 %v4271_v30  ;;  %v5473_v30 = vld [vmem:[%s6173_s0 + $0x10] sm:$0xff] }
  0xbf   :  { %2784 = vmatpush2.bf16.msra.mxu0 %v4266_v31  ;;  %v4350_v31 = vld [vmem:[%s6174_s1 + $0x6a0] ss:$8 sps:$4 sm:$0xff]  }
  0xc0   :  { %2835 = vmatprep.subr.bf16.mxu0 %v4274_v33  ;;  %v4353_v33 = vld [vmem:[%s6174_s1 + $0x7a0] ss:$8 sps:$4 sm:$0xff]  }
  0xc1   :  { %2825 = vmatpush2.bf16.msra.mxu1 %v4269_v34  ;;  %v5486_v34 = vrot.slane %v5473_v30, %v4823_v48 }
  0xc2   :  { %2786 = vmatmul.mubr.bf16.vlgmr.msra.gmra.mxu0 %v512_v32  ;;  %2876 = vmatprep.subr.bf16.mxu1 %v4277_v36  ;;  %v4358_v32 = vld [vmem:[%s6174_s1 + $0x694] ss:$8 sps:$4 sm:$0xff]   ;;  %v4356_v36 = vld [vmem:[%s6174_s1 + $0x690] ss:$8 sps:$4 sm:$0xff]  }
  0xc3   :  { %2836 = vmatpush1.bf16.msra.mxu0 %v4272_v28  ;;  %2867 = vmatprep.mubr.bf16.mxu0 %v533_v35  ;;  %v4361_v35 = vld [vmem:[%s6174_s1 + $0x794] ss:$8 sps:$4 sm:$0xff]   ;;  %v4364_v28 = vld [vmem:[%s6174_s1 + $0x684] ss:$8 sps:$4 sm:$0xff]  }
  0xc4   :  { %2827 = vmatmul.mubr.bf16.vlgmr.msra.gmra.mxu1 %v534_v37  ;;  %2837 = vmatprep.subr.bf16.mxu0 %v4280_v38  ;;  %v4359_v37 = vld [vmem:[%s6174_s1 + $0x790] ss:$8 sps:$4 sm:$0xff]   ;;  %v553_v38 = vcombine.high %v5486_v34, %v5486_v34 }
  0xc5   :  { %2877 = vmatpush1.bf16.msra.mxu1 %v4275_v39  ;;  %2908 = vmatprep.mubr.bf16.mxu1 %v537_v40  ;;  %v4367_v39 = vld [vmem:[%s6174_s1 + $0x784] ss:$8 sps:$4 sm:$0xff]   ;;  %v4362_v40 = vld [vmem:[%s6174_s1 + $0x680] ss:$8 sps:$4 sm:$0xff]  }
  0xc6   :  { %2878 = vmatprep.subr.bf16.mxu1 %v4283_v41  ;;  %v424_v41 = vld [vmem:[%s6175_s2] sm:$0x3] }
  0xc7   :  { %2838 = vmatpush1.bf16.msra.mxu0 %v4278_v43  ;;  %v428_v43 = vsub.s32 0, %v4808_v42 }
  0xc8   :  { %2839 = vmatprep.subr.bf16.mxu0 %v4286_v44  ;;  %v519_v44 = vrot.slane %v5280_v24, %v4823_v48 }
  0xc9   :  { %2879 = vmatpush1.bf16.msra.mxu1 %v4281_v45  ;;  %v4371_v45 = vld [vmem:[%s6174_s1 + $0x874] ss:$8 sps:$4 sm:$0xff]   ;;  %v429_v24 = vrot.slane %v424_v41, %v428_v43 }
  0xca   :  { %2880 = vmatprep.subr.bf16.mxu1 %v4289_v46  ;;  %v4365_v46 = vld [vmem:[%s6174_s1 + $0x780] ss:$8 sps:$4 sm:$0xff]  }
  0xcb   :  { %2840 = vmatpush1.bf16.msra.mxu0 %v4284_v47  ;;  %v432_v47 = vsub.s32 1, %v4808_v42 }
  0xcc   :  { %2841 = vmatprep.subr.bf16.mxu0 %v4292_v49  ;;  %v575_v49 = vrot.slane %v553_v38, %v4823_v48 }
  0xcd   :  { %2881 = vmatpush1.bf16.msra.mxu1 %v4287_v50  ;;  %v4374_v50 = vld [vmem:[%s6174_s1 + $0x974] ss:$8 sps:$4 sm:$0xff]  }
  0xce   :  { %2882 = vmatprep.subr.bf16.mxu1 %v4295_v51  ;;  %v4369_v51 = vld [vmem:[%s6174_s1 + $0x870] ss:$8 sps:$4 sm:$0xff]  }
  0xcf   :  { %2842 = vmatpush1.bf16.msra.mxu0 %v4290_v52  ;;  %v535_v52 = vcombine.high %v519_v44, %v519_v44 }
  0xd0   :  { %2843 = vmatprep.subr.bf16.mxu0 %v4298_v53  ;;  %v4377_v53 = vld [vmem:[%s6174_s1 + $0x864] ss:$8 sps:$4 sm:$0xff]  }
  0xd1   :  { %2883 = vmatpush1.bf16.msra.mxu1 %v4293_v54  ;;  %v433_v54 = vrot.slane %v424_v41, %v432_v47 }
  0xd2   :  { %2884 = vmatprep.subr.bf16.mxu1 %v4301_v55  ;;  %v4372_v55 = vld [vmem:[%s6174_s1 + $0x970] ss:$8 sps:$4 sm:$0xff]  }
  0xd3   :  { %2844 = vmatpush1.bf16.msra.mxu0 %v4296_v56  ;;  %v585_v56 = vcombine.high %v575_v49, %v575_v49 }
  0xd4   :  { %2845 = vmatprep.subr.bf16.mxu0 %v4304_v57 }
  0xd5   :  { %2885 = vmatpush1.bf16.msra.mxu1 %v4299_v58  ;;  %v4375_v58 = vld [vmem:[%s6174_s1 + $0x860] ss:$8 sps:$4 sm:$0xff]  }
  0xd6   :  { %2886 = vmatprep.subr.bf16.mxu1 %v4307_v59  ;;  %v4380_v59 = vld [vmem:[%s6174_s1 + $0x964] ss:$8 sps:$4 sm:$0xff]  }
  0xd7   :  { %2846 = vmatpush1.bf16.msra.mxu0 %v4302_v60 }
  0xd8   :  { %2847 = vmatprep.subr.bf16.mxu0 %v4310_v61  ;;  %v4378_v61 = vld [vmem:[%s6174_s1 + $0x960] ss:$8 sps:$4 sm:$0xff]  }
  0xd9   :  { %2887 = vmatpush1.bf16.msra.mxu1 %v4305_v62 }
  0xda   :  { %2888 = vmatprep.subr.bf16.mxu1 %v4313_v63 }
  0xdb   :  { %2848 = vmatpush1.bf16.msra.mxu0 %v4308_v0  ;;  %v4383_v0 = vld [vmem:[%s6174_s1 + $0x854] ss:$8 sps:$4 sm:$0xff]  }
  0xdc   :  { %2849 = vmatprep.subr.bf16.mxu0 %v4316_v1 }
  0xdd   :  { %2889 = vmatpush1.bf16.msra.mxu1 %v4311_v2 }
  0xde   :  { %2890 = vmatprep.subr.bf16.mxu1 %v4319_v3  ;;  %v4381_v3 = vld [vmem:[%s6174_s1 + $0x850] ss:$8 sps:$4 sm:$0xff]  }
  0xdf   :  { %2850 = vmatpush1.bf16.msra.mxu0 %v4314_v4  ;;  %v4386_v4 = vld [vmem:[%s6174_s1 + $0x954] ss:$8 sps:$4 sm:$0xff]  }
  0xe0   :  { %2851 = vmatprep.subr.bf16.mxu0 %v4322_v6 }
  0xe1   :  { %2891 = vmatpush1.bf16.msra.mxu1 %v4317_v7 }
  0xe2   :  { %2892 = vmatprep.subr.bf16.mxu1 %v4325_v8 }
  0xe3   :  { %2852 = vmatpush2.bf16.msra.mxu0 %v4320_v9  ;;  %v4384_v9 = vld [vmem:[%s6174_s1 + $0x950] ss:$8 sps:$4 sm:$0xff]  }
  0xe4   :  { %2853 = vmatprep.subr.bf16.mxu0 %v4328_v10 }
  0xe5   :  { %2893 = vmatpush2.bf16.msra.mxu1 %v4323_v11  ;;  %v4389_v11 = vld [vmem:[%s6174_s1 + $0x844] ss:$8 sps:$4 sm:$0xff]  }
  0xe6   :  { %2894 = vmatprep.subr.bf16.mxu1 %v4331_v12 }
  0xe7   :  { %2854 = vmatpush2.bf16.msra.mxu0 %v4326_v13  ;;  %v4392_v13 = vld [vmem:[%s6174_s1 + $0x944] ss:$8 sps:$4 sm:$0xff]  }
  0xe8   :  { %2855 = vmatprep.subr.bf16.mxu0 %v4334_v14  ;;  %v4387_v14 = vld [vmem:[%s6174_s1 + $0x840] ss:$8 sps:$4 sm:$0xff]  }
  0xe9   :  { %2895 = vmatpush2.bf16.msra.mxu1 %v4329_v15 }
  0xea   :  { %2896 = vmatprep.subr.bf16.mxu1 %v4337_v16  ;;  %v4390_v16 = vld [vmem:[%s6174_s1 + $0x940] ss:$8 sps:$4 sm:$0xff]  }
  0xeb   :  { %2856 = vmatpush2.bf16.msra.mxu0 %v4332_v17  ;;  %v4395_v17 = vld [vmem:[%s6174_s1 + $0x834] ss:$8 sps:$4 sm:$0xff]  }
  0xec   :  { %2857 = vmatprep.subr.bf16.mxu0 %v4340_v18  ;;  %v4398_v18 = vld [vmem:[%s6174_s1 + $0x934] ss:$8 sps:$4 sm:$0xff]  }
  0xed   :  { %2897 = vmatpush2.bf16.msra.mxu1 %v4335_v19  ;;  %v4393_v19 = vld [vmem:[%s6174_s1 + $0x830] ss:$8 sps:$4 sm:$0xff]  }
  0xee   :  { %2898 = vmatprep.subr.bf16.mxu1 %v4343_v20  ;;  %v4396_v20 = vld [vmem:[%s6174_s1 + $0x930] ss:$8 sps:$4 sm:$0xff]  }
  0xef   :  { %2858 = vmatpush2.bf16.msra.mxu0 %v4338_v21  ;;  %v4401_v21 = vld [vmem:[%s6174_s1 + $0x824] ss:$8 sps:$4 sm:$0xff]  }
  0xf0   :  { %2859 = vmatprep.subr.bf16.mxu0 %v4346_v22  ;;  %v4404_v22 = vld [vmem:[%s6174_s1 + $0x924] ss:$8 sps:$4 sm:$0xff]  }
  0xf1   :  { %2899 = vmatpush2.bf16.msra.mxu1 %v4341_v23 }
  0xf2   :  { %2900 = vmatprep.subr.bf16.mxu1 %v4349_v5 }
  0xf3   :  { %2860 = vmatpush2.bf16.msra.mxu0 %v4344_v25 }
  0xf4   :  { %2861 = vmatprep.subr.bf16.mxu0 %v4352_v26 }
  0xf5   :  { %2901 = vmatpush2.bf16.msra.mxu1 %v4347_v27 }
  0xf6   :  { %2902 = vmatprep.subr.bf16.mxu1 %v4355_v29 }
  0xf7   :  { %2862 = vmatpush2.bf16.msra.mxu0 %v4350_v31 }
  0xf8   :  { %2863 = vmatprep.subr.bf16.mxu0 %v4358_v32 }
  0xf9   :  { %2903 = vmatpush2.bf16.msra.mxu1 %v4353_v33 }
  0xfa   :  { %2904 = vmatprep.subr.bf16.mxu1 %v4361_v35 }
  0xfb   :  { %2864 = vmatpush2.bf16.msra.mxu0 %v4356_v36 }
  0xfc   :  { %2865 = vmatprep.subr.bf16.mxu0 %v4364_v28 }
  0xfd   :  { %2905 = vmatpush2.bf16.msra.mxu1 %v4359_v37 }
  0xfe   :  { %2906 = vmatprep.subr.bf16.mxu1 %v4367_v39 }
  0xff   :  { %2866 = vmatpush2.bf16.msra.mxu0 %v4362_v40 }
 0x100   :  { %2917 = vmatprep.subr.bf16.mxu0 %v4371_v45 }
 0x101   :  { %2907 = vmatpush2.bf16.msra.mxu1 %v4365_v46 }
 0x102   :  { %v2623_v57 = vpop.f32.mrf.mxu0  ;;  %2868 = vmatmul.mubr.bf16.vlgmr.msra.gmra.mxu0 %v519_v44  ;;  %2958 = vmatprep.subr.bf16.mxu1 %v4374_v50 }
 0x103   :  { %v2624_v60 = vadd.f32 %v2623_v57, %v429_v24  ;;  %2918 = vmatpush1.bf16.msra.mxu0 %v4369_v51  ;;  %2949 = vmatprep.mubr.bf16.mxu0 %v575_v49 }
 0x104   :  { %v2625_v62 = vpop.f32.mrf.mxu0  ;;  %v2664_v63 = vpop.f32.mrf.mxu1  ;;  %2909 = vmatmul.mubr.bf16.vlgmr.msra.gmra.mxu1 %v535_v52  ;;  %2919 = vmatprep.subr.bf16.mxu0 %v4377_v53 }
 0x105   :  { %v2626_v1 = vadd.f32 %v2625_v62, %v433_v54  ;;  %v5550_v2 = vadd.f32 %v2664_v63, %v2624_v60  ;;  %2959 = vmatpush1.bf16.msra.mxu1 %v4372_v55  ;;  %2990 = vmatprep.mubr.bf16.mxu1 %v585_v56 }
 0x106   :  { %v2627_v6 = vpop.f32.mrf.mxu0  ;;  %v2666_v7 = vpop.f32.mrf.mxu1  ;;  %2960 = vmatprep.subr.bf16.mxu1 %v4380_v59 }
 0x107   :  { %v5558_v8 = vadd.f32 %v2666_v7, %v2626_v1  ;;  %2920 = vmatpush1.bf16.msra.mxu0 %v4375_v58 }
 0x108   :  { %v2628_v10 = vpop.f32.mrf.mxu0  ;;  %2921 = vmatprep.subr.bf16.mxu0 %v4383_v0  ;;  %v2668_v12 = vpop.f32.mrf.mxu1 }
 0x109   :  { %2961 = vmatpush1.bf16.msra.mxu1 %v4378_v61 }
 0x10a   :  { %2962 = vmatprep.subr.bf16.mxu1 %v4386_v4  ;;  %v2669_v15 = vpop.f32.mrf.mxu1 }
 0x10b   :  { %2922 = vmatpush1.bf16.msra.mxu0 %v4381_v3 }
 0x10c   :  { %2923 = vmatprep.subr.bf16.mxu0 %v4389_v11 }
 0x10d   :  { %2963 = vmatpush1.bf16.msra.mxu1 %v4384_v9 }
 0x10e   :  { %2964 = vmatprep.subr.bf16.mxu1 %v4392_v13 }
 0x10f   :  { %2924 = vmatpush1.bf16.msra.mxu0 %v4387_v14 }
 0x110   :  { %2925 = vmatprep.subr.bf16.mxu0 %v4395_v17 }
 0x111   :  { %2965 = vmatpush1.bf16.msra.mxu1 %v4390_v16 }
 0x112   :  { %2966 = vmatprep.subr.bf16.mxu1 %v4398_v18 }
 0x113   :  { %12 = vsyncpa [#allocation3], 0  ;;  %2926 = vmatpush1.bf16.msra.mxu0 %v4393_v19  ;;  %v4399_v23 = vld [vmem:[%s6174_s1 + $0x820] ss:$8 sps:$4 sm:$0xff]   ;;  %v4407_v5 = vld [vmem:[%s6174_s1 + $0x814] ss:$8 sps:$4 sm:$0xff]   ;;  %v538_v59 = vcombine.high %v5473_v30, %v5473_v30  ;;  %v561_v10 = vrot.slane %v5486_v34, %v4823_v48 }
 0x114   :  { %2927 = vmatprep.subr.bf16.mxu0 %v4401_v21  ;;  %v4402_v25 = vld [vmem:[%s6174_s1 + $0x920] ss:$8 sps:$4 sm:$0xff]   ;;  %v4410_v26 = vld [vmem:[%s6174_s1 + $0x914] ss:$8 sps:$4 sm:$0xff]   ;;  %v4405_v27 = vld [vmem:[%s6174_s1 + $0x810] ss:$8 sps:$4 sm:$0xff]  }
 0x115   :  { %2967 = vmatpush1.bf16.msra.mxu1 %v4396_v20  ;;  %v4413_v29 = vld [vmem:[%s6174_s1 + $0x804] ss:$8 sps:$4 sm:$0xff]   ;;  %v4408_v31 = vld [vmem:[%s6174_s1 + $0x910] ss:$8 sps:$4 sm:$0xff]   ;;  %v4411_v33 = vld [vmem:[%s6174_s1 + $0x800] ss:$8 sps:$4 sm:$0xff]   ;;  %v5701_v63 = vrot.slane %v538_v59, %v4823_v48  ;;  %v583_v15 = vcombine.high %v561_v10, %v561_v10 }
 0x116   :  { %2968 = vmatprep.subr.bf16.mxu1 %v4404_v22  ;;  %v4416_v32 = vld [vmem:[%s6174_s1 + $0x904] ss:$8 sps:$4 sm:$0xff]   ;;  %v4419_v35 = vld [vmem:[%s6174_s1 + $0x8f4] ss:$8 sps:$4 sm:$0xff]   ;;  %v4414_v36 = vld [vmem:[%s6174_s1 + $0x900] ss:$8 sps:$4 sm:$0xff]  }
 0x117   :  { %2928 = vmatpush1.bf16.msra.mxu0 %v4399_v23  ;;  %v4422_v28 = vld [vmem:[%s6174_s1 + $0x9f4] ss:$8 sps:$4 sm:$0xff]   ;;  %v4417_v37 = vld [vmem:[%s6174_s1 + $0x8f0] ss:$8 sps:$4 sm:$0xff]   ;;  %v4425_v38 = vld [vmem:[%s6174_s1 + $0x8e4] ss:$8 sps:$4 sm:$0xff]   ;;  %v554_v6 = vcombine.high %v5701_v63, %v5701_v63 }
 0x118   :  { %2929 = vmatprep.subr.bf16.mxu0 %v4407_v5  ;;  %v4420_v39 = vld [vmem:[%s6174_s1 + $0x9f0] ss:$8 sps:$4 sm:$0xff]   ;;  %v4428_v40 = vld [vmem:[%s6174_s1 + $0x9e4] ss:$8 sps:$4 sm:$0xff]   ;;  %v4423_v41 = vld [vmem:[%s6174_s1 + $0x8e0] ss:$8 sps:$4 sm:$0xff]  }
 0x119   :  { %2969 = vmatpush1.bf16.msra.mxu1 %v4402_v25  ;;  %v4431_v44 = vld [vmem:[%s6174_s1 + $0x8d4] ss:$8 sps:$4 sm:$0xff]   ;;  %v4426_v45 = vld [vmem:[%s6174_s1 + $0x9e0] ss:$8 sps:$4 sm:$0xff]   ;;  %v4429_v49 = vld [vmem:[%s6174_s1 + $0x8d0] ss:$8 sps:$4 sm:$0xff]   ;;  %v582_v13 = vrot.slane %v554_v6, %v4823_v48 }
 0x11a   :  { %2970 = vmatprep.subr.bf16.mxu1 %v4410_v26  ;;  %v4434_v46 = vld [vmem:[%s6174_s1 + $0x9d4] ss:$8 sps:$4 sm:$0xff]   ;;  %v4437_v50 = vld [vmem:[%s6174_s1 + $0x8c4] ss:$8 sps:$4 sm:$0xff]   ;;  %v4432_v24 = vld [vmem:[%s6174_s1 + $0x9d0] ss:$8 sps:$4 sm:$0xff]  }
 0x11b   :  { %2930 = vmatpush1.bf16.msra.mxu0 %v4405_v27  ;;  %v4440_v51 = vld [vmem:[%s6174_s1 + $0x9c4] ss:$8 sps:$4 sm:$0xff]   ;;  %v4435_v52 = vld [vmem:[%s6174_s1 + $0x8c0] ss:$8 sps:$4 sm:$0xff]   ;;  %v4443_v53 = vld [vmem:[%s6174_s1 + $0x8b4] ss:$8 sps:$4 sm:$0xff]   ;;  %v586_v18 = vcombine.high %v582_v13, %v582_v13 }
 0x11c   :  { %2931 = vmatprep.subr.bf16.mxu0 %v4413_v29  ;;  %v4438_v54 = vld [vmem:[%s6174_s1 + $0x9c0] ss:$8 sps:$4 sm:$0xff]   ;;  %v4446_v55 = vld [vmem:[%s6174_s1 + $0x9b4] ss:$8 sps:$4 sm:$0xff]   ;;  %v4441_v56 = vld [vmem:[%s6174_s1 + $0x8b0] ss:$8 sps:$4 sm:$0xff]  }
 0x11d   :  { %2971 = vmatpush1.bf16.msra.mxu1 %v4408_v31  ;;  %v4449_v57 = vld [vmem:[%s6174_s1 + $0x8a4] ss:$8 sps:$4 sm:$0xff]   ;;  %v4444_v58 = vld [vmem:[%s6174_s1 + $0x9b0] ss:$8 sps:$4 sm:$0xff]   ;;  %v4447_v61 = vld [vmem:[%s6174_s1 + $0x8a0] ss:$8 sps:$4 sm:$0xff]  }
 0x11e   :  { %2972 = vmatprep.subr.bf16.mxu1 %v4416_v32  ;;  %v4452_v60 = vld [vmem:[%s6174_s1 + $0x9a4] ss:$8 sps:$4 sm:$0xff]   ;;  %v4455_v62 = vld [vmem:[%s6174_s1 + $0x894] ss:$8 sps:$4 sm:$0xff]   ;;  %v4450_v30 = vld [vmem:[%s6174_s1 + $0x9a0] ss:$8 sps:$4 sm:$0xff]  }
 0x11f   :  { %2932 = vmatpush1.bf16.msra.mxu0 %v4411_v33  ;;  %v4458_v0 = vld [vmem:[%s6174_s1 + $0x994] ss:$8 sps:$4 sm:$0xff]   ;;  %v4453_v1 = vld [vmem:[%s6174_s1 + $0x890] ss:$8 sps:$4 sm:$0xff]   ;;  %v4461_v3 = vld [vmem:[%s6174_s1 + $0x884] ss:$8 sps:$4 sm:$0xff]  }
 0x120   :  { %2933 = vmatprep.subr.bf16.mxu0 %v4419_v35  ;;  %v4456_v4 = vld [vmem:[%s6174_s1 + $0x990] ss:$8 sps:$4 sm:$0xff]   ;;  %v4464_v7 = vld [vmem:[%s6174_s1 + $0x984] ss:$8 sps:$4 sm:$0xff]   ;;  %v4459_v9 = vld [vmem:[%s6174_s1 + $0x880] ss:$8 sps:$4 sm:$0xff]  }
 0x121   :  { %2973 = vmatpush1.bf16.msra.mxu1 %v4414_v36  ;;  %v4467_v11 = vld [vmem:[%s6174_s1 + $0xa74] ss:$8 sps:$4 sm:$0xff]   ;;  %v4462_v12 = vld [vmem:[%s6174_s1 + $0x980] ss:$8 sps:$4 sm:$0xff]   ;;  %v4465_v34 = vld [vmem:[%s6174_s1 + $0xa70] ss:$8 sps:$4 sm:$0xff]  }
 0x122   :  { %2974 = vmatprep.subr.bf16.mxu1 %v4422_v28  ;;  %v4470_v14 = vld [vmem:[%s6174_s1 + $0xb74] ss:$8 sps:$4 sm:$0xff]   ;;  %v4473_v16 = vld [vmem:[%s6174_s1 + $0xa64] ss:$8 sps:$4 sm:$0xff]   ;;  %v4468_v17 = vld [vmem:[%s6174_s1 + $0xb70] ss:$8 sps:$4 sm:$0xff]  }
 0x123   :  { %2934 = vmatpush2.bf16.msra.mxu0 %v4417_v37  ;;  %v4476_v20 = vld [vmem:[%s6174_s1 + $0xb64] ss:$8 sps:$4 sm:$0xff]   ;;  %v4471_v22 = vld [vmem:[%s6174_s1 + $0xa60] ss:$8 sps:$4 sm:$0xff]   ;;  %v4479_v25 = vld [vmem:[%s6174_s1 + $0xa54] ss:$8 sps:$4 sm:$0xff]  }
 0x124   :  { %2935 = vmatprep.subr.bf16.mxu0 %v4425_v38  ;;  %v4482_v32 = vld [vmem:[%s6174_s1 + $0xb54] ss:$8 sps:$4 sm:$0xff]   ;;  %v4485_v36 = vld [vmem:[%s6174_s1 + $0xa44] ss:$8 sps:$4 sm:$0xff]   ;;  %v4480_v37 = vld [vmem:[%s6174_s1 + $0xb50] ss:$8 sps:$4 sm:$0xff]  }
 0x125   :  { %2975 = vmatpush2.bf16.msra.mxu1 %v4420_v39  ;;  %v4488_v38 = vld [vmem:[%s6174_s1 + $0xb44] ss:$8 sps:$4 sm:$0xff]   ;;  %v4507_v59 = vld [vmem:[%s6174_s1 + $0xa00] ss:$8 sps:$4 sm:$0xff]   ;;  %v4527_v6 = vld [vmem:[%s6174_s1 + $0xad4] ss:$8 sps:$4 sm:$0xff]  }
 0x126   :  { %2976 = vmatprep.subr.bf16.mxu1 %v4428_v40  ;;  %v4483_v40 = vld [vmem:[%s6174_s1 + $0xa40] ss:$8 sps:$4 sm:$0xff]   ;;  %vm2585_vm0 = vcmask 523264   ;;  %vm3490_vm5 = vcmask 74752   ;;  %s4650_s21 = smov [#allocation2]  }
 0x127   :  { %2936 = vmatpush2.bf16.msra.mxu0 %v4423_v41  ;;  %v4491_v41 = vld [vmem:[%s6174_s1 + $0xa34] ss:$8 sps:$4 sm:$0xff]   ;;  %v3944_v42 = vld [vmem:[%s6179_s6] ss:$0 sm:$0xff]  ;;  %s3510_s22 = sshll.u32 %s4650_s21, 4  ;;  %s3511_s22 = int_to_ptr.vmem [resolvable:$true] %s3510_s22 }
 0x128   :  { %2937 = vmatprep.subr.bf16.mxu0 %v4431_v44  ;;  %v4486_v44 = vld [vmem:[%s6174_s1 + $0xb40] ss:$8 sps:$4 sm:$0xff]   ;;  %s4626_s6 = scalar_lea.vmem %s3511_s22, 32  ;;  %p4631_p1 = scmp.lt.s32.totalorder %s3511_s22, %s3511_s22 }
 0x129   :  { %2977 = vmatpush2.bf16.msra.mxu1 %v4426_v45  ;;  %v4494_v45 = vld [vmem:[%s6174_s1 + $0xb34] ss:$8 sps:$4 sm:$0xff]   ;;  %p4627_p0 = scmp.ne.s32.totalorder %s3511_s22, %s4626_s6  ;;  %p4632_p2 = scmp.lt.s32.totalorder %s4626_s6, %s4626_s6 }
 0x12a   :  { %2978 = vmatprep.subr.bf16.mxu1 %v4434_v46  ;;  %v4489_v46 = vld [vmem:[%s6174_s1 + $0xa30] ss:$8 sps:$4 sm:$0xff]  }
 0x12b   :  { %2938 = vmatpush2.bf16.msra.mxu0 %v4429_v49  ;;  %v4497_v49 = vld [vmem:[%s6174_s1 + $0xa24] ss:$8 sps:$4 sm:$0xff]   ;;  %p4633_p3 = por %p4632_p2, %p4631_p1 }
 0x12c   :  { %2939 = vmatprep.subr.bf16.mxu0 %v4437_v50  ;;  %v4492_v50 = vld [vmem:[%s6174_s1 + $0xb30] ss:$8 sps:$4 sm:$0xff]  }
 0x12d   :  { %2979 = vmatpush2.bf16.msra.mxu1 %v4432_v24  ;;  %v4500_v24 = vld [vmem:[%s6174_s1 + $0xb24] ss:$8 sps:$4 sm:$0xff]   ;;  %p4634_p4 = pnand %p4633_p3, %p4627_p0 }
 0x12e   :  { %2980 = vmatprep.subr.bf16.mxu1 %v4440_v51  ;;  %v4495_v51 = vld [vmem:[%s6174_s1 + $0xa20] ss:$8 sps:$4 sm:$0xff]  }
 0x12f   :  { %2940 = vmatpush2.bf16.msra.mxu0 %v4435_v52  ;;  %v4503_v52 = vld [vmem:[%s6174_s1 + $0xa14] ss:$8 sps:$4 sm:$0xff]  }
 0x130   :  { %2941 = vmatprep.subr.bf16.mxu0 %v4443_v53  ;;  %v4498_v53 = vld [vmem:[%s6174_s1 + $0xb20] ss:$8 sps:$4 sm:$0xff]  }
 0x131   :  { %2981 = vmatpush2.bf16.msra.mxu1 %v4438_v54  ;;  %v4506_v54 = vld [vmem:[%s6174_s1 + $0xb14] ss:$8 sps:$4 sm:$0xff]  }
 0x132   :  { %2982 = vmatprep.subr.bf16.mxu1 %v4446_v55  ;;  %v4501_v55 = vld [vmem:[%s6174_s1 + $0xa10] ss:$8 sps:$4 sm:$0xff]  }
 0x133   :  { %2942 = vmatpush2.bf16.msra.mxu0 %v4441_v56  ;;  %v4509_v56 = vld [vmem:[%s6174_s1 + $0xa04] ss:$8 sps:$4 sm:$0xff]  }
 0x134   :  { %2943 = vmatprep.subr.bf16.mxu0 %v4449_v57  ;;  %v4504_v57 = vld [vmem:[%s6174_s1 + $0xb10] ss:$8 sps:$4 sm:$0xff]  }
 0x135   :  { %2983 = vmatpush2.bf16.msra.mxu1 %v4444_v58  ;;  %v4512_v58 = vld [vmem:[%s6174_s1 + $0xb04] ss:$8 sps:$4 sm:$0xff]  }
 0x136   :  { %2984 = vmatprep.subr.bf16.mxu1 %v4452_v60  ;;  %v4515_v60 = vld [vmem:[%s6174_s1 + $0xaf4] ss:$8 sps:$4 sm:$0xff]  }
 0x137   :  { %2944 = vmatpush2.bf16.msra.mxu0 %v4447_v61  ;;  %v4510_v61 = vld [vmem:[%s6174_s1 + $0xb00] ss:$8 sps:$4 sm:$0xff]  }
 0x138   :  { %2945 = vmatprep.subr.bf16.mxu0 %v4455_v62  ;;  %v4518_v62 = vld [vmem:[%s6174_s1 + $0xbf4] ss:$8 sps:$4 sm:$0xff]  }
 0x139   :  { %2985 = vmatpush2.bf16.msra.mxu1 %v4450_v30  ;;  %v4513_v30 = vld [vmem:[%s6174_s1 + $0xaf0] ss:$8 sps:$4 sm:$0xff]  }
 0x13a   :  { %2986 = vmatprep.subr.bf16.mxu1 %v4458_v0  ;;  %v4521_v0 = vld [vmem:[%s6174_s1 + $0xae4] ss:$8 sps:$4 sm:$0xff]  }
 0x13b   :  { %2946 = vmatpush2.bf16.msra.mxu0 %v4453_v1  ;;  %v4516_v1 = vld [vmem:[%s6174_s1 + $0xbf0] ss:$8 sps:$4 sm:$0xff]  }
 0x13c   :  { %2947 = vmatprep.subr.bf16.mxu0 %v4461_v3  ;;  %v4524_v3 = vld [vmem:[%s6174_s1 + $0xbe4] ss:$8 sps:$4 sm:$0xff]  }
 0x13d   :  { %2987 = vmatpush2.bf16.msra.mxu1 %v4456_v4  ;;  %v4519_v4 = vld [vmem:[%s6174_s1 + $0xae0] ss:$8 sps:$4 sm:$0xff]  }
 0x13e   :  { %2988 = vmatprep.subr.bf16.mxu1 %v4464_v7  ;;  %v4522_v7 = vld [vmem:[%s6174_s1 + $0xbe0] ss:$8 sps:$4 sm:$0xff]  }
 0x13f   :  { %2948 = vmatpush2.bf16.msra.mxu0 %v4459_v9  ;;  %v4530_v9 = vld [vmem:[%s6174_s1 + $0xbd4] ss:$8 sps:$4 sm:$0xff]  }
 0x140   :  { %2999 = vmatprep.subr.bf16.mxu0 %v4467_v11  ;;  %v4533_v11 = vld [vmem:[%s6174_s1 + $0xac4] ss:$8 sps:$4 sm:$0xff]  }
 0x141   :  { %2989 = vmatpush2.bf16.msra.mxu1 %v4462_v12  ;;  %v4528_v12 = vld [vmem:[%s6174_s1 + $0xbd0] ss:$8 sps:$4 sm:$0xff]  }
 0x142   :  { %v2705_v19 = vpop.f32.mrf.mxu0  ;;  %2950 = vmatmul.mubr.bf16.vlgmr.msra.gmra.mxu0 %v561_v10  ;;  %3040 = vmatprep.subr.bf16.mxu1 %v4470_v14  ;;  %v4525_v10 = vld [vmem:[%s6174_s1 + $0xad0] ss:$8 sps:$4 sm:$0xff]   ;;  %v4531_v14 = vld [vmem:[%s6174_s1 + $0xac0] ss:$8 sps:$4 sm:$0xff]  }
 0x143   :  { %v2706_v21 = vadd.f32 %v2705_v19, %v5550_v2  ;;  %3000 = vmatpush1.bf16.msra.mxu0 %v4465_v34  ;;  %3031 = vmatprep.mubr.bf16.mxu0 %v582_v13  ;;  %v4474_v2 = vld [vmem:[%s6174_s1 + $0xb60] ss:$8 sps:$4 sm:$0xff]   ;;  %v4536_v13 = vld [vmem:[%s6174_s1 + $0xbc4] ss:$8 sps:$4 sm:$0xff]   ;;  %v4539_v34 = vld [vmem:[%s6174_s1 + $0xab4] ss:$8 sps:$4 sm:$0xff]  }
 0x144   :  { %v2707_v23 = vpop.f32.mrf.mxu0  ;;  %v2746_v5 = vpop.f32.mrf.mxu1  ;;  %2991 = vmatmul.mubr.bf16.vlgmr.msra.gmra.mxu1 %v583_v15  ;;  %3001 = vmatprep.subr.bf16.mxu0 %v4473_v16  ;;  %v4534_v15 = vld [vmem:[%s6174_s1 + $0xbc0] ss:$8 sps:$4 sm:$0xff]   ;;  %v4542_v16 = vld [vmem:[%s6174_s1 + $0xbb4] ss:$8 sps:$4 sm:$0xff]   ;;  %v4540_v19 = vld [vmem:[%s6174_s1 + $0xbb0] ss:$8 sps:$4 sm:$0xff]  }
 0x145   :  { %v2708_v26 = vadd.f32 %v2707_v23, %v5558_v8  ;;  %v5755_v27 = vadd.f32 %v2746_v5, %v2706_v21  ;;  %3041 = vmatpush1.bf16.msra.mxu1 %v4468_v17  ;;  %3072 = vmatprep.mubr.bf16.mxu1 %v586_v18  ;;  %v4477_v8 = vld [vmem:[%s6174_s1 + $0xa50] ss:$8 sps:$4 sm:$0xff]   ;;  %v4545_v18 = vld [vmem:[%s6174_s1 + $0xaa4] ss:$8 sps:$4 sm:$0xff]   ;;  %v4543_v21 = vld [vmem:[%s6174_s1 + $0xaa0] ss:$8 sps:$4 sm:$0xff]  }
 0x146   :  { %v2709_v29 = vpop.f32.mrf.mxu0  ;;  %v2748_v31 = vpop.f32.mrf.mxu1  ;;  %3042 = vmatprep.subr.bf16.mxu1 %v4476_v20  ;;  %v4537_v17 = vld [vmem:[%s6174_s1 + $0xab0] ss:$8 sps:$4 sm:$0xff]   ;;  %v4548_v20 = vld [vmem:[%s6174_s1 + $0xba4] ss:$8 sps:$4 sm:$0xff]   ;;  %v4546_v23 = vld [vmem:[%s6174_s1 + $0xba0] ss:$8 sps:$4 sm:$0xff]  }
 0x147   :  { %v5763_v33 = vadd.f32 %v2748_v31, %v2708_v26  ;;  %3002 = vmatpush1.bf16.msra.mxu0 %v4471_v22  ;;  %v4551_v22 = vld [vmem:[%s6174_s1 + $0xa94] ss:$8 sps:$4 sm:$0xff]   ;;  %v4557_v26 = vld [vmem:[%s6174_s1 + $0xa84] ss:$8 sps:$4 sm:$0xff]   ;;  %v4555_v31 = vld [vmem:[%s6174_s1 + $0xa80] ss:$8 sps:$4 sm:$0xff]  }
 0x148   :  { %v2710_v35 = vpop.f32.mrf.mxu0  ;;  %3003 = vmatprep.subr.bf16.mxu0 %v4479_v25  ;;  %v2750_v28 = vpop.f32.mrf.mxu1  ;;  %v4554_v5 = vld [vmem:[%s6174_s1 + $0xb94] ss:$8 sps:$4 sm:$0xff]   ;;  %v4549_v25 = vld [vmem:[%s6174_s1 + $0xa90] ss:$8 sps:$4 sm:$0xff]   ;;  %v4560_v29 = vld [vmem:[%s6174_s1 + $0xb84] ss:$8 sps:$4 sm:$0xff]  }
 0x149   :  { %3043 = vmatpush1.bf16.msra.mxu1 %v4474_v2  ;;  %v4552_v2 = vld [vmem:[%s6174_s1 + $0xb90] ss:$8 sps:$4 sm:$0xff]   ;;  %v4558_v35 = vld [vmem:[%s6174_s1 + $0xb80] ss:$8 sps:$4 sm:$0xff]  }
 0x14a   :  { %3044 = vmatprep.subr.bf16.mxu1 %v4482_v32  ;;  %v2751_v39 = vpop.f32.mrf.mxu1  ;;  %v568_v32 = vrot.slane %v5701_v63, %v4823_v48  ;;  %v4567_v63 = vld [vmem:[%s6174_s1 + $0xc24] ss:$8 sps:$4 sm:$0xff]  }
 0x14b   :  { %3004 = vmatpush1.bf16.msra.mxu0 %v4477_v8  ;;  %v4564_v8 = vld [vmem:[%s6174_s1 + $0xc34] ss:$8 sps:$4 sm:$0xff]   ;;  %v4565_v39 = vld [vmem:[%s6174_s1 + $0xc20] ss:$8 sps:$4 sm:$0xff]  }
 0x14c   :  { %3005 = vmatprep.subr.bf16.mxu0 %v4485_v36  ;;  %v4562_v36 = vld [vmem:[%s6174_s1 + $0xc30] ss:$8 sps:$4 sm:$0xff]   ;;  %v584_v28 = vcombine.high %v568_v32, %v568_v32 }
 0x14d   :  { %3045 = vmatpush1.bf16.msra.mxu1 %v4480_v37 }
 0x14e   :  { %3046 = vmatprep.subr.bf16.mxu1 %v4488_v38 }
 0x14f   :  { %3006 = vmatpush1.bf16.msra.mxu0 %v4483_v40  ;;  %v4649_v40 = vmov 0  }
 0x150   :  { %3007 = vmatprep.subr.bf16.mxu0 %v4491_v41 }
 0x151   :  { %3047 = vmatpush1.bf16.msra.mxu1 %v4486_v44 }
 0x152   :  { %3048 = vmatprep.subr.bf16.mxu1 %v4494_v45  ;;  %v4570_v45 = vld [vmem:[%s6174_s1 + $0xc14] ss:$8 sps:$4 sm:$0xff]  }
 0x153   :  { %3008 = vmatpush1.bf16.msra.mxu0 %v4489_v46 }
 0x154   :  { %3009 = vmatprep.subr.bf16.mxu0 %v4497_v49 }
 0x155   :  { %3049 = vmatpush1.bf16.msra.mxu1 %v4492_v50 }
 0x156   :  { %3050 = vmatprep.subr.bf16.mxu1 %v4500_v24 }
 0x157   :  { %3010 = vmatpush1.bf16.msra.mxu0 %v4495_v51  ;;  %v4568_v51 = vld [vmem:[%s6174_s1 + $0xc10] ss:$8 sps:$4 sm:$0xff]  }
 0x158   :  { %3011 = vmatprep.subr.bf16.mxu0 %v4503_v52 }
 0x159   :  { %3051 = vmatpush1.bf16.msra.mxu1 %v4498_v53  ;;  %v4573_v53 = vld [vmem:[%s6174_s1 + $0xc04] ss:$8 sps:$4 sm:$0xff]  }
 0x15a   :  { %3052 = vmatprep.subr.bf16.mxu1 %v4506_v54 }
 0x15b   :  { %3012 = vmatpush1.bf16.msra.mxu0 %v4501_v55 }
 0x15c   :  { %3013 = vmatprep.subr.bf16.mxu0 %v4509_v56  ;;  %v4574_v56 = vld [vmem:[%s6176_s3 + $0x70] ss:$8 sps:$4 sm:$0xff]  }
 0x15d   :  { %3053 = vmatpush1.bf16.msra.mxu1 %v4504_v57  ;;  %v4576_v57 = vld [vmem:[%s6176_s3 + $0x74] ss:$8 sps:$4 sm:$0xff]  }
 0x15e   :  { %3054 = vmatprep.subr.bf16.mxu1 %v4512_v58  ;;  %v3518_v58 = vld.sshfl [vmem:[%s6173_s0 + $0x18] sm:$0x1 pattern:$0x75316420] }
 0x15f   :  { %3014 = vmatpush1.bf16.msra.mxu0 %v4507_v59  ;;  %v4579_v59 = vld [vmem:[%s6176_s3 + $0x64] ss:$8 sps:$4 sm:$0xff]  }
 0x160   :  { %3015 = vmatprep.subr.bf16.mxu0 %v4515_v60  ;;  %v4577_v60 = vld [vmem:[%s6176_s3 + $0x60] ss:$8 sps:$4 sm:$0xff]  }
 0x161   :  { %3055 = vmatpush1.bf16.msra.mxu1 %v4510_v61  ;;  %v600_v61 = vrot.slane %v3518_v58, %v4823_v48  ;;  %v4583_v48 = vld [vmem:[%s6176_s3 + $0x40] ss:$8 sps:$4 sm:$0xff]   ;;  %v3388_v58 = vld [vmem:[%s6178_s5 + $0x38] sm:$0xff] }
 0x162   :  { %3056 = vmatprep.subr.bf16.mxu1 %v4518_v62  ;;  %v4582_v62 = vld [vmem:[%s6176_s3 + $0x54] ss:$8 sps:$4 sm:$0xff]  }
 0x163   :  { %3016 = vmatpush2.bf16.msra.mxu0 %v4513_v30  ;;  %v4580_v30 = vld [vmem:[%s6176_s3 + $0x50] ss:$8 sps:$4 sm:$0xff]  }
 0x164   :  { %3017 = vmatprep.subr.bf16.mxu0 %v4521_v0  ;;  %v4585_v0 = vld [vmem:[%s6176_s3 + $0x44] ss:$8 sps:$4 sm:$0xff]  }
 0x165   :  { %3057 = vmatpush2.bf16.msra.mxu1 %v4516_v1  ;;  %v4588_v1 = vld [vmem:[%s6176_s3 + $0x34] ss:$8 sps:$4 sm:$0xff]  }
 0x166   :  { %3058 = vmatprep.subr.bf16.mxu1 %v4524_v3  ;;  %v4586_v3 = vld [vmem:[%s6176_s3 + $0x30] ss:$8 sps:$4 sm:$0xff]  }
 0x167   :  { %3018 = vmatpush2.bf16.msra.mxu0 %v4519_v4  ;;  %v4591_v4 = vld [vmem:[%s6176_s3 + $0x24] ss:$8 sps:$4 sm:$0xff]  }
 0x168   :  { %3019 = vmatprep.subr.bf16.mxu0 %v4527_v6  ;;  %v4589_v6 = vld [vmem:[%s6176_s3 + $0x20] ss:$8 sps:$4 sm:$0xff]  }
 0x169   :  { %3059 = vmatpush2.bf16.msra.mxu1 %v4522_v7  ;;  %v4594_v7 = vld [vmem:[%s6176_s3 + $0x14] ss:$8 sps:$4 sm:$0xff]  }
 0x16a   :  { %3060 = vmatprep.subr.bf16.mxu1 %v4530_v9  ;;  %v4592_v9 = vld [vmem:[%s6176_s3 + $0x10] ss:$8 sps:$4 sm:$0xff]  }
 0x16b   :  { %3020 = vmatpush2.bf16.msra.mxu0 %v4525_v10  ;;  %v4597_v10 = vld [vmem:[%s6176_s3 + $0x4] ss:$8 sps:$4 sm:$0xff]  }
 0x16c   :  { %3021 = vmatprep.subr.bf16.mxu0 %v4533_v11  ;;  %v4595_v11 = vld [vmem:[%s6176_s3] ss:$8 sps:$4 sm:$0xff]  }
 0x16d   :  { %3061 = vmatpush2.bf16.msra.mxu1 %v4528_v12  ;;  %v4600_v12 = vld [vmem:[%s6176_s3 + $0xf4] ss:$8 sps:$4 sm:$0xff]  }
 0x16e   :  { %3062 = vmatprep.subr.bf16.mxu1 %v4536_v13  ;;  %v4598_v13 = vld [vmem:[%s6176_s3 + $0xf0] ss:$8 sps:$4 sm:$0xff]  }
 0x16f   :  { %3022 = vmatpush2.bf16.msra.mxu0 %v4531_v14  ;;  %v4603_v14 = vld [vmem:[%s6176_s3 + $0xe4] ss:$8 sps:$4 sm:$0xff]  }
 0x170   :  { %3023 = vmatprep.subr.bf16.mxu0 %v4539_v34  ;;  %v4601_v34 = vld [vmem:[%s6176_s3 + $0xe0] ss:$8 sps:$4 sm:$0xff]  }
 0x171   :  { %3063 = vmatpush2.bf16.msra.mxu1 %v4534_v15 }
 0x172   :  { %3064 = vmatprep.subr.bf16.mxu1 %v4542_v16 }
 0x173   :  { %3024 = vmatpush2.bf16.msra.mxu0 %v4537_v17  ;;  %v4606_v17 = vld [vmem:[%s6176_s3 + $0xd4] ss:$8 sps:$4 sm:$0xff]  }
 0x174   :  { %3025 = vmatprep.subr.bf16.mxu0 %v4545_v18 }
 0x175   :  { %3065 = vmatpush2.bf16.msra.mxu1 %v4540_v19 }
 0x176   :  { %3066 = vmatprep.subr.bf16.mxu1 %v4548_v20  ;;  %v4604_v20 = vld [vmem:[%s6176_s3 + $0xd0] ss:$8 sps:$4 sm:$0xff]  }
 0x177   :  { %3026 = vmatpush2.bf16.msra.mxu0 %v4543_v21 }
 0x178   :  { %3027 = vmatprep.subr.bf16.mxu0 %v4551_v22 }
 0x179   :  { %3067 = vmatpush2.bf16.msra.mxu1 %v4546_v23 }
 0x17a   :  { %3068 = vmatprep.subr.bf16.mxu1 %v4554_v5 }
 0x17b   :  { %3028 = vmatpush2.bf16.msra.mxu0 %v4549_v25 }
 0x17c   :  { %3029 = vmatprep.subr.bf16.mxu0 %v4557_v26  ;;  %v4609_v26 = vld [vmem:[%s6176_s3 + $0xc4] ss:$8 sps:$4 sm:$0xff]  }
 0x17d   :  { %3069 = vmatpush2.bf16.msra.mxu1 %v4552_v2 }
 0x17e   :  { %3070 = vmatprep.subr.bf16.mxu1 %v4560_v29 }
 0x17f   :  { %3030 = vmatpush2.bf16.msra.mxu0 %v4555_v31  ;;  %v4607_v31 = vld [vmem:[%s6176_s3 + $0xc0] ss:$8 sps:$4 sm:$0xff]  }
 0x180   :  { %3089 = vmatprep.subr.bf16.mxu0 %v4564_v8 }
 0x181   :  { %3071 = vmatpush2.bf16.msra.mxu1 %v4558_v35  ;;  %v4610_v35 = vld [vmem:[%s6176_s3 + $0xb0] ss:$8 sps:$4 sm:$0xff]  }
 0x182   :  { %v2787_v37 = vpop.f32.mrf.mxu0  ;;  %3032 = vmatmul.mubr.bf16.vlgmr.msra.gmra.mxu0 %v568_v32  ;;  %3334 = vmatprep.subr.bf16.mxu1 %v4576_v57  ;;  %v4612_v32 = vld [vmem:[%s6176_s3 + $0xb4] ss:$8 sps:$4 sm:$0xff]  }
 0x183   :  { %v2788_v38 = vadd.f32 %v2787_v37, %v5755_v27  ;;  %3090 = vmatpush1.bf16.msra.mxu0 %v4562_v36  ;;  %3113 = vmatprep.mubr.bf16.mxu0 %v4649_v40  ;;  %v4615_v36 = vld [vmem:[%s6176_s3 + $0xa4] ss:$8 sps:$4 sm:$0xff]   ;;  %v4616_v37 = vld [vmem:[%s6176_s3 + $0x90] ss:$8 sps:$4 sm:$0xff]  }
 0x184   :  { %v2789_v41 = vpop.f32.mrf.mxu0  ;;  %v2828_v44 = vpop.f32.mrf.mxu1  ;;  %3073 = vmatmul.mubr.bf16.vlgmr.msra.gmra.mxu1 %v584_v28  ;;  %3091 = vmatprep.subr.bf16.mxu0 %v4567_v63  ;;  %v4613_v28 = vld [vmem:[%s6176_s3 + $0xa0] ss:$8 sps:$4 sm:$0xff]   ;;  %v4618_v63 = vld [vmem:[%s6176_s3 + $0x94] ss:$8 sps:$4 sm:$0xff]  }
 0x185   :  { %v2790_v46 = vadd.f32 %v2789_v41, %v5763_v33  ;;  %v2829_v49 = vadd.f32 %v2828_v44, %v2788_v38  ;;  %v4571_v33 = vld [vmem:[%s6174_s1 + $0xc00] ss:$8 sps:$4 sm:$0xff]   ;;  %3335 = vmatpush1.bf16.msra.mxu1 %v4574_v56  ;;  %v4621_v38 = vld [vmem:[%s6176_s3 + $0x84] ss:$8 sps:$4 sm:$0xff]   ;;  %v3412_v40 = vld [vmem:[%s6178_s5 + $0xf8] sm:$0xff] }
 0x186   :  { %v2791_v50 = vpop.f32.mrf.mxu0  ;;  %v2830_v27 = vpop.f32.mrf.mxu1  ;;  %3336 = vmatprep.subr.bf16.mxu1 %v4579_v59  ;;  %v3396_v41 = vld [vmem:[%s6178_s5 + $0x78] sm:$0xff]  ;;  %v3411_v44 = vld [vmem:[%s6178_s5 + $0xf0] sm:$0xff]  ;;  %v3389_v56 = vld [vmem:[%s6178_s5 + $0x40] sm:$0xff] }
 0x187   :  { %v2831_v24 = vadd.f32 %v2830_v27, %v2790_v46  ;;  %3092 = vmatpush1.bf16.msra.mxu0 %v4565_v39  ;;  %v4619_v39 = vld [vmem:[%s6176_s3 + $0x80] ss:$8 sps:$4 sm:$0xff]   ;;  %v3404_v57 = vld [vmem:[%s6178_s5 + $0xb8] sm:$0xff]  ;;  %v3403_v59 = vld [vmem:[%s6178_s5 + $0xb0] sm:$0xff] }
 0x188   :  { %v2792_v52 = vpop.f32.mrf.mxu0  ;;  %3093 = vmatprep.subr.bf16.mxu0 %v4570_v45  ;;  %v2832_v54 = vpop.f32.mrf.mxu1  ;;  %v3395_v45 = vld [vmem:[%s6178_s5 + $0x70] sm:$0xff]  ;;  %v3410_v46 = vld [vmem:[%s6178_s5 + $0xe8] sm:$0xff]  ;;  %v3409_v50 = vld [vmem:[%s6178_s5 + $0xe0] sm:$0xff] }
 0x189   :  { %3337 = vmatpush1.bf16.msra.mxu1 %v4577_v60  ;;  %v3393_v27 = vld [vmem:[%s6178_s5 + $0x60] sm:$0xff]  ;;  %v3407_v52 = vld [vmem:[%s6178_s5 + $0xd0] sm:$0xff]  ;;  %v3406_v54 = vld [vmem:[%s6178_s5 + $0xc8] sm:$0xff] }
 0x18a   :  { %v2833_v55 = vpop.f32.mrf.mxu1  ;;  %3338 = vmatprep.subr.bf16.mxu1 %v4582_v62  ;;  %v3387_v60 = vld [vmem:[%s6178_s5 + $0x30] sm:$0xff]  ;;  %v3386_v62 = vld [vmem:[%s6178_s5 + $0x28] sm:$0xff] }
 0x18b   :  { %3094 = vmatpush1.bf16.msra.mxu0 %v4568_v51  ;;  %v3392_v51 = vld [vmem:[%s6178_s5 + $0x58] sm:$0xff]  ;;  %v3405_v55 = vld [vmem:[%s6178_s5 + $0xc0] sm:$0xff] }
 0x18c   :  { %3095 = vmatprep.subr.bf16.mxu0 %v4573_v53  ;;  %v3391_v53 = vld [vmem:[%s6178_s5 + $0x50] sm:$0xff] }
 0x18d   :  { %3339 = vmatpush1.bf16.msra.mxu1 %v4580_v30  ;;  %v3401_v30 = vld [vmem:[%s6178_s5 + $0xa0] sm:$0xff] }
 0x18e   :  { %3340 = vmatprep.subr.bf16.mxu1 %v4585_v0 }
 0x18f   :  { %3096 = vmatpush1.bf16.msra.mxu0 %v4571_v33  ;;  %v3390_v33 = vld [vmem:[%s6178_s5 + $0x48] sm:$0xff] }
 0x190   :  { %3945 = vmatprep.subr.mxu0 %v3412_v40  ;;  %v3384_v40 = vld [vmem:[%s6178_s5 + $0x18] sm:$0xff] }
 0x191   :  { %3341 = vmatpush1.bf16.msra.mxu1 %v4583_v48 }
 0x192   :  { %3911 = vmatmul.mubr.msk.bf16.vlgmr.msra.gmra.mxu0 %vm2585_vm0, %v600_v61  ;;  %3342 = vmatprep.subr.bf16.mxu1 %v4588_v1  ;;  %v3402_v61 = vld [vmem:[%s6178_s5 + $0xa8] sm:$0xff] }
 0x193   :  { %3946 = vmatpush3.msra.mxu0 %v3396_v41  ;;  %v3399_v41 = vld [vmem:[%s6178_s5 + $0x90] sm:$0xff] }
 0x194   :  { %3947 = vmatprep.subr.mxu0 %v3411_v44  ;;  %v3383_v44 = vld [vmem:[%s6178_s5 + $0x10] sm:$0xff] }
 0x195   :  { %3343 = vmatpush1.bf16.msra.mxu1 %v4586_v3  ;;  %3948 = vmatpush3.msra.mxu0 %v3395_v45  ;;  %v3398_v45 = vld [vmem:[%s6178_s5 + $0x88] sm:$0xff] }
 0x196   :  { %3344 = vmatprep.subr.bf16.mxu1 %v4591_v4  ;;  %3949 = vmatprep.subr.mxu0 %v3410_v46  ;;  %v3382_v46 = vld [vmem:[%s6178_s5 + $0x8] sm:$0xff] }
 0x199   :  { %3345 = vmatpush1.bf16.msra.mxu1 %v4589_v6 }
 0x19a   :  { %3346 = vmatprep.subr.bf16.mxu1 %v4594_v7 }
 0x19d   :  { %3347 = vmatpush1.bf16.msra.mxu1 %v4592_v9 }
 0x19e   :  { %3348 = vmatprep.subr.bf16.mxu1 %v4597_v10 }
 0x1a1   :  { %3349 = vmatpush1.bf16.msra.mxu1 %v4595_v11 }
 0x1a2   :  { %3350 = vmatprep.subr.bf16.mxu1 %v4600_v12 }
 0x1a5   :  { %3351 = vmatpush2.bf16.msra.mxu1 %v4598_v13 }
 0x1a6   :  { %3352 = vmatprep.subr.bf16.mxu1 %v4603_v14 }
 0x1a9   :  { %3353 = vmatpush2.bf16.msra.mxu1 %v4601_v34 }
 0x1aa   :  { %3354 = vmatprep.subr.bf16.mxu1 %v4606_v17 }
 0x1ad   :  { %3355 = vmatpush2.bf16.msra.mxu1 %v4604_v20 }
 0x1ae   :  { %3356 = vmatprep.subr.bf16.mxu1 %v4609_v26 }
 0x1b1   :  { %3357 = vmatpush2.bf16.msra.mxu1 %v4607_v31 }
 0x1b2   :  { %3358 = vmatprep.subr.bf16.mxu1 %v4612_v32 }
 0x1b5   :  { %3359 = vmatpush2.bf16.msra.mxu1 %v4610_v35 }
 0x1b6   :  { %3360 = vmatprep.subr.bf16.mxu1 %v4615_v36 }
 0x1b9   :  { %3361 = vmatpush2.bf16.msra.mxu1 %v4613_v28 }
 0x1ba   :  { %3362 = vmatprep.subr.bf16.mxu1 %v4618_v63 }
 0x1bd   :  { %3363 = vmatpush2.bf16.msra.mxu1 %v4616_v37 }
 0x1be   :  { %3364 = vmatprep.subr.bf16.mxu1 %v4621_v38  ;;  %v3385_v38 = vld [vmem:[%s6178_s5 + $0x20] sm:$0xff] }
 0x1c1   :  { %3365 = vmatpush2.bf16.msra.mxu1 %v4619_v39  ;;  %v3400_v39 = vld [vmem:[%s6178_s5 + $0x98] sm:$0xff] }
 0x1c2   :  { %v2869_v15 = vpop.f32.mrf.mxu0 }
 0x1c3   :  { %v2870_v16 = vadd.f32 %v2869_v15, %v2829_v49  ;;  %v3394_v49 = vld [vmem:[%s6178_s5 + $0x68] sm:$0xff] }
 0x1c4   :  { %v2871_v18 = vpop.f32.mrf.mxu0  ;;  %v2910_v19 = vpop.f32.mrf.mxu1  ;;  %3950 = vmatpush3.msra.mxu0 %v3394_v49  ;;  %v3397_v49 = vld [vmem:[%s6178_s5 + $0x80] sm:$0xff] }
 0x1c5   :  { %v2872_v21 = vadd.f32 %v2871_v18, %v2831_v24  ;;  %v6025_v22 = vadd.f32 %v2910_v19, %v2870_v16  ;;  %v3408_v24 = vld [vmem:[%s6178_s5 + $0xd8] sm:$0xff]  ;;  %3951 = vmatprep.subr.mxu0 %v3409_v50  ;;  %v3381_v50 = vld [vmem:[%s6178_s5] sm:$0xff] }
 0x1c6   :  { %v2873_v23 = vpop.f32.mrf.mxu0  ;;  %v2912_v5 = vpop.f32.mrf.mxu1  ;;  %3952 = vmatpush3.msra.mxu0 %v3393_v27  ;;  %v3162_v27 = vld [vmem:[%s6177_s4] sm:$0x3] }
 0x1c7   :  { %v6027_v25 = vadd.f32 %v2912_v5, %v2872_v21  ;;  %3953 = vmatprep.subr.mxu0 %v3408_v24  ;;  %v3167_v24 = vrot.slane %v3162_v27, %v428_v43 }
 0x1c8   :  { %v2874_v2 = vpop.f32.mrf.mxu0  ;;  %v2914_v29 = vpop.f32.mrf.mxu1  ;;  %3954 = vmatpush3.msra.mxu0 %v3392_v51  ;;  %v3171_v51 = vrot.slane %v3162_v27, %v432_v47 }
 0x1c9   :  { %3955 = vmatprep.subr.mxu0 %v3407_v52 }
 0x1ca   :  { %v2915_v8 = vpop.f32.mrf.mxu1  ;;  %3956 = vmatpush3.msra.mxu0 %v3391_v53 }
 0x1cb   :  { %3957 = vmatprep.subr.mxu0 %v3406_v54 }
 0x1cc   :  { %3958 = vmatpush3.msra.mxu0 %v3390_v33 }
 0x1cd   :  { %3959 = vmatprep.subr.mxu0 %v3405_v55 }
 0x1ce   :  { %3960 = vmatpush3.msra.mxu0 %v3389_v56 }
 0x1cf   :  { %3961 = vmatprep.subr.mxu0 %v3404_v57 }
 0x1d0   :  { %3962 = vmatpush3.msra.mxu0 %v3388_v58 }
 0x1d1   :  { %3963 = vmatprep.subr.mxu0 %v3403_v59 }
 0x1d2   :  { %3964 = vmatpush3.msra.mxu0 %v3387_v60 }
 0x1d3   :  { %3965 = vmatprep.subr.mxu0 %v3402_v61 }
 0x1d4   :  { %3966 = vmatpush3.msra.mxu0 %v3386_v62 }
 0x1d5   :  { %3967 = vmatprep.subr.mxu0 %v3401_v30 }
 0x1d6   :  { %3968 = vmatpush3.msra.mxu0 %v3385_v38 }
 0x1d7   :  { %3969 = vmatprep.subr.mxu0 %v3400_v39 }
 0x1d8   :  { %3970 = vmatpush3.msra.mxu0 %v3384_v40 }
 0x1d9   :  { %3971 = vmatprep.subr.mxu0 %v3399_v41 }
 0x1da   :  { %3972 = vmatpush3.msra.mxu0 %v3383_v44 }
 0x1db   :  { %3973 = vmatprep.subr.mxu0 %v3398_v45 }
 0x1dc   :  { %3974 = vmatpush3.msra.mxu0 %v3382_v46 }
 0x1dd   :  { %3975 = vmatprep.subr.mxu0 %v3397_v49 }
 0x1de   :  { %3976 = vmatpush3.msra.mxu0 %v3381_v50 }
 0x202   :  { %v2951_v0 = vpop.f32.mrf.mxu0 }
 0x203   :  { %v2952_v48 = vadd.f32 %v2951_v0, %v6025_v22 }
 0x204   :  { %v2953_v1 = vpop.f32.mrf.mxu0  ;;  %v2992_v3 = vpop.f32.mrf.mxu1 }
 0x205   :  { %v2954_v4 = vadd.f32 %v2953_v1, %v6027_v25  ;;  %v2993_v6 = vadd.f32 %v2992_v3, %v2952_v48 }
 0x206   :  { %v2955_v7 = vpop.f32.mrf.mxu0  ;;  %v2994_v9 = vpop.f32.mrf.mxu1 }
 0x207   :  { %v2995_v10 = vadd.f32 %v2994_v9, %v2954_v4 }
 0x208   :  { %v2956_v11 = vpop.f32.mrf.mxu0  ;;  %v2996_v12 = vpop.f32.mrf.mxu1 }
 0x20a   :  { %v2997_v13 = vpop.f32.mrf.mxu1 }
 0x242   :  { %v3033_v14 = vpop.f32.mrf.mxu0 }
 0x243   :  { %v3034_v21 = vadd.f32 %v3033_v14, %v2993_v6 }
 0x244   :  { %v3035_v34 = vpop.f32.mrf.mxu0  ;;  %v3074_v15 = vpop.f32.mrf.mxu1 }
 0x245   :  { %v3036_v22 = vadd.f32 %v3035_v34, %v2995_v10  ;;  %v3075_v23 = vadd.f32 %v3074_v15, %v3034_v21 }
 0x246   :  { %v3037_v16 = vpop.f32.mrf.mxu0  ;;  %v3076_v17 = vpop.f32.mrf.mxu1 }
 0x247   :  { %v3077_v25 = vadd.f32 %v3076_v17, %v3036_v22 }
 0x248   :  { %v3038_v18 = vpop.f32.mrf.mxu0  ;;  %v3078_v19 = vpop.f32.mrf.mxu1 }
 0x24a   :  { %v3079_v20 = vpop.f32.mrf.mxu1 }
 0x252   :  { %v3115_v5 = vpop.f32.mrf.mxu0 }
 0x253   :  { %v3116_v26 = vadd.f32 %v3115_v5, %v3075_v23 }
 0x254   :  { %v3117_v2 = vpop.f32.mrf.mxu0 }
 0x255   :  { %vm3122_vm1 = vcmp.ge.f32.partialorder %v3116_v26, 0.0  ;;  %v3124_v29 = vmul.f32 0.01, %v3116_v26  ;;  %v3118_v31 = vadd.f32 %v3117_v2, %v3077_v25 }
 0x256   :  { %v3119_v32 = vpop.f32.mrf.mxu0 }
 0x257   :  { %vm3123_vm2 = vcmp.ge.f32.partialorder %v3118_v31, 0.0  ;;  %v3125_v8 = vmul.f32 0.01, %v3118_v31  ;;  %v3126_v35 = vsel %vm3122_vm1, %v3116_v26, %v3124_v29 }
 0x258   :  { %v3120_v36 = vpop.f32.mrf.mxu0  ;;  %v3128_v37 = vpack.c.bf16 %v3126_v35, %v3126_v35 }
 0x259   :  { %v3127_v28 = vsel %vm3123_vm2, %v3118_v31, %v3125_v8 }
 0x25a   :  { %v3129_v63 = vpack.c.bf16 %v3127_v28, %v3127_v28 }
 0x25c   :  { %3366 = vmatprep.mubr.bf16.mxu1 %v3129_v63 }
 0x25d   :  { %3367 = vmatmul.mubr.bf16.vlgmr.msra.gmra.mxu1 %v3128_v37 }
 0x31d   :  { %v3368_v52 = vpop.f32.mrf.mxu1 }
 0x31e   :  { %v3369_v53 = vadd.f32 %v3368_v52, %v3167_v24 }
 0x31f   :  { %v3370_v54 = vpop.f32.mrf.mxu1 }
 0x320   :  { %v3371_v33 = vadd.f32 %v3370_v54, %v3171_v51  ;;  %v3377_v55 = vmul.f32 0.01, %v3369_v53  ;;  %vm3375_vm3 = vcmp.ge.f32.partialorder %v3369_v53, 0.0 }
 0x321   :  { %v3372_v56 = vpop.f32.mrf.mxu1 }
 0x322   :  { %v3378_v57 = vmul.f32 0.01, %v3371_v33  ;;  %vm3376_vm4 = vcmp.ge.f32.partialorder %v3371_v33, 0.0  ;;  %v3379_v60 = vsel %vm3375_vm3, %v3369_v53, %v3377_v55 }
 0x323   :  { %v3373_v58 = vpop.f32.mrf.mxu1 }
 0x324   :  { %v3380_v59 = vsel %vm3376_vm4, %v3371_v33, %v3378_v57 }
 0x325   :  { %3484 = vmatprep.mubr.f32.mxu0 %v3380_v59 }
 0x326   :  { %3485 = vmatmul.mubr.f32.vlgmr.msra.gmra.mxu0 %v3379_v60 }
 0x3e6   :  { %v3977_v61 = vpop.f32.mrf.mxu0 }
 0x3e8   :  { %v3978_v62 = vpop.f32.mrf.mxu0 }
 0x3e9   :  { %v3979_v43 = vadd.f32 %v3978_v62, %v3977_v61 }
 0x3eb   :  { %v3487_v47 = vadd.f32 %v3979_v43, %v3944_v42 }
 0x3ed   :  { %v3491_v30 = vsel %vm3490_vm5, %v3487_v47, -inf }
 0x3ee   :  { %3492 = vmax.xlane.f32.xlu0 %v3491_v30 }
 0x477   :  { %v3493_v0 = vpop.xlane.xlu0 %3492 }
 0x478   :  { %v3494_v48 = vsub.f32 %v3487_v47, %v3493_v0 }
 0x47a   :  { %v3495_v1 = vmul.f32 1.442695, %v3494_v48 }
 0x47c   :  { %4622 = vpow2.f32 %v3495_v1 }
 0x489   :  { %v4623_v3 = vpop.eup %4622 }
 0x48a   :  { %v3497_v4 = vsel %vm3490_vm5, %v4623_v3, 0.0 }
 0x48b   :  { %3498 = vadd.xlane.f32.xlu0 %v3497_v4 }
 0x514   :  { %v3499_v6 = vpop.xlane.xlu0 %3498 }
 0x515   :  { %4624 = vlog2.f32 %v3499_v6 }
 0x522   :  { %v4625_v7 = vpop.eup %4624 }
 0x523   :  { %v3501_v9 = vmul.f32 0.6931472, %v4625_v7 }
 0x525   :  { %v3502_v10 = vsub.f32 %v3494_v48, %v3501_v9 }
 0x527   :  { %3503 = vst.msk [vmem:[#allocation2] sm:$0x3] %vm3490_vm5, %v3502_v10 }
 0x528   :  { %4637 = shalt.err (!%p4634_p4)
}
 0x529   :  { %3513 = dma.vmem_to_hbm [thread:$0]  %s3511_s22, 32, %s6180_s7, [#allocation3]  }
 0x52a   :  { %4646 = dma.done.wait [#allocation3], 32  }
 0x52b   :  { %4647 = vsyncadd [#allocation3], 4294967264 }
 0x52c   :  { %3517 = vsyncpa [#allocation3], 1 }

</bundles_post_ra>
